<compile_context>
chip_gen: v6e
topology: v6e:2x2x1
jax: 0.10.0
libtpu: 0.0.40
codegen_flags: <defaults>
</compile_context>

<pallas_src>
import functools

import jax
import jax.numpy as jnp
from jax.experimental import pallas as pl
from jax.experimental.pallas import tpu as pltpu


_EPS = 1e-5


def _round_up(x, m):
    return (x + m - 1) // m * m


# ----------------------------------------------------------------------------
# Pallas kernel 1: tiled matmul + bias (im2col path: head conv + stride-2 convs)
# ----------------------------------------------------------------------------
def _matmul_bias_kernel(p_ref, w_ref, b_ref, o_ref):
    acc = jnp.dot(p_ref[...], w_ref[...], preferred_element_type=jnp.float32)
    o_ref[...] = (acc + b_ref[...]).astype(o_ref.dtype)


def matmul_bias(patches, w_mat, bias2, out_dtype=jnp.bfloat16):
    """patches: (M, K) bf16, w_mat: (K, C) bf16, bias2: (1, C) f32 -> (M, C)."""
    M, K = patches.shape
    C = w_mat.shape[1]
    tm = 256 if M >= 256 else _round_up(M, 8)
    Mp = _round_up(M, tm)
    if Mp != M:
        patches = jnp.pad(patches, ((0, Mp - M), (0, 0)))

    out = pl.pallas_call(
        _matmul_bias_kernel,
        out_shape=jax.ShapeDtypeStruct((Mp, C), out_dtype),
        grid=(Mp // tm,),
        in_specs=[
            pl.BlockSpec((tm, K), lambda i: (i, 0)),
            pl.BlockSpec((K, C), lambda i: (0, 0)),
            pl.BlockSpec((1, C), lambda i: (0, 0)),
        ],
        out_specs=pl.BlockSpec((tm, C), lambda i: (i, 0)),
        compiler_params=pltpu.CompilerParams(
            dimension_semantics=("parallel",)),
    )(patches, w_mat, bias2)
    return out[:M]


# ----------------------------------------------------------------------------
# Pallas kernel 2: fused stride-1 conv ("row conv", no HBM im2col)
#   grid = (N, out_row, kernel_row); the kernel_row axis is an accumulating
#   reduction into a VMEM f32 scratch; the whole weight stays VMEM-resident.
# ----------------------------------------------------------------------------
def _make_conv_row_kernel(kw, Wo, apply_tanh):
    def kernel(x_ref, w_ref, b_ref, o_ref, acc_ref):
        i = pl.program_id(2)

        @pl.when(i == 0)
        def _():
            acc_ref[...] = jnp.zeros_like(acc_ref)

        acc = acc_ref[...]
        for j in range(kw):
            lhs = x_ref[0, 0, j:j + Wo, :]                 # (Wo, Cin) bf16
            acc += jnp.dot(lhs, w_ref[i, j],               # (Cin, Coutp) bf16
                           preferred_element_type=jnp.float32)
        acc_ref[...] = acc

        @pl.when(i == pl.num_programs(2) - 1)
        def _():
            y = acc_ref[...] + b_ref[...]
            if apply_tanh:
                y = jnp.tanh(y)
            o_ref[0, 0] = y.astype(o_ref.dtype)

    return kernel


def conv2d_s1_fused(x, w4, bias2, apply_tanh=False, out_dtype=jnp.bfloat16):
    """Stride-1 conv on an already-padded NHWC input.

    x: (N, Hp, Wp, Cin) bf16; w4: (kh, kw, Cin, Coutp) bf16; bias2: (1, Coutp) f32.
    Returns (N, Ho, Wo, Coutp).
    """
    N, Hp, Wp, Cin = x.shape
    kh, kw, _, Coutp = w4.shape
    Ho = Hp - kh + 1
    Wo = Wp - kw + 1

    kernel = _make_conv_row_kernel(kw, Wo, apply_tanh)
    return pl.pallas_call(
        kernel,
        out_shape=jax.ShapeDtypeStruct((N, Ho, Wo, Coutp), out_dtype),
        grid=(N, Ho, kh),
        in_specs=[
            pl.BlockSpec((1, 1, Wp, Cin), lambda n, h, i: (n, h + i, 0, 0)),
            pl.BlockSpec((kh, kw, Cin, Coutp), lambda n, h, i: (0, 0, 0, 0)),
            pl.BlockSpec((1, Coutp), lambda n, h, i: (0, 0)),
        ],
        out_specs=pl.BlockSpec((1, 1, Wo, Coutp), lambda n, h, i: (n, h, 0, 0)),
        scratch_shapes=[pltpu.VMEM((Wo, Coutp), jnp.float32)],
        compiler_params=pltpu.CompilerParams(
            dimension_semantics=("parallel", "parallel", "arbitrary")),
    )(x, w4, bias2)


# ----------------------------------------------------------------------------
# Pallas kernels 3+4: HW-tiled InstanceNorm2d (affine=False, eps=1e-5),
#   optional ReLU, optional fused residual add.  Two passes: stats, then apply.
# ----------------------------------------------------------------------------
def _in_stats_kernel(x_ref, s_ref, q_ref):
    t = pl.program_id(1)
    x = x_ref[...].astype(jnp.float32)              # (1, t_hw, C)
    s = jnp.sum(x, axis=1, keepdims=True)           # (1, 1, C)
    q = jnp.sum(x * x, axis=1, keepdims=True)

    @pl.when(t == 0)
    def _():
        s_ref[...] = s
        q_ref[...] = q

    @pl.when(t > 0)
    def _():
        s_ref[...] = s_ref[...] + s
        q_ref[...] = q_ref[...] + q


def _in_apply(x_ref, s_ref, q_ref, r_ref, o_ref, inv_hw, relu):
    x = x_ref[...].astype(jnp.float32)
    mean = s_ref[...] * inv_hw
    var = jnp.maximum(q_ref[...] * inv_hw - mean * mean, 0.0)
    y = (x - mean) * jax.lax.rsqrt(var + _EPS)
    if relu:
        y = jnp.maximum(y, 0.0)
    if r_ref is not None:
        y = y + r_ref[...].astype(jnp.float32)
    o_ref[...] = y.astype(o_ref.dtype)


def _make_in_apply_kernel(inv_hw, relu, has_res):
    if has_res:
        def kernel(x_ref, s_ref, q_ref, r_ref, o_ref):
            _in_apply(x_ref, s_ref, q_ref, r_ref, o_ref, inv_hw, relu)
    else:
        def kernel(x_ref, s_ref, q_ref, o_ref):
            _in_apply(x_ref, s_ref, q_ref, None, o_ref, inv_hw, relu)
    return kernel


def _pick_hw_tile(HW, cap=4096):
    if HW <= cap:
        return HW
    for t in range(cap, 7, -8):
        if HW % t == 0:
            return t
    return HW


def instance_norm(x_nhwc, relu=False, residual=None):
    N, H, W, C = x_nhwc.shape
    HW = H * W
    x2 = x_nhwc.reshape(N, HW, C)
    t_hw = _pick_hw_tile(HW)
    n_t = HW // t_hw

    s, q = pl.pallas_call(
        _in_stats_kernel,
        out_shape=(jax.ShapeDtypeStruct((N, 1, C), jnp.float32),
                   jax.ShapeDtypeStruct((N, 1, C), jnp.float32)),
        grid=(N, n_t),
        in_specs=[pl.BlockSpec((1, t_hw, C), lambda b, t: (b, t, 0))],
        out_specs=(pl.BlockSpec((1, 1, C), lambda b, t: (b, 0, 0)),
                   pl.BlockSpec((1, 1, C), lambda b, t: (b, 0, 0))),
        compiler_params=pltpu.CompilerParams(
            dimension_semantics=("parallel", "arbitrary")),
    )(x2)

    args = [x2, s, q]
    in_specs = [pl.BlockSpec((1, t_hw, C), lambda b, t: (b, t, 0)),
                pl.BlockSpec((1, 1, C), lambda b, t: (b, 0, 0)),
                pl.BlockSpec((1, 1, C), lambda b, t: (b, 0, 0))]
    if residual is not None:
        args.append(residual.reshape(N, HW, C))
        in_specs.append(pl.BlockSpec((1, t_hw, C), lambda b, t: (b, t, 0)))

    out = pl.pallas_call(
        _make_in_apply_kernel(1.0 / HW, relu, residual is not None),
        out_shape=jax.ShapeDtypeStruct((N, HW, C), jnp.bfloat16),
        grid=(N, n_t),
        in_specs=in_specs,
        out_specs=pl.BlockSpec((1, t_hw, C), lambda b, t: (b, t, 0)),
        compiler_params=pltpu.CompilerParams(
            dimension_semantics=("parallel", "parallel")),
    )(*args)
    return out.reshape(N, H, W, C)


# ----------------------------------------------------------------------------
# Convolution glue (plain-JAX padding / patch extraction / phase interleave)
# ----------------------------------------------------------------------------
def reflect_pad(x, p):
    return jnp.pad(x, ((0, 0), (p, p), (p, p), (0, 0)), mode="reflect")


def _im2col(x, kh, kw, stride):
    """x: (N, H, W, C) already padded -> ((N*Ho*Wo, kh*kw*C), (N, Ho, Wo))."""
    N, H, W, C = x.shape
    Ho = (H - kh) // stride + 1
    Wo = (W - kw) // stride + 1
    cols = []
    for i in range(kh):
        for j in range(kw):
            cols.append(
                x[:, i:i + stride * (Ho - 1) + 1:stride,
                     j:j + stride * (Wo - 1) + 1:stride, :])
    p = jnp.concatenate(cols, axis=-1)            # (N, Ho, Wo, kh*kw*C)
    return p.reshape(N * Ho * Wo, kh * kw * C), (N, Ho, Wo)


def conv2d_im2col(x, w_mat, bias2, kh, kw, stride=1, pad=0):
    """x: NHWC bf16, w_mat: (kh*kw*Cin, Cout) bf16, bias2: (1, Cout) f32."""
    if pad > 0:
        x = jnp.pad(x, ((0, 0), (pad, pad), (pad, pad), (0, 0)))
    patches, (N, Ho, Wo) = _im2col(x, kh, kw, stride)
    out = matmul_bias(patches, w_mat, bias2)
    return out.reshape(N, Ho, Wo, w_mat.shape[1])


def conv_transpose2d(x, phases, bias2):
    """Sub-pixel (phase) decomposition of ConvT(k=3, s=2, p=1, out_pad=1)."""
    N, H, W, _ = x.shape
    xr = jnp.pad(x, ((0, 0), (0, 0), (0, 1), (0, 0)))
    xb = jnp.pad(x, ((0, 0), (0, 1), (0, 0), (0, 0)))
    xbr = jnp.pad(x, ((0, 0), (0, 1), (0, 1), (0, 0)))
    p00 = conv2d_s1_fused(x,   phases["p00"], bias2)
    p01 = conv2d_s1_fused(xr,  phases["p01"], bias2)
    p10 = conv2d_s1_fused(xb,  phases["p10"], bias2)
    p11 = conv2d_s1_fused(xbr, phases["p11"], bias2)
    Cout = p00.shape[-1]
    ph = jnp.stack([p00, p01, p10, p11], axis=3)        # (N, H, W, 4, Cout)
    ph = ph.reshape(N, H, W, 2, 2, Cout)
    ph = jnp.transpose(ph, (0, 1, 3, 2, 4, 5))          # (N, H, 2, W, 2, Cout)
    return ph.reshape(N, 2 * H, 2 * W, Cout)


# ----------------------------------------------------------------------------
# Parameters: deterministic init (torch layouts) + one-time kernel-ready prep
# ----------------------------------------------------------------------------
def init_params(key):
    def nrm(k, shape, scale=0.05):
        return scale * jax.random.normal(k, shape, jnp.float32)

    keys = iter(jax.random.split(key, 64))
    p = {}
    p["c1_w"] = nrm(next(keys), (64, 3, 7, 7));    p["c1_b"] = nrm(next(keys), (64,))
    p["c2_w"] = nrm(next(keys), (128, 64, 3, 3));  p["c2_b"] = nrm(next(keys), (128,))
    p["c3_w"] = nrm(next(keys), (256, 128, 3, 3)); p["c3_b"] = nrm(next(keys), (256,))
    p["res"] = []
    for _ in range(6):
        p["res"].append({
            "w1": nrm(next(keys), (256, 256, 3, 3)), "b1": nrm(next(keys), (256,)),
            "w2": nrm(next(keys), (256, 256, 3, 3)), "b2": nrm(next(keys), (256,)),
        })
    p["t1_w"] = nrm(next(keys), (256, 128, 3, 3)); p["t1_b"] = nrm(next(keys), (128,))
    p["t2_w"] = nrm(next(keys), (128, 64, 3, 3));  p["t2_b"] = nrm(next(keys), (64,))
    p["c4_w"] = nrm(next(keys), (3, 64, 7, 7));    p["c4_b"] = nrm(next(keys), (3,))
    return p


def _prep_deconv_phases(w_t, b):
    """w_t: torch ConvT layout (Cin, Cout, 3, 3) -> 4 sub-pixel phase kernels."""
    w = jnp.transpose(w_t, (2, 3, 0, 1))            # (3, 3, Cin, Cout)
    bf = lambda a: a.astype(jnp.bfloat16)
    p00 = bf(w[1:2, 1:2])                                           # (1,1,Cin,Cout)
    p01 = bf(jnp.stack([w[1, 2], w[1, 0]], axis=0)[None])           # (1,2,Cin,Cout)
    p10 = bf(jnp.stack([w[2, 1], w[0, 1]], axis=0)[:, None])        # (2,1,Cin,Cout)
    p11 = bf(jnp.stack([jnp.stack([w[2, 2], w[2, 0]], axis=0),
                        jnp.stack([w[0, 2], w[0, 0]], axis=0)], axis=0))  # (2,2,..)
    Cout = w_t.shape[1]
    return {"phases": {"p00": p00, "p01": p01, "p10": p10, "p11": p11},
            "bias": b.reshape(1, Cout).astype(jnp.float32)}


def prepare_params(p):
    """Hoisted, one-time reshape / pad / bf16-cast of all weights."""
    q = {}
    # im2col path (head conv + the two stride-2 downsample convs)
    q["c1_w"] = jnp.transpose(p["c1_w"], (2, 3, 1, 0)).reshape(7 * 7 * 3, 64).astype(jnp.bfloat16)
    q["c1_b"] = p["c1_b"].reshape(1, 64).astype(jnp.float32)
    q["c2_w"] = jnp.transpose(p["c2_w"], (2, 3, 1, 0)).reshape(3 * 3 * 64, 128).astype(jnp.bfloat16)
    q["c2_b"] = p["c2_b"].reshape(1, 128).astype(jnp.float32)
    q["c3_w"] = jnp.transpose(p["c3_w"], (2, 3, 1, 0)).reshape(3 * 3 * 128, 256).astype(jnp.bfloat16)
    q["c3_b"] = p["c3_b"].reshape(1, 256).astype(jnp.float32)
    # fused row-conv path: weight layout (kh, kw, Cin, Cout)
    q["res"] = []
    for blk in p["res"]:
        q["res"].append({
            "w1": jnp.transpose(blk["w1"], (2, 3, 1, 0)).astype(jnp.bfloat16),
            "b1": blk["b1"].reshape(1, 256).astype(jnp.float32),
            "w2": jnp.transpose(blk["w2"], (2, 3, 1, 0)).astype(jnp.bfloat16),
            "b2": blk["b2"].reshape(1, 256).astype(jnp.float32),
        })
    q["t1"] = _prep_deconv_phases(p["t1_w"], p["t1_b"])
    q["t2"] = _prep_deconv_phases(p["t2_w"], p["t2_b"])
    # final conv: pad Cout 3 -> 128 for lane-dense stores; tanh fused in-kernel
    w4 = jnp.transpose(p["c4_w"], (2, 3, 1, 0))               # (7, 7, 64, 3)
    q["c4_w"] = jnp.pad(w4, ((0, 0), (0, 0), (0, 0), (0, 125))).astype(jnp.bfloat16)
    q["c4_b"] = jnp.pad(p["c4_b"], (0, 125)).reshape(1, 128).astype(jnp.float32)
    return q


# ----------------------------------------------------------------------------
# Generator forward
# ----------------------------------------------------------------------------
def generator_forward(params, x_nchw):
    h = jnp.transpose(x_nchw, (0, 2, 3, 1)).astype(jnp.bfloat16)   # NCHW -> NHWC

    # head: ReflPad(3) -> Conv 3->64 k7 -> IN -> ReLU
    h = reflect_pad(h, 3)
    h = conv2d_im2col(h, params["c1_w"], params["c1_b"], 7, 7, stride=1, pad=0)
    h = instance_norm(h, relu=True)

    # downsample: Conv 64->128 k3 s2 p1 -> IN -> ReLU
    h = conv2d_im2col(h, params["c2_w"], params["c2_b"], 3, 3, stride=2, pad=1)
    h = instance_norm(h, relu=True)
    # downsample: Conv 128->256 k3 s2 p1 -> IN -> ReLU
    h = conv2d_im2col(h, params["c3_w"], params["c3_b"], 3, 3, stride=2, pad=1)
    h = instance_norm(h, relu=True)

    # 6 x ResNetBlock (fused row-conv, fused residual add in the second IN)
    for blk in params["res"]:
        res = h
        y = reflect_pad(h, 1)
        y = conv2d_s1_fused(y, blk["w1"], blk["b1"])
        y = instance_norm(y, relu=True)
        y = reflect_pad(y, 1)
        y = conv2d_s1_fused(y, blk["w2"], blk["b2"])
        h = instance_norm(y, relu=False, residual=res)

    # upsample: ConvT 256->128 -> IN -> ReLU (sub-pixel phases)
    h = conv_transpose2d(h, params["t1"]["phases"], params["t1"]["bias"])
    h = instance_norm(h, relu=True)
    # upsample: ConvT 128->64 -> IN -> ReLU
    h = conv_transpose2d(h, params["t2"]["phases"], params["t2"]["bias"])
    h = instance_norm(h, relu=True)

    # tail: ReflPad(3) -> Conv 64->3 k7 with fused Tanh (Cout padded to 128)
    h = reflect_pad(h, 3)
    h = conv2d_s1_fused(h, params["c4_w"], params["c4_b"], apply_tanh=True)
    h = h[..., :3].astype(jnp.float32)

    return jnp.transpose(h, (0, 3, 1, 2))   # back to NCHW


if __name__ == "__main__":
    key = jax.random.PRNGKey(0)
    kp, kx = jax.random.split(key)
    raw_params = init_params(kp)
    params = prepare_params(raw_params)    # one-time weight prep (hoisted)

    # small input consistent with the module: NCHW, 3 input channels
    x = jax.random.normal(kx, (2, 3, 16, 16), jnp.float32)

    fwd = jax.jit(generator_forward)
    out = fwd(params, x)
    out = jax.block_until_ready(out)

    assert out.shape == (2, 3, 16, 16), out.shape
    assert out.dtype == jnp.float32
    assert bool(jnp.all(jnp.isfinite(out)))
    assert bool(jnp.max(jnp.abs(out)) <= 1.0)   # tanh range
    print("KERNEL_OK")
</pallas_src>

<mosaic_0001>
module attributes {stable_mosaic.version = 11 : i64} {
  func.func @_matmul_bias_kernel(%arg0: i32, %arg1: memref<256x147xbf16, #tpu.memory_space<vmem>>, %arg2: memref<147x64xbf16, #tpu.memory_space<vmem>>, %arg3: memref<1x64xf32, #tpu.memory_space<vmem>>, %arg4: memref<256x64xbf16, #tpu.memory_space<vmem>>) attributes {dimension_semantics = [#tpu.dimension_semantics<parallel>], iteration_bounds = array<i64: 2>, scalar_prefetch = 0 : i64, scratch_operands = 0 : i64, tpu.core_type = #tpu.core_type<tc>, window_params = [{transform_indices = @transform_0, window_bounds = array<i64: 256, 147>}, {pipeline_mode = #tpu.pipeline_mode<synchronous>, transform_indices = @transform_1, window_bounds = array<i64: 147, 64>}, {pipeline_mode = #tpu.pipeline_mode<synchronous>, transform_indices = @transform_2, window_bounds = array<i64: 1, 64>}, {transform_indices = @transform_3, window_bounds = array<i64: 256, 64>}]} {
    %c0 = arith.constant 0 : index
    %c0_0 = arith.constant 0 : index
    %0 = vector.load %arg1[%c0, %c0_0] : memref<256x147xbf16, #tpu.memory_space<vmem>>, vector<256x147xbf16>
    %c0_1 = arith.constant 0 : index
    %c0_2 = arith.constant 0 : index
    %1 = vector.load %arg2[%c0_1, %c0_2] : memref<147x64xbf16, #tpu.memory_space<vmem>>, vector<147x64xbf16>
    %cst = arith.constant dense<0.000000e+00> : vector<256x64xf32>
    %2 = tpu.matmul %0, %1, %cst {dimension_numbers = #tpu.dot_dimension_numbers<[1], [0], [0], [1], [0, 0, 1, 1], [], []>} : vector<256x147xbf16>, vector<147x64xbf16>, vector<256x64xf32> -> vector<256x64xf32>
    %c0_3 = arith.constant 0 : index
    %c0_4 = arith.constant 0 : index
    %3 = vector.load %arg3[%c0_3, %c0_4] : memref<1x64xf32, #tpu.memory_space<vmem>>, vector<1x64xf32>
    %4 = vector.broadcast %3 : vector<1x64xf32> to vector<256x64xf32>
    %5 = arith.addf %2, %4 : vector<256x64xf32>
    %6 = arith.truncf %5 : vector<256x64xf32> to vector<256x64xbf16>
    %c0_5 = arith.constant 0 : index
    %c0_6 = arith.constant 0 : index
    %7 = vector.load %arg4[%c0_5, %c0_6] : memref<256x64xbf16, #tpu.memory_space<vmem>>, vector<256x64xbf16>
    tpu.vector_store %arg4[%c0_5, %c0_6], %6 {strides = array<i32>} : memref<256x64xbf16, #tpu.memory_space<vmem>>, vector<256x64xbf16>,
    return
  }
  func.func @transform_0(%arg0: i32) -> (i32, i32) {
    %c0_i32 = arith.constant 0 : i32
    %c0_i32_0 = arith.constant 0 : i32
    return %arg0, %c0_i32 : i32, i32
  }
  func.func @transform_1(%arg0: i32) -> (i32, i32) {
    %c0_i32 = arith.constant 0 : i32
    %c0_i32_0 = arith.constant 0 : i32
    %c0_i32_1 = arith.constant 0 : i32
    return %c0_i32, %c0_i32_0 : i32, i32
  }
  func.func @transform_2(%arg0: i32) -> (i32, i32) {
    %c0_i32 = arith.constant 0 : i32
    %c0_i32_0 = arith.constant 0 : i32
    %c0_i32_1 = arith.constant 0 : i32
    return %c0_i32, %c0_i32_0 : i32, i32
  }
  func.func @transform_3(%arg0: i32) -> (i32, i32) {
    %c0_i32 = arith.constant 0 : i32
    %c0_i32_0 = arith.constant 0 : i32
    return %arg0, %c0_i32 : i32, i32
  }
}

module attributes {stable_mosaic.version = 11 : i64} {
  func.func @_in_stats_kernel(%arg0: i32, %arg1: i32, %arg2: memref<1x256x64xbf16, #tpu.memory_space<vmem>>, %arg3: memref<1x1x64xf32, #tpu.memory_space<vmem>>, %arg4: memref<1x1x64xf32, #tpu.memory_space<vmem>>) attributes {dimension_semantics = [#tpu.dimension_semantics<parallel>, #tpu.dimension_semantics<arbitrary>], iteration_bounds = array<i64: 2, 1>, scalar_prefetch = 0 : i64, scratch_operands = 0 : i64, tpu.core_type = #tpu.core_type<tc>, window_params = [{transform_indices = @transform_0, window_bounds = array<i64: 1, 256, 64>}, {transform_indices = @transform_1, window_bounds = array<i64: 1, 1, 64>}, {transform_indices = @transform_2, window_bounds = array<i64: 1, 1, 64>}]} {
    %c0 = arith.constant 0 : index
    %c0_0 = arith.constant 0 : index
    %c0_1 = arith.constant 0 : index
    %0 = vector.load %arg2[%c0, %c0_0, %c0_1] : memref<1x256x64xbf16, #tpu.memory_space<vmem>>, vector<1x256x64xbf16>
    %1 = arith.extf %0 : vector<1x256x64xbf16> to vector<1x256x64xf32>
    %cst = arith.constant dense<0.000000e+00> : vector<1x64xf32>
    %2 = vector.multi_reduction <add>, %1, %cst [1] : vector<1x256x64xf32> to vector<1x64xf32>
    %3 = vector.shape_cast %2 : vector<1x64xf32> to vector<1x1x64xf32>
    %4 = arith.mulf %1, %1 : vector<1x256x64xf32>
    %cst_2 = arith.constant dense<0.000000e+00> : vector<1x64xf32>
    %5 = vector.multi_reduction <add>, %4, %cst_2 [1] : vector<1x256x64xf32> to vector<1x64xf32>
    %6 = vector.shape_cast %5 : vector<1x64xf32> to vector<1x1x64xf32>
    %c0_i32 = arith.constant 0 : i32
    %7 = arith.cmpi eq, %arg1, %c0_i32 : i32
    %8 = arith.extui %7 : i1 to i32
    %c0_i32_3 = arith.constant 0 : i32
    %9 = arith.cmpi ne, %8, %c0_i32_3 : i32
    scf.if %9 {
      %c0_6 = arith.constant 0 : index
      %c0_7 = arith.constant 0 : index
      %c0_8 = arith.constant 0 : index
      %13 = vector.load %arg3[%c0_6, %c0_7, %c0_8] : memref<1x1x64xf32, #tpu.memory_space<vmem>>, vector<1x1x64xf32>
      tpu.vector_store %arg3[%c0_6, %c0_7, %c0_8], %3 {strides = array<i32>} : memref<1x1x64xf32, #tpu.memory_space<vmem>>, vector<1x1x64xf32>,
      %c0_9 = arith.constant 0 : index
      %c0_10 = arith.constant 0 : index
      %c0_11 = arith.constant 0 : index
      %14 = vector.load %arg4[%c0_9, %c0_10, %c0_11] : memref<1x1x64xf32, #tpu.memory_space<vmem>>, vector<1x1x64xf32>
      tpu.vector_store %arg4[%c0_9, %c0_10, %c0_11], %6 {strides = array<i32>} : memref<1x1x64xf32, #tpu.memory_space<vmem>>, vector<1x1x64xf32>,
    } else {
    }
    %c0_i32_4 = arith.constant 0 : i32
    %10 = arith.cmpi sgt, %arg1, %c0_i32_4 : i32
    %11 = arith.extui %10 : i1 to i32
    %c0_i32_5 = arith.constant 0 : i32
    %12 = arith.cmpi ne, %11, %c0_i32_5 : i32
    scf.if %12 {
      %c0_6 = arith.constant 0 : index
      %c0_7 = arith.constant 0 : index
      %c0_8 = arith.constant 0 : index
      %13 = vector.load %arg3[%c0_6, %c0_7, %c0_8] : memref<1x1x64xf32, #tpu.memory_space<vmem>>, vector<1x1x64xf32>
      %14 = arith.addf %13, %3 : vector<1x1x64xf32>
      %c0_9 = arith.constant 0 : index
      %c0_10 = arith.constant 0 : index
      %c0_11 = arith.constant 0 : index
      %15 = vector.load %arg3[%c0_9, %c0_10, %c0_11] : memref<1x1x64xf32, #tpu.memory_space<vmem>>, vector<1x1x64xf32>
      tpu.vector_store %arg3[%c0_9, %c0_10, %c0_11], %14 {strides = array<i32>} : memref<1x1x64xf32, #tpu.memory_space<vmem>>, vector<1x1x64xf32>,
      %c0_12 = arith.constant 0 : index
      %c0_13 = arith.constant 0 : index
      %c0_14 = arith.constant 0 : index
      %16 = vector.load %arg4[%c0_12, %c0_13, %c0_14] : memref<1x1x64xf32, #tpu.memory_space<vmem>>, vector<1x1x64xf32>
      %17 = arith.addf %16, %6 : vector<1x1x64xf32>
      %c0_15 = arith.constant 0 : index
      %c0_16 = arith.constant 0 : index
      %c0_17 = arith.constant 0 : index
      %18 = vector.load %arg4[%c0_15, %c0_16, %c0_17] : memref<1x1x64xf32, #tpu.memory_space<vmem>>, vector<1x1x64xf32>
      tpu.vector_store %arg4[%c0_15, %c0_16, %c0_17], %17 {strides = array<i32>} : memref<1x1x64xf32, #tpu.memory_space<vmem>>, vector<1x1x64xf32>,
    } else {
    }
    return
  }
  func.func @transform_0(%arg0: i32, %arg1: i32) -> (i32, i32, i32) {
    %c0_i32 = arith.constant 0 : i32
    %c0_i32_0 = arith.constant 0 : i32
    return %arg0, %arg1, %c0_i32 : i32, i32, i32
  }
  func.func @transform_1(%arg0: i32, %arg1: i32) -> (i32, i32, i32) {
    %c0_i32 = arith.constant 0 : i32
    %c0_i32_0 = arith.constant 0 : i32
    %c0_i32_1 = arith.constant 0 : i32
    return %arg0, %c0_i32, %c0_i32_0 : i32, i32, i32
  }
  func.func @transform_2(%arg0: i32, %arg1: i32) -> (i32, i32, i32) {
    %c0_i32 = arith.constant 0 : i32
    %c0_i32_0 = arith.constant 0 : i32
    %c0_i32_1 = arith.constant 0 : i32
    return %arg0, %c0_i32, %c0_i32_0 : i32, i32, i32
  }
}

module attributes {stable_mosaic.version = 11 : i64} {
  func.func @kernel(%arg0: i32, %arg1: i32, %arg2: memref<1x256x64xbf16, #tpu.memory_space<vmem>>, %arg3: memref<1x1x64xf32, #tpu.memory_space<vmem>>, %arg4: memref<1x1x64xf32, #tpu.memory_space<vmem>>, %arg5: memref<1x256x64xbf16, #tpu.memory_space<vmem>>) attributes {dimension_semantics = [#tpu.dimension_semantics<parallel>, #tpu.dimension_semantics<parallel>], iteration_bounds = array<i64: 2, 1>, scalar_prefetch = 0 : i64, scratch_operands = 0 : i64, tpu.core_type = #tpu.core_type<tc>, window_params = [{transform_indices = @transform_0, window_bounds = array<i64: 1, 256, 64>}, {transform_indices = @transform_1, window_bounds = array<i64: 1, 1, 64>}, {transform_indices = @transform_2, window_bounds = array<i64: 1, 1, 64>}, {transform_indices = @transform_3, window_bounds = array<i64: 1, 256, 64>}]} {
    %c0 = arith.constant 0 : index
    %c0_0 = arith.constant 0 : index
    %c0_1 = arith.constant 0 : index
    %0 = vector.load %arg2[%c0, %c0_0, %c0_1] : memref<1x256x64xbf16, #tpu.memory_space<vmem>>, vector<1x256x64xbf16>
    %1 = arith.extf %0 : vector<1x256x64xbf16> to vector<1x256x64xf32>
    %c0_2 = arith.constant 0 : index
    %c0_3 = arith.constant 0 : index
    %c0_4 = arith.constant 0 : index
    %2 = vector.load %arg3[%c0_2, %c0_3, %c0_4] : memref<1x1x64xf32, #tpu.memory_space<vmem>>, vector<1x1x64xf32>
    %cst = arith.constant 3.906250e-03 : f32
    %3 = vector.broadcast %cst : f32 to vector<1x1x64xf32>
    %4 = arith.mulf %2, %3 : vector<1x1x64xf32>
    %c0_5 = arith.constant 0 : index
    %c0_6 = arith.constant 0 : index
    %c0_7 = arith.constant 0 : index
    %5 = vector.load %arg4[%c0_5, %c0_6, %c0_7] : memref<1x1x64xf32, #tpu.memory_space<vmem>>, vector<1x1x64xf32>
    %cst_8 = arith.constant 3.906250e-03 : f32
    %6 = vector.broadcast %cst_8 : f32 to vector<1x1x64xf32>
    %7 = arith.mulf %5, %6 : vector<1x1x64xf32>
    %8 = arith.mulf %4, %4 : vector<1x1x64xf32>
    %9 = arith.subf %7, %8 : vector<1x1x64xf32>
    %cst_9 = arith.constant 0.000000e+00 : f32
    %10 = vector.broadcast %cst_9 : f32 to vector<1x1x64xf32>
    %11 = arith.maximumf %9, %10 : vector<1x1x64xf32>
    %12 = vector.broadcast %4 : vector<1x1x64xf32> to vector<1x256x64xf32>
    %13 = arith.subf %1, %12 : vector<1x256x64xf32>
    %cst_10 = arith.constant 9.99999974E-6 : f32
    %14 = vector.broadcast %cst_10 : f32 to vector<1x1x64xf32>
    %15 = arith.addf %11, %14 : vector<1x1x64xf32>
    %16 = math.rsqrt %15 : vector<1x1x64xf32>
    %17 = vector.broadcast %16 : vector<1x1x64xf32> to vector<1x256x64xf32>
    %18 = arith.mulf %13, %17 : vector<1x256x64xf32>
    %cst_11 = arith.constant 0.000000e+00 : f32
    %19 = vector.broadcast %cst_11 : f32 to vector<1x256x64xf32>
    %20 = arith.maximumf %18, %19 : vector<1x256x64xf32>
    %21 = arith.truncf %20 : vector<1x256x64xf32> to vector<1x256x64xbf16>
    %c0_12 = arith.constant 0 : index
    %c0_13 = arith.constant 0 : index
    %c0_14 = arith.constant 0 : index
    %22 = vector.load %arg5[%c0_12, %c0_13, %c0_14] : memref<1x256x64xbf16, #tpu.memory_space<vmem>>, vector<1x256x64xbf16>
    tpu.vector_store %arg5[%c0_12, %c0_13, %c0_14], %21 {strides = array<i32>} : memref<1x256x64xbf16, #tpu.memory_space<vmem>>, vector<1x256x64xbf16>,
    return
  }
  func.func @transform_0(%arg0: i32, %arg1: i32) -> (i32, i32, i32) {
    %c0_i32 = arith.constant 0 : i32
    %c0_i32_0 = arith.constant 0 : i32
    return %arg0, %arg1, %c0_i32 : i32, i32, i32
  }
  func.func @transform_1(%arg0: i32, %arg1: i32) -> (i32, i32, i32) {
    %c0_i32 = arith.constant 0 : i32
    %c0_i32_0 = arith.constant 0 : i32
    %c0_i32_1 = arith.constant 0 : i32
    return %arg0, %c0_i32, %c0_i32_0 : i32, i32, i32
  }
  func.func @transform_2(%arg0: i32, %arg1: i32) -> (i32, i32, i32) {
    %c0_i32 = arith.constant 0 : i32
    %c0_i32_0 = arith.constant 0 : i32
    %c0_i32_1 = arith.constant 0 : i32
    return %arg0, %c0_i32, %c0_i32_0 : i32, i32, i32
  }
  func.func @transform_3(%arg0: i32, %arg1: i32) -> (i32, i32, i32) {
    %c0_i32 = arith.constant 0 : i32
    %c0_i32_0 = arith.constant 0 : i32
    return %arg0, %arg1, %c0_i32 : i32, i32, i32
  }
}

module attributes {stable_mosaic.version = 11 : i64} {
  func.func @_matmul_bias_kernel(%arg0: i32, %arg1: memref<128x576xbf16, #tpu.memory_space<vmem>>, %arg2: memref<576x128xbf16, #tpu.memory_space<vmem>>, %arg3: memref<1x128xf32, #tpu.memory_space<vmem>>, %arg4: memref<128x128xbf16, #tpu.memory_space<vmem>>) attributes {dimension_semantics = [#tpu.dimension_semantics<parallel>], iteration_bounds = array<i64: 1>, scalar_prefetch = 0 : i64, scratch_operands = 0 : i64, tpu.core_type = #tpu.core_type<tc>, window_params = [{transform_indices = @transform_0, window_bounds = array<i64: 128, 576>}, {pipeline_mode = #tpu.pipeline_mode<synchronous>, transform_indices = @transform_1, window_bounds = array<i64: 576, 128>}, {pipeline_mode = #tpu.pipeline_mode<synchronous>, transform_indices = @transform_2, window_bounds = array<i64: 1, 128>}, {transform_indices = @transform_3, window_bounds = array<i64: 128, 128>}]} {
    %c0 = arith.constant 0 : index
    %c0_0 = arith.constant 0 : index
    %0 = vector.load %arg1[%c0, %c0_0] : memref<128x576xbf16, #tpu.memory_space<vmem>>, vector<128x576xbf16>
    %c0_1 = arith.constant 0 : index
    %c0_2 = arith.constant 0 : index
    %1 = vector.load %arg2[%c0_1, %c0_2] : memref<576x128xbf16, #tpu.memory_space<vmem>>, vector<576x128xbf16>
    %cst = arith.constant dense<0.000000e+00> : vector<128x128xf32>
    %2 = tpu.matmul %0, %1, %cst {dimension_numbers = #tpu.dot_dimension_numbers<[1], [0], [0], [1], [0, 0, 1, 1], [], []>} : vector<128x576xbf16>, vector<576x128xbf16>, vector<128x128xf32> -> vector<128x128xf32>
    %c0_3 = arith.constant 0 : index
    %c0_4 = arith.constant 0 : index
    %3 = vector.load %arg3[%c0_3, %c0_4] : memref<1x128xf32, #tpu.memory_space<vmem>>, vector<1x128xf32>
    %4 = vector.broadcast %3 : vector<1x128xf32> to vector<128x128xf32>
    %5 = arith.addf %2, %4 : vector<128x128xf32>
    %6 = arith.truncf %5 : vector<128x128xf32> to vector<128x128xbf16>
    %c0_5 = arith.constant 0 : index
    %c0_6 = arith.constant 0 : index
    %7 = vector.load %arg4[%c0_5, %c0_6] : memref<128x128xbf16, #tpu.memory_space<vmem>>, vector<128x128xbf16>
    tpu.vector_store %arg4[%c0_5, %c0_6], %6 {strides = array<i32>} : memref<128x128xbf16, #tpu.memory_space<vmem>>, vector<128x128xbf16>,
    return
  }
  func.func @transform_0(%arg0: i32) -> (i32, i32) {
    %c0_i32 = arith.constant 0 : i32
    %c0_i32_0 = arith.constant 0 : i32
    return %arg0, %c0_i32 : i32, i32
  }
  func.func @transform_1(%arg0: i32) -> (i32, i32) {
    %c0_i32 = arith.constant 0 : i32
    %c0_i32_0 = arith.constant 0 : i32
    %c0_i32_1 = arith.constant 0 : i32
    return %c0_i32, %c0_i32_0 : i32, i32
  }
  func.func @transform_2(%arg0: i32) -> (i32, i32) {
    %c0_i32 = arith.constant 0 : i32
    %c0_i32_0 = arith.constant 0 : i32
    %c0_i32_1 = arith.constant 0 : i32
    return %c0_i32, %c0_i32_0 : i32, i32
  }
  func.func @transform_3(%arg0: i32) -> (i32, i32) {
    %c0_i32 = arith.constant 0 : i32
    %c0_i32_0 = arith.constant 0 : i32
    return %arg0, %c0_i32 : i32, i32
  }
}

module attributes {stable_mosaic.version = 11 : i64} {
  func.func @_in_stats_kernel(%arg0: i32, %arg1: i32, %arg2: memref<1x64x128xbf16, #tpu.memory_space<vmem>>, %arg3: memref<1x1x128xf32, #tpu.memory_space<vmem>>, %arg4: memref<1x1x128xf32, #tpu.memory_space<vmem>>) attributes {dimension_semantics = [#tpu.dimension_semantics<parallel>, #tpu.dimension_semantics<arbitrary>], iteration_bounds = array<i64: 2, 1>, scalar_prefetch = 0 : i64, scratch_operands = 0 : i64, tpu.core_type = #tpu.core_type<tc>, window_params = [{transform_indices = @transform_0, window_bounds = array<i64: 1, 64, 128>}, {transform_indices = @transform_1, window_bounds = array<i64: 1, 1, 128>}, {transform_indices = @transform_2, window_bounds = array<i64: 1, 1, 128>}]} {
    %c0 = arith.constant 0 : index
    %c0_0 = arith.constant 0 : index
    %c0_1 = arith.constant 0 : index
    %0 = vector.load %arg2[%c0, %c0_0, %c0_1] : memref<1x64x128xbf16, #tpu.memory_space<vmem>>, vector<1x64x128xbf16>
    %1 = arith.extf %0 : vector<1x64x128xbf16> to vector<1x64x128xf32>
    %cst = arith.constant dense<0.000000e+00> : vector<1x128xf32>
    %2 = vector.multi_reduction <add>, %1, %cst [1] : vector<1x64x128xf32> to vector<1x128xf32>
    %3 = vector.shape_cast %2 : vector<1x128xf32> to vector<1x1x128xf32>
    %4 = arith.mulf %1, %1 : vector<1x64x128xf32>
    %cst_2 = arith.constant dense<0.000000e+00> : vector<1x128xf32>
    %5 = vector.multi_reduction <add>, %4, %cst_2 [1] : vector<1x64x128xf32> to vector<1x128xf32>
    %6 = vector.shape_cast %5 : vector<1x128xf32> to vector<1x1x128xf32>
    %c0_i32 = arith.constant 0 : i32
    %7 = arith.cmpi eq, %arg1, %c0_i32 : i32
    %8 = arith.extui %7 : i1 to i32
    %c0_i32_3 = arith.constant 0 : i32
    %9 = arith.cmpi ne, %8, %c0_i32_3 : i32
    scf.if %9 {
      %c0_6 = arith.constant 0 : index
      %c0_7 = arith.constant 0 : index
      %c0_8 = arith.constant 0 : index
      %13 = vector.load %arg3[%c0_6, %c0_7, %c0_8] : memref<1x1x128xf32, #tpu.memory_space<vmem>>, vector<1x1x128xf32>
      tpu.vector_store %arg3[%c0_6, %c0_7, %c0_8], %3 {strides = array<i32>} : memref<1x1x128xf32, #tpu.memory_space<vmem>>, vector<1x1x128xf32>,
      %c0_9 = arith.constant 0 : index
      %c0_10 = arith.constant 0 : index
      %c0_11 = arith.constant 0 : index
      %14 = vector.load %arg4[%c0_9, %c0_10, %c0_11] : memref<1x1x128xf32, #tpu.memory_space<vmem>>, vector<1x1x128xf32>
      tpu.vector_store %arg4[%c0_9, %c0_10, %c0_11], %6 {strides = array<i32>} : memref<1x1x128xf32, #tpu.memory_space<vmem>>, vector<1x1x128xf32>,
    } else {
    }
    %c0_i32_4 = arith.constant 0 : i32
    %10 = arith.cmpi sgt, %arg1, %c0_i32_4 : i32
    %11 = arith.extui %10 : i1 to i32
    %c0_i32_5 = arith.constant 0 : i32
    %12 = arith.cmpi ne, %11, %c0_i32_5 : i32
    scf.if %12 {
      %c0_6 = arith.constant 0 : index
      %c0_7 = arith.constant 0 : index
      %c0_8 = arith.constant 0 : index
      %13 = vector.load %arg3[%c0_6, %c0_7, %c0_8] : memref<1x1x128xf32, #tpu.memory_space<vmem>>, vector<1x1x128xf32>
      %14 = arith.addf %13, %3 : vector<1x1x128xf32>
      %c0_9 = arith.constant 0 : index
      %c0_10 = arith.constant 0 : index
      %c0_11 = arith.constant 0 : index
      %15 = vector.load %arg3[%c0_9, %c0_10, %c0_11] : memref<1x1x128xf32, #tpu.memory_space<vmem>>, vector<1x1x128xf32>
      tpu.vector_store %arg3[%c0_9, %c0_10, %c0_11], %14 {strides = array<i32>} : memref<1x1x128xf32, #tpu.memory_space<vmem>>, vector<1x1x128xf32>,
      %c0_12 = arith.constant 0 : index
      %c0_13 = arith.constant 0 : index
      %c0_14 = arith.constant 0 : index
      %16 = vector.load %arg4[%c0_12, %c0_13, %c0_14] : memref<1x1x128xf32, #tpu.memory_space<vmem>>, vector<1x1x128xf32>
      %17 = arith.addf %16, %6 : vector<1x1x128xf32>
      %c0_15 = arith.constant 0 : index
      %c0_16 = arith.constant 0 : index
      %c0_17 = arith.constant 0 : index
      %18 = vector.load %arg4[%c0_15, %c0_16, %c0_17] : memref<1x1x128xf32, #tpu.memory_space<vmem>>, vector<1x1x128xf32>
      tpu.vector_store %arg4[%c0_15, %c0_16, %c0_17], %17 {strides = array<i32>} : memref<1x1x128xf32, #tpu.memory_space<vmem>>, vector<1x1x128xf32>,
    } else {
    }
    return
  }
  func.func @transform_0(%arg0: i32, %arg1: i32) -> (i32, i32, i32) {
    %c0_i32 = arith.constant 0 : i32
    %c0_i32_0 = arith.constant 0 : i32
    return %arg0, %arg1, %c0_i32 : i32, i32, i32
  }
  func.func @transform_1(%arg0: i32, %arg1: i32) -> (i32, i32, i32) {
    %c0_i32 = arith.constant 0 : i32
    %c0_i32_0 = arith.constant 0 : i32
    %c0_i32_1 = arith.constant 0 : i32
    return %arg0, %c0_i32, %c0_i32_0 : i32, i32, i32
  }
  func.func @transform_2(%arg0: i32, %arg1: i32) -> (i32, i32, i32) {
    %c0_i32 = arith.constant 0 : i32
    %c0_i32_0 = arith.constant 0 : i32
    %c0_i32_1 = arith.constant 0 : i32
    return %arg0, %c0_i32, %c0_i32_0 : i32, i32, i32
  }
}

module attributes {stable_mosaic.version = 11 : i64} {
  func.func @kernel(%arg0: i32, %arg1: i32, %arg2: memref<1x64x128xbf16, #tpu.memory_space<vmem>>, %arg3: memref<1x1x128xf32, #tpu.memory_space<vmem>>, %arg4: memref<1x1x128xf32, #tpu.memory_space<vmem>>, %arg5: memref<1x64x128xbf16, #tpu.memory_space<vmem>>) attributes {dimension_semantics = [#tpu.dimension_semantics<parallel>, #tpu.dimension_semantics<parallel>], iteration_bounds = array<i64: 2, 1>, scalar_prefetch = 0 : i64, scratch_operands = 0 : i64, tpu.core_type = #tpu.core_type<tc>, window_params = [{transform_indices = @transform_0, window_bounds = array<i64: 1, 64, 128>}, {transform_indices = @transform_1, window_bounds = array<i64: 1, 1, 128>}, {transform_indices = @transform_2, window_bounds = array<i64: 1, 1, 128>}, {transform_indices = @transform_3, window_bounds = array<i64: 1, 64, 128>}]} {
    %c0 = arith.constant 0 : index
    %c0_0 = arith.constant 0 : index
    %c0_1 = arith.constant 0 : index
    %0 = vector.load %arg2[%c0, %c0_0, %c0_1] : memref<1x64x128xbf16, #tpu.memory_space<vmem>>, vector<1x64x128xbf16>
    %1 = arith.extf %0 : vector<1x64x128xbf16> to vector<1x64x128xf32>
    %c0_2 = arith.constant 0 : index
    %c0_3 = arith.constant 0 : index
    %c0_4 = arith.constant 0 : index
    %2 = vector.load %arg3[%c0_2, %c0_3, %c0_4] : memref<1x1x128xf32, #tpu.memory_space<vmem>>, vector<1x1x128xf32>
    %cst = arith.constant 1.562500e-02 : f32
    %3 = vector.broadcast %cst : f32 to vector<1x1x128xf32>
    %4 = arith.mulf %2, %3 : vector<1x1x128xf32>
    %c0_5 = arith.constant 0 : index
    %c0_6 = arith.constant 0 : index
    %c0_7 = arith.constant 0 : index
    %5 = vector.load %arg4[%c0_5, %c0_6, %c0_7] : memref<1x1x128xf32, #tpu.memory_space<vmem>>, vector<1x1x128xf32>
    %cst_8 = arith.constant 1.562500e-02 : f32
    %6 = vector.broadcast %cst_8 : f32 to vector<1x1x128xf32>
    %7 = arith.mulf %5, %6 : vector<1x1x128xf32>
    %8 = arith.mulf %4, %4 : vector<1x1x128xf32>
    %9 = arith.subf %7, %8 : vector<1x1x128xf32>
    %cst_9 = arith.constant 0.000000e+00 : f32
    %10 = vector.broadcast %cst_9 : f32 to vector<1x1x128xf32>
    %11 = arith.maximumf %9, %10 : vector<1x1x128xf32>
    %12 = vector.broadcast %4 : vector<1x1x128xf32> to vector<1x64x128xf32>
    %13 = arith.subf %1, %12 : vector<1x64x128xf32>
    %cst_10 = arith.constant 9.99999974E-6 : f32
    %14 = vector.broadcast %cst_10 : f32 to vector<1x1x128xf32>
    %15 = arith.addf %11, %14 : vector<1x1x128xf32>
    %16 = math.rsqrt %15 : vector<1x1x128xf32>
    %17 = vector.broadcast %16 : vector<1x1x128xf32> to vector<1x64x128xf32>
    %18 = arith.mulf %13, %17 : vector<1x64x128xf32>
    %cst_11 = arith.constant 0.000000e+00 : f32
    %19 = vector.broadcast %cst_11 : f32 to vector<1x64x128xf32>
    %20 = arith.maximumf %18, %19 : vector<1x64x128xf32>
    %21 = arith.truncf %20 : vector<1x64x128xf32> to vector<1x64x128xbf16>
    %c0_12 = arith.constant 0 : index
    %c0_13 = arith.constant 0 : index
    %c0_14 = arith.constant 0 : index
    %22 = vector.load %arg5[%c0_12, %c0_13, %c0_14] : memref<1x64x128xbf16, #tpu.memory_space<vmem>>, vector<1x64x128xbf16>
    tpu.vector_store %arg5[%c0_12, %c0_13, %c0_14], %21 {strides = array<i32>} : memref<1x64x128xbf16, #tpu.memory_space<vmem>>, vector<1x64x128xbf16>,
    return
  }
  func.func @transform_0(%arg0: i32, %arg1: i32) -> (i32, i32, i32) {
    %c0_i32 = arith.constant 0 : i32
    %c0_i32_0 = arith.constant 0 : i32
    return %arg0, %arg1, %c0_i32 : i32, i32, i32
  }
  func.func @transform_1(%arg0: i32, %arg1: i32) -> (i32, i32, i32) {
    %c0_i32 = arith.constant 0 : i32
    %c0_i32_0 = arith.constant 0 : i32
    %c0_i32_1 = arith.constant 0 : i32
    return %arg0, %c0_i32, %c0_i32_0 : i32, i32, i32
  }
  func.func @transform_2(%arg0: i32, %arg1: i32) -> (i32, i32, i32) {
    %c0_i32 = arith.constant 0 : i32
    %c0_i32_0 = arith.constant 0 : i32
    %c0_i32_1 = arith.constant 0 : i32
    return %arg0, %c0_i32, %c0_i32_0 : i32, i32, i32
  }
  func.func @transform_3(%arg0: i32, %arg1: i32) -> (i32, i32, i32) {
    %c0_i32 = arith.constant 0 : i32
    %c0_i32_0 = arith.constant 0 : i32
    return %arg0, %arg1, %c0_i32 : i32, i32, i32
  }
}

module attributes {stable_mosaic.version = 11 : i64} {
  func.func @_matmul_bias_kernel(%arg0: i32, %arg1: memref<32x1152xbf16, #tpu.memory_space<vmem>>, %arg2: memref<1152x256xbf16, #tpu.memory_space<vmem>>, %arg3: memref<1x256xf32, #tpu.memory_space<vmem>>, %arg4: memref<32x256xbf16, #tpu.memory_space<vmem>>) attributes {dimension_semantics = [#tpu.dimension_semantics<parallel>], iteration_bounds = array<i64: 1>, scalar_prefetch = 0 : i64, scratch_operands = 0 : i64, tpu.core_type = #tpu.core_type<tc>, window_params = [{transform_indices = @transform_0, window_bounds = array<i64: 32, 1152>}, {pipeline_mode = #tpu.pipeline_mode<synchronous>, transform_indices = @transform_1, window_bounds = array<i64: 1152, 256>}, {pipeline_mode = #tpu.pipeline_mode<synchronous>, transform_indices = @transform_2, window_bounds = array<i64: 1, 256>}, {transform_indices = @transform_3, window_bounds = array<i64: 32, 256>}]} {
    %c0 = arith.constant 0 : index
    %c0_0 = arith.constant 0 : index
    %0 = vector.load %arg1[%c0, %c0_0] : memref<32x1152xbf16, #tpu.memory_space<vmem>>, vector<32x1152xbf16>
    %c0_1 = arith.constant 0 : index
    %c0_2 = arith.constant 0 : index
    %1 = vector.load %arg2[%c0_1, %c0_2] : memref<1152x256xbf16, #tpu.memory_space<vmem>>, vector<1152x256xbf16>
    %cst = arith.constant dense<0.000000e+00> : vector<32x256xf32>
    %2 = tpu.matmul %0, %1, %cst {dimension_numbers = #tpu.dot_dimension_numbers<[1], [0], [0], [1], [0, 0, 1, 1], [], []>} : vector<32x1152xbf16>, vector<1152x256xbf16>, vector<32x256xf32> -> vector<32x256xf32>
    %c0_3 = arith.constant 0 : index
    %c0_4 = arith.constant 0 : index
    %3 = vector.load %arg3[%c0_3, %c0_4] : memref<1x256xf32, #tpu.memory_space<vmem>>, vector<1x256xf32>
    %4 = vector.broadcast %3 : vector<1x256xf32> to vector<32x256xf32>
    %5 = arith.addf %2, %4 : vector<32x256xf32>
    %6 = arith.truncf %5 : vector<32x256xf32> to vector<32x256xbf16>
    %c0_5 = arith.constant 0 : index
    %c0_6 = arith.constant 0 : index
    %7 = vector.load %arg4[%c0_5, %c0_6] : memref<32x256xbf16, #tpu.memory_space<vmem>>, vector<32x256xbf16>
    tpu.vector_store %arg4[%c0_5, %c0_6], %6 {strides = array<i32>} : memref<32x256xbf16, #tpu.memory_space<vmem>>, vector<32x256xbf16>,
    return
  }
  func.func @transform_0(%arg0: i32) -> (i32, i32) {
    %c0_i32 = arith.constant 0 : i32
    %c0_i32_0 = arith.constant 0 : i32
    return %arg0, %c0_i32 : i32, i32
  }
  func.func @transform_1(%arg0: i32) -> (i32, i32) {
    %c0_i32 = arith.constant 0 : i32
    %c0_i32_0 = arith.constant 0 : i32
    %c0_i32_1 = arith.constant 0 : i32
    return %c0_i32, %c0_i32_0 : i32, i32
  }
  func.func @transform_2(%arg0: i32) -> (i32, i32) {
    %c0_i32 = arith.constant 0 : i32
    %c0_i32_0 = arith.constant 0 : i32
    %c0_i32_1 = arith.constant 0 : i32
    return %c0_i32, %c0_i32_0 : i32, i32
  }
  func.func @transform_3(%arg0: i32) -> (i32, i32) {
    %c0_i32 = arith.constant 0 : i32
    %c0_i32_0 = arith.constant 0 : i32
    return %arg0, %c0_i32 : i32, i32
  }
}

module attributes {stable_mosaic.version = 11 : i64} {
  func.func @_in_stats_kernel(%arg0: i32, %arg1: i32, %arg2: memref<1x16x256xbf16, #tpu.memory_space<vmem>>, %arg3: memref<1x1x256xf32, #tpu.memory_space<vmem>>, %arg4: memref<1x1x256xf32, #tpu.memory_space<vmem>>) attributes {dimension_semantics = [#tpu.dimension_semantics<parallel>, #tpu.dimension_semantics<arbitrary>], iteration_bounds = array<i64: 2, 1>, scalar_prefetch = 0 : i64, scratch_operands = 0 : i64, tpu.core_type = #tpu.core_type<tc>, window_params = [{transform_indices = @transform_0, window_bounds = array<i64: 1, 16, 256>}, {transform_indices = @transform_1, window_bounds = array<i64: 1, 1, 256>}, {transform_indices = @transform_2, window_bounds = array<i64: 1, 1, 256>}]} {
    %c0 = arith.constant 0 : index
    %c0_0 = arith.constant 0 : index
    %c0_1 = arith.constant 0 : index
    %0 = vector.load %arg2[%c0, %c0_0, %c0_1] : memref<1x16x256xbf16, #tpu.memory_space<vmem>>, vector<1x16x256xbf16>
    %1 = arith.extf %0 : vector<1x16x256xbf16> to vector<1x16x256xf32>
    %cst = arith.constant dense<0.000000e+00> : vector<1x256xf32>
    %2 = vector.multi_reduction <add>, %1, %cst [1] : vector<1x16x256xf32> to vector<1x256xf32>
    %3 = vector.shape_cast %2 : vector<1x256xf32> to vector<1x1x256xf32>
    %4 = arith.mulf %1, %1 : vector<1x16x256xf32>
    %cst_2 = arith.constant dense<0.000000e+00> : vector<1x256xf32>
    %5 = vector.multi_reduction <add>, %4, %cst_2 [1] : vector<1x16x256xf32> to vector<1x256xf32>
    %6 = vector.shape_cast %5 : vector<1x256xf32> to vector<1x1x256xf32>
    %c0_i32 = arith.constant 0 : i32
    %7 = arith.cmpi eq, %arg1, %c0_i32 : i32
    %8 = arith.extui %7 : i1 to i32
    %c0_i32_3 = arith.constant 0 : i32
    %9 = arith.cmpi ne, %8, %c0_i32_3 : i32
    scf.if %9 {
      %c0_6 = arith.constant 0 : index
      %c0_7 = arith.constant 0 : index
      %c0_8 = arith.constant 0 : index
      %13 = vector.load %arg3[%c0_6, %c0_7, %c0_8] : memref<1x1x256xf32, #tpu.memory_space<vmem>>, vector<1x1x256xf32>
      tpu.vector_store %arg3[%c0_6, %c0_7, %c0_8], %3 {strides = array<i32>} : memref<1x1x256xf32, #tpu.memory_space<vmem>>, vector<1x1x256xf32>,
      %c0_9 = arith.constant 0 : index
      %c0_10 = arith.constant 0 : index
      %c0_11 = arith.constant 0 : index
      %14 = vector.load %arg4[%c0_9, %c0_10, %c0_11] : memref<1x1x256xf32, #tpu.memory_space<vmem>>, vector<1x1x256xf32>
      tpu.vector_store %arg4[%c0_9, %c0_10, %c0_11], %6 {strides = array<i32>} : memref<1x1x256xf32, #tpu.memory_space<vmem>>, vector<1x1x256xf32>,
    } else {
    }
    %c0_i32_4 = arith.constant 0 : i32
    %10 = arith.cmpi sgt, %arg1, %c0_i32_4 : i32
    %11 = arith.extui %10 : i1 to i32
    %c0_i32_5 = arith.constant 0 : i32
    %12 = arith.cmpi ne, %11, %c0_i32_5 : i32
    scf.if %12 {
      %c0_6 = arith.constant 0 : index
      %c0_7 = arith.constant 0 : index
      %c0_8 = arith.constant 0 : index
      %13 = vector.load %arg3[%c0_6, %c0_7, %c0_8] : memref<1x1x256xf32, #tpu.memory_space<vmem>>, vector<1x1x256xf32>
      %14 = arith.addf %13, %3 : vector<1x1x256xf32>
      %c0_9 = arith.constant 0 : index
      %c0_10 = arith.constant 0 : index
      %c0_11 = arith.constant 0 : index
      %15 = vector.load %arg3[%c0_9, %c0_10, %c0_11] : memref<1x1x256xf32, #tpu.memory_space<vmem>>, vector<1x1x256xf32>
      tpu.vector_store %arg3[%c0_9, %c0_10, %c0_11], %14 {strides = array<i32>} : memref<1x1x256xf32, #tpu.memory_space<vmem>>, vector<1x1x256xf32>,
      %c0_12 = arith.constant 0 : index
      %c0_13 = arith.constant 0 : index
      %c0_14 = arith.constant 0 : index
      %16 = vector.load %arg4[%c0_12, %c0_13, %c0_14] : memref<1x1x256xf32, #tpu.memory_space<vmem>>, vector<1x1x256xf32>
      %17 = arith.addf %16, %6 : vector<1x1x256xf32>
      %c0_15 = arith.constant 0 : index
      %c0_16 = arith.constant 0 : index
      %c0_17 = arith.constant 0 : index
      %18 = vector.load %arg4[%c0_15, %c0_16, %c0_17] : memref<1x1x256xf32, #tpu.memory_space<vmem>>, vector<1x1x256xf32>
      tpu.vector_store %arg4[%c0_15, %c0_16, %c0_17], %17 {strides = array<i32>} : memref<1x1x256xf32, #tpu.memory_space<vmem>>, vector<1x1x256xf32>,
    } else {
    }
    return
  }
  func.func @transform_0(%arg0: i32, %arg1: i32) -> (i32, i32, i32) {
    %c0_i32 = arith.constant 0 : i32
    %c0_i32_0 = arith.constant 0 : i32
    return %arg0, %arg1, %c0_i32 : i32, i32, i32
  }
  func.func @transform_1(%arg0: i32, %arg1: i32) -> (i32, i32, i32) {
    %c0_i32 = arith.constant 0 : i32
    %c0_i32_0 = arith.constant 0 : i32
    %c0_i32_1 = arith.constant 0 : i32
    return %arg0, %c0_i32, %c0_i32_0 : i32, i32, i32
  }
  func.func @transform_2(%arg0: i32, %arg1: i32) -> (i32, i32, i32) {
    %c0_i32 = arith.constant 0 : i32
    %c0_i32_0 = arith.constant 0 : i32
    %c0_i32_1 = arith.constant 0 : i32
    return %arg0, %c0_i32, %c0_i32_0 : i32, i32, i32
  }
}

module attributes {stable_mosaic.version = 11 : i64} {
  func.func @kernel(%arg0: i32, %arg1: i32, %arg2: memref<1x16x256xbf16, #tpu.memory_space<vmem>>, %arg3: memref<1x1x256xf32, #tpu.memory_space<vmem>>, %arg4: memref<1x1x256xf32, #tpu.memory_space<vmem>>, %arg5: memref<1x16x256xbf16, #tpu.memory_space<vmem>>) attributes {dimension_semantics = [#tpu.dimension_semantics<parallel>, #tpu.dimension_semantics<parallel>], iteration_bounds = array<i64: 2, 1>, scalar_prefetch = 0 : i64, scratch_operands = 0 : i64, tpu.core_type = #tpu.core_type<tc>, window_params = [{transform_indices = @transform_0, window_bounds = array<i64: 1, 16, 256>}, {transform_indices = @transform_1, window_bounds = array<i64: 1, 1, 256>}, {transform_indices = @transform_2, window_bounds = array<i64: 1, 1, 256>}, {transform_indices = @transform_3, window_bounds = array<i64: 1, 16, 256>}]} {
    %c0 = arith.constant 0 : index
    %c0_0 = arith.constant 0 : index
    %c0_1 = arith.constant 0 : index
    %0 = vector.load %arg2[%c0, %c0_0, %c0_1] : memref<1x16x256xbf16, #tpu.memory_space<vmem>>, vector<1x16x256xbf16>
    %1 = arith.extf %0 : vector<1x16x256xbf16> to vector<1x16x256xf32>
    %c0_2 = arith.constant 0 : index
    %c0_3 = arith.constant 0 : index
    %c0_4 = arith.constant 0 : index
    %2 = vector.load %arg3[%c0_2, %c0_3, %c0_4] : memref<1x1x256xf32, #tpu.memory_space<vmem>>, vector<1x1x256xf32>
    %cst = arith.constant 6.250000e-02 : f32
    %3 = vector.broadcast %cst : f32 to vector<1x1x256xf32>
    %4 = arith.mulf %2, %3 : vector<1x1x256xf32>
    %c0_5 = arith.constant 0 : index
    %c0_6 = arith.constant 0 : index
    %c0_7 = arith.constant 0 : index
    %5 = vector.load %arg4[%c0_5, %c0_6, %c0_7] : memref<1x1x256xf32, #tpu.memory_space<vmem>>, vector<1x1x256xf32>
    %cst_8 = arith.constant 6.250000e-02 : f32
    %6 = vector.broadcast %cst_8 : f32 to vector<1x1x256xf32>
    %7 = arith.mulf %5, %6 : vector<1x1x256xf32>
    %8 = arith.mulf %4, %4 : vector<1x1x256xf32>
    %9 = arith.subf %7, %8 : vector<1x1x256xf32>
    %cst_9 = arith.constant 0.000000e+00 : f32
    %10 = vector.broadcast %cst_9 : f32 to vector<1x1x256xf32>
    %11 = arith.maximumf %9, %10 : vector<1x1x256xf32>
    %12 = vector.broadcast %4 : vector<1x1x256xf32> to vector<1x16x256xf32>
    %13 = arith.subf %1, %12 : vector<1x16x256xf32>
    %cst_10 = arith.constant 9.99999974E-6 : f32
    %14 = vector.broadcast %cst_10 : f32 to vector<1x1x256xf32>
    %15 = arith.addf %11, %14 : vector<1x1x256xf32>
    %16 = math.rsqrt %15 : vector<1x1x256xf32>
    %17 = vector.broadcast %16 : vector<1x1x256xf32> to vector<1x16x256xf32>
    %18 = arith.mulf %13, %17 : vector<1x16x256xf32>
    %cst_11 = arith.constant 0.000000e+00 : f32
    %19 = vector.broadcast %cst_11 : f32 to vector<1x16x256xf32>
    %20 = arith.maximumf %18, %19 : vector<1x16x256xf32>
    %21 = arith.truncf %20 : vector<1x16x256xf32> to vector<1x16x256xbf16>
    %c0_12 = arith.constant 0 : index
    %c0_13 = arith.constant 0 : index
    %c0_14 = arith.constant 0 : index
    %22 = vector.load %arg5[%c0_12, %c0_13, %c0_14] : memref<1x16x256xbf16, #tpu.memory_space<vmem>>, vector<1x16x256xbf16>
    tpu.vector_store %arg5[%c0_12, %c0_13, %c0_14], %21 {strides = array<i32>} : memref<1x16x256xbf16, #tpu.memory_space<vmem>>, vector<1x16x256xbf16>,
    return
  }
  func.func @transform_0(%arg0: i32, %arg1: i32) -> (i32, i32, i32) {
    %c0_i32 = arith.constant 0 : i32
    %c0_i32_0 = arith.constant 0 : i32
    return %arg0, %arg1, %c0_i32 : i32, i32, i32
  }
  func.func @transform_1(%arg0: i32, %arg1: i32) -> (i32, i32, i32) {
    %c0_i32 = arith.constant 0 : i32
    %c0_i32_0 = arith.constant 0 : i32
    %c0_i32_1 = arith.constant 0 : i32
    return %arg0, %c0_i32, %c0_i32_0 : i32, i32, i32
  }
  func.func @transform_2(%arg0: i32, %arg1: i32) -> (i32, i32, i32) {
    %c0_i32 = arith.constant 0 : i32
    %c0_i32_0 = arith.constant 0 : i32
    %c0_i32_1 = arith.constant 0 : i32
    return %arg0, %c0_i32, %c0_i32_0 : i32, i32, i32
  }
  func.func @transform_3(%arg0: i32, %arg1: i32) -> (i32, i32, i32) {
    %c0_i32 = arith.constant 0 : i32
    %c0_i32_0 = arith.constant 0 : i32
    return %arg0, %arg1, %c0_i32 : i32, i32, i32
  }
}

module attributes {stable_mosaic.version = 11 : i64} {
  func.func @kernel(%arg0: i32, %arg1: i32, %arg2: i32, %arg3: memref<1x1x6x256xbf16, #tpu.memory_space<vmem>>, %arg4: memref<3x3x256x256xbf16, #tpu.memory_space<vmem>>, %arg5: memref<1x256xf32, #tpu.memory_space<vmem>>, %arg6: memref<1x1x4x256xbf16, #tpu.memory_space<vmem>>, %arg7: memref<4x256xf32, #tpu.memory_space<vmem>>) attributes {dimension_semantics = [#tpu.dimension_semantics<parallel>, #tpu.dimension_semantics<parallel>, #tpu.dimension_semantics<arbitrary>], iteration_bounds = array<i64: 2, 4, 3>, scalar_prefetch = 0 : i64, scratch_operands = 1 : i64, tpu.core_type = #tpu.core_type<tc>, window_params = [{transform_indices = @transform_0, window_bounds = array<i64: 1, 1, 6, 256>}, {pipeline_mode = #tpu.pipeline_mode<synchronous>, transform_indices = @transform_1, window_bounds = array<i64: 3, 3, 256, 256>}, {pipeline_mode = #tpu.pipeline_mode<synchronous>, transform_indices = @transform_2, window_bounds = array<i64: 1, 256>}, {transform_indices = @transform_3, window_bounds = array<i64: 1, 1, 4, 256>}]} {
    %c0_i32 = arith.constant 0 : i32
    %0 = arith.cmpi eq, %arg2, %c0_i32 : i32
    %1 = arith.extui %0 : i1 to i32
    %c0_i32_0 = arith.constant 0 : i32
    %2 = arith.cmpi ne, %1, %c0_i32_0 : i32
    scf.if %2 {
      %cst_26 = arith.constant 0.000000e+00 : f32
      %29 = vector.broadcast %cst_26 : f32 to vector<4x256xf32>
      %c0_27 = arith.constant 0 : index
      %c0_28 = arith.constant 0 : index
      %30 = vector.load %arg7[%c0_27, %c0_28] : memref<4x256xf32, #tpu.memory_space<vmem>>, vector<4x256xf32>
      tpu.vector_store %arg7[%c0_27, %c0_28], %29 {strides = array<i32>} : memref<4x256xf32, #tpu.memory_space<vmem>>, vector<4x256xf32>,
    } else {
    }
    %c0 = arith.constant 0 : index
    %c0_1 = arith.constant 0 : index
    %3 = vector.load %arg7[%c0, %c0_1] : memref<4x256xf32, #tpu.memory_space<vmem>>, vector<4x256xf32>
    %c0_2 = arith.constant 0 : index
    %c0_3 = arith.constant 0 : index
    %c0_4 = arith.constant 0 : index
    %c0_5 = arith.constant 0 : index
    %4 = vector.load %arg3[%c0_2, %c0_3, %c0_4, %c0_5] : memref<1x1x6x256xbf16, #tpu.memory_space<vmem>>, vector<1x1x4x256xbf16>
    %5 = vector.shape_cast %4 : vector<1x1x4x256xbf16> to vector<4x256xbf16>
    %6 = arith.index_cast %arg2 : i32 to index
    %c0_6 = arith.constant 0 : index
    %c0_7 = arith.constant 0 : index
    %c0_8 = arith.constant 0 : index
    %7 = vector.load %arg4[%6, %c0_6, %c0_7, %c0_8] : memref<3x3x256x256xbf16, #tpu.memory_space<vmem>>, vector<1x1x256x256xbf16>
    %8 = vector.shape_cast %7 : vector<1x1x256x256xbf16> to vector<256x256xbf16>
    %cst = arith.constant dense<0.000000e+00> : vector<4x256xf32>
    %9 = tpu.matmul %5, %8, %cst {dimension_numbers = #tpu.dot_dimension_numbers<[1], [0], [0], [1], [0, 0, 1, 1], [], []>} : vector<4x256xbf16>, vector<256x256xbf16>, vector<4x256xf32> -> vector<4x256xf32>
    %10 = arith.addf %3, %9 : vector<4x256xf32>
    %c0_9 = arith.constant 0 : index
    %c0_10 = arith.constant 0 : index
    %c1 = arith.constant 1 : index
    %c0_11 = arith.constant 0 : index
    %11 = vector.load %arg3[%c0_9, %c0_10, %c1, %c0_11] : memref<1x1x6x256xbf16, #tpu.memory_space<vmem>>, vector<1x1x4x256xbf16>
    %12 = vector.shape_cast %11 : vector<1x1x4x256xbf16> to vector<4x256xbf16>
    %13 = arith.index_cast %arg2 : i32 to index
    %c1_12 = arith.constant 1 : index
    %c0_13 = arith.constant 0 : index
    %c0_14 = arith.constant 0 : index
    %14 = vector.load %arg4[%13, %c1_12, %c0_13, %c0_14] : memref<3x3x256x256xbf16, #tpu.memory_space<vmem>>, vector<1x1x256x256xbf16>
    %15 = vector.shape_cast %14 : vector<1x1x256x256xbf16> to vector<256x256xbf16>
    %cst_15 = arith.constant dense<0.000000e+00> : vector<4x256xf32>
    %16 = tpu.matmul %12, %15, %cst_15 {dimension_numbers = #tpu.dot_dimension_numbers<[1], [0], [0], [1], [0, 0, 1, 1], [], []>} : vector<4x256xbf16>, vector<256x256xbf16>, vector<4x256xf32> -> vector<4x256xf32>
    %17 = arith.addf %10, %16 : vector<4x256xf32>
    %c0_16 = arith.constant 0 : index
    %c0_17 = arith.constant 0 : index
    %c2 = arith.constant 2 : index
    %c0_18 = arith.constant 0 : index
    %18 = vector.load %arg3[%c0_16, %c0_17, %c2, %c0_18] : memref<1x1x6x256xbf16, #tpu.memory_space<vmem>>, vector<1x1x4x256xbf16>
    %19 = vector.shape_cast %18 : vector<1x1x4x256xbf16> to vector<4x256xbf16>
    %20 = arith.index_cast %arg2 : i32 to index
    %c2_19 = arith.constant 2 : index
    %c0_20 = arith.constant 0 : index
    %c0_21 = arith.constant 0 : index
    %21 = vector.load %arg4[%20, %c2_19, %c0_20, %c0_21] : memref<3x3x256x256xbf16, #tpu.memory_space<vmem>>, vector<1x1x256x256xbf16>
    %22 = vector.shape_cast %21 : vector<1x1x256x256xbf16> to vector<256x256xbf16>
    %cst_22 = arith.constant dense<0.000000e+00> : vector<4x256xf32>
    %23 = tpu.matmul %19, %22, %cst_22 {dimension_numbers = #tpu.dot_dimension_numbers<[1], [0], [0], [1], [0, 0, 1, 1], [], []>} : vector<4x256xbf16>, vector<256x256xbf16>, vector<4x256xf32> -> vector<4x256xf32>
    %24 = arith.addf %17, %23 : vector<4x256xf32>
    %c0_23 = arith.constant 0 : index
    %c0_24 = arith.constant 0 : index
    %25 = vector.load %arg7[%c0_23, %c0_24] : memref<4x256xf32, #tpu.memory_space<vmem>>, vector<4x256xf32>
    tpu.vector_store %arg7[%c0_23, %c0_24], %24 {strides = array<i32>} : memref<4x256xf32, #tpu.memory_space<vmem>>, vector<4x256xf32>,
    %c2_i32 = arith.constant 2 : i32
    %26 = arith.cmpi eq, %arg2, %c2_i32 : i32
    %27 = arith.extui %26 : i1 to i32
    %c0_i32_25 = arith.constant 0 : i32
    %28 = arith.cmpi ne, %27, %c0_i32_25 : i32
    scf.if %28 {
      %c0_26 = arith.constant 0 : index
      %c0_27 = arith.constant 0 : index
      %29 = vector.load %arg7[%c0_26, %c0_27] : memref<4x256xf32, #tpu.memory_space<vmem>>, vector<4x256xf32>
      %c0_28 = arith.constant 0 : index
      %c0_29 = arith.constant 0 : index
      %30 = vector.load %arg5[%c0_28, %c0_29] : memref<1x256xf32, #tpu.memory_space<vmem>>, vector<1x256xf32>
      %31 = vector.broadcast %30 : vector<1x256xf32> to vector<4x256xf32>
      %32 = arith.addf %29, %31 : vector<4x256xf32>
      %33 = arith.truncf %32 : vector<4x256xf32> to vector<4x256xbf16>
      %c0_30 = arith.constant 0 : index
      %c0_31 = arith.constant 0 : index
      %c0_32 = arith.constant 0 : index
      %c0_33 = arith.constant 0 : index
      %34 = vector.load %arg6[%c0_30, %c0_31, %c0_32, %c0_33] : memref<1x1x4x256xbf16, #tpu.memory_space<vmem>>, vector<1x1x4x256xbf16>
      %35 = vector.shape_cast %34 : vector<1x1x4x256xbf16> to vector<4x256xbf16>
      %36 = vector.shape_cast %33 : vector<4x256xbf16> to vector<1x1x4x256xbf16>
      tpu.vector_store %arg6[%c0_30, %c0_31, %c0_32, %c0_33], %36 {strides = array<i32>} : memref<1x1x4x256xbf16, #tpu.memory_space<vmem>>, vector<1x1x4x256xbf16>,
    } else {
    }
    return
  }
  func.func @transform_0(%arg0: i32, %arg1: i32, %arg2: i32) -> (i32, i32, i32, i32) {
    %0 = arith.addi %arg1, %arg2 : i32
    %c0_i32 = arith.constant 0 : i32
    %c0_i32_0 = arith.constant 0 : i32
    %c0_i32_1 = arith.constant 0 : i32
    return %arg0, %0, %c0_i32, %c0_i32_0 : i32, i32, i32, i32
  }
  func.func @transform_1(%arg0: i32, %arg1: i32, %arg2: i32) -> (i32, i32, i32, i32) {
    %c0_i32 = arith.constant 0 : i32
    %c0_i32_0 = arith.constant 0 : i32
    %c0_i32_1 = arith.constant 0 : i32
    %c0_i32_2 = arith.constant 0 : i32
    %c0_i32_3 = arith.constant 0 : i32
    return %c0_i32, %c0_i32_0, %c0_i32_1, %c0_i32_2 : i32, i32, i32, i32
  }
  func.func @transform_2(%arg0: i32, %arg1: i32, %arg2: i32) -> (i32, i32) {
    %c0_i32 = arith.constant 0 : i32
    %c0_i32_0 = arith.constant 0 : i32
    %c0_i32_1 = arith.constant 0 : i32
    return %c0_i32, %c0_i32_0 : i32, i32
  }
  func.func @transform_3(%arg0: i32, %arg1: i32, %arg2: i32) -> (i32, i32, i32, i32) {
    %c0_i32 = arith.constant 0 : i32
    %c0_i32_0 = arith.constant 0 : i32
    %c0_i32_1 = arith.constant 0 : i32
    return %arg0, %arg1, %c0_i32, %c0_i32_0 : i32, i32, i32, i32
  }
}

module attributes {stable_mosaic.version = 11 : i64} {
  func.func @kernel(%arg0: i32, %arg1: i32, %arg2: memref<1x16x256xbf16, #tpu.memory_space<vmem>>, %arg3: memref<1x1x256xf32, #tpu.memory_space<vmem>>, %arg4: memref<1x1x256xf32, #tpu.memory_space<vmem>>, %arg5: memref<1x16x256xbf16, #tpu.memory_space<vmem>>, %arg6: memref<1x16x256xbf16, #tpu.memory_space<vmem>>) attributes {dimension_semantics = [#tpu.dimension_semantics<parallel>, #tpu.dimension_semantics<parallel>], iteration_bounds = array<i64: 2, 1>, scalar_prefetch = 0 : i64, scratch_operands = 0 : i64, tpu.core_type = #tpu.core_type<tc>, window_params = [{transform_indices = @transform_0, window_bounds = array<i64: 1, 16, 256>}, {transform_indices = @transform_1, window_bounds = array<i64: 1, 1, 256>}, {transform_indices = @transform_2, window_bounds = array<i64: 1, 1, 256>}, {transform_indices = @transform_3, window_bounds = array<i64: 1, 16, 256>}, {transform_indices = @transform_4, window_bounds = array<i64: 1, 16, 256>}]} {
    %c0 = arith.constant 0 : index
    %c0_0 = arith.constant 0 : index
    %c0_1 = arith.constant 0 : index
    %0 = vector.load %arg2[%c0, %c0_0, %c0_1] : memref<1x16x256xbf16, #tpu.memory_space<vmem>>, vector<1x16x256xbf16>
    %1 = arith.extf %0 : vector<1x16x256xbf16> to vector<1x16x256xf32>
    %c0_2 = arith.constant 0 : index
    %c0_3 = arith.constant 0 : index
    %c0_4 = arith.constant 0 : index
    %2 = vector.load %arg3[%c0_2, %c0_3, %c0_4] : memref<1x1x256xf32, #tpu.memory_space<vmem>>, vector<1x1x256xf32>
    %cst = arith.constant 6.250000e-02 : f32
    %3 = vector.broadcast %cst : f32 to vector<1x1x256xf32>
    %4 = arith.mulf %2, %3 : vector<1x1x256xf32>
    %c0_5 = arith.constant 0 : index
    %c0_6 = arith.constant 0 : index
    %c0_7 = arith.constant 0 : index
    %5 = vector.load %arg4[%c0_5, %c0_6, %c0_7] : memref<1x1x256xf32, #tpu.memory_space<vmem>>, vector<1x1x256xf32>
    %cst_8 = arith.constant 6.250000e-02 : f32
    %6 = vector.broadcast %cst_8 : f32 to vector<1x1x256xf32>
    %7 = arith.mulf %5, %6 : vector<1x1x256xf32>
    %8 = arith.mulf %4, %4 : vector<1x1x256xf32>
    %9 = arith.subf %7, %8 : vector<1x1x256xf32>
    %cst_9 = arith.constant 0.000000e+00 : f32
    %10 = vector.broadcast %cst_9 : f32 to vector<1x1x256xf32>
    %11 = arith.maximumf %9, %10 : vector<1x1x256xf32>
    %12 = vector.broadcast %4 : vector<1x1x256xf32> to vector<1x16x256xf32>
    %13 = arith.subf %1, %12 : vector<1x16x256xf32>
    %cst_10 = arith.constant 9.99999974E-6 : f32
    %14 = vector.broadcast %cst_10 : f32 to vector<1x1x256xf32>
    %15 = arith.addf %11, %14 : vector<1x1x256xf32>
    %16 = math.rsqrt %15 : vector<1x1x256xf32>
    %17 = vector.broadcast %16 : vector<1x1x256xf32> to vector<1x16x256xf32>
    %18 = arith.mulf %13, %17 : vector<1x16x256xf32>
    %c0_11 = arith.constant 0 : index
    %c0_12 = arith.constant 0 : index
    %c0_13 = arith.constant 0 : index
    %19 = vector.load %arg5[%c0_11, %c0_12, %c0_13] : memref<1x16x256xbf16, #tpu.memory_space<vmem>>, vector<1x16x256xbf16>
    %20 = arith.extf %19 : vector<1x16x256xbf16> to vector<1x16x256xf32>
    %21 = arith.addf %18, %20 : vector<1x16x256xf32>
    %22 = arith.truncf %21 : vector<1x16x256xf32> to vector<1x16x256xbf16>
    %c0_14 = arith.constant 0 : index
    %c0_15 = arith.constant 0 : index
    %c0_16 = arith.constant 0 : index
    %23 = vector.load %arg6[%c0_14, %c0_15, %c0_16] : memref<1x16x256xbf16, #tpu.memory_space<vmem>>, vector<1x16x256xbf16>
    tpu.vector_store %arg6[%c0_14, %c0_15, %c0_16], %22 {strides = array<i32>} : memref<1x16x256xbf16, #tpu.memory_space<vmem>>, vector<1x16x256xbf16>,
    return
  }
  func.func @transform_0(%arg0: i32, %arg1: i32) -> (i32, i32, i32) {
    %c0_i32 = arith.constant 0 : i32
    %c0_i32_0 = arith.constant 0 : i32
    return %arg0, %arg1, %c0_i32 : i32, i32, i32
  }
  func.func @transform_1(%arg0: i32, %arg1: i32) -> (i32, i32, i32) {
    %c0_i32 = arith.constant 0 : i32
    %c0_i32_0 = arith.constant 0 : i32
    %c0_i32_1 = arith.constant 0 : i32
    return %arg0, %c0_i32, %c0_i32_0 : i32, i32, i32
  }
  func.func @transform_2(%arg0: i32, %arg1: i32) -> (i32, i32, i32) {
    %c0_i32 = arith.constant 0 : i32
    %c0_i32_0 = arith.constant 0 : i32
    %c0_i32_1 = arith.constant 0 : i32
    return %arg0, %c0_i32, %c0_i32_0 : i32, i32, i32
  }
  func.func @transform_3(%arg0: i32, %arg1: i32) -> (i32, i32, i32) {
    %c0_i32 = arith.constant 0 : i32
    %c0_i32_0 = arith.constant 0 : i32
    return %arg0, %arg1, %c0_i32 : i32, i32, i32
  }
  func.func @transform_4(%arg0: i32, %arg1: i32) -> (i32, i32, i32) {
    %c0_i32 = arith.constant 0 : i32
    %c0_i32_0 = arith.constant 0 : i32
    return %arg0, %arg1, %c0_i32 : i32, i32, i32
  }
}

module attributes {stable_mosaic.version = 11 : i64} {
  func.func @kernel(%arg0: i32, %arg1: i32, %arg2: i32, %arg3: memref<1x1x5x256xbf16, #tpu.memory_space<vmem>>, %arg4: memref<2x2x256x128xbf16, #tpu.memory_space<vmem>>, %arg5: memref<1x128xf32, #tpu.memory_space<vmem>>, %arg6: memref<1x1x4x128xbf16, #tpu.memory_space<vmem>>, %arg7: memref<4x128xf32, #tpu.memory_space<vmem>>) attributes {dimension_semantics = [#tpu.dimension_semantics<parallel>, #tpu.dimension_semantics<parallel>, #tpu.dimension_semantics<arbitrary>], iteration_bounds = array<i64: 2, 4, 2>, scalar_prefetch = 0 : i64, scratch_operands = 1 : i64, tpu.core_type = #tpu.core_type<tc>, window_params = [{transform_indices = @transform_0, window_bounds = array<i64: 1, 1, 5, 256>}, {pipeline_mode = #tpu.pipeline_mode<synchronous>, transform_indices = @transform_1, window_bounds = array<i64: 2, 2, 256, 128>}, {pipeline_mode = #tpu.pipeline_mode<synchronous>, transform_indices = @transform_2, window_bounds = array<i64: 1, 128>}, {transform_indices = @transform_3, window_bounds = array<i64: 1, 1, 4, 128>}]} {
    %c0_i32 = arith.constant 0 : i32
    %0 = arith.cmpi eq, %arg2, %c0_i32 : i32
    %1 = arith.extui %0 : i1 to i32
    %c0_i32_0 = arith.constant 0 : i32
    %2 = arith.cmpi ne, %1, %c0_i32_0 : i32
    scf.if %2 {
      %cst_19 = arith.constant 0.000000e+00 : f32
      %22 = vector.broadcast %cst_19 : f32 to vector<4x128xf32>
      %c0_20 = arith.constant 0 : index
      %c0_21 = arith.constant 0 : index
      %23 = vector.load %arg7[%c0_20, %c0_21] : memref<4x128xf32, #tpu.memory_space<vmem>>, vector<4x128xf32>
      tpu.vector_store %arg7[%c0_20, %c0_21], %22 {strides = array<i32>} : memref<4x128xf32, #tpu.memory_space<vmem>>, vector<4x128xf32>,
    } else {
    }
    %c0 = arith.constant 0 : index
    %c0_1 = arith.constant 0 : index
    %3 = vector.load %arg7[%c0, %c0_1] : memref<4x128xf32, #tpu.memory_space<vmem>>, vector<4x128xf32>
    %c0_2 = arith.constant 0 : index
    %c0_3 = arith.constant 0 : index
    %c0_4 = arith.constant 0 : index
    %c0_5 = arith.constant 0 : index
    %4 = vector.load %arg3[%c0_2, %c0_3, %c0_4, %c0_5] : memref<1x1x5x256xbf16, #tpu.memory_space<vmem>>, vector<1x1x4x256xbf16>
    %5 = vector.shape_cast %4 : vector<1x1x4x256xbf16> to vector<4x256xbf16>
    %6 = arith.index_cast %arg2 : i32 to index
    %c0_6 = arith.constant 0 : index
    %c0_7 = arith.constant 0 : index
    %c0_8 = arith.constant 0 : index
    %7 = vector.load %arg4[%6, %c0_6, %c0_7, %c0_8] : memref<2x2x256x128xbf16, #tpu.memory_space<vmem>>, vector<1x1x256x128xbf16>
    %8 = vector.shape_cast %7 : vector<1x1x256x128xbf16> to vector<256x128xbf16>
    %cst = arith.constant dense<0.000000e+00> : vector<4x128xf32>
    %9 = tpu.matmul %5, %8, %cst {dimension_numbers = #tpu.dot_dimension_numbers<[1], [0], [0], [1], [0, 0, 1, 1], [], []>} : vector<4x256xbf16>, vector<256x128xbf16>, vector<4x128xf32> -> vector<4x128xf32>
    %10 = arith.addf %3, %9 : vector<4x128xf32>
    %c0_9 = arith.constant 0 : index
    %c0_10 = arith.constant 0 : index
    %c1 = arith.constant 1 : index
    %c0_11 = arith.constant 0 : index
    %11 = vector.load %arg3[%c0_9, %c0_10, %c1, %c0_11] : memref<1x1x5x256xbf16, #tpu.memory_space<vmem>>, vector<1x1x4x256xbf16>
    %12 = vector.shape_cast %11 : vector<1x1x4x256xbf16> to vector<4x256xbf16>
    %13 = arith.index_cast %arg2 : i32 to index
    %c1_12 = arith.constant 1 : index
    %c0_13 = arith.constant 0 : index
    %c0_14 = arith.constant 0 : index
    %14 = vector.load %arg4[%13, %c1_12, %c0_13, %c0_14] : memref<2x2x256x128xbf16, #tpu.memory_space<vmem>>, vector<1x1x256x128xbf16>
    %15 = vector.shape_cast %14 : vector<1x1x256x128xbf16> to vector<256x128xbf16>
    %cst_15 = arith.constant dense<0.000000e+00> : vector<4x128xf32>
    %16 = tpu.matmul %12, %15, %cst_15 {dimension_numbers = #tpu.dot_dimension_numbers<[1], [0], [0], [1], [0, 0, 1, 1], [], []>} : vector<4x256xbf16>, vector<256x128xbf16>, vector<4x128xf32> -> vector<4x128xf32>
    %17 = arith.addf %10, %16 : vector<4x128xf32>
    %c0_16 = arith.constant 0 : index
    %c0_17 = arith.constant 0 : index
    %18 = vector.load %arg7[%c0_16, %c0_17] : memref<4x128xf32, #tpu.memory_space<vmem>>, vector<4x128xf32>
    tpu.vector_store %arg7[%c0_16, %c0_17], %17 {strides = array<i32>} : memref<4x128xf32, #tpu.memory_space<vmem>>, vector<4x128xf32>,
    %c1_i32 = arith.constant 1 : i32
    %19 = arith.cmpi eq, %arg2, %c1_i32 : i32
    %20 = arith.extui %19 : i1 to i32
    %c0_i32_18 = arith.constant 0 : i32
    %21 = arith.cmpi ne, %20, %c0_i32_18 : i32
    scf.if %21 {
      %c0_19 = arith.constant 0 : index
      %c0_20 = arith.constant 0 : index
      %22 = vector.load %arg7[%c0_19, %c0_20] : memref<4x128xf32, #tpu.memory_space<vmem>>, vector<4x128xf32>
      %c0_21 = arith.constant 0 : index
      %c0_22 = arith.constant 0 : index
      %23 = vector.load %arg5[%c0_21, %c0_22] : memref<1x128xf32, #tpu.memory_space<vmem>>, vector<1x128xf32>
      %24 = vector.broadcast %23 : vector<1x128xf32> to vector<4x128xf32>
      %25 = arith.addf %22, %24 : vector<4x128xf32>
      %26 = arith.truncf %25 : vector<4x128xf32> to vector<4x128xbf16>
      %c0_23 = arith.constant 0 : index
      %c0_24 = arith.constant 0 : index
      %c0_25 = arith.constant 0 : index
      %c0_26 = arith.constant 0 : index
      %27 = vector.load %arg6[%c0_23, %c0_24, %c0_25, %c0_26] : memref<1x1x4x128xbf16, #tpu.memory_space<vmem>>, vector<1x1x4x128xbf16>
      %28 = vector.shape_cast %27 : vector<1x1x4x128xbf16> to vector<4x128xbf16>
      %29 = vector.shape_cast %26 : vector<4x128xbf16> to vector<1x1x4x128xbf16>
      tpu.vector_store %arg6[%c0_23, %c0_24, %c0_25, %c0_26], %29 {strides = array<i32>} : memref<1x1x4x128xbf16, #tpu.memory_space<vmem>>, vector<1x1x4x128xbf16>,
    } else {
    }
    return
  }
  func.func @transform_0(%arg0: i32, %arg1: i32, %arg2: i32) -> (i32, i32, i32, i32) {
    %0 = arith.addi %arg1, %arg2 : i32
    %c0_i32 = arith.constant 0 : i32
    %c0_i32_0 = arith.constant 0 : i32
    %c0_i32_1 = arith.constant 0 : i32
    return %arg0, %0, %c0_i32, %c0_i32_0 : i32, i32, i32, i32
  }
  func.func @transform_1(%arg0: i32, %arg1: i32, %arg2: i32) -> (i32, i32, i32, i32) {
    %c0_i32 = arith.constant 0 : i32
    %c0_i32_0 = arith.constant 0 : i32
    %c0_i32_1 = arith.constant 0 : i32
    %c0_i32_2 = arith.constant 0 : i32
    %c0_i32_3 = arith.constant 0 : i32
    return %c0_i32, %c0_i32_0, %c0_i32_1, %c0_i32_2 : i32, i32, i32, i32
  }
  func.func @transform_2(%arg0: i32, %arg1: i32, %arg2: i32) -> (i32, i32) {
    %c0_i32 = arith.constant 0 : i32
    %c0_i32_0 = arith.constant 0 : i32
    %c0_i32_1 = arith.constant 0 : i32
    return %c0_i32, %c0_i32_0 : i32, i32
  }
  func.func @transform_3(%arg0: i32, %arg1: i32, %arg2: i32) -> (i32, i32, i32, i32) {
    %c0_i32 = arith.constant 0 : i32
    %c0_i32_0 = arith.constant 0 : i32
    %c0_i32_1 = arith.constant 0 : i32
    return %arg0, %arg1, %c0_i32, %c0_i32_0 : i32, i32, i32, i32
  }
}

module attributes {stable_mosaic.version = 11 : i64} {
  func.func @kernel(%arg0: i32, %arg1: i32, %arg2: i32, %arg3: memref<1x1x5x256xbf16, #tpu.memory_space<vmem>>, %arg4: memref<1x2x256x128xbf16, #tpu.memory_space<vmem>>, %arg5: memref<1x128xf32, #tpu.memory_space<vmem>>, %arg6: memref<1x1x4x128xbf16, #tpu.memory_space<vmem>>, %arg7: memref<4x128xf32, #tpu.memory_space<vmem>>) attributes {dimension_semantics = [#tpu.dimension_semantics<parallel>, #tpu.dimension_semantics<parallel>, #tpu.dimension_semantics<arbitrary>], iteration_bounds = array<i64: 2, 4, 1>, scalar_prefetch = 0 : i64, scratch_operands = 1 : i64, tpu.core_type = #tpu.core_type<tc>, window_params = [{transform_indices = @transform_0, window_bounds = array<i64: 1, 1, 5, 256>}, {pipeline_mode = #tpu.pipeline_mode<synchronous>, transform_indices = @transform_1, window_bounds = array<i64: 1, 2, 256, 128>}, {pipeline_mode = #tpu.pipeline_mode<synchronous>, transform_indices = @transform_2, window_bounds = array<i64: 1, 128>}, {transform_indices = @transform_3, window_bounds = array<i64: 1, 1, 4, 128>}]} {
    %c0_i32 = arith.constant 0 : i32
    %0 = arith.cmpi eq, %arg2, %c0_i32 : i32
    %1 = arith.extui %0 : i1 to i32
    %c0_i32_0 = arith.constant 0 : i32
    %2 = arith.cmpi ne, %1, %c0_i32_0 : i32
    scf.if %2 {
      %cst_20 = arith.constant 0.000000e+00 : f32
      %22 = vector.broadcast %cst_20 : f32 to vector<4x128xf32>
      %c0_21 = arith.constant 0 : index
      %c0_22 = arith.constant 0 : index
      %23 = vector.load %arg7[%c0_21, %c0_22] : memref<4x128xf32, #tpu.memory_space<vmem>>, vector<4x128xf32>
      tpu.vector_store %arg7[%c0_21, %c0_22], %22 {strides = array<i32>} : memref<4x128xf32, #tpu.memory_space<vmem>>, vector<4x128xf32>,
    } else {
    }
    %c0 = arith.constant 0 : index
    %c0_1 = arith.constant 0 : index
    %3 = vector.load %arg7[%c0, %c0_1] : memref<4x128xf32, #tpu.memory_space<vmem>>, vector<4x128xf32>
    %c0_2 = arith.constant 0 : index
    %c0_3 = arith.constant 0 : index
    %c0_4 = arith.constant 0 : index
    %c0_5 = arith.constant 0 : index
    %4 = vector.load %arg3[%c0_2, %c0_3, %c0_4, %c0_5] : memref<1x1x5x256xbf16, #tpu.memory_space<vmem>>, vector<1x1x4x256xbf16>
    %5 = vector.shape_cast %4 : vector<1x1x4x256xbf16> to vector<4x256xbf16>
    %6 = arith.index_cast %arg2 : i32 to index
    %c0_6 = arith.constant 0 : index
    %c0_7 = arith.constant 0 : index
    %c0_8 = arith.constant 0 : index
    %7 = vector.load %arg4[%6, %c0_6, %c0_7, %c0_8] : memref<1x2x256x128xbf16, #tpu.memory_space<vmem>>, vector<1x1x256x128xbf16>
    %8 = vector.shape_cast %7 : vector<1x1x256x128xbf16> to vector<256x128xbf16>
    %cst = arith.constant dense<0.000000e+00> : vector<4x128xf32>
    %9 = tpu.matmul %5, %8, %cst {dimension_numbers = #tpu.dot_dimension_numbers<[1], [0], [0], [1], [0, 0, 1, 1], [], []>} : vector<4x256xbf16>, vector<256x128xbf16>, vector<4x128xf32> -> vector<4x128xf32>
    %10 = arith.addf %3, %9 : vector<4x128xf32>
    %c0_9 = arith.constant 0 : index
    %c0_10 = arith.constant 0 : index
    %c1 = arith.constant 1 : index
    %c0_11 = arith.constant 0 : index
    %11 = vector.load %arg3[%c0_9, %c0_10, %c1, %c0_11] : memref<1x1x5x256xbf16, #tpu.memory_space<vmem>>, vector<1x1x4x256xbf16>
    %12 = vector.shape_cast %11 : vector<1x1x4x256xbf16> to vector<4x256xbf16>
    %13 = arith.index_cast %arg2 : i32 to index
    %c1_12 = arith.constant 1 : index
    %c0_13 = arith.constant 0 : index
    %c0_14 = arith.constant 0 : index
    %14 = vector.load %arg4[%13, %c1_12, %c0_13, %c0_14] : memref<1x2x256x128xbf16, #tpu.memory_space<vmem>>, vector<1x1x256x128xbf16>
    %15 = vector.shape_cast %14 : vector<1x1x256x128xbf16> to vector<256x128xbf16>
    %cst_15 = arith.constant dense<0.000000e+00> : vector<4x128xf32>
    %16 = tpu.matmul %12, %15, %cst_15 {dimension_numbers = #tpu.dot_dimension_numbers<[1], [0], [0], [1], [0, 0, 1, 1], [], []>} : vector<4x256xbf16>, vector<256x128xbf16>, vector<4x128xf32> -> vector<4x128xf32>
    %17 = arith.addf %10, %16 : vector<4x128xf32>
    %c0_16 = arith.constant 0 : index
    %c0_17 = arith.constant 0 : index
    %18 = vector.load %arg7[%c0_16, %c0_17] : memref<4x128xf32, #tpu.memory_space<vmem>>, vector<4x128xf32>
    tpu.vector_store %arg7[%c0_16, %c0_17], %17 {strides = array<i32>} : memref<4x128xf32, #tpu.memory_space<vmem>>, vector<4x128xf32>,
    %c0_i32_18 = arith.constant 0 : i32
    %19 = arith.cmpi eq, %arg2, %c0_i32_18 : i32
    %20 = arith.extui %19 : i1 to i32
    %c0_i32_19 = arith.constant 0 : i32
    %21 = arith.cmpi ne, %20, %c0_i32_19 : i32
    scf.if %21 {
      %c0_20 = arith.constant 0 : index
      %c0_21 = arith.constant 0 : index
      %22 = vector.load %arg7[%c0_20, %c0_21] : memref<4x128xf32, #tpu.memory_space<vmem>>, vector<4x128xf32>
      %c0_22 = arith.constant 0 : index
      %c0_23 = arith.constant 0 : index
      %23 = vector.load %arg5[%c0_22, %c0_23] : memref<1x128xf32, #tpu.memory_space<vmem>>, vector<1x128xf32>
      %24 = vector.broadcast %23 : vector<1x128xf32> to vector<4x128xf32>
      %25 = arith.addf %22, %24 : vector<4x128xf32>
      %26 = arith.truncf %25 : vector<4x128xf32> to vector<4x128xbf16>
      %c0_24 = arith.constant 0 : index
      %c0_25 = arith.constant 0 : index
      %c0_26 = arith.constant 0 : index
      %c0_27 = arith.constant 0 : index
      %27 = vector.load %arg6[%c0_24, %c0_25, %c0_26, %c0_27] : memref<1x1x4x128xbf16, #tpu.memory_space<vmem>>, vector<1x1x4x128xbf16>
      %28 = vector.shape_cast %27 : vector<1x1x4x128xbf16> to vector<4x128xbf16>
      %29 = vector.shape_cast %26 : vector<4x128xbf16> to vector<1x1x4x128xbf16>
      tpu.vector_store %arg6[%c0_24, %c0_25, %c0_26, %c0_27], %29 {strides = array<i32>} : memref<1x1x4x128xbf16, #tpu.memory_space<vmem>>, vector<1x1x4x128xbf16>,
    } else {
    }
    return
  }
  func.func @transform_0(%arg0: i32, %arg1: i32, %arg2: i32) -> (i32, i32, i32, i32) {
    %0 = arith.addi %arg1, %arg2 : i32
    %c0_i32 = arith.constant 0 : i32
    %c0_i32_0 = arith.constant 0 : i32
    %c0_i32_1 = arith.constant 0 : i32
    return %arg0, %0, %c0_i32, %c0_i32_0 : i32, i32, i32, i32
  }
  func.func @transform_1(%arg0: i32, %arg1: i32, %arg2: i32) -> (i32, i32, i32, i32) {
    %c0_i32 = arith.constant 0 : i32
    %c0_i32_0 = arith.constant 0 : i32
    %c0_i32_1 = arith.constant 0 : i32
    %c0_i32_2 = arith.constant 0 : i32
    %c0_i32_3 = arith.constant 0 : i32
    return %c0_i32, %c0_i32_0, %c0_i32_1, %c0_i32_2 : i32, i32, i32, i32
  }
  func.func @transform_2(%arg0: i32, %arg1: i32, %arg2: i32) -> (i32, i32) {
    %c0_i32 = arith.constant 0 : i32
    %c0_i32_0 = arith.constant 0 : i32
    %c0_i32_1 = arith.constant 0 : i32
    return %c0_i32, %c0_i32_0 : i32, i32
  }
  func.func @transform_3(%arg0: i32, %arg1: i32, %arg2: i32) -> (i32, i32, i32, i32) {
    %c0_i32 = arith.constant 0 : i32
    %c0_i32_0 = arith.constant 0 : i32
    %c0_i32_1 = arith.constant 0 : i32
    return %arg0, %arg1, %c0_i32, %c0_i32_0 : i32, i32, i32, i32
  }
}

module attributes {stable_mosaic.version = 11 : i64} {
  func.func @kernel(%arg0: i32, %arg1: i32, %arg2: i32, %arg3: memref<1x1x4x256xbf16, #tpu.memory_space<vmem>>, %arg4: memref<2x1x256x128xbf16, #tpu.memory_space<vmem>>, %arg5: memref<1x128xf32, #tpu.memory_space<vmem>>, %arg6: memref<1x1x4x128xbf16, #tpu.memory_space<vmem>>, %arg7: memref<4x128xf32, #tpu.memory_space<vmem>>) attributes {dimension_semantics = [#tpu.dimension_semantics<parallel>, #tpu.dimension_semantics<parallel>, #tpu.dimension_semantics<arbitrary>], iteration_bounds = array<i64: 2, 4, 2>, scalar_prefetch = 0 : i64, scratch_operands = 1 : i64, tpu.core_type = #tpu.core_type<tc>, window_params = [{transform_indices = @transform_0, window_bounds = array<i64: 1, 1, 4, 256>}, {pipeline_mode = #tpu.pipeline_mode<synchronous>, transform_indices = @transform_1, window_bounds = array<i64: 2, 1, 256, 128>}, {pipeline_mode = #tpu.pipeline_mode<synchronous>, transform_indices = @transform_2, window_bounds = array<i64: 1, 128>}, {transform_indices = @transform_3, window_bounds = array<i64: 1, 1, 4, 128>}]} {
    %c0_i32 = arith.constant 0 : i32
    %0 = arith.cmpi eq, %arg2, %c0_i32 : i32
    %1 = arith.extui %0 : i1 to i32
    %c0_i32_0 = arith.constant 0 : i32
    %2 = arith.cmpi ne, %1, %c0_i32_0 : i32
    scf.if %2 {
      %cst_12 = arith.constant 0.000000e+00 : f32
      %15 = vector.broadcast %cst_12 : f32 to vector<4x128xf32>
      %c0_13 = arith.constant 0 : index
      %c0_14 = arith.constant 0 : index
      %16 = vector.load %arg7[%c0_13, %c0_14] : memref<4x128xf32, #tpu.memory_space<vmem>>, vector<4x128xf32>
      tpu.vector_store %arg7[%c0_13, %c0_14], %15 {strides = array<i32>} : memref<4x128xf32, #tpu.memory_space<vmem>>, vector<4x128xf32>,
    } else {
    }
    %c0 = arith.constant 0 : index
    %c0_1 = arith.constant 0 : index
    %3 = vector.load %arg7[%c0, %c0_1] : memref<4x128xf32, #tpu.memory_space<vmem>>, vector<4x128xf32>
    %c0_2 = arith.constant 0 : index
    %c0_3 = arith.constant 0 : index
    %c0_4 = arith.constant 0 : index
    %c0_5 = arith.constant 0 : index
    %4 = vector.load %arg3[%c0_2, %c0_3, %c0_4, %c0_5] : memref<1x1x4x256xbf16, #tpu.memory_space<vmem>>, vector<1x1x4x256xbf16>
    %5 = vector.shape_cast %4 : vector<1x1x4x256xbf16> to vector<4x256xbf16>
    %6 = arith.index_cast %arg2 : i32 to index
    %c0_6 = arith.constant 0 : index
    %c0_7 = arith.constant 0 : index
    %c0_8 = arith.constant 0 : index
    %7 = vector.load %arg4[%6, %c0_6, %c0_7, %c0_8] : memref<2x1x256x128xbf16, #tpu.memory_space<vmem>>, vector<1x1x256x128xbf16>
    %8 = vector.shape_cast %7 : vector<1x1x256x128xbf16> to vector<256x128xbf16>
    %cst = arith.constant dense<0.000000e+00> : vector<4x128xf32>
    %9 = tpu.matmul %5, %8, %cst {dimension_numbers = #tpu.dot_dimension_numbers<[1], [0], [0], [1], [0, 0, 1, 1], [], []>} : vector<4x256xbf16>, vector<256x128xbf16>, vector<4x128xf32> -> vector<4x128xf32>
    %10 = arith.addf %3, %9 : vector<4x128xf32>
    %c0_9 = arith.constant 0 : index
    %c0_10 = arith.constant 0 : index
    %11 = vector.load %arg7[%c0_9, %c0_10] : memref<4x128xf32, #tpu.memory_space<vmem>>, vector<4x128xf32>
    tpu.vector_store %arg7[%c0_9, %c0_10], %10 {strides = array<i32>} : memref<4x128xf32, #tpu.memory_space<vmem>>, vector<4x128xf32>,
    %c1_i32 = arith.constant 1 : i32
    %12 = arith.cmpi eq, %arg2, %c1_i32 : i32
    %13 = arith.extui %12 : i1 to i32
    %c0_i32_11 = arith.constant 0 : i32
    %14 = arith.cmpi ne, %13, %c0_i32_11 : i32
    scf.if %14 {
      %c0_12 = arith.constant 0 : index
      %c0_13 = arith.constant 0 : index
      %15 = vector.load %arg7[%c0_12, %c0_13] : memref<4x128xf32, #tpu.memory_space<vmem>>, vector<4x128xf32>
      %c0_14 = arith.constant 0 : index
      %c0_15 = arith.constant 0 : index
      %16 = vector.load %arg5[%c0_14, %c0_15] : memref<1x128xf32, #tpu.memory_space<vmem>>, vector<1x128xf32>
      %17 = vector.broadcast %16 : vector<1x128xf32> to vector<4x128xf32>
      %18 = arith.addf %15, %17 : vector<4x128xf32>
      %19 = arith.truncf %18 : vector<4x128xf32> to vector<4x128xbf16>
      %c0_16 = arith.constant 0 : index
      %c0_17 = arith.constant 0 : index
      %c0_18 = arith.constant 0 : index
      %c0_19 = arith.constant 0 : index
      %20 = vector.load %arg6[%c0_16, %c0_17, %c0_18, %c0_19] : memref<1x1x4x128xbf16, #tpu.memory_space<vmem>>, vector<1x1x4x128xbf16>
      %21 = vector.shape_cast %20 : vector<1x1x4x128xbf16> to vector<4x128xbf16>
      %22 = vector.shape_cast %19 : vector<4x128xbf16> to vector<1x1x4x128xbf16>
      tpu.vector_store %arg6[%c0_16, %c0_17, %c0_18, %c0_19], %22 {strides = array<i32>} : memref<1x1x4x128xbf16, #tpu.memory_space<vmem>>, vector<1x1x4x128xbf16>,
    } else {
    }
    return
  }
  func.func @transform_0(%arg0: i32, %arg1: i32, %arg2: i32) -> (i32, i32, i32, i32) {
    %0 = arith.addi %arg1, %arg2 : i32
    %c0_i32 = arith.constant 0 : i32
    %c0_i32_0 = arith.constant 0 : i32
    %c0_i32_1 = arith.constant 0 : i32
    return %arg0, %0, %c0_i32, %c0_i32_0 : i32, i32, i32, i32
  }
  func.func @transform_1(%arg0: i32, %arg1: i32, %arg2: i32) -> (i32, i32, i32, i32) {
    %c0_i32 = arith.constant 0 : i32
    %c0_i32_0 = arith.constant 0 : i32
    %c0_i32_1 = arith.constant 0 : i32
    %c0_i32_2 = arith.constant 0 : i32
    %c0_i32_3 = arith.constant 0 : i32
    return %c0_i32, %c0_i32_0, %c0_i32_1, %c0_i32_2 : i32, i32, i32, i32
  }
  func.func @transform_2(%arg0: i32, %arg1: i32, %arg2: i32) -> (i32, i32) {
    %c0_i32 = arith.constant 0 : i32
    %c0_i32_0 = arith.constant 0 : i32
    %c0_i32_1 = arith.constant 0 : i32
    return %c0_i32, %c0_i32_0 : i32, i32
  }
  func.func @transform_3(%arg0: i32, %arg1: i32, %arg2: i32) -> (i32, i32, i32, i32) {
    %c0_i32 = arith.constant 0 : i32
    %c0_i32_0 = arith.constant 0 : i32
    %c0_i32_1 = arith.constant 0 : i32
    return %arg0, %arg1, %c0_i32, %c0_i32_0 : i32, i32, i32, i32
  }
}

module attributes {stable_mosaic.version = 11 : i64} {
  func.func @kernel(%arg0: i32, %arg1: i32, %arg2: i32, %arg3: memref<1x1x4x256xbf16, #tpu.memory_space<vmem>>, %arg4: memref<1x1x256x128xbf16, #tpu.memory_space<vmem>>, %arg5: memref<1x128xf32, #tpu.memory_space<vmem>>, %arg6: memref<1x1x4x128xbf16, #tpu.memory_space<vmem>>, %arg7: memref<4x128xf32, #tpu.memory_space<vmem>>) attributes {dimension_semantics = [#tpu.dimension_semantics<parallel>, #tpu.dimension_semantics<parallel>, #tpu.dimension_semantics<arbitrary>], iteration_bounds = array<i64: 2, 4, 1>, scalar_prefetch = 0 : i64, scratch_operands = 1 : i64, tpu.core_type = #tpu.core_type<tc>, window_params = [{transform_indices = @transform_0, window_bounds = array<i64: 1, 1, 4, 256>}, {pipeline_mode = #tpu.pipeline_mode<synchronous>, transform_indices = @transform_1, window_bounds = array<i64: 1, 1, 256, 128>}, {pipeline_mode = #tpu.pipeline_mode<synchronous>, transform_indices = @transform_2, window_bounds = array<i64: 1, 128>}, {transform_indices = @transform_3, window_bounds = array<i64: 1, 1, 4, 128>}]} {
    %c0_i32 = arith.constant 0 : i32
    %0 = arith.cmpi eq, %arg2, %c0_i32 : i32
    %1 = arith.extui %0 : i1 to i32
    %c0_i32_0 = arith.constant 0 : i32
    %2 = arith.cmpi ne, %1, %c0_i32_0 : i32
    scf.if %2 {
      %cst_13 = arith.constant 0.000000e+00 : f32
      %15 = vector.broadcast %cst_13 : f32 to vector<4x128xf32>
      %c0_14 = arith.constant 0 : index
      %c0_15 = arith.constant 0 : index
      %16 = vector.load %arg7[%c0_14, %c0_15] : memref<4x128xf32, #tpu.memory_space<vmem>>, vector<4x128xf32>
      tpu.vector_store %arg7[%c0_14, %c0_15], %15 {strides = array<i32>} : memref<4x128xf32, #tpu.memory_space<vmem>>, vector<4x128xf32>,
    } else {
    }
    %c0 = arith.constant 0 : index
    %c0_1 = arith.constant 0 : index
    %3 = vector.load %arg7[%c0, %c0_1] : memref<4x128xf32, #tpu.memory_space<vmem>>, vector<4x128xf32>
    %c0_2 = arith.constant 0 : index
    %c0_3 = arith.constant 0 : index
    %c0_4 = arith.constant 0 : index
    %c0_5 = arith.constant 0 : index
    %4 = vector.load %arg3[%c0_2, %c0_3, %c0_4, %c0_5] : memref<1x1x4x256xbf16, #tpu.memory_space<vmem>>, vector<1x1x4x256xbf16>
    %5 = vector.shape_cast %4 : vector<1x1x4x256xbf16> to vector<4x256xbf16>
    %6 = arith.index_cast %arg2 : i32 to index
    %c0_6 = arith.constant 0 : index
    %c0_7 = arith.constant 0 : index
    %c0_8 = arith.constant 0 : index
    %7 = vector.load %arg4[%6, %c0_6, %c0_7, %c0_8] : memref<1x1x256x128xbf16, #tpu.memory_space<vmem>>, vector<1x1x256x128xbf16>
    %8 = vector.shape_cast %7 : vector<1x1x256x128xbf16> to vector<256x128xbf16>
    %cst = arith.constant dense<0.000000e+00> : vector<4x128xf32>
    %9 = tpu.matmul %5, %8, %cst {dimension_numbers = #tpu.dot_dimension_numbers<[1], [0], [0], [1], [0, 0, 1, 1], [], []>} : vector<4x256xbf16>, vector<256x128xbf16>, vector<4x128xf32> -> vector<4x128xf32>
    %10 = arith.addf %3, %9 : vector<4x128xf32>
    %c0_9 = arith.constant 0 : index
    %c0_10 = arith.constant 0 : index
    %11 = vector.load %arg7[%c0_9, %c0_10] : memref<4x128xf32, #tpu.memory_space<vmem>>, vector<4x128xf32>
    tpu.vector_store %arg7[%c0_9, %c0_10], %10 {strides = array<i32>} : memref<4x128xf32, #tpu.memory_space<vmem>>, vector<4x128xf32>,
    %c0_i32_11 = arith.constant 0 : i32
    %12 = arith.cmpi eq, %arg2, %c0_i32_11 : i32
    %13 = arith.extui %12 : i1 to i32
    %c0_i32_12 = arith.constant 0 : i32
    %14 = arith.cmpi ne, %13, %c0_i32_12 : i32
    scf.if %14 {
      %c0_13 = arith.constant 0 : index
      %c0_14 = arith.constant 0 : index
      %15 = vector.load %arg7[%c0_13, %c0_14] : memref<4x128xf32, #tpu.memory_space<vmem>>, vector<4x128xf32>
      %c0_15 = arith.constant 0 : index
      %c0_16 = arith.constant 0 : index
      %16 = vector.load %arg5[%c0_15, %c0_16] : memref<1x128xf32, #tpu.memory_space<vmem>>, vector<1x128xf32>
      %17 = vector.broadcast %16 : vector<1x128xf32> to vector<4x128xf32>
      %18 = arith.addf %15, %17 : vector<4x128xf32>
      %19 = arith.truncf %18 : vector<4x128xf32> to vector<4x128xbf16>
      %c0_17 = arith.constant 0 : index
      %c0_18 = arith.constant 0 : index
      %c0_19 = arith.constant 0 : index
      %c0_20 = arith.constant 0 : index
      %20 = vector.load %arg6[%c0_17, %c0_18, %c0_19, %c0_20] : memref<1x1x4x128xbf16, #tpu.memory_space<vmem>>, vector<1x1x4x128xbf16>
      %21 = vector.shape_cast %20 : vector<1x1x4x128xbf16> to vector<4x128xbf16>
      %22 = vector.shape_cast %19 : vector<4x128xbf16> to vector<1x1x4x128xbf16>
      tpu.vector_store %arg6[%c0_17, %c0_18, %c0_19, %c0_20], %22 {strides = array<i32>} : memref<1x1x4x128xbf16, #tpu.memory_space<vmem>>, vector<1x1x4x128xbf16>,
    } else {
    }
    return
  }
  func.func @transform_0(%arg0: i32, %arg1: i32, %arg2: i32) -> (i32, i32, i32, i32) {
    %0 = arith.addi %arg1, %arg2 : i32
    %c0_i32 = arith.constant 0 : i32
    %c0_i32_0 = arith.constant 0 : i32
    %c0_i32_1 = arith.constant 0 : i32
    return %arg0, %0, %c0_i32, %c0_i32_0 : i32, i32, i32, i32
  }
  func.func @transform_1(%arg0: i32, %arg1: i32, %arg2: i32) -> (i32, i32, i32, i32) {
    %c0_i32 = arith.constant 0 : i32
    %c0_i32_0 = arith.constant 0 : i32
    %c0_i32_1 = arith.constant 0 : i32
    %c0_i32_2 = arith.constant 0 : i32
    %c0_i32_3 = arith.constant 0 : i32
    return %c0_i32, %c0_i32_0, %c0_i32_1, %c0_i32_2 : i32, i32, i32, i32
  }
  func.func @transform_2(%arg0: i32, %arg1: i32, %arg2: i32) -> (i32, i32) {
    %c0_i32 = arith.constant 0 : i32
    %c0_i32_0 = arith.constant 0 : i32
    %c0_i32_1 = arith.constant 0 : i32
    return %c0_i32, %c0_i32_0 : i32, i32
  }
  func.func @transform_3(%arg0: i32, %arg1: i32, %arg2: i32) -> (i32, i32, i32, i32) {
    %c0_i32 = arith.constant 0 : i32
    %c0_i32_0 = arith.constant 0 : i32
    %c0_i32_1 = arith.constant 0 : i32
    return %arg0, %arg1, %c0_i32, %c0_i32_0 : i32, i32, i32, i32
  }
}

module attributes {stable_mosaic.version = 11 : i64} {
  func.func @kernel(%arg0: i32, %arg1: i32, %arg2: i32, %arg3: memref<1x1x9x128xbf16, #tpu.memory_space<vmem>>, %arg4: memref<2x2x128x64xbf16, #tpu.memory_space<vmem>>, %arg5: memref<1x64xf32, #tpu.memory_space<vmem>>, %arg6: memref<1x1x8x64xbf16, #tpu.memory_space<vmem>>, %arg7: memref<8x64xf32, #tpu.memory_space<vmem>>) attributes {dimension_semantics = [#tpu.dimension_semantics<parallel>, #tpu.dimension_semantics<parallel>, #tpu.dimension_semantics<arbitrary>], iteration_bounds = array<i64: 2, 8, 2>, scalar_prefetch = 0 : i64, scratch_operands = 1 : i64, tpu.core_type = #tpu.core_type<tc>, window_params = [{transform_indices = @transform_0, window_bounds = array<i64: 1, 1, 9, 128>}, {pipeline_mode = #tpu.pipeline_mode<synchronous>, transform_indices = @transform_1, window_bounds = array<i64: 2, 2, 128, 64>}, {pipeline_mode = #tpu.pipeline_mode<synchronous>, transform_indices = @transform_2, window_bounds = array<i64: 1, 64>}, {transform_indices = @transform_3, window_bounds = array<i64: 1, 1, 8, 64>}]} {
    %c0_i32 = arith.constant 0 : i32
    %0 = arith.cmpi eq, %arg2, %c0_i32 : i32
    %1 = arith.extui %0 : i1 to i32
    %c0_i32_0 = arith.constant 0 : i32
    %2 = arith.cmpi ne, %1, %c0_i32_0 : i32
    scf.if %2 {
      %cst_19 = arith.constant 0.000000e+00 : f32
      %22 = vector.broadcast %cst_19 : f32 to vector<8x64xf32>
      %c0_20 = arith.constant 0 : index
      %c0_21 = arith.constant 0 : index
      %23 = vector.load %arg7[%c0_20, %c0_21] : memref<8x64xf32, #tpu.memory_space<vmem>>, vector<8x64xf32>
      tpu.vector_store %arg7[%c0_20, %c0_21], %22 {strides = array<i32>} : memref<8x64xf32, #tpu.memory_space<vmem>>, vector<8x64xf32>,
    } else {
    }
    %c0 = arith.constant 0 : index
    %c0_1 = arith.constant 0 : index
    %3 = vector.load %arg7[%c0, %c0_1] : memref<8x64xf32, #tpu.memory_space<vmem>>, vector<8x64xf32>
    %c0_2 = arith.constant 0 : index
    %c0_3 = arith.constant 0 : index
    %c0_4 = arith.constant 0 : index
    %c0_5 = arith.constant 0 : index
    %4 = vector.load %arg3[%c0_2, %c0_3, %c0_4, %c0_5] : memref<1x1x9x128xbf16, #tpu.memory_space<vmem>>, vector<1x1x8x128xbf16>
    %5 = vector.shape_cast %4 : vector<1x1x8x128xbf16> to vector<8x128xbf16>
    %6 = arith.index_cast %arg2 : i32 to index
    %c0_6 = arith.constant 0 : index
    %c0_7 = arith.constant 0 : index
    %c0_8 = arith.constant 0 : index
    %7 = vector.load %arg4[%6, %c0_6, %c0_7, %c0_8] : memref<2x2x128x64xbf16, #tpu.memory_space<vmem>>, vector<1x1x128x64xbf16>
    %8 = vector.shape_cast %7 : vector<1x1x128x64xbf16> to vector<128x64xbf16>
    %cst = arith.constant dense<0.000000e+00> : vector<8x64xf32>
    %9 = tpu.matmul %5, %8, %cst {dimension_numbers = #tpu.dot_dimension_numbers<[1], [0], [0], [1], [0, 0, 1, 1], [], []>} : vector<8x128xbf16>, vector<128x64xbf16>, vector<8x64xf32> -> vector<8x64xf32>
    %10 = arith.addf %3, %9 : vector<8x64xf32>
    %c0_9 = arith.constant 0 : index
    %c0_10 = arith.constant 0 : index
    %c1 = arith.constant 1 : index
    %c0_11 = arith.constant 0 : index
    %11 = vector.load %arg3[%c0_9, %c0_10, %c1, %c0_11] : memref<1x1x9x128xbf16, #tpu.memory_space<vmem>>, vector<1x1x8x128xbf16>
    %12 = vector.shape_cast %11 : vector<1x1x8x128xbf16> to vector<8x128xbf16>
    %13 = arith.index_cast %arg2 : i32 to index
    %c1_12 = arith.constant 1 : index
    %c0_13 = arith.constant 0 : index
    %c0_14 = arith.constant 0 : index
    %14 = vector.load %arg4[%13, %c1_12, %c0_13, %c0_14] : memref<2x2x128x64xbf16, #tpu.memory_space<vmem>>, vector<1x1x128x64xbf16>
    %15 = vector.shape_cast %14 : vector<1x1x128x64xbf16> to vector<128x64xbf16>
    %cst_15 = arith.constant dense<0.000000e+00> : vector<8x64xf32>
    %16 = tpu.matmul %12, %15, %cst_15 {dimension_numbers = #tpu.dot_dimension_numbers<[1], [0], [0], [1], [0, 0, 1, 1], [], []>} : vector<8x128xbf16>, vector<128x64xbf16>, vector<8x64xf32> -> vector<8x64xf32>
    %17 = arith.addf %10, %16 : vector<8x64xf32>
    %c0_16 = arith.constant 0 : index
    %c0_17 = arith.constant 0 : index
    %18 = vector.load %arg7[%c0_16, %c0_17] : memref<8x64xf32, #tpu.memory_space<vmem>>, vector<8x64xf32>
    tpu.vector_store %arg7[%c0_16, %c0_17], %17 {strides = array<i32>} : memref<8x64xf32, #tpu.memory_space<vmem>>, vector<8x64xf32>,
    %c1_i32 = arith.constant 1 : i32
    %19 = arith.cmpi eq, %arg2, %c1_i32 : i32
    %20 = arith.extui %19 : i1 to i32
    %c0_i32_18 = arith.constant 0 : i32
    %21 = arith.cmpi ne, %20, %c0_i32_18 : i32
    scf.if %21 {
      %c0_19 = arith.constant 0 : index
      %c0_20 = arith.constant 0 : index
      %22 = vector.load %arg7[%c0_19, %c0_20] : memref<8x64xf32, #tpu.memory_space<vmem>>, vector<8x64xf32>
      %c0_21 = arith.constant 0 : index
      %c0_22 = arith.constant 0 : index
      %23 = vector.load %arg5[%c0_21, %c0_22] : memref<1x64xf32, #tpu.memory_space<vmem>>, vector<1x64xf32>
      %24 = vector.broadcast %23 : vector<1x64xf32> to vector<8x64xf32>
      %25 = arith.addf %22, %24 : vector<8x64xf32>
      %26 = arith.truncf %25 : vector<8x64xf32> to vector<8x64xbf16>
      %c0_23 = arith.constant 0 : index
      %c0_24 = arith.constant 0 : index
      %c0_25 = arith.constant 0 : index
      %c0_26 = arith.constant 0 : index
      %27 = vector.load %arg6[%c0_23, %c0_24, %c0_25, %c0_26] : memref<1x1x8x64xbf16, #tpu.memory_space<vmem>>, vector<1x1x8x64xbf16>
      %28 = vector.shape_cast %27 : vector<1x1x8x64xbf16> to vector<8x64xbf16>
      %29 = vector.shape_cast %26 : vector<8x64xbf16> to vector<1x1x8x64xbf16>
      tpu.vector_store %arg6[%c0_23, %c0_24, %c0_25, %c0_26], %29 {strides = array<i32>} : memref<1x1x8x64xbf16, #tpu.memory_space<vmem>>, vector<1x1x8x64xbf16>,
    } else {
    }
    return
  }
  func.func @transform_0(%arg0: i32, %arg1: i32, %arg2: i32) -> (i32, i32, i32, i32) {
    %0 = arith.addi %arg1, %arg2 : i32
    %c0_i32 = arith.constant 0 : i32
    %c0_i32_0 = arith.constant 0 : i32
    %c0_i32_1 = arith.constant 0 : i32
    return %arg0, %0, %c0_i32, %c0_i32_0 : i32, i32, i32, i32
  }
  func.func @transform_1(%arg0: i32, %arg1: i32, %arg2: i32) -> (i32, i32, i32, i32) {
    %c0_i32 = arith.constant 0 : i32
    %c0_i32_0 = arith.constant 0 : i32
    %c0_i32_1 = arith.constant 0 : i32
    %c0_i32_2 = arith.constant 0 : i32
    %c0_i32_3 = arith.constant 0 : i32
    return %c0_i32, %c0_i32_0, %c0_i32_1, %c0_i32_2 : i32, i32, i32, i32
  }
  func.func @transform_2(%arg0: i32, %arg1: i32, %arg2: i32) -> (i32, i32) {
    %c0_i32 = arith.constant 0 : i32
    %c0_i32_0 = arith.constant 0 : i32
    %c0_i32_1 = arith.constant 0 : i32
    return %c0_i32, %c0_i32_0 : i32, i32
  }
  func.func @transform_3(%arg0: i32, %arg1: i32, %arg2: i32) -> (i32, i32, i32, i32) {
    %c0_i32 = arith.constant 0 : i32
    %c0_i32_0 = arith.constant 0 : i32
    %c0_i32_1 = arith.constant 0 : i32
    return %arg0, %arg1, %c0_i32, %c0_i32_0 : i32, i32, i32, i32
  }
}

module attributes {stable_mosaic.version = 11 : i64} {
  func.func @kernel(%arg0: i32, %arg1: i32, %arg2: i32, %arg3: memref<1x1x9x128xbf16, #tpu.memory_space<vmem>>, %arg4: memref<1x2x128x64xbf16, #tpu.memory_space<vmem>>, %arg5: memref<1x64xf32, #tpu.memory_space<vmem>>, %arg6: memref<1x1x8x64xbf16, #tpu.memory_space<vmem>>, %arg7: memref<8x64xf32, #tpu.memory_space<vmem>>) attributes {dimension_semantics = [#tpu.dimension_semantics<parallel>, #tpu.dimension_semantics<parallel>, #tpu.dimension_semantics<arbitrary>], iteration_bounds = array<i64: 2, 8, 1>, scalar_prefetch = 0 : i64, scratch_operands = 1 : i64, tpu.core_type = #tpu.core_type<tc>, window_params = [{transform_indices = @transform_0, window_bounds = array<i64: 1, 1, 9, 128>}, {pipeline_mode = #tpu.pipeline_mode<synchronous>, transform_indices = @transform_1, window_bounds = array<i64: 1, 2, 128, 64>}, {pipeline_mode = #tpu.pipeline_mode<synchronous>, transform_indices = @transform_2, window_bounds = array<i64: 1, 64>}, {transform_indices = @transform_3, window_bounds = array<i64: 1, 1, 8, 64>}]} {
    %c0_i32 = arith.constant 0 : i32
    %0 = arith.cmpi eq, %arg2, %c0_i32 : i32
    %1 = arith.extui %0 : i1 to i32
    %c0_i32_0 = arith.constant 0 : i32
    %2 = arith.cmpi ne, %1, %c0_i32_0 : i32
    scf.if %2 {
      %cst_20 = arith.constant 0.000000e+00 : f32
      %22 = vector.broadcast %cst_20 : f32 to vector<8x64xf32>
      %c0_21 = arith.constant 0 : index
      %c0_22 = arith.constant 0 : index
      %23 = vector.load %arg7[%c0_21, %c0_22] : memref<8x64xf32, #tpu.memory_space<vmem>>, vector<8x64xf32>
      tpu.vector_store %arg7[%c0_21, %c0_22], %22 {strides = array<i32>} : memref<8x64xf32, #tpu.memory_space<vmem>>, vector<8x64xf32>,
    } else {
    }
    %c0 = arith.constant 0 : index
    %c0_1 = arith.constant 0 : index
    %3 = vector.load %arg7[%c0, %c0_1] : memref<8x64xf32, #tpu.memory_space<vmem>>, vector<8x64xf32>
    %c0_2 = arith.constant 0 : index
    %c0_3 = arith.constant 0 : index
    %c0_4 = arith.constant 0 : index
    %c0_5 = arith.constant 0 : index
    %4 = vector.load %arg3[%c0_2, %c0_3, %c0_4, %c0_5] : memref<1x1x9x128xbf16, #tpu.memory_space<vmem>>, vector<1x1x8x128xbf16>
    %5 = vector.shape_cast %4 : vector<1x1x8x128xbf16> to vector<8x128xbf16>
    %6 = arith.index_cast %arg2 : i32 to index
    %c0_6 = arith.constant 0 : index
    %c0_7 = arith.constant 0 : index
    %c0_8 = arith.constant 0 : index
    %7 = vector.load %arg4[%6, %c0_6, %c0_7, %c0_8] : memref<1x2x128x64xbf16, #tpu.memory_space<vmem>>, vector<1x1x128x64xbf16>
    %8 = vector.shape_cast %7 : vector<1x1x128x64xbf16> to vector<128x64xbf16>
    %cst = arith.constant dense<0.000000e+00> : vector<8x64xf32>
    %9 = tpu.matmul %5, %8, %cst {dimension_numbers = #tpu.dot_dimension_numbers<[1], [0], [0], [1], [0, 0, 1, 1], [], []>} : vector<8x128xbf16>, vector<128x64xbf16>, vector<8x64xf32> -> vector<8x64xf32>
    %10 = arith.addf %3, %9 : vector<8x64xf32>
    %c0_9 = arith.constant 0 : index
    %c0_10 = arith.constant 0 : index
    %c1 = arith.constant 1 : index
    %c0_11 = arith.constant 0 : index
    %11 = vector.load %arg3[%c0_9, %c0_10, %c1, %c0_11] : memref<1x1x9x128xbf16, #tpu.memory_space<vmem>>, vector<1x1x8x128xbf16>
    %12 = vector.shape_cast %11 : vector<1x1x8x128xbf16> to vector<8x128xbf16>
    %13 = arith.index_cast %arg2 : i32 to index
    %c1_12 = arith.constant 1 : index
    %c0_13 = arith.constant 0 : index
    %c0_14 = arith.constant 0 : index
    %14 = vector.load %arg4[%13, %c1_12, %c0_13, %c0_14] : memref<1x2x128x64xbf16, #tpu.memory_space<vmem>>, vector<1x1x128x64xbf16>
    %15 = vector.shape_cast %14 : vector<1x1x128x64xbf16> to vector<128x64xbf16>
    %cst_15 = arith.constant dense<0.000000e+00> : vector<8x64xf32>
    %16 = tpu.matmul %12, %15, %cst_15 {dimension_numbers = #tpu.dot_dimension_numbers<[1], [0], [0], [1], [0, 0, 1, 1], [], []>} : vector<8x128xbf16>, vector<128x64xbf16>, vector<8x64xf32> -> vector<8x64xf32>
    %17 = arith.addf %10, %16 : vector<8x64xf32>
    %c0_16 = arith.constant 0 : index
    %c0_17 = arith.constant 0 : index
    %18 = vector.load %arg7[%c0_16, %c0_17] : memref<8x64xf32, #tpu.memory_space<vmem>>, vector<8x64xf32>
    tpu.vector_store %arg7[%c0_16, %c0_17], %17 {strides = array<i32>} : memref<8x64xf32, #tpu.memory_space<vmem>>, vector<8x64xf32>,
    %c0_i32_18 = arith.constant 0 : i32
    %19 = arith.cmpi eq, %arg2, %c0_i32_18 : i32
    %20 = arith.extui %19 : i1 to i32
    %c0_i32_19 = arith.constant 0 : i32
    %21 = arith.cmpi ne, %20, %c0_i32_19 : i32
    scf.if %21 {
      %c0_20 = arith.constant 0 : index
      %c0_21 = arith.constant 0 : index
      %22 = vector.load %arg7[%c0_20, %c0_21] : memref<8x64xf32, #tpu.memory_space<vmem>>, vector<8x64xf32>
      %c0_22 = arith.constant 0 : index
      %c0_23 = arith.constant 0 : index
      %23 = vector.load %arg5[%c0_22, %c0_23] : memref<1x64xf32, #tpu.memory_space<vmem>>, vector<1x64xf32>
      %24 = vector.broadcast %23 : vector<1x64xf32> to vector<8x64xf32>
      %25 = arith.addf %22, %24 : vector<8x64xf32>
      %26 = arith.truncf %25 : vector<8x64xf32> to vector<8x64xbf16>
      %c0_24 = arith.constant 0 : index
      %c0_25 = arith.constant 0 : index
      %c0_26 = arith.constant 0 : index
      %c0_27 = arith.constant 0 : index
      %27 = vector.load %arg6[%c0_24, %c0_25, %c0_26, %c0_27] : memref<1x1x8x64xbf16, #tpu.memory_space<vmem>>, vector<1x1x8x64xbf16>
      %28 = vector.shape_cast %27 : vector<1x1x8x64xbf16> to vector<8x64xbf16>
      %29 = vector.shape_cast %26 : vector<8x64xbf16> to vector<1x1x8x64xbf16>
      tpu.vector_store %arg6[%c0_24, %c0_25, %c0_26, %c0_27], %29 {strides = array<i32>} : memref<1x1x8x64xbf16, #tpu.memory_space<vmem>>, vector<1x1x8x64xbf16>,
    } else {
    }
    return
  }
  func.func @transform_0(%arg0: i32, %arg1: i32, %arg2: i32) -> (i32, i32, i32, i32) {
    %0 = arith.addi %arg1, %arg2 : i32
    %c0_i32 = arith.constant 0 : i32
    %c0_i32_0 = arith.constant 0 : i32
    %c0_i32_1 = arith.constant 0 : i32
    return %arg0, %0, %c0_i32, %c0_i32_0 : i32, i32, i32, i32
  }
  func.func @transform_1(%arg0: i32, %arg1: i32, %arg2: i32) -> (i32, i32, i32, i32) {
    %c0_i32 = arith.constant 0 : i32
    %c0_i32_0 = arith.constant 0 : i32
    %c0_i32_1 = arith.constant 0 : i32
    %c0_i32_2 = arith.constant 0 : i32
    %c0_i32_3 = arith.constant 0 : i32
    return %c0_i32, %c0_i32_0, %c0_i32_1, %c0_i32_2 : i32, i32, i32, i32
  }
  func.func @transform_2(%arg0: i32, %arg1: i32, %arg2: i32) -> (i32, i32) {
    %c0_i32 = arith.constant 0 : i32
    %c0_i32_0 = arith.constant 0 : i32
    %c0_i32_1 = arith.constant 0 : i32
    return %c0_i32, %c0_i32_0 : i32, i32
  }
  func.func @transform_3(%arg0: i32, %arg1: i32, %arg2: i32) -> (i32, i32, i32, i32) {
    %c0_i32 = arith.constant 0 : i32
    %c0_i32_0 = arith.constant 0 : i32
    %c0_i32_1 = arith.constant 0 : i32
    return %arg0, %arg1, %c0_i32, %c0_i32_0 : i32, i32, i32, i32
  }
}

module attributes {stable_mosaic.version = 11 : i64} {
  func.func @kernel(%arg0: i32, %arg1: i32, %arg2: i32, %arg3: memref<1x1x8x128xbf16, #tpu.memory_space<vmem>>, %arg4: memref<2x1x128x64xbf16, #tpu.memory_space<vmem>>, %arg5: memref<1x64xf32, #tpu.memory_space<vmem>>, %arg6: memref<1x1x8x64xbf16, #tpu.memory_space<vmem>>, %arg7: memref<8x64xf32, #tpu.memory_space<vmem>>) attributes {dimension_semantics = [#tpu.dimension_semantics<parallel>, #tpu.dimension_semantics<parallel>, #tpu.dimension_semantics<arbitrary>], iteration_bounds = array<i64: 2, 8, 2>, scalar_prefetch = 0 : i64, scratch_operands = 1 : i64, tpu.core_type = #tpu.core_type<tc>, window_params = [{transform_indices = @transform_0, window_bounds = array<i64: 1, 1, 8, 128>}, {pipeline_mode = #tpu.pipeline_mode<synchronous>, transform_indices = @transform_1, window_bounds = array<i64: 2, 1, 128, 64>}, {pipeline_mode = #tpu.pipeline_mode<synchronous>, transform_indices = @transform_2, window_bounds = array<i64: 1, 64>}, {transform_indices = @transform_3, window_bounds = array<i64: 1, 1, 8, 64>}]} {
    %c0_i32 = arith.constant 0 : i32
    %0 = arith.cmpi eq, %arg2, %c0_i32 : i32
    %1 = arith.extui %0 : i1 to i32
    %c0_i32_0 = arith.constant 0 : i32
    %2 = arith.cmpi ne, %1, %c0_i32_0 : i32
    scf.if %2 {
      %cst_12 = arith.constant 0.000000e+00 : f32
      %15 = vector.broadcast %cst_12 : f32 to vector<8x64xf32>
      %c0_13 = arith.constant 0 : index
      %c0_14 = arith.constant 0 : index
      %16 = vector.load %arg7[%c0_13, %c0_14] : memref<8x64xf32, #tpu.memory_space<vmem>>, vector<8x64xf32>
      tpu.vector_store %arg7[%c0_13, %c0_14], %15 {strides = array<i32>} : memref<8x64xf32, #tpu.memory_space<vmem>>, vector<8x64xf32>,
    } else {
    }
    %c0 = arith.constant 0 : index
    %c0_1 = arith.constant 0 : index
    %3 = vector.load %arg7[%c0, %c0_1] : memref<8x64xf32, #tpu.memory_space<vmem>>, vector<8x64xf32>
    %c0_2 = arith.constant 0 : index
    %c0_3 = arith.constant 0 : index
    %c0_4 = arith.constant 0 : index
    %c0_5 = arith.constant 0 : index
    %4 = vector.load %arg3[%c0_2, %c0_3, %c0_4, %c0_5] : memref<1x1x8x128xbf16, #tpu.memory_space<vmem>>, vector<1x1x8x128xbf16>
    %5 = vector.shape_cast %4 : vector<1x1x8x128xbf16> to vector<8x128xbf16>
    %6 = arith.index_cast %arg2 : i32 to index
    %c0_6 = arith.constant 0 : index
    %c0_7 = arith.constant 0 : index
    %c0_8 = arith.constant 0 : index
    %7 = vector.load %arg4[%6, %c0_6, %c0_7, %c0_8] : memref<2x1x128x64xbf16, #tpu.memory_space<vmem>>, vector<1x1x128x64xbf16>
    %8 = vector.shape_cast %7 : vector<1x1x128x64xbf16> to vector<128x64xbf16>
    %cst = arith.constant dense<0.000000e+00> : vector<8x64xf32>
    %9 = tpu.matmul %5, %8, %cst {dimension_numbers = #tpu.dot_dimension_numbers<[1], [0], [0], [1], [0, 0, 1, 1], [], []>} : vector<8x128xbf16>, vector<128x64xbf16>, vector<8x64xf32> -> vector<8x64xf32>
    %10 = arith.addf %3, %9 : vector<8x64xf32>
    %c0_9 = arith.constant 0 : index
    %c0_10 = arith.constant 0 : index
    %11 = vector.load %arg7[%c0_9, %c0_10] : memref<8x64xf32, #tpu.memory_space<vmem>>, vector<8x64xf32>
    tpu.vector_store %arg7[%c0_9, %c0_10], %10 {strides = array<i32>} : memref<8x64xf32, #tpu.memory_space<vmem>>, vector<8x64xf32>,
    %c1_i32 = arith.constant 1 : i32
    %12 = arith.cmpi eq, %arg2, %c1_i32 : i32
    %13 = arith.extui %12 : i1 to i32
    %c0_i32_11 = arith.constant 0 : i32
    %14 = arith.cmpi ne, %13, %c0_i32_11 : i32
    scf.if %14 {
      %c0_12 = arith.constant 0 : index
      %c0_13 = arith.constant 0 : index
      %15 = vector.load %arg7[%c0_12, %c0_13] : memref<8x64xf32, #tpu.memory_space<vmem>>, vector<8x64xf32>
      %c0_14 = arith.constant 0 : index
      %c0_15 = arith.constant 0 : index
      %16 = vector.load %arg5[%c0_14, %c0_15] : memref<1x64xf32, #tpu.memory_space<vmem>>, vector<1x64xf32>
      %17 = vector.broadcast %16 : vector<1x64xf32> to vector<8x64xf32>
      %18 = arith.addf %15, %17 : vector<8x64xf32>
      %19 = arith.truncf %18 : vector<8x64xf32> to vector<8x64xbf16>
      %c0_16 = arith.constant 0 : index
      %c0_17 = arith.constant 0 : index
      %c0_18 = arith.constant 0 : index
      %c0_19 = arith.constant 0 : index
      %20 = vector.load %arg6[%c0_16, %c0_17, %c0_18, %c0_19] : memref<1x1x8x64xbf16, #tpu.memory_space<vmem>>, vector<1x1x8x64xbf16>
      %21 = vector.shape_cast %20 : vector<1x1x8x64xbf16> to vector<8x64xbf16>
      %22 = vector.shape_cast %19 : vector<8x64xbf16> to vector<1x1x8x64xbf16>
      tpu.vector_store %arg6[%c0_16, %c0_17, %c0_18, %c0_19], %22 {strides = array<i32>} : memref<1x1x8x64xbf16, #tpu.memory_space<vmem>>, vector<1x1x8x64xbf16>,
    } else {
    }
    return
  }
  func.func @transform_0(%arg0: i32, %arg1: i32, %arg2: i32) -> (i32, i32, i32, i32) {
    %0 = arith.addi %arg1, %arg2 : i32
    %c0_i32 = arith.constant 0 : i32
    %c0_i32_0 = arith.constant 0 : i32
    %c0_i32_1 = arith.constant 0 : i32
    return %arg0, %0, %c0_i32, %c0_i32_0 : i32, i32, i32, i32
  }
  func.func @transform_1(%arg0: i32, %arg1: i32, %arg2: i32) -> (i32, i32, i32, i32) {
    %c0_i32 = arith.constant 0 : i32
    %c0_i32_0 = arith.constant 0 : i32
    %c0_i32_1 = arith.constant 0 : i32
    %c0_i32_2 = arith.constant 0 : i32
    %c0_i32_3 = arith.constant 0 : i32
    return %c0_i32, %c0_i32_0, %c0_i32_1, %c0_i32_2 : i32, i32, i32, i32
  }
  func.func @transform_2(%arg0: i32, %arg1: i32, %arg2: i32) -> (i32, i32) {
    %c0_i32 = arith.constant 0 : i32
    %c0_i32_0 = arith.constant 0 : i32
    %c0_i32_1 = arith.constant 0 : i32
    return %c0_i32, %c0_i32_0 : i32, i32
  }
  func.func @transform_3(%arg0: i32, %arg1: i32, %arg2: i32) -> (i32, i32, i32, i32) {
    %c0_i32 = arith.constant 0 : i32
    %c0_i32_0 = arith.constant 0 : i32
    %c0_i32_1 = arith.constant 0 : i32
    return %arg0, %arg1, %c0_i32, %c0_i32_0 : i32, i32, i32, i32
  }
}

module attributes {stable_mosaic.version = 11 : i64} {
  func.func @kernel(%arg0: i32, %arg1: i32, %arg2: i32, %arg3: memref<1x1x8x128xbf16, #tpu.memory_space<vmem>>, %arg4: memref<1x1x128x64xbf16, #tpu.memory_space<vmem>>, %arg5: memref<1x64xf32, #tpu.memory_space<vmem>>, %arg6: memref<1x1x8x64xbf16, #tpu.memory_space<vmem>>, %arg7: memref<8x64xf32, #tpu.memory_space<vmem>>) attributes {dimension_semantics = [#tpu.dimension_semantics<parallel>, #tpu.dimension_semantics<parallel>, #tpu.dimension_semantics<arbitrary>], iteration_bounds = array<i64: 2, 8, 1>, scalar_prefetch = 0 : i64, scratch_operands = 1 : i64, tpu.core_type = #tpu.core_type<tc>, window_params = [{transform_indices = @transform_0, window_bounds = array<i64: 1, 1, 8, 128>}, {pipeline_mode = #tpu.pipeline_mode<synchronous>, transform_indices = @transform_1, window_bounds = array<i64: 1, 1, 128, 64>}, {pipeline_mode = #tpu.pipeline_mode<synchronous>, transform_indices = @transform_2, window_bounds = array<i64: 1, 64>}, {transform_indices = @transform_3, window_bounds = array<i64: 1, 1, 8, 64>}]} {
    %c0_i32 = arith.constant 0 : i32
    %0 = arith.cmpi eq, %arg2, %c0_i32 : i32
    %1 = arith.extui %0 : i1 to i32
    %c0_i32_0 = arith.constant 0 : i32
    %2 = arith.cmpi ne, %1, %c0_i32_0 : i32
    scf.if %2 {
      %cst_13 = arith.constant 0.000000e+00 : f32
      %15 = vector.broadcast %cst_13 : f32 to vector<8x64xf32>
      %c0_14 = arith.constant 0 : index
      %c0_15 = arith.constant 0 : index
      %16 = vector.load %arg7[%c0_14, %c0_15] : memref<8x64xf32, #tpu.memory_space<vmem>>, vector<8x64xf32>
      tpu.vector_store %arg7[%c0_14, %c0_15], %15 {strides = array<i32>} : memref<8x64xf32, #tpu.memory_space<vmem>>, vector<8x64xf32>,
    } else {
    }
    %c0 = arith.constant 0 : index
    %c0_1 = arith.constant 0 : index
    %3 = vector.load %arg7[%c0, %c0_1] : memref<8x64xf32, #tpu.memory_space<vmem>>, vector<8x64xf32>
    %c0_2 = arith.constant 0 : index
    %c0_3 = arith.constant 0 : index
    %c0_4 = arith.constant 0 : index
    %c0_5 = arith.constant 0 : index
    %4 = vector.load %arg3[%c0_2, %c0_3, %c0_4, %c0_5] : memref<1x1x8x128xbf16, #tpu.memory_space<vmem>>, vector<1x1x8x128xbf16>
    %5 = vector.shape_cast %4 : vector<1x1x8x128xbf16> to vector<8x128xbf16>
    %6 = arith.index_cast %arg2 : i32 to index
    %c0_6 = arith.constant 0 : index
    %c0_7 = arith.constant 0 : index
    %c0_8 = arith.constant 0 : index
    %7 = vector.load %arg4[%6, %c0_6, %c0_7, %c0_8] : memref<1x1x128x64xbf16, #tpu.memory_space<vmem>>, vector<1x1x128x64xbf16>
    %8 = vector.shape_cast %7 : vector<1x1x128x64xbf16> to vector<128x64xbf16>
    %cst = arith.constant dense<0.000000e+00> : vector<8x64xf32>
    %9 = tpu.matmul %5, %8, %cst {dimension_numbers = #tpu.dot_dimension_numbers<[1], [0], [0], [1], [0, 0, 1, 1], [], []>} : vector<8x128xbf16>, vector<128x64xbf16>, vector<8x64xf32> -> vector<8x64xf32>
    %10 = arith.addf %3, %9 : vector<8x64xf32>
    %c0_9 = arith.constant 0 : index
    %c0_10 = arith.constant 0 : index
    %11 = vector.load %arg7[%c0_9, %c0_10] : memref<8x64xf32, #tpu.memory_space<vmem>>, vector<8x64xf32>
    tpu.vector_store %arg7[%c0_9, %c0_10], %10 {strides = array<i32>} : memref<8x64xf32, #tpu.memory_space<vmem>>, vector<8x64xf32>,
    %c0_i32_11 = arith.constant 0 : i32
    %12 = arith.cmpi eq, %arg2, %c0_i32_11 : i32
    %13 = arith.extui %12 : i1 to i32
    %c0_i32_12 = arith.constant 0 : i32
    %14 = arith.cmpi ne, %13, %c0_i32_12 : i32
    scf.if %14 {
      %c0_13 = arith.constant 0 : index
      %c0_14 = arith.constant 0 : index
      %15 = vector.load %arg7[%c0_13, %c0_14] : memref<8x64xf32, #tpu.memory_space<vmem>>, vector<8x64xf32>
      %c0_15 = arith.constant 0 : index
      %c0_16 = arith.constant 0 : index
      %16 = vector.load %arg5[%c0_15, %c0_16] : memref<1x64xf32, #tpu.memory_space<vmem>>, vector<1x64xf32>
      %17 = vector.broadcast %16 : vector<1x64xf32> to vector<8x64xf32>
      %18 = arith.addf %15, %17 : vector<8x64xf32>
      %19 = arith.truncf %18 : vector<8x64xf32> to vector<8x64xbf16>
      %c0_17 = arith.constant 0 : index
      %c0_18 = arith.constant 0 : index
      %c0_19 = arith.constant 0 : index
      %c0_20 = arith.constant 0 : index
      %20 = vector.load %arg6[%c0_17, %c0_18, %c0_19, %c0_20] : memref<1x1x8x64xbf16, #tpu.memory_space<vmem>>, vector<1x1x8x64xbf16>
      %21 = vector.shape_cast %20 : vector<1x1x8x64xbf16> to vector<8x64xbf16>
      %22 = vector.shape_cast %19 : vector<8x64xbf16> to vector<1x1x8x64xbf16>
      tpu.vector_store %arg6[%c0_17, %c0_18, %c0_19, %c0_20], %22 {strides = array<i32>} : memref<1x1x8x64xbf16, #tpu.memory_space<vmem>>, vector<1x1x8x64xbf16>,
    } else {
    }
    return
  }
  func.func @transform_0(%arg0: i32, %arg1: i32, %arg2: i32) -> (i32, i32, i32, i32) {
    %0 = arith.addi %arg1, %arg2 : i32
    %c0_i32 = arith.constant 0 : i32
    %c0_i32_0 = arith.constant 0 : i32
    %c0_i32_1 = arith.constant 0 : i32
    return %arg0, %0, %c0_i32, %c0_i32_0 : i32, i32, i32, i32
  }
  func.func @transform_1(%arg0: i32, %arg1: i32, %arg2: i32) -> (i32, i32, i32, i32) {
    %c0_i32 = arith.constant 0 : i32
    %c0_i32_0 = arith.constant 0 : i32
    %c0_i32_1 = arith.constant 0 : i32
    %c0_i32_2 = arith.constant 0 : i32
    %c0_i32_3 = arith.constant 0 : i32
    return %c0_i32, %c0_i32_0, %c0_i32_1, %c0_i32_2 : i32, i32, i32, i32
  }
  func.func @transform_2(%arg0: i32, %arg1: i32, %arg2: i32) -> (i32, i32) {
    %c0_i32 = arith.constant 0 : i32
    %c0_i32_0 = arith.constant 0 : i32
    %c0_i32_1 = arith.constant 0 : i32
    return %c0_i32, %c0_i32_0 : i32, i32
  }
  func.func @transform_3(%arg0: i32, %arg1: i32, %arg2: i32) -> (i32, i32, i32, i32) {
    %c0_i32 = arith.constant 0 : i32
    %c0_i32_0 = arith.constant 0 : i32
    %c0_i32_1 = arith.constant 0 : i32
    return %arg0, %arg1, %c0_i32, %c0_i32_0 : i32, i32, i32, i32
  }
}

module attributes {stable_mosaic.version = 11 : i64} {
  func.func @kernel(%arg0: i32, %arg1: i32, %arg2: i32, %arg3: memref<1x1x22x64xbf16, #tpu.memory_space<vmem>>, %arg4: memref<7x7x64x128xbf16, #tpu.memory_space<vmem>>, %arg5: memref<1x128xf32, #tpu.memory_space<vmem>>, %arg6: memref<1x1x16x128xbf16, #tpu.memory_space<vmem>>, %arg7: memref<16x128xf32, #tpu.memory_space<vmem>>) attributes {dimension_semantics = [#tpu.dimension_semantics<parallel>, #tpu.dimension_semantics<parallel>, #tpu.dimension_semantics<arbitrary>], iteration_bounds = array<i64: 2, 16, 7>, scalar_prefetch = 0 : i64, scratch_operands = 1 : i64, tpu.core_type = #tpu.core_type<tc>, window_params = [{transform_indices = @transform_0, window_bounds = array<i64: 1, 1, 22, 64>}, {pipeline_mode = #tpu.pipeline_mode<synchronous>, transform_indices = @transform_1, window_bounds = array<i64: 7, 7, 64, 128>}, {pipeline_mode = #tpu.pipeline_mode<synchronous>, transform_indices = @transform_2, window_bounds = array<i64: 1, 128>}, {transform_indices = @transform_3, window_bounds = array<i64: 1, 1, 16, 128>}]} {
    %c0_i32 = arith.constant 0 : i32
    %0 = arith.cmpi eq, %arg2, %c0_i32 : i32
    %1 = arith.extui %0 : i1 to i32
    %c0_i32_0 = arith.constant 0 : i32
    %2 = arith.cmpi ne, %1, %c0_i32_0 : i32
    scf.if %2 {
      %cst_54 = arith.constant 0.000000e+00 : f32
      %57 = vector.broadcast %cst_54 : f32 to vector<16x128xf32>
      %c0_55 = arith.constant 0 : index
      %c0_56 = arith.constant 0 : index
      %58 = vector.load %arg7[%c0_55, %c0_56] : memref<16x128xf32, #tpu.memory_space<vmem>>, vector<16x128xf32>
      tpu.vector_store %arg7[%c0_55, %c0_56], %57 {strides = array<i32>} : memref<16x128xf32, #tpu.memory_space<vmem>>, vector<16x128xf32>,
    } else {
    }
    %c0 = arith.constant 0 : index
    %c0_1 = arith.constant 0 : index
    %3 = vector.load %arg7[%c0, %c0_1] : memref<16x128xf32, #tpu.memory_space<vmem>>, vector<16x128xf32>
    %c0_2 = arith.constant 0 : index
    %c0_3 = arith.constant 0 : index
    %c0_4 = arith.constant 0 : index
    %c0_5 = arith.constant 0 : index
    %4 = vector.load %arg3[%c0_2, %c0_3, %c0_4, %c0_5] : memref<1x1x22x64xbf16, #tpu.memory_space<vmem>>, vector<1x1x16x64xbf16>
    %5 = vector.shape_cast %4 : vector<1x1x16x64xbf16> to vector<16x64xbf16>
    %6 = arith.index_cast %arg2 : i32 to index
    %c0_6 = arith.constant 0 : index
    %c0_7 = arith.constant 0 : index
    %c0_8 = arith.constant 0 : index
    %7 = vector.load %arg4[%6, %c0_6, %c0_7, %c0_8] : memref<7x7x64x128xbf16, #tpu.memory_space<vmem>>, vector<1x1x64x128xbf16>
    %8 = vector.shape_cast %7 : vector<1x1x64x128xbf16> to vector<64x128xbf16>
    %cst = arith.constant dense<0.000000e+00> : vector<16x128xf32>
    %9 = tpu.matmul %5, %8, %cst {dimension_numbers = #tpu.dot_dimension_numbers<[1], [0], [0], [1], [0, 0, 1, 1], [], []>} : vector<16x64xbf16>, vector<64x128xbf16>, vector<16x128xf32> -> vector<16x128xf32>
    %10 = arith.addf %3, %9 : vector<16x128xf32>
    %c0_9 = arith.constant 0 : index
    %c0_10 = arith.constant 0 : index
    %c1 = arith.constant 1 : index
    %c0_11 = arith.constant 0 : index
    %11 = vector.load %arg3[%c0_9, %c0_10, %c1, %c0_11] : memref<1x1x22x64xbf16, #tpu.memory_space<vmem>>, vector<1x1x16x64xbf16>
    %12 = vector.shape_cast %11 : vector<1x1x16x64xbf16> to vector<16x64xbf16>
    %13 = arith.index_cast %arg2 : i32 to index
    %c1_12 = arith.constant 1 : index
    %c0_13 = arith.constant 0 : index
    %c0_14 = arith.constant 0 : index
    %14 = vector.load %arg4[%13, %c1_12, %c0_13, %c0_14] : memref<7x7x64x128xbf16, #tpu.memory_space<vmem>>, vector<1x1x64x128xbf16>
    %15 = vector.shape_cast %14 : vector<1x1x64x128xbf16> to vector<64x128xbf16>
    %cst_15 = arith.constant dense<0.000000e+00> : vector<16x128xf32>
    %16 = tpu.matmul %12, %15, %cst_15 {dimension_numbers = #tpu.dot_dimension_numbers<[1], [0], [0], [1], [0, 0, 1, 1], [], []>} : vector<16x64xbf16>, vector<64x128xbf16>, vector<16x128xf32> -> vector<16x128xf32>
    %17 = arith.addf %10, %16 : vector<16x128xf32>
    %c0_16 = arith.constant 0 : index
    %c0_17 = arith.constant 0 : index
    %c2 = arith.constant 2 : index
    %c0_18 = arith.constant 0 : index
    %18 = vector.load %arg3[%c0_16, %c0_17, %c2, %c0_18] : memref<1x1x22x64xbf16, #tpu.memory_space<vmem>>, vector<1x1x16x64xbf16>
    %19 = vector.shape_cast %18 : vector<1x1x16x64xbf16> to vector<16x64xbf16>
    %20 = arith.index_cast %arg2 : i32 to index
    %c2_19 = arith.constant 2 : index
    %c0_20 = arith.constant 0 : index
    %c0_21 = arith.constant 0 : index
    %21 = vector.load %arg4[%20, %c2_19, %c0_20, %c0_21] : memref<7x7x64x128xbf16, #tpu.memory_space<vmem>>, vector<1x1x64x128xbf16>
    %22 = vector.shape_cast %21 : vector<1x1x64x128xbf16> to vector<64x128xbf16>
    %cst_22 = arith.constant dense<0.000000e+00> : vector<16x128xf32>
    %23 = tpu.matmul %19, %22, %cst_22 {dimension_numbers = #tpu.dot_dimension_numbers<[1], [0], [0], [1], [0, 0, 1, 1], [], []>} : vector<16x64xbf16>, vector<64x128xbf16>, vector<16x128xf32> -> vector<16x128xf32>
    %24 = arith.addf %17, %23 : vector<16x128xf32>
    %c0_23 = arith.constant 0 : index
    %c0_24 = arith.constant 0 : index
    %c3 = arith.constant 3 : index
    %c0_25 = arith.constant 0 : index
    %25 = vector.load %arg3[%c0_23, %c0_24, %c3, %c0_25] : memref<1x1x22x64xbf16, #tpu.memory_space<vmem>>, vector<1x1x16x64xbf16>
    %26 = vector.shape_cast %25 : vector<1x1x16x64xbf16> to vector<16x64xbf16>
    %27 = arith.index_cast %arg2 : i32 to index
    %c3_26 = arith.constant 3 : index
    %c0_27 = arith.constant 0 : index
    %c0_28 = arith.constant 0 : index
    %28 = vector.load %arg4[%27, %c3_26, %c0_27, %c0_28] : memref<7x7x64x128xbf16, #tpu.memory_space<vmem>>, vector<1x1x64x128xbf16>
    %29 = vector.shape_cast %28 : vector<1x1x64x128xbf16> to vector<64x128xbf16>
    %cst_29 = arith.constant dense<0.000000e+00> : vector<16x128xf32>
    %30 = tpu.matmul %26, %29, %cst_29 {dimension_numbers = #tpu.dot_dimension_numbers<[1], [0], [0], [1], [0, 0, 1, 1], [], []>} : vector<16x64xbf16>, vector<64x128xbf16>, vector<16x128xf32> -> vector<16x128xf32>
    %31 = arith.addf %24, %30 : vector<16x128xf32>
    %c0_30 = arith.constant 0 : index
    %c0_31 = arith.constant 0 : index
    %c4 = arith.constant 4 : index
    %c0_32 = arith.constant 0 : index
    %32 = vector.load %arg3[%c0_30, %c0_31, %c4, %c0_32] : memref<1x1x22x64xbf16, #tpu.memory_space<vmem>>, vector<1x1x16x64xbf16>
    %33 = vector.shape_cast %32 : vector<1x1x16x64xbf16> to vector<16x64xbf16>
    %34 = arith.index_cast %arg2 : i32 to index
    %c4_33 = arith.constant 4 : index
    %c0_34 = arith.constant 0 : index
    %c0_35 = arith.constant 0 : index
    %35 = vector.load %arg4[%34, %c4_33, %c0_34, %c0_35] : memref<7x7x64x128xbf16, #tpu.memory_space<vmem>>, vector<1x1x64x128xbf16>
    %36 = vector.shape_cast %35 : vector<1x1x64x128xbf16> to vector<64x128xbf16>
    %cst_36 = arith.constant dense<0.000000e+00> : vector<16x128xf32>
    %37 = tpu.matmul %33, %36, %cst_36 {dimension_numbers = #tpu.dot_dimension_numbers<[1], [0], [0], [1], [0, 0, 1, 1], [], []>} : vector<16x64xbf16>, vector<64x128xbf16>, vector<16x128xf32> -> vector<16x128xf32>
    %38 = arith.addf %31, %37 : vector<16x128xf32>
    %c0_37 = arith.constant 0 : index
    %c0_38 = arith.constant 0 : index
    %c5 = arith.constant 5 : index
    %c0_39 = arith.constant 0 : index
    %39 = vector.load %arg3[%c0_37, %c0_38, %c5, %c0_39] : memref<1x1x22x64xbf16, #tpu.memory_space<vmem>>, vector<1x1x16x64xbf16>
    %40 = vector.shape_cast %39 : vector<1x1x16x64xbf16> to vector<16x64xbf16>
    %41 = arith.index_cast %arg2 : i32 to index
    %c5_40 = arith.constant 5 : index
    %c0_41 = arith.constant 0 : index
    %c0_42 = arith.constant 0 : index
    %42 = vector.load %arg4[%41, %c5_40, %c0_41, %c0_42] : memref<7x7x64x128xbf16, #tpu.memory_space<vmem>>, vector<1x1x64x128xbf16>
    %43 = vector.shape_cast %42 : vector<1x1x64x128xbf16> to vector<64x128xbf16>
    %cst_43 = arith.constant dense<0.000000e+00> : vector<16x128xf32>
    %44 = tpu.matmul %40, %43, %cst_43 {dimension_numbers = #tpu.dot_dimension_numbers<[1], [0], [0], [1], [0, 0, 1, 1], [], []>} : vector<16x64xbf16>, vector<64x128xbf16>, vector<16x128xf32> -> vector<16x128xf32>
    %45 = arith.addf %38, %44 : vector<16x128xf32>
    %c0_44 = arith.constant 0 : index
    %c0_45 = arith.constant 0 : index
    %c6 = arith.constant 6 : index
    %c0_46 = arith.constant 0 : index
    %46 = vector.load %arg3[%c0_44, %c0_45, %c6, %c0_46] : memref<1x1x22x64xbf16, #tpu.memory_space<vmem>>, vector<1x1x16x64xbf16>
    %47 = vector.shape_cast %46 : vector<1x1x16x64xbf16> to vector<16x64xbf16>
    %48 = arith.index_cast %arg2 : i32 to index
    %c6_47 = arith.constant 6 : index
    %c0_48 = arith.constant 0 : index
    %c0_49 = arith.constant 0 : index
    %49 = vector.load %arg4[%48, %c6_47, %c0_48, %c0_49] : memref<7x7x64x128xbf16, #tpu.memory_space<vmem>>, vector<1x1x64x128xbf16>
    %50 = vector.shape_cast %49 : vector<1x1x64x128xbf16> to vector<64x128xbf16>
    %cst_50 = arith.constant dense<0.000000e+00> : vector<16x128xf32>
    %51 = tpu.matmul %47, %50, %cst_50 {dimension_numbers = #tpu.dot_dimension_numbers<[1], [0], [0], [1], [0, 0, 1, 1], [], []>} : vector<16x64xbf16>, vector<64x128xbf16>, vector<16x128xf32> -> vector<16x128xf32>
    %52 = arith.addf %45, %51 : vector<16x128xf32>
    %c0_51 = arith.constant 0 : index
    %c0_52 = arith.constant 0 : index
    %53 = vector.load %arg7[%c0_51, %c0_52] : memref<16x128xf32, #tpu.memory_space<vmem>>, vector<16x128xf32>
    tpu.vector_store %arg7[%c0_51, %c0_52], %52 {strides = array<i32>} : memref<16x128xf32, #tpu.memory_space<vmem>>, vector<16x128xf32>,
    %c6_i32 = arith.constant 6 : i32
    %54 = arith.cmpi eq, %arg2, %c6_i32 : i32
    %55 = arith.extui %54 : i1 to i32
    %c0_i32_53 = arith.constant 0 : i32
    %56 = arith.cmpi ne, %55, %c0_i32_53 : i32
    scf.if %56 {
      %c0_54 = arith.constant 0 : index
      %c0_55 = arith.constant 0 : index
      %57 = vector.load %arg7[%c0_54, %c0_55] : memref<16x128xf32, #tpu.memory_space<vmem>>, vector<16x128xf32>
      %c0_56 = arith.constant 0 : index
      %c0_57 = arith.constant 0 : index
      %58 = vector.load %arg5[%c0_56, %c0_57] : memref<1x128xf32, #tpu.memory_space<vmem>>, vector<1x128xf32>
      %59 = vector.broadcast %58 : vector<1x128xf32> to vector<16x128xf32>
      %60 = arith.addf %57, %59 : vector<16x128xf32>
      %61 = math.tanh %60 : vector<16x128xf32>
      %62 = arith.truncf %61 : vector<16x128xf32> to vector<16x128xbf16>
      %c0_58 = arith.constant 0 : index
      %c0_59 = arith.constant 0 : index
      %c0_60 = arith.constant 0 : index
      %c0_61 = arith.constant 0 : index
      %63 = vector.load %arg6[%c0_58, %c0_59, %c0_60, %c0_61] : memref<1x1x16x128xbf16, #tpu.memory_space<vmem>>, vector<1x1x16x128xbf16>
      %64 = vector.shape_cast %63 : vector<1x1x16x128xbf16> to vector<16x128xbf16>
      %65 = vector.shape_cast %62 : vector<16x128xbf16> to vector<1x1x16x128xbf16>
      tpu.vector_store %arg6[%c0_58, %c0_59, %c0_60, %c0_61], %65 {strides = array<i32>} : memref<1x1x16x128xbf16, #tpu.memory_space<vmem>>, vector<1x1x16x128xbf16>,
    } else {
    }
    return
  }
  func.func @transform_0(%arg0: i32, %arg1: i32, %arg2: i32) -> (i32, i32, i32, i32) {
    %0 = arith.addi %arg1, %arg2 : i32
    %c0_i32 = arith.constant 0 : i32
    %c0_i32_0 = arith.constant 0 : i32
    %c0_i32_1 = arith.constant 0 : i32
    return %arg0, %0, %c0_i32, %c0_i32_0 : i32, i32, i32, i32
  }
  func.func @transform_1(%arg0: i32, %arg1: i32, %arg2: i32) -> (i32, i32, i32, i32) {
    %c0_i32 = arith.constant 0 : i32
    %c0_i32_0 = arith.constant 0 : i32
    %c0_i32_1 = arith.constant 0 : i32
    %c0_i32_2 = arith.constant 0 : i32
    %c0_i32_3 = arith.constant 0 : i32
    return %c0_i32, %c0_i32_0, %c0_i32_1, %c0_i32_2 : i32, i32, i32, i32
  }
  func.func @transform_2(%arg0: i32, %arg1: i32, %arg2: i32) -> (i32, i32) {
    %c0_i32 = arith.constant 0 : i32
    %c0_i32_0 = arith.constant 0 : i32
    %c0_i32_1 = arith.constant 0 : i32
    return %c0_i32, %c0_i32_0 : i32, i32
  }
  func.func @transform_3(%arg0: i32, %arg1: i32, %arg2: i32) -> (i32, i32, i32, i32) {
    %c0_i32 = arith.constant 0 : i32
    %c0_i32_0 = arith.constant 0 : i32
    %c0_i32_1 = arith.constant 0 : i32
    return %arg0, %arg1, %c0_i32, %c0_i32_0 : i32, i32, i32, i32
  }
}

</mosaic_0001>

<bundles_post_ra>
// kernel: generator_forward.58
= control target key start
LH: loop header
LB: loop body
LE: loop exit
PB: predicated region body
PF: predicated region fallthrough
CT: control target
= control target key end

     0   :  { %s1125_s12 = smov 0   ;;  %s1329_s0 = inlined_call_operand.vmem [shape: bf16[512,147], index: 0, kind: input, shape index: {}]   ;;  %s1330_s1 = inlined_call_operand.vmem [shape: bf16[147,64], index: 1, kind: input, shape index: {}]   ;;  %s1331_s2 = inlined_call_operand.vmem [shape: f32[1,64], index: 2, kind: input, shape index: {}]   ;;  %s1332_s3 = inlined_call_operand.vmem [shape: bf16[512,64], index: 3, kind: output, shape index: {}]  }
   0x1 LB: > { %s871_s13 = sadd.s32 4294967295, %s1101_s12   ;;  %p875_p0 = scmp.ge.s32.totalorder %s1101_s12, 1  ;;  %s1101_s12 = sphi %s1125_s12, %s13_s12  }
   0x2   : > { %p139_p1 = scmp.lt.s32.totalorder %s1101_s12, 3 }
   0x4   : > { %p140_p2 = pnand %p875_p0, %p139_p1 }
   0x5   : > { %s876_s20 = sshll.u32 (!%p140_p2), %s871_s13, 5 }
   0x6   : > { %143 = sbr.rel (%p140_p2) target bundleno = 310 (0x136), region = 32  ;;  %p165_p3 = scmp.lt.s32.totalorder (!%p140_p2), %s876_s20, 63 }
   0xb   : > { %v1037_v0 = vld [vmem:[%s1330_s1 + $0x38] sm:$0xff]   ;;  %v1103_v1 = vmov 0   ;;  %v1038_v2 = vld [vmem:[%s1330_s1 + $0x30] sm:$0xff]   ;;  %v1039_v3 = vld [vmem:[%s1330_s1 + $0x28] sm:$0xff]   ;;  %s1334_s20 = smov (!%p165_p3, %s876_s20), 63  ;;  %vm437_vm0 = vcmask 154624  }
   0xc   : > { %493 = vmatprep.subr.bf16.mxu0 %v1103_v1  ;;  %1007 = vmatprep.subr.bf16.mxu1 %v1103_v1  ;;  %v1040_v4 = vld [vmem:[%s1330_s1 + $0x20] sm:$0xff]   ;;  %s974_s23 = sshll.u32 %s1334_s20, 3  ;;  %v1041_v5 = vld [vmem:[%s1330_s1 + $0x18] sm:$0xff]   ;;  %v1042_v8 = vld [vmem:[%s1330_s1 + $0x10] sm:$0xff]   ;;  %vm486_vm1 = vcmask 1040384   ;;  %vm487_vm2 = vcmask 1041408  }
   0xd   : > { %494 = vmatpush1.bf16.msra.mxu0 %v1037_v0  ;;  %1017 = vmatpush1.bf16.msra.mxu1 %v1037_v0  ;;  %s1151_s26 = scalar_lea.vmem %s1329_s0, %s974_s23  ;;  %v1043_v9 = vld [vmem:[%s1330_s1 + $0x8] sm:$0xff]   ;;  %v1104_v10 = vmov 65535   ;;  %v1044_v12 = vld [vmem:[%s1330_s1] sm:$0xff]   ;;  %s880_s15 = sshll.u32 %s1334_s20, 2  ;;  %vm782_vm3 = vcmask 519168  }
   0xe   : > { %495 = vmatprep.subr.bf16.mxu0 %v1103_v1  ;;  %1008 = vmatprep.subr.bf16.mxu1 %v1103_v1  ;;  %v1049_v6 = vld [vmem:[%s1151_s26 + $0x4] ss:$8 sps:$4 sm:$0xff]   ;;  %v488_v11 = vsel %vm486_vm1, 4294967295, %v1104_v10  ;;  %v1045_v13 = vld [vmem:[%s1330_s1 + $0x48] ss:$0 sps:$4 sm:$0x33]   ;;  %s1230_s18 = scalar_lea.vmem %s1332_s3, %s880_s15 }
   0xf   : > { %v1052_v7 = vld [vmem:[%s1151_s26 + $0x84] ss:$8 sps:$4 sm:$0xff]   ;;  %924 = vmatprep.mubr.msk.bf16.mxu0 %vm437_vm0, %v1049_v6  ;;  %v489_v14 = vsel %vm487_vm2, %v488_v11, 0  ;;  %v1047_v17 = vld [vmem:[%s1151_s26] ss:$8 sps:$4 sm:$0xff]  }
  0x10   : > { %932 = vmatprep.mubr.msk.bf16.mxu1 %vm437_vm0, %v1052_v7  ;;  %v491_v15 = vand.u32 %v1045_v13, %v489_v14  ;;  %v1046_v16 = vld [vmem:[%s1330_s1 + $0x40] sm:$0xff]   ;;  %v1053_v19 = vld [vmem:[%s1151_s26 + $0x14] ss:$8 sps:$4 sm:$0xff]   ;;  %v1057_v21 = vld [vmem:[%s1151_s26 + $0x10] ss:$8 sps:$4 sm:$0xff]  }
  0x11   : > { %496 = vmatpush1.bf16.msra.mxu0 %v1038_v2  ;;  %1018 = vmatpush1.bf16.msra.mxu1 %v1038_v2  ;;  %v1050_v18 = vld [vmem:[%s1151_s26 + $0x80] ss:$8 sps:$4 sm:$0xff]   ;;  %v1055_v20 = vld [vmem:[%s1151_s26 + $0x94] ss:$8 sps:$4 sm:$0xff]   ;;  %v1058_v22 = vld [vmem:[%s1151_s26 + $0x90] ss:$8 sps:$4 sm:$0xff]  }
  0x12   : > { %497 = vmatprep.subr.bf16.mxu0 %v1103_v1  ;;  %1009 = vmatprep.subr.bf16.mxu1 %v1103_v1  ;;  %v1059_v23 = vld [vmem:[%s1151_s26 + $0x24] ss:$8 sps:$4 sm:$0xff]   ;;  %v1063_v25 = vld [vmem:[%s1151_s26 + $0x20] ss:$8 sps:$4 sm:$0xff]   ;;  %v1065_v27 = vld [vmem:[%s1151_s26 + $0x34] ss:$8 sps:$4 sm:$0xff]  }
  0x13   : > { %v1061_v24 = vld [vmem:[%s1151_s26 + $0xa4] ss:$8 sps:$4 sm:$0xff]   ;;  %v1064_v26 = vld [vmem:[%s1151_s26 + $0xa0] ss:$8 sps:$4 sm:$0xff]   ;;  %v1067_v28 = vld [vmem:[%s1151_s26 + $0xb4] ss:$8 sps:$4 sm:$0xff]  }
  0x14   : > { %v1069_v29 = vld [vmem:[%s1151_s26 + $0x30] ss:$8 sps:$4 sm:$0xff]   ;;  %v1071_v31 = vld [vmem:[%s1151_s26 + $0x44] ss:$8 sps:$4 sm:$0xff]   ;;  %v1075_v33 = vld [vmem:[%s1151_s26 + $0x40] ss:$8 sps:$4 sm:$0xff]  }
  0x15   : > { %498 = vmatpush1.bf16.msra.mxu0 %v1039_v3  ;;  %1019 = vmatpush1.bf16.msra.mxu1 %v1039_v3  ;;  %v1070_v30 = vld [vmem:[%s1151_s26 + $0xb0] ss:$8 sps:$4 sm:$0xff]   ;;  %v1073_v32 = vld [vmem:[%s1151_s26 + $0xc4] ss:$8 sps:$4 sm:$0xff]   ;;  %v1076_v34 = vld [vmem:[%s1151_s26 + $0xc0] ss:$8 sps:$4 sm:$0xff]  }
  0x16   : > { %499 = vmatprep.subr.bf16.mxu0 %v1103_v1  ;;  %1010 = vmatprep.subr.bf16.mxu1 %v1103_v1  ;;  %v1077_v35 = vld [vmem:[%s1151_s26 + $0x54] ss:$8 sps:$4 sm:$0xff]   ;;  %v1081_v37 = vld [vmem:[%s1151_s26 + $0x50] ss:$8 sps:$4 sm:$0xff]   ;;  %v1083_v39 = vld [vmem:[%s1151_s26 + $0x64] ss:$8 sps:$4 sm:$0xff]  }
  0x17   : > { %v1079_v36 = vld [vmem:[%s1151_s26 + $0xd4] ss:$8 sps:$4 sm:$0xff]   ;;  %v1082_v38 = vld [vmem:[%s1151_s26 + $0xd0] ss:$8 sps:$4 sm:$0xff]   ;;  %v1085_v40 = vld [vmem:[%s1151_s26 + $0xe4] ss:$8 sps:$4 sm:$0xff]  }
  0x18   : > { %v1087_v41 = vld [vmem:[%s1151_s26 + $0x60] ss:$8 sps:$4 sm:$0xff]   ;;  %v1089_v43 = vld [vmem:[%s1151_s26 + $0x74] ss:$8 sps:$4 sm:$0xff]   ;;  %v1093_v45 = vld [vmem:[%s1151_s26 + $0x70] ss:$8 sps:$4 sm:$0xff]  }
  0x19   : > { %500 = vmatpush1.bf16.msra.mxu0 %v1040_v4  ;;  %1020 = vmatpush1.bf16.msra.mxu1 %v1040_v4  ;;  %v1088_v42 = vld [vmem:[%s1151_s26 + $0xe0] ss:$8 sps:$4 sm:$0xff]   ;;  %v1091_v44 = vld [vmem:[%s1151_s26 + $0xf4] ss:$8 sps:$4 sm:$0xff]   ;;  %v1094_v46 = vld [vmem:[%s1151_s26 + $0xf0] ss:$8 sps:$4 sm:$0xff]  }
  0x1a   : > { %501 = vmatprep.subr.bf16.mxu0 %v1103_v1  ;;  %1011 = vmatprep.subr.bf16.mxu1 %v1103_v1  ;;  %v1222_v47 = vld [vmem:[%s1331_s2] ss:$0 sm:$0xff] }
  0x1d   : > { %502 = vmatpush1.bf16.msra.mxu0 %v1041_v5  ;;  %1021 = vmatpush1.bf16.msra.mxu1 %v1041_v5 }
  0x1e   : > { %503 = vmatprep.subr.bf16.mxu0 %v1103_v1  ;;  %1012 = vmatprep.subr.bf16.mxu1 %v1103_v1 }
  0x21   : > { %504 = vmatpush1.bf16.msra.mxu0 %v1042_v8  ;;  %1022 = vmatpush1.bf16.msra.mxu1 %v1042_v8 }
  0x22   : > { %505 = vmatprep.subr.bf16.mxu0 %v1103_v1  ;;  %1013 = vmatprep.subr.bf16.mxu1 %v1103_v1 }
  0x25   : > { %506 = vmatpush1.bf16.msra.mxu0 %v1043_v9  ;;  %1023 = vmatpush1.bf16.msra.mxu1 %v1043_v9 }
  0x26   : > { %507 = vmatprep.subr.bf16.mxu0 %v1103_v1  ;;  %1014 = vmatprep.subr.bf16.mxu1 %v1103_v1 }
  0x29   : > { %508 = vmatpush1.bf16.msra.mxu0 %v1044_v12  ;;  %1024 = vmatpush1.bf16.msra.mxu1 %v1044_v12 }
  0x2a   : > { %521 = vmatprep.subr.bf16.mxu0 %v1103_v1  ;;  %1015 = vmatprep.subr.bf16.mxu1 %v1103_v1 }
  0x2d   : > { %522 = vmatpush2.bf16.msra.mxu0 %v491_v15  ;;  %1025 = vmatpush2.bf16.msra.mxu1 %v491_v15 }
  0x2e   : > { %523 = vmatprep.subr.bf16.mxu0 %v1103_v1  ;;  %1016 = vmatprep.subr.bf16.mxu1 %v1103_v1 }
  0x31   : > { %524 = vmatpush2.bf16.msra.mxu0 %v1046_v16  ;;  %1026 = vmatpush2.bf16.msra.mxu1 %v1046_v16 }
  0x34   : > { %526 = vmatmul.mubr.bf16.vlgmr.msra.gmra.mxu0 %v1047_v17  ;;  %590 = vmatmul.mubr.bf16.vlgmr.msra.gmra.mxu1 %v1050_v18 }
  0x35   : > { %925 = vmatprep.mubr.msk.bf16.mxu0 %vm437_vm0, %v1053_v19  ;;  %933 = vmatprep.mubr.msk.bf16.mxu1 %vm437_vm0, %v1055_v20 }
  0x3c   : > { %534 = vmatmul.mubr.bf16.gmra.mxu0 %v1057_v21  ;;  %598 = vmatmul.mubr.bf16.gmra.mxu1 %v1058_v22 }
  0x3d   : > { %926 = vmatprep.mubr.msk.bf16.mxu0 %vm437_vm0, %v1059_v23  ;;  %934 = vmatprep.mubr.msk.bf16.mxu1 %vm437_vm0, %v1061_v24 }
  0x44   : > { %542 = vmatmul.mubr.bf16.gmra.mxu0 %v1063_v25  ;;  %606 = vmatmul.mubr.bf16.gmra.mxu1 %v1064_v26 }
  0x45   : > { %927 = vmatprep.mubr.msk.bf16.mxu0 %vm437_vm0, %v1065_v27  ;;  %935 = vmatprep.mubr.msk.bf16.mxu1 %vm437_vm0, %v1067_v28 }
  0x4c   : > { %550 = vmatmul.mubr.bf16.gmra.mxu0 %v1069_v29  ;;  %614 = vmatmul.mubr.bf16.gmra.mxu1 %v1070_v30 }
  0x4d   : > { %928 = vmatprep.mubr.msk.bf16.mxu0 %vm437_vm0, %v1071_v31  ;;  %936 = vmatprep.mubr.msk.bf16.mxu1 %vm437_vm0, %v1073_v32 }
  0x54   : > { %558 = vmatmul.mubr.bf16.gmra.mxu0 %v1075_v33  ;;  %622 = vmatmul.mubr.bf16.gmra.mxu1 %v1076_v34 }
  0x55   : > { %929 = vmatprep.mubr.msk.bf16.mxu0 %vm437_vm0, %v1077_v35  ;;  %937 = vmatprep.mubr.msk.bf16.mxu1 %vm437_vm0, %v1079_v36 }
  0x5c   : > { %566 = vmatmul.mubr.bf16.gmra.mxu0 %v1081_v37  ;;  %630 = vmatmul.mubr.bf16.gmra.mxu1 %v1082_v38 }
  0x5d   : > { %930 = vmatprep.mubr.msk.bf16.mxu0 %vm437_vm0, %v1083_v39  ;;  %938 = vmatprep.mubr.msk.bf16.mxu1 %vm437_vm0, %v1085_v40 }
  0x64   : > { %574 = vmatmul.mubr.bf16.gmra.mxu0 %v1087_v41  ;;  %638 = vmatmul.mubr.bf16.gmra.mxu1 %v1088_v42 }
  0x65   : > { %931 = vmatprep.mubr.msk.bf16.mxu0 %vm437_vm0, %v1089_v43  ;;  %939 = vmatprep.mubr.msk.bf16.mxu1 %vm437_vm0, %v1091_v44 }
  0x6c   : > { %582 = vmatmul.mubr.bf16.gmra.mxu0 %v1093_v45  ;;  %646 = vmatmul.mubr.bf16.gmra.mxu1 %v1094_v46 }
  0xf4   : > { %v527_v48 = vpop.f32.mrf.mxu0  ;;  %v591_v49 = vpop.f32.mrf.mxu1 }
  0xf5   : > { %v528_v50 = vadd.f32 %v1222_v47, %v527_v48  ;;  %v592_v51 = vadd.f32 %v1222_v47, %v591_v49 }
  0xf6   : > { %v529_v52 = vpop.f32.mrf.mxu0  ;;  %v593_v53 = vpop.f32.mrf.mxu1 }
  0xf7   : > { %v975_v54 = vpack.c.bf16 %v528_v50, %v528_v50  ;;  %v991_v55 = vpack.c.bf16 %v592_v51, %v592_v51 }
  0xf8   : > { %v530_v56 = vpop.f32.mrf.mxu0  ;;  %v594_v57 = vpop.f32.mrf.mxu1 }
  0xf9   : > { %783 = vst.msk [vmem:[%s1230_s18] sm:$0xf] %vm782_vm3, %v975_v54  ;;  %799 = vst.msk [vmem:[%s1230_s18 + $0x40] sm:$0xf] %vm782_vm3, %v991_v55  ;;  %v531_v58 = vadd.f32 %v1222_v47, %v530_v56  ;;  %v595_v59 = vadd.f32 %v1222_v47, %v594_v57 }
  0xfa   : > { %v532_v60 = vpop.f32.mrf.mxu0  ;;  %v596_v61 = vpop.f32.mrf.mxu1 }
  0xfb   : > { %v976_v62 = vpack.c.bf16 %v531_v58, %v531_v58  ;;  %v992_v63 = vpack.c.bf16 %v595_v59, %v595_v59 }
  0xfc   : > { %v535_v0 = vpop.f32.mrf.mxu0  ;;  %v599_v1 = vpop.f32.mrf.mxu1 }
  0xfd   : > { %784 = vst.msk [vmem:[%s1230_s18 + $0x4] sm:$0xf] %vm782_vm3, %v976_v62  ;;  %800 = vst.msk [vmem:[%s1230_s18 + $0x44] sm:$0xf] %vm782_vm3, %v992_v63  ;;  %v536_v2 = vadd.f32 %v1222_v47, %v535_v0  ;;  %v600_v3 = vadd.f32 %v1222_v47, %v599_v1 }
  0xfe   : > { %v537_v4 = vpop.f32.mrf.mxu0  ;;  %v601_v5 = vpop.f32.mrf.mxu1 }
  0xff   : > { %v977_v6 = vpack.c.bf16 %v536_v2, %v536_v2  ;;  %v993_v7 = vpack.c.bf16 %v600_v3, %v600_v3 }
 0x100   : > { %v538_v8 = vpop.f32.mrf.mxu0  ;;  %v602_v9 = vpop.f32.mrf.mxu1 }
 0x101   : > { %785 = vst.msk [vmem:[%s1230_s18 + $0x8] sm:$0xf] %vm782_vm3, %v977_v6  ;;  %801 = vst.msk [vmem:[%s1230_s18 + $0x48] sm:$0xf] %vm782_vm3, %v993_v7  ;;  %v539_v10 = vadd.f32 %v1222_v47, %v538_v8  ;;  %v603_v11 = vadd.f32 %v1222_v47, %v602_v9 }
 0x102   : > { %v540_v12 = vpop.f32.mrf.mxu0  ;;  %v604_v13 = vpop.f32.mrf.mxu1 }
 0x103   : > { %v978_v14 = vpack.c.bf16 %v539_v10, %v539_v10  ;;  %v994_v15 = vpack.c.bf16 %v603_v11, %v603_v11 }
 0x104   : > { %v543_v16 = vpop.f32.mrf.mxu0  ;;  %v607_v17 = vpop.f32.mrf.mxu1 }
 0x105   : > { %786 = vst.msk [vmem:[%s1230_s18 + $0xc] sm:$0xf] %vm782_vm3, %v978_v14  ;;  %802 = vst.msk [vmem:[%s1230_s18 + $0x4c] sm:$0xf] %vm782_vm3, %v994_v15  ;;  %v544_v18 = vadd.f32 %v1222_v47, %v543_v16  ;;  %v608_v19 = vadd.f32 %v1222_v47, %v607_v17 }
 0x106   : > { %v545_v20 = vpop.f32.mrf.mxu0  ;;  %v609_v21 = vpop.f32.mrf.mxu1 }
 0x107   : > { %v979_v22 = vpack.c.bf16 %v544_v18, %v544_v18  ;;  %v995_v23 = vpack.c.bf16 %v608_v19, %v608_v19 }
 0x108   : > { %v546_v24 = vpop.f32.mrf.mxu0  ;;  %v610_v25 = vpop.f32.mrf.mxu1 }
 0x109   : > { %787 = vst.msk [vmem:[%s1230_s18 + $0x10] sm:$0xf] %vm782_vm3, %v979_v22  ;;  %803 = vst.msk [vmem:[%s1230_s18 + $0x50] sm:$0xf] %vm782_vm3, %v995_v23  ;;  %v547_v26 = vadd.f32 %v1222_v47, %v546_v24  ;;  %v611_v27 = vadd.f32 %v1222_v47, %v610_v25 }
 0x10a   : > { %v548_v28 = vpop.f32.mrf.mxu0  ;;  %v612_v29 = vpop.f32.mrf.mxu1 }
 0x10b   : > { %v980_v30 = vpack.c.bf16 %v547_v26, %v547_v26  ;;  %v996_v31 = vpack.c.bf16 %v611_v27, %v611_v27 }
 0x10c   : > { %v551_v32 = vpop.f32.mrf.mxu0  ;;  %v615_v33 = vpop.f32.mrf.mxu1 }
 0x10d   : > { %788 = vst.msk [vmem:[%s1230_s18 + $0x14] sm:$0xf] %vm782_vm3, %v980_v30  ;;  %804 = vst.msk [vmem:[%s1230_s18 + $0x54] sm:$0xf] %vm782_vm3, %v996_v31  ;;  %v552_v34 = vadd.f32 %v1222_v47, %v551_v32  ;;  %v616_v35 = vadd.f32 %v1222_v47, %v615_v33 }
 0x10e   : > { %v553_v36 = vpop.f32.mrf.mxu0  ;;  %v617_v37 = vpop.f32.mrf.mxu1 }
 0x10f   : > { %v981_v38 = vpack.c.bf16 %v552_v34, %v552_v34  ;;  %v997_v39 = vpack.c.bf16 %v616_v35, %v616_v35 }
 0x110   : > { %v554_v40 = vpop.f32.mrf.mxu0  ;;  %v618_v41 = vpop.f32.mrf.mxu1 }
 0x111   : > { %789 = vst.msk [vmem:[%s1230_s18 + $0x18] sm:$0xf] %vm782_vm3, %v981_v38  ;;  %805 = vst.msk [vmem:[%s1230_s18 + $0x58] sm:$0xf] %vm782_vm3, %v997_v39  ;;  %v555_v42 = vadd.f32 %v1222_v47, %v554_v40  ;;  %v619_v43 = vadd.f32 %v1222_v47, %v618_v41 }
 0x112   : > { %v556_v44 = vpop.f32.mrf.mxu0  ;;  %v620_v45 = vpop.f32.mrf.mxu1 }
 0x113   : > { %v982_v46 = vpack.c.bf16 %v555_v42, %v555_v42  ;;  %v998_v48 = vpack.c.bf16 %v619_v43, %v619_v43 }
 0x114   : > { %v559_v49 = vpop.f32.mrf.mxu0  ;;  %v623_v50 = vpop.f32.mrf.mxu1 }
 0x115   : > { %790 = vst.msk [vmem:[%s1230_s18 + $0x1c] sm:$0xf] %vm782_vm3, %v982_v46  ;;  %806 = vst.msk [vmem:[%s1230_s18 + $0x5c] sm:$0xf] %vm782_vm3, %v998_v48  ;;  %v560_v51 = vadd.f32 %v1222_v47, %v559_v49  ;;  %v624_v52 = vadd.f32 %v1222_v47, %v623_v50 }
 0x116   : > { %v561_v53 = vpop.f32.mrf.mxu0  ;;  %v625_v54 = vpop.f32.mrf.mxu1 }
 0x117   : > { %v983_v55 = vpack.c.bf16 %v560_v51, %v560_v51  ;;  %v999_v56 = vpack.c.bf16 %v624_v52, %v624_v52 }
 0x118   : > { %v562_v57 = vpop.f32.mrf.mxu0  ;;  %v626_v58 = vpop.f32.mrf.mxu1 }
 0x119   : > { %791 = vst.msk [vmem:[%s1230_s18 + $0x20] sm:$0xf] %vm782_vm3, %v983_v55  ;;  %807 = vst.msk [vmem:[%s1230_s18 + $0x60] sm:$0xf] %vm782_vm3, %v999_v56  ;;  %v563_v59 = vadd.f32 %v1222_v47, %v562_v57  ;;  %v627_v60 = vadd.f32 %v1222_v47, %v626_v58 }
 0x11a   : > { %v564_v61 = vpop.f32.mrf.mxu0  ;;  %v628_v62 = vpop.f32.mrf.mxu1 }
 0x11b   : > { %v984_v63 = vpack.c.bf16 %v563_v59, %v563_v59  ;;  %v1000_v0 = vpack.c.bf16 %v627_v60, %v627_v60 }
 0x11c   : > { %v567_v1 = vpop.f32.mrf.mxu0  ;;  %v631_v2 = vpop.f32.mrf.mxu1 }
 0x11d   : > { %792 = vst.msk [vmem:[%s1230_s18 + $0x24] sm:$0xf] %vm782_vm3, %v984_v63  ;;  %808 = vst.msk [vmem:[%s1230_s18 + $0x64] sm:$0xf] %vm782_vm3, %v1000_v0  ;;  %v568_v3 = vadd.f32 %v1222_v47, %v567_v1  ;;  %v632_v4 = vadd.f32 %v1222_v47, %v631_v2 }
 0x11e   : > { %v569_v5 = vpop.f32.mrf.mxu0  ;;  %v633_v6 = vpop.f32.mrf.mxu1 }
 0x11f   : > { %v985_v7 = vpack.c.bf16 %v568_v3, %v568_v3  ;;  %v1001_v8 = vpack.c.bf16 %v632_v4, %v632_v4 }
 0x120   : > { %v570_v9 = vpop.f32.mrf.mxu0  ;;  %v634_v10 = vpop.f32.mrf.mxu1 }
 0x121   : > { %793 = vst.msk [vmem:[%s1230_s18 + $0x28] sm:$0xf] %vm782_vm3, %v985_v7  ;;  %809 = vst.msk [vmem:[%s1230_s18 + $0x68] sm:$0xf] %vm782_vm3, %v1001_v8  ;;  %v571_v11 = vadd.f32 %v1222_v47, %v570_v9  ;;  %v635_v12 = vadd.f32 %v1222_v47, %v634_v10 }
 0x122   : > { %v572_v13 = vpop.f32.mrf.mxu0  ;;  %v636_v14 = vpop.f32.mrf.mxu1 }
 0x123   : > { %v986_v15 = vpack.c.bf16 %v571_v11, %v571_v11  ;;  %v1002_v16 = vpack.c.bf16 %v635_v12, %v635_v12 }
 0x124   : > { %v575_v17 = vpop.f32.mrf.mxu0  ;;  %v639_v18 = vpop.f32.mrf.mxu1 }
 0x125   : > { %794 = vst.msk [vmem:[%s1230_s18 + $0x2c] sm:$0xf] %vm782_vm3, %v986_v15  ;;  %810 = vst.msk [vmem:[%s1230_s18 + $0x6c] sm:$0xf] %vm782_vm3, %v1002_v16  ;;  %v576_v19 = vadd.f32 %v1222_v47, %v575_v17  ;;  %v640_v20 = vadd.f32 %v1222_v47, %v639_v18 }
 0x126   : > { %v577_v21 = vpop.f32.mrf.mxu0  ;;  %v641_v22 = vpop.f32.mrf.mxu1 }
 0x127   : > { %v987_v23 = vpack.c.bf16 %v576_v19, %v576_v19  ;;  %v1003_v24 = vpack.c.bf16 %v640_v20, %v640_v20 }
 0x128   : > { %v578_v25 = vpop.f32.mrf.mxu0  ;;  %v642_v26 = vpop.f32.mrf.mxu1 }
 0x129   : > { %795 = vst.msk [vmem:[%s1230_s18 + $0x30] sm:$0xf] %vm782_vm3, %v987_v23  ;;  %811 = vst.msk [vmem:[%s1230_s18 + $0x70] sm:$0xf] %vm782_vm3, %v1003_v24  ;;  %v579_v27 = vadd.f32 %v1222_v47, %v578_v25  ;;  %v643_v28 = vadd.f32 %v1222_v47, %v642_v26 }
 0x12a   : > { %v580_v29 = vpop.f32.mrf.mxu0  ;;  %v644_v30 = vpop.f32.mrf.mxu1 }
 0x12b   : > { %v988_v31 = vpack.c.bf16 %v579_v27, %v579_v27  ;;  %v1004_v32 = vpack.c.bf16 %v643_v28, %v643_v28 }
 0x12c   : > { %v583_v33 = vpop.f32.mrf.mxu0  ;;  %v647_v34 = vpop.f32.mrf.mxu1 }
 0x12d   : > { %796 = vst.msk [vmem:[%s1230_s18 + $0x34] sm:$0xf] %vm782_vm3, %v988_v31  ;;  %812 = vst.msk [vmem:[%s1230_s18 + $0x74] sm:$0xf] %vm782_vm3, %v1004_v32  ;;  %v584_v35 = vadd.f32 %v1222_v47, %v583_v33  ;;  %v648_v36 = vadd.f32 %v1222_v47, %v647_v34 }
 0x12e   : > { %v585_v37 = vpop.f32.mrf.mxu0  ;;  %v649_v38 = vpop.f32.mrf.mxu1 }
 0x12f   : > { %v989_v39 = vpack.c.bf16 %v584_v35, %v584_v35  ;;  %v1005_v40 = vpack.c.bf16 %v648_v36, %v648_v36 }
 0x130   : > { %v586_v41 = vpop.f32.mrf.mxu0  ;;  %v650_v42 = vpop.f32.mrf.mxu1 }
 0x131   : > { %797 = vst.msk [vmem:[%s1230_s18 + $0x38] sm:$0xf] %vm782_vm3, %v989_v39  ;;  %813 = vst.msk [vmem:[%s1230_s18 + $0x78] sm:$0xf] %vm782_vm3, %v1005_v40  ;;  %v587_v43 = vadd.f32 %v1222_v47, %v586_v41  ;;  %v651_v44 = vadd.f32 %v1222_v47, %v650_v42 }
 0x132   : > { %v588_v45 = vpop.f32.mrf.mxu0  ;;  %v652_v46 = vpop.f32.mrf.mxu1 }
 0x133   : > { %v990_v48 = vpack.c.bf16 %v587_v43, %v587_v43  ;;  %v1006_v49 = vpack.c.bf16 %v651_v44, %v651_v44 }
 0x135   : > { %798 = vst.msk [vmem:[%s1230_s18 + $0x3c] sm:$0xf] %vm782_vm3, %v990_v48  ;;  %814 = vst.msk [vmem:[%s1230_s18 + $0x7c] sm:$0xf] %vm782_vm3, %v1006_v49 }
 0x136 PF: > { %s13_s12 = sadd.s32 1, %s1101_s12  }
 0x137   : > { %p10_p4 = scmp.ge.s32.totalorder %s13_s12, 4  }
 0x139   :  { %12 = sbr.rel (!%p10_p4) target bundleno = 1 (0x1), region = 62 }

// kernel: generator_forward.59
= control target key start
LH: loop header
LB: loop body
LE: loop exit
PB: predicated region body
PF: predicated region fallthrough
CT: control target
= control target key end

     0   :  { %s668_s9 = smov 0   ;;  %s670_s10 = smov 0   ;;  %s793_s0 = inlined_call_operand.vmem [shape: bf16[2,256,64], index: 0, kind: input, shape index: {}]   ;;  %s794_s1 = inlined_call_operand.vmem [shape: f32[2,1,64], index: 1, kind: output, shape index: {0}]   ;;  %s795_s2 = inlined_call_operand.vmem [shape: f32[2,1,64], index: 2, kind: output, shape index: {1}]  }
   0x1   :  { %s672_s11 = smov 0  }
   0x2 LB: > { %s25_s12 = sadd.s32 1, %s647_s10  ;;  %p520_p0 = scmp.ge.s32.totalorder %s651_s11, 1  ;;  %s651_s11 = sphi %s672_s11, %s13_s11   ;;  %s647_s10 = sphi %s670_s10, %s797_s10   ;;  %s643_s9 = sphi %s668_s9, %s796_s9  }
   0x3   : > { %p27_p1 = scmp.ge.s32.totalorder %s25_s12, 2  ;;  %p134_p2 = scmp.lt.s32.totalorder %s651_s11, 3 }
   0x5   : > { %s799_s12 = smov (%p27_p1, %s25_s12), 0  ;;  %p135_p3 = pnand %p520_p0, %p134_p2 }
   0x6   : > { %p162_p4 = scmp.lt.s32.totalorder (!%p135_p3), %s643_s9, 1 }
   0x7   : > { %138 = sbr.rel (%p135_p3) target bundleno = 100 (0x64), region = 24 }
   0xc   : > { %s801_s9 = smov (!%p162_p4, %s643_s9), 1  ;;  %vm241_vm0 = vcmask 523264   ;;  %vm416_vm1 = vcmask 516096  }
   0xd   : > { %s525_s13 = sshll.u32 %s801_s9, 7  ;;  %s173_s19 = scalar_lea.vmem %s794_s1, %s801_s9 }
   0xe   : > { %s692_s16 = scalar_lea.vmem %s793_s0, %s525_s13  ;;  %s176_s22 = scalar_lea.vmem %s795_s2, %s801_s9 }
   0xf   : > { %v527_v0 = vld [vmem:[%s692_s16] sm:$0xff]   ;;  %v590_v1 = vld [vmem:[%s692_s16 + $0x8] sm:$0xff]   ;;  %v591_v5 = vld [vmem:[%s692_s16 + $0x10] sm:$0xff]  }
  0x10   : > { %v528_v2 = vunpack.c.l.bf16 %v527_v0  ;;  %v529_v3 = vunpack.c.h.bf16 %v527_v0  ;;  %v532_v4 = vunpack.c.l.bf16 %v590_v1  ;;  %v533_v6 = vunpack.c.h.bf16 %v590_v1  ;;  %v592_v13 = vld [vmem:[%s692_s16 + $0x18] sm:$0xff]   ;;  %v593_v20 = vld [vmem:[%s692_s16 + $0x20] sm:$0xff]   ;;  %v594_v26 = vld [vmem:[%s692_s16 + $0x28] sm:$0xff]  }
  0x11   : > { %v536_v11 = vunpack.c.l.bf16 %v591_v5  ;;  %v537_v15 = vunpack.c.h.bf16 %v591_v5  ;;  %v540_v18 = vunpack.c.l.bf16 %v592_v13  ;;  %v541_v22 = vunpack.c.h.bf16 %v592_v13  ;;  %v595_v33 = vld [vmem:[%s692_s16 + $0x30] sm:$0xff]   ;;  %v596_v49 = vld [vmem:[%s692_s16 + $0x38] sm:$0xff]   ;;  %v597_v62 = vld [vmem:[%s692_s16 + $0x40] sm:$0xff]  }
  0x12   : > { %v242_v7 = vsel %vm241_vm0, %v528_v2, 0.0  ;;  %v243_v8 = vsel %vm241_vm0, %v529_v3, 0.0  ;;  %v245_v9 = vsel %vm241_vm0, %v532_v4, 0.0  ;;  %v247_v12 = vsel %vm241_vm0, %v533_v6, 0.0 }
  0x13   : > { %v244_v10 = vadd.f32 %v243_v8, %v242_v7  ;;  %v249_v16 = vsel %vm241_vm0, %v536_v11, 0.0  ;;  %v251_v19 = vsel %vm241_vm0, %v537_v15, 0.0  ;;  %v253_v23 = vsel %vm241_vm0, %v540_v18, 0.0 }
  0x14   : > { %v544_v25 = vunpack.c.l.bf16 %v593_v20  ;;  %v255_v27 = vsel %vm241_vm0, %v541_v22, 0.0  ;;  %v545_v29 = vunpack.c.h.bf16 %v593_v20  ;;  %v548_v31 = vunpack.c.l.bf16 %v594_v26 }
  0x15   : > { %v246_v14 = vadd.f32 %v245_v9, %v244_v10  ;;  %v311_v35 = vmul.f32 %v528_v2, %v528_v2  ;;  %v312_v36 = vmul.f32 %v529_v3, %v529_v3  ;;  %v313_v37 = vmul.f32 %v532_v4, %v532_v4 }
  0x16   : > { %v257_v30 = vsel %vm241_vm0, %v544_v25, 0.0  ;;  %v259_v34 = vsel %vm241_vm0, %v545_v29, 0.0  ;;  %v549_v38 = vunpack.c.h.bf16 %v594_v26  ;;  %v261_v40 = vsel %vm241_vm0, %v548_v31, 0.0 }
  0x17   : > { %v248_v17 = vadd.f32 %v247_v12, %v246_v14  ;;  %v314_v41 = vmul.f32 %v533_v6, %v533_v6  ;;  %v552_v42 = vunpack.c.l.bf16 %v595_v33  ;;  %v315_v45 = vmul.f32 %v536_v11, %v536_v11  ;;  %v598_v11 = vld [vmem:[%s692_s16 + $0x48] sm:$0xff]  }
  0x18   : > { %v263_v44 = vsel %vm241_vm0, %v549_v38, 0.0  ;;  %v343_v46 = vsel %vm241_vm0, %v311_v35, 0.0  ;;  %v344_v47 = vsel %vm241_vm0, %v312_v36, 0.0  ;;  %v346_v48 = vsel %vm241_vm0, %v313_v37, 0.0  ;;  %v600_v37 = vld [vmem:[%s692_s16 + $0x58] sm:$0xff]  }
  0x19   : > { %v250_v21 = vadd.f32 %v249_v16, %v248_v17  ;;  %v345_v51 = vadd.f32 %v344_v47, %v343_v46  ;;  %v553_v52 = vunpack.c.h.bf16 %v595_v33  ;;  %v265_v53 = vsel %vm241_vm0, %v552_v42, 0.0 }
  0x1a   : > { %v316_v54 = vmul.f32 %v537_v15, %v537_v15  ;;  %v348_v55 = vsel %vm241_vm0, %v314_v41, 0.0  ;;  %v556_v58 = vunpack.c.l.bf16 %v596_v49  ;;  %v317_v60 = vmul.f32 %v540_v18, %v540_v18 }
  0x1b   : > { %v252_v24 = vadd.f32 %v251_v19, %v250_v21  ;;  %v347_v57 = vadd.f32 %v346_v48, %v345_v51  ;;  %v267_v59 = vsel %vm241_vm0, %v553_v52, 0.0  ;;  %v350_v61 = vsel %vm241_vm0, %v315_v45, 0.0 }
  0x1c   : > { %v557_v1 = vunpack.c.h.bf16 %v596_v49  ;;  %v269_v2 = vsel %vm241_vm0, %v556_v58, 0.0  ;;  %v318_v3 = vmul.f32 %v541_v22, %v541_v22  ;;  %v352_v4 = vsel %vm241_vm0, %v316_v54, 0.0 }
  0x1d   : > { %v254_v28 = vadd.f32 %v253_v23, %v252_v24  ;;  %v349_v0 = vadd.f32 %v348_v55, %v347_v57  ;;  %v560_v7 = vunpack.c.l.bf16 %v597_v62  ;;  %v319_v9 = vmul.f32 %v544_v25, %v544_v25  ;;  %v599_v24 = vld [vmem:[%s692_s16 + $0x50] sm:$0xff]  }
  0x1e   : > { %v271_v8 = vsel %vm241_vm0, %v557_v1, 0.0  ;;  %v354_v10 = vsel %vm241_vm0, %v317_v60, 0.0  ;;  %v561_v14 = vunpack.c.h.bf16 %v597_v62  ;;  %v320_v16 = vmul.f32 %v545_v29, %v545_v29 }
  0x1f   : > { %v256_v32 = vadd.f32 %v255_v27, %v254_v28  ;;  %v351_v6 = vadd.f32 %v350_v61, %v349_v0  ;;  %v273_v15 = vsel %vm241_vm0, %v560_v7, 0.0  ;;  %v356_v17 = vsel %vm241_vm0, %v318_v3, 0.0 }
  0x20   : > { %v564_v20 = vunpack.c.l.bf16 %v598_v11  ;;  %v275_v21 = vsel %vm241_vm0, %v561_v14, 0.0  ;;  %v321_v22 = vmul.f32 %v548_v31, %v548_v31  ;;  %v358_v23 = vsel %vm241_vm0, %v319_v9, 0.0 }
  0x21   : > { %v258_v39 = vadd.f32 %v257_v30, %v256_v32  ;;  %v353_v13 = vadd.f32 %v352_v4, %v351_v6  ;;  %v565_v27 = vunpack.c.h.bf16 %v598_v11  ;;  %v322_v30 = vmul.f32 %v549_v38, %v549_v38 }
  0x22   : > { %v277_v28 = vsel %vm241_vm0, %v564_v20, 0.0  ;;  %v360_v29 = vsel %vm241_vm0, %v320_v16, 0.0  ;;  %v323_v36 = vmul.f32 %v552_v42, %v552_v42  ;;  %v362_v31 = vsel %vm241_vm0, %v321_v22, 0.0 }
  0x23   : > { %v260_v43 = vadd.f32 %v259_v34, %v258_v39  ;;  %v355_v19 = vadd.f32 %v354_v10, %v353_v13  ;;  %v568_v34 = vunpack.c.l.bf16 %v599_v24  ;;  %v279_v35 = vsel %vm241_vm0, %v565_v27, 0.0 }
  0x24   : > { %v569_v41 = vunpack.c.h.bf16 %v599_v24  ;;  %v364_v38 = vsel %vm241_vm0, %v322_v30, 0.0  ;;  %v572_v47 = vunpack.c.l.bf16 %v600_v37  ;;  %v325_v49 = vmul.f32 %v556_v58, %v556_v58 }
  0x25   : > { %v262_v50 = vadd.f32 %v261_v40, %v260_v43  ;;  %v357_v26 = vadd.f32 %v356_v17, %v355_v19  ;;  %v281_v43 = vsel %vm241_vm0, %v568_v34, 0.0  ;;  %v366_v42 = vsel %vm241_vm0, %v323_v36, 0.0 }
  0x26   : > { %v283_v48 = vsel %vm241_vm0, %v569_v41, 0.0  ;;  %v573_v54 = vunpack.c.h.bf16 %v600_v37  ;;  %v285_v55 = vsel %vm241_vm0, %v572_v47, 0.0  ;;  %v327_v62 = vmul.f32 %v560_v7, %v560_v7 }
  0x27   : > { %v264_v56 = vadd.f32 %v263_v44, %v262_v50  ;;  %v359_v33 = vadd.f32 %v358_v23, %v357_v26  ;;  %v324_v44 = vmul.f32 %v553_v52, %v553_v52  ;;  %v601_v50 = vld [vmem:[%s692_s16 + $0x60] sm:$0xff]   ;;  %v370_v58 = vsel %vm241_vm0, %v325_v49, 0.0 }
  0x28   : > { %v576_v60 = vunpack.c.l.bf16 %v601_v50  ;;  %v287_v61 = vsel %vm241_vm0, %v573_v54, 0.0  ;;  %v577_v3 = vunpack.c.h.bf16 %v601_v50  ;;  %v329_v11 = vmul.f32 %v564_v20, %v564_v20  ;;  %v604_v20 = vld [vmem:[%s692_s16 + $0x78] sm:$0xff]  }
  0x29   : > { %v266_v63 = vadd.f32 %v265_v53, %v264_v56  ;;  %v361_v40 = vadd.f32 %v360_v29, %v359_v33  ;;  %v326_v56 = vmul.f32 %v557_v1, %v557_v1  ;;  %v368_v52 = vsel %vm241_vm0, %v324_v44, 0.0 }
  0x2a   : > { %v289_v4 = vsel %vm241_vm0, %v576_v60, 0.0  ;;  %v291_v10 = vsel %vm241_vm0, %v577_v3, 0.0  ;;  %v374_v7 = vsel %vm241_vm0, %v327_v62, 0.0  ;;  %v331_v24 = vmul.f32 %v568_v34, %v568_v34 }
  0x2b   : > { %v268_v5 = vadd.f32 %v267_v59, %v266_v63  ;;  %v363_v46 = vadd.f32 %v362_v31, %v361_v40  ;;  %v602_v63 = vld [vmem:[%s692_s16 + $0x68] sm:$0xff]   ;;  %v372_v1 = vsel %vm241_vm0, %v326_v56, 0.0  ;;  %v588_v36 = vunpack.c.l.bf16 %v604_v20 }
  0x2c   : > { %v580_v9 = vunpack.c.l.bf16 %v602_v63  ;;  %v581_v16 = vunpack.c.h.bf16 %v602_v63  ;;  %v333_v37 = vmul.f32 %v572_v47, %v572_v47  ;;  %v335_v49 = vmul.f32 %v576_v60, %v576_v60 }
  0x2d   : > { %v270_v12 = vadd.f32 %v269_v2, %v268_v5  ;;  %v365_v53 = vadd.f32 %v364_v38, %v363_v46  ;;  %v328_v5 = vmul.f32 %v561_v14, %v561_v14  ;;  %v301_v44 = vsel %vm241_vm0, %v588_v36, 0.0 }
  0x2e   : > { %v293_v17 = vsel %vm241_vm0, %v580_v9, 0.0  ;;  %v295_v23 = vsel %vm241_vm0, %v581_v16, 0.0  ;;  %v334_v38 = vmul.f32 %v573_v54, %v573_v54  ;;  %v336_v47 = vmul.f32 %v577_v3, %v577_v3 }
  0x2f   : > { %v272_v18 = vadd.f32 %v271_v8, %v270_v12  ;;  %v367_v59 = vadd.f32 %v366_v42, %v365_v53  ;;  %v603_v12 = vld [vmem:[%s692_s16 + $0x70] sm:$0xff]   ;;  %v376_v14 = vsel %vm241_vm0, %v328_v5, 0.0  ;;  %v386_v42 = vsel %vm241_vm0, %v333_v37, 0.0 }
  0x30   : > { %v584_v22 = vunpack.c.l.bf16 %v603_v12  ;;  %v585_v30 = vunpack.c.h.bf16 %v603_v12  ;;  %v388_v53 = vsel %vm241_vm0, %v334_v38, 0.0  ;;  %v392_v62 = vsel %vm241_vm0, %v336_v47, 0.0 }
  0x31   : > { %v274_v25 = vadd.f32 %v273_v15, %v272_v18  ;;  %v369_v2 = vadd.f32 %v368_v52, %v367_v59  ;;  %v330_v18 = vmul.f32 %v565_v27, %v565_v27  ;;  %v337_v52 = vmul.f32 %v580_v9, %v580_v9 }
  0x32   : > { %v297_v29 = vsel %vm241_vm0, %v584_v22, 0.0  ;;  %v299_v31 = vsel %vm241_vm0, %v585_v30, 0.0  ;;  %v339_v63 = vmul.f32 %v584_v22, %v584_v22 }
  0x33   : > { %v276_v32 = vadd.f32 %v275_v21, %v274_v25  ;;  %v371_v8 = vadd.f32 %v370_v58, %v369_v2  ;;  %v378_v25 = vsel %vm241_vm0, %v329_v11, 0.0  ;;  %v380_v33 = vsel %vm241_vm0, %v330_v18, 0.0 }
  0x34   : > { %v398_v9 = vsel %vm241_vm0, %v339_v63, 0.0 }
  0x35   : > { %v278_v39 = vadd.f32 %v277_v28, %v276_v32  ;;  %v373_v15 = vadd.f32 %v372_v1, %v371_v8  ;;  %v332_v32 = vmul.f32 %v569_v41, %v569_v41  ;;  %v341_v8 = vmul.f32 %v588_v36, %v588_v36 }
  0x37   : > { %v280_v45 = vadd.f32 %v279_v35, %v278_v39  ;;  %v375_v21 = vadd.f32 %v374_v7, %v373_v15  ;;  %v382_v39 = vsel %vm241_vm0, %v331_v24, 0.0 }
  0x39   : > { %v282_v51 = vadd.f32 %v281_v43, %v280_v45  ;;  %v377_v28 = vadd.f32 %v376_v14, %v375_v21  ;;  %v589_v43 = vunpack.c.h.bf16 %v604_v20  ;;  %v384_v45 = vsel %vm241_vm0, %v332_v32, 0.0 }
  0x3b   : > { %v284_v57 = vadd.f32 %v283_v48, %v282_v51  ;;  %v379_v35 = vadd.f32 %v378_v25, %v377_v28  ;;  %v303_v48 = vsel %vm241_vm0, %v589_v43, 0.0  ;;  %v342_v7 = vmul.f32 %v589_v43, %v589_v43 }
  0x3d   : > { %v286_v0 = vadd.f32 %v285_v55, %v284_v57  ;;  %v381_v40 = vadd.f32 %v380_v33, %v379_v35  ;;  %v390_v57 = vsel %vm241_vm0, %v335_v49, 0.0  ;;  %v404_v18 = vsel %vm241_vm0, %v342_v7, 0.0 }
  0x3f   : > { %v288_v6 = vadd.f32 %v287_v61, %v286_v0  ;;  %v383_v41 = vadd.f32 %v382_v39, %v381_v40  ;;  %v338_v61 = vmul.f32 %v581_v16, %v581_v16  ;;  %v394_v0 = vsel %vm241_vm0, %v337_v52, 0.0 }
  0x40   : > { %v402_v16 = vsel %vm241_vm0, %v341_v8, 0.0 }
  0x41   : > { %v290_v13 = vadd.f32 %v289_v4, %v288_v6  ;;  %v385_v51 = vadd.f32 %v384_v45, %v383_v41  ;;  %v340_v4 = vmul.f32 %v585_v30, %v585_v30  ;;  %v396_v5 = vsel %vm241_vm0, %v338_v61, 0.0 }
  0x43   : > { %v292_v19 = vadd.f32 %v291_v10, %v290_v13  ;;  %v387_v56 = vadd.f32 %v386_v42, %v385_v51  ;;  %v400_v12 = vsel %vm241_vm0, %v340_v4, 0.0 }
  0x45   : > { %v294_v26 = vadd.f32 %v293_v17, %v292_v19  ;;  %v389_v59 = vadd.f32 %v388_v53, %v387_v56 }
  0x47   : > { %v296_v27 = vadd.f32 %v295_v23, %v294_v26  ;;  %v391_v60 = vadd.f32 %v390_v57, %v389_v59 }
  0x49   : > { %v298_v34 = vadd.f32 %v297_v29, %v296_v27  ;;  %v393_v3 = vadd.f32 %v392_v62, %v391_v60 }
  0x4b   : > { %v300_v46 = vadd.f32 %v299_v31, %v298_v34  ;;  %v395_v6 = vadd.f32 %v394_v0, %v393_v3 }
  0x4d   : > { %v302_v50 = vadd.f32 %v301_v44, %v300_v46  ;;  %v397_v11 = vadd.f32 %v396_v5, %v395_v6 }
  0x4f   : > { %v304_v55 = vadd.f32 %v303_v48, %v302_v50  ;;  %v399_v15 = vadd.f32 %v398_v9, %v397_v11 }
  0x51   : > { %v305_v54 = vrot.slane %v304_v55, 4  ;;  %v401_v17 = vadd.f32 %v400_v12, %v399_v15 }
  0x53   : > { %v306_v58 = vadd.f32 %v305_v54, %v304_v55  ;;  %v403_v14 = vadd.f32 %v402_v16, %v401_v17 }
  0x55   : > { %v307_v2 = vrot.slane %v306_v58, 2  ;;  %v405_v19 = vadd.f32 %v404_v18, %v403_v14 }
  0x57   : > { %v308_v1 = vadd.f32 %v307_v2, %v306_v58  ;;  %v406_v21 = vrot.slane %v405_v19, 4 }
  0x59   : > { %v309_v10 = vrot.slane %v308_v1, 1  ;;  %v407_v22 = vadd.f32 %v406_v21, %v405_v19 }
  0x5b   : > { %v310_v13 = vadd.f32 %v309_v10, %v308_v1  ;;  %v408_v23 = vrot.slane %v407_v22, 2 }
  0x5d   : > { %417 = vst.msk [vmem:[%s173_s19] sm:$0x1] %vm416_vm1, %v310_v13  ;;  %v409_v24 = vadd.f32 %v408_v23, %v407_v22 }
  0x5f   : > { %v410_v25 = vrot.slane %v409_v24, 1 }
  0x61   : > { %v411_v20 = vadd.f32 %v410_v25, %v409_v24 }
  0x63   : > { %418 = vst.msk [vmem:[%s176_s22] sm:$0x1] %vm416_vm1, %v411_v20 }
  0x64 PF: > { %s13_s11 = sadd.s32 1, %s651_s11   ;;  %s796_s9 = smov %s647_s10 }
  0x65   : > { %p10_p5 = scmp.ge.s32.totalorder %s13_s11, 4   ;;  %s797_s10 = smov %s799_s12 }
  0x67   :  { %12 = sbr.rel (!%p10_p5) target bundleno = 2 (0x2), region = 74 }

// kernel: generator_forward.60
= control target key start
LH: loop header
LB: loop body
LE: loop exit
PB: predicated region body
PF: predicated region fallthrough
CT: control target
= control target key end

     0   :  { %s911_s12 = smov 0   ;;  %s913_s13 = smov 0   ;;  %s1193_s0 = inlined_call_operand.vmem [shape: bf16[2,256,64], index: 0, kind: input, shape index: {}]   ;;  %s1194_s1 = inlined_call_operand.vmem [shape: f32[2,1,64], index: 1, kind: input, shape index: {}]   ;;  %s1195_s2 = inlined_call_operand.vmem [shape: f32[2,1,64], index: 2, kind: input, shape index: {}]   ;;  %s1196_s3 = inlined_call_operand.vmem [shape: bf16[2,256,64], index: 3, kind: output, shape index: {}]  }
   0x1   :  { %s915_s14 = smov 0  }
   0x2 LB: > { %s25_s15 = sadd.s32 1, %s885_s13  ;;  %p689_p0 = scmp.ge.s32.totalorder %s889_s14, 1  ;;  %s889_s14 = sphi %s915_s14, %s13_s14   ;;  %s885_s13 = sphi %s913_s13, %s1198_s13   ;;  %s881_s12 = sphi %s911_s12, %s1197_s12  }
   0x3   : > { %p27_p1 = scmp.ge.s32.totalorder %s25_s15, 2  ;;  %p174_p2 = scmp.lt.s32.totalorder %s889_s14, 3 }
   0x5   : > { %s1200_s15 = smov (%p27_p1, %s25_s15), 0  ;;  %p175_p3 = pnand %p689_p0, %p174_p2 }
   0x6   : > { %p213_p4 = scmp.lt.s32.totalorder (!%p175_p3), %s881_s12, 1 }
   0x7   : > { %178 = sbr.rel (%p175_p3) target bundleno = 70 (0x46), region = 32 }
   0xc   : > { %s1202_s12 = smov (!%p213_p4, %s881_s12), 1  ;;  %v310_v0 = vlaneseq  ;;  %vm547_vm0 = vcmask 519168  }
   0xd   : > { %s224_s18 = scalar_lea.vmem %s1194_s1, %s1202_s12  ;;  %s728_s19 = sshll.u32 %s1202_s12, 7 }
   0xe   : > { %s227_s22 = scalar_lea.vmem %s1195_s2, %s1202_s12  ;;  %v302_v1 = vld [vmem:[%s224_s18] sm:$0x1]  ;;  %v940_v4 = vshrl.u32 %v310_v0, 7  ;;  %s947_s25 = scalar_lea.vmem %s1193_s0, %s728_s19 }
   0xf   : > { %v303_v2 = vmul.f32 0.00390625, %v302_v1  ;;  %v304_v3 = vld [vmem:[%s227_s22] sm:$0x1]  ;;  %v826_v11 = vld [vmem:[%s947_s25 + $0x8] sm:$0xff]   ;;  %v827_v12 = vld [vmem:[%s947_s25 + $0x10] sm:$0xff]   ;;  %s1070_s28 = scalar_lea.vmem %s1196_s3, %s728_s19 }
  0x10   : > { %v305_v5 = vmul.f32 0.00390625, %v304_v3  ;;  %v312_v8 = vsub.s32 0, %v940_v4  ;;  %v763_v9 = vld [vmem:[%s947_s25] sm:$0xff]   ;;  %v828_v16 = vld [vmem:[%s947_s25 + $0x18] sm:$0xff]   ;;  %v830_v19 = vld [vmem:[%s947_s25 + $0x28] sm:$0xff]   ;;  %v768_v20 = vunpack.c.l.bf16 %v826_v11  ;;  %v769_v21 = vunpack.c.h.bf16 %v826_v11 }
  0x11   : > { %v306_v6 = vmul.f32 %v303_v2, %v303_v2  ;;  %v764_v13 = vunpack.c.l.bf16 %v763_v9  ;;  %v829_v17 = vld [vmem:[%s947_s25 + $0x20] sm:$0xff]   ;;  %v765_v18 = vunpack.c.h.bf16 %v763_v9  ;;  %v772_v22 = vunpack.c.l.bf16 %v827_v12  ;;  %v831_v23 = vld [vmem:[%s947_s25 + $0x30] sm:$0xff]   ;;  %v832_v24 = vld [vmem:[%s947_s25 + $0x38] sm:$0xff]  }
  0x12   : > { %v955_v14 = vrot.slane %v303_v2, %v312_v8  ;;  %v773_v25 = vunpack.c.h.bf16 %v827_v12  ;;  %v776_v26 = vunpack.c.l.bf16 %v828_v16  ;;  %v777_v27 = vunpack.c.h.bf16 %v828_v16  ;;  %v833_v37 = vld [vmem:[%s947_s25 + $0x40] sm:$0xff]   ;;  %v834_v46 = vld [vmem:[%s947_s25 + $0x48] sm:$0xff]   ;;  %v835_v47 = vld [vmem:[%s947_s25 + $0x50] sm:$0xff]  }
  0x13   : > { %v307_v7 = vsub.f32 %v305_v5, %v306_v6  ;;  %v780_v28 = vunpack.c.l.bf16 %v829_v17  ;;  %v781_v30 = vunpack.c.h.bf16 %v829_v17  ;;  %v784_v31 = vunpack.c.l.bf16 %v830_v19  ;;  %v836_v52 = vld [vmem:[%s947_s25 + $0x58] sm:$0xff]   ;;  %v837_v53 = vld [vmem:[%s947_s25 + $0x60] sm:$0xff]   ;;  %v838_v58 = vld [vmem:[%s947_s25 + $0x68] sm:$0xff]  }
  0x14   : > { %v963_v29 = vsub.f32 %v764_v13, %v955_v14  ;;  %v785_v32 = vunpack.c.h.bf16 %v830_v19  ;;  %v788_v33 = vunpack.c.l.bf16 %v831_v23  ;;  %v789_v34 = vunpack.c.h.bf16 %v831_v23  ;;  %v839_v63 = vld [vmem:[%s947_s25 + $0x70] sm:$0xff]   ;;  %v840_v0 = vld [vmem:[%s947_s25 + $0x78] sm:$0xff]  }
  0x15   : > { %v308_v10 = vmax.f32 %v307_v7, 0.0  ;;  %v792_v35 = vunpack.c.l.bf16 %v832_v24  ;;  %v793_v36 = vunpack.c.h.bf16 %v832_v24  ;;  %v316_v38 = vsub.f32 %v765_v18, %v955_v14 }
  0x16   : > { %v317_v39 = vsub.f32 %v768_v20, %v955_v14  ;;  %v318_v40 = vsub.f32 %v769_v21, %v955_v14  ;;  %v319_v41 = vsub.f32 %v772_v22, %v955_v14  ;;  %v320_v42 = vsub.f32 %v773_v25, %v955_v14 }
  0x17   : > { %v347_v15 = vadd.f32 1e-05, %v308_v10  ;;  %v321_v43 = vsub.f32 %v776_v26, %v955_v14  ;;  %v322_v44 = vsub.f32 %v777_v27, %v955_v14  ;;  %v974_v45 = vsub.f32 %v780_v28, %v955_v14 }
  0x18   : > { %v979_v48 = vsub.f32 %v781_v30, %v955_v14  ;;  %v982_v49 = vsub.f32 %v784_v31, %v955_v14  ;;  %v985_v50 = vsub.f32 %v785_v32, %v955_v14  ;;  %v796_v51 = vunpack.c.l.bf16 %v833_v37 }
  0x19   : > { %865 = vrsqrt.f32 %v347_v15  ;;  %v990_v54 = vsub.f32 %v788_v33, %v955_v14  ;;  %v993_v55 = vsub.f32 %v789_v34, %v955_v14  ;;  %v996_v56 = vsub.f32 %v792_v35, %v955_v14 }
  0x1a   : > { %v999_v57 = vsub.f32 %v793_v36, %v955_v14  ;;  %v797_v59 = vunpack.c.h.bf16 %v833_v37  ;;  %v800_v60 = vunpack.c.l.bf16 %v834_v46  ;;  %v801_v61 = vunpack.c.h.bf16 %v834_v46 }
  0x1b   : > { %v804_v62 = vunpack.c.l.bf16 %v835_v47  ;;  %v805_v1 = vunpack.c.h.bf16 %v835_v47  ;;  %v808_v2 = vunpack.c.l.bf16 %v836_v52  ;;  %v809_v3 = vunpack.c.h.bf16 %v836_v52 }
  0x1c   : > { %v812_v5 = vunpack.c.l.bf16 %v837_v53  ;;  %v1005_v6 = vsub.f32 %v796_v51, %v955_v14  ;;  %v813_v7 = vunpack.c.h.bf16 %v837_v53  ;;  %v816_v9 = vunpack.c.l.bf16 %v838_v58 }
  0x1d   : > { %v817_v10 = vunpack.c.h.bf16 %v838_v58  ;;  %v820_v11 = vunpack.c.l.bf16 %v839_v63  ;;  %v821_v12 = vunpack.c.h.bf16 %v839_v63  ;;  %v824_v13 = vunpack.c.l.bf16 %v840_v0 }
  0x1e   : > { %v825_v15 = vunpack.c.h.bf16 %v840_v0  ;;  %v1008_v16 = vsub.f32 %v797_v59, %v955_v14  ;;  %v1011_v17 = vsub.f32 %v800_v60, %v955_v14  ;;  %v1014_v18 = vsub.f32 %v801_v61, %v955_v14 }
  0x1f   : > { %v1017_v19 = vsub.f32 %v804_v62, %v955_v14  ;;  %v1020_v21 = vsub.f32 %v805_v1, %v955_v14  ;;  %v1023_v22 = vsub.f32 %v808_v2, %v955_v14  ;;  %v1026_v23 = vsub.f32 %v809_v3, %v955_v14 }
  0x20   : > { %v1029_v24 = vsub.f32 %v812_v5, %v955_v14  ;;  %v1036_v26 = vsub.f32 %v813_v7, %v955_v14  ;;  %v1039_v27 = vsub.f32 %v816_v9, %v955_v14  ;;  %v1042_v28 = vsub.f32 %v817_v10, %v955_v14 }
  0x21   : > { %v1045_v30 = vsub.f32 %v820_v11, %v955_v14  ;;  %v1048_v31 = vsub.f32 %v821_v12, %v955_v14  ;;  %v1051_v4 = vsub.f32 %v824_v13, %v955_v14 }
  0x26   : > { %v866_v20 = vpop.eup %865 }
  0x27   : > { %v1033_v25 = vrot.slane %v866_v20, %v312_v8  ;;  %v1054_v8 = vsub.f32 %v825_v15, %v955_v14 }
  0x29   : > { %v355_v32 = vmul.f32 %v1033_v25, %v963_v29  ;;  %v356_v33 = vmul.f32 %v1033_v25, %v316_v38  ;;  %v357_v34 = vmul.f32 %v1033_v25, %v317_v39  ;;  %v358_v35 = vmul.f32 %v1033_v25, %v318_v40 }
  0x2a   : > { %v359_v36 = vmul.f32 %v1033_v25, %v319_v41  ;;  %v360_v37 = vmul.f32 %v1033_v25, %v320_v42  ;;  %v361_v46 = vmul.f32 %v1033_v25, %v321_v43  ;;  %v362_v47 = vmul.f32 %v1033_v25, %v322_v44 }
  0x2b   : > { %v387_v51 = vmax.f32 %v355_v32, 0.0  ;;  %v388_v14 = vmax.f32 %v356_v33, 0.0  ;;  %v389_v52 = vmax.f32 %v357_v34, 0.0  ;;  %v390_v53 = vmax.f32 %v358_v35, 0.0 }
  0x2c   : > { %v391_v29 = vmax.f32 %v359_v36, 0.0  ;;  %v392_v38 = vmax.f32 %v360_v37, 0.0  ;;  %v393_v39 = vmax.f32 %v361_v46, 0.0  ;;  %v394_v40 = vmax.f32 %v362_v47, 0.0 }
  0x2d   : > { %v730_v41 = vpack.c.bf16 %v387_v51, %v387_v51  ;;  %v731_v42 = vpack.c.bf16 %v388_v14, %v388_v14  ;;  %v732_v43 = vpack.c.bf16 %v389_v52, %v389_v52  ;;  %v733_v44 = vpack.c.bf16 %v390_v53, %v390_v53 }
  0x2e   : > { %v734_v58 = vpack.c.bf16 %v391_v29, %v391_v29  ;;  %v735_v59 = vpack.c.bf16 %v392_v38, %v392_v38  ;;  %v736_v60 = vpack.c.bf16 %v393_v39, %v393_v39  ;;  %v737_v61 = vpack.c.bf16 %v394_v40, %v394_v40 }
  0x2f   : > { %548 = vst.msk [vmem:[%s1070_s28] sm:$0xf] %vm547_vm0, %v730_v41  ;;  %549 = vst.msk [vmem:[%s1070_s28 + $0x4] sm:$0xf] %vm547_vm0, %v731_v42  ;;  %v363_v62 = vmul.f32 %v1033_v25, %v974_v45  ;;  %v364_v63 = vmul.f32 %v1033_v25, %v979_v48  ;;  %v365_v0 = vmul.f32 %v1033_v25, %v982_v49 }
  0x30   : > { %550 = vst.msk [vmem:[%s1070_s28 + $0x8] sm:$0xf] %vm547_vm0, %v732_v43  ;;  %551 = vst.msk [vmem:[%s1070_s28 + $0xc] sm:$0xf] %vm547_vm0, %v733_v44  ;;  %v366_v1 = vmul.f32 %v1033_v25, %v985_v50  ;;  %v367_v45 = vmul.f32 %v1033_v25, %v990_v54  ;;  %v368_v48 = vmul.f32 %v1033_v25, %v993_v55 }
  0x31   : > { %552 = vst.msk [vmem:[%s1070_s28 + $0x10] sm:$0xf] %vm547_vm0, %v734_v58  ;;  %553 = vst.msk [vmem:[%s1070_s28 + $0x14] sm:$0xf] %vm547_vm0, %v735_v59  ;;  %v369_v49 = vmul.f32 %v1033_v25, %v996_v56  ;;  %v370_v50 = vmul.f32 %v1033_v25, %v999_v57  ;;  %v395_v2 = vmax.f32 %v363_v62, 0.0  ;;  %v396_v3 = vmax.f32 %v364_v63, 0.0 }
  0x32   : > { %554 = vst.msk [vmem:[%s1070_s28 + $0x18] sm:$0xf] %vm547_vm0, %v736_v60  ;;  %555 = vst.msk [vmem:[%s1070_s28 + $0x1c] sm:$0xf] %vm547_vm0, %v737_v61  ;;  %v397_v5 = vmax.f32 %v365_v0, 0.0  ;;  %v398_v7 = vmax.f32 %v366_v1, 0.0  ;;  %v371_v33 = vmul.f32 %v1033_v25, %v1005_v6  ;;  %v372_v34 = vmul.f32 %v1033_v25, %v1008_v16 }
  0x33   : > { %v399_v9 = vmax.f32 %v367_v45, 0.0  ;;  %v400_v10 = vmax.f32 %v368_v48, 0.0  ;;  %v401_v54 = vmax.f32 %v369_v49, 0.0  ;;  %v402_v11 = vmax.f32 %v370_v50, 0.0 }
  0x34   : > { %v738_v12 = vpack.c.bf16 %v395_v2, %v395_v2  ;;  %v739_v55 = vpack.c.bf16 %v396_v3, %v396_v3  ;;  %v740_v56 = vpack.c.bf16 %v397_v5, %v397_v5  ;;  %v741_v13 = vpack.c.bf16 %v398_v7, %v398_v7 }
  0x35   : > { %v742_v57 = vpack.c.bf16 %v399_v9, %v399_v9  ;;  %v743_v15 = vpack.c.bf16 %v400_v10, %v400_v10  ;;  %v744_v20 = vpack.c.bf16 %v401_v54, %v401_v54  ;;  %v745_v32 = vpack.c.bf16 %v402_v11, %v402_v11 }
  0x36   : > { %556 = vst.msk [vmem:[%s1070_s28 + $0x20] sm:$0xf] %vm547_vm0, %v738_v12  ;;  %557 = vst.msk [vmem:[%s1070_s28 + $0x24] sm:$0xf] %vm547_vm0, %v739_v55  ;;  %v373_v35 = vmul.f32 %v1033_v25, %v1011_v17  ;;  %v374_v36 = vmul.f32 %v1033_v25, %v1014_v18  ;;  %v375_v6 = vmul.f32 %v1033_v25, %v1017_v19  ;;  %v403_v37 = vmax.f32 %v371_v33, 0.0 }
  0x37   : > { %558 = vst.msk [vmem:[%s1070_s28 + $0x28] sm:$0xf] %vm547_vm0, %v740_v56  ;;  %559 = vst.msk [vmem:[%s1070_s28 + $0x2c] sm:$0xf] %vm547_vm0, %v741_v13  ;;  %v376_v16 = vmul.f32 %v1033_v25, %v1020_v21  ;;  %v377_v17 = vmul.f32 %v1033_v25, %v1023_v22  ;;  %v378_v18 = vmul.f32 %v1033_v25, %v1026_v23  ;;  %v404_v46 = vmax.f32 %v372_v34, 0.0 }
  0x38   : > { %560 = vst.msk [vmem:[%s1070_s28 + $0x30] sm:$0xf] %vm547_vm0, %v742_v57  ;;  %561 = vst.msk [vmem:[%s1070_s28 + $0x34] sm:$0xf] %vm547_vm0, %v743_v15  ;;  %v405_v47 = vmax.f32 %v373_v35, 0.0  ;;  %v406_v51 = vmax.f32 %v374_v36, 0.0  ;;  %v746_v29 = vpack.c.bf16 %v403_v37, %v403_v37  ;;  %v379_v42 = vmul.f32 %v1033_v25, %v1029_v24 }
  0x39   : > { %562 = vst.msk [vmem:[%s1070_s28 + $0x38] sm:$0xf] %vm547_vm0, %v744_v20  ;;  %563 = vst.msk [vmem:[%s1070_s28 + $0x3c] sm:$0xf] %vm547_vm0, %v745_v32  ;;  %v407_v14 = vmax.f32 %v375_v6, 0.0  ;;  %v408_v52 = vmax.f32 %v376_v16, 0.0  ;;  %v747_v21 = vpack.c.bf16 %v404_v46, %v404_v46  ;;  %v380_v43 = vmul.f32 %v1033_v25, %v1036_v26 }
  0x3a   : > { %v409_v19 = vmax.f32 %v377_v17, 0.0  ;;  %v410_v53 = vmax.f32 %v378_v18, 0.0  ;;  %v748_v22 = vpack.c.bf16 %v405_v47, %v405_v47  ;;  %v749_v38 = vpack.c.bf16 %v406_v51, %v406_v51  ;;  %564 = vst.msk [vmem:[%s1070_s28 + $0x40] sm:$0xf] %vm547_vm0, %v746_v29 }
  0x3b   : > { %v750_v23 = vpack.c.bf16 %v407_v14, %v407_v14  ;;  %v751_v39 = vpack.c.bf16 %v408_v52, %v408_v52  ;;  %565 = vst.msk [vmem:[%s1070_s28 + $0x44] sm:$0xf] %vm547_vm0, %v747_v21  ;;  %v381_v44 = vmul.f32 %v1033_v25, %v1039_v27  ;;  %v382_v58 = vmul.f32 %v1033_v25, %v1042_v28 }
  0x3c   : > { %v752_v40 = vpack.c.bf16 %v409_v19, %v409_v19  ;;  %v753_v41 = vpack.c.bf16 %v410_v53, %v410_v53  ;;  %566 = vst.msk [vmem:[%s1070_s28 + $0x48] sm:$0xf] %vm547_vm0, %v748_v22  ;;  %567 = vst.msk [vmem:[%s1070_s28 + $0x4c] sm:$0xf] %vm547_vm0, %v749_v38  ;;  %v383_v24 = vmul.f32 %v1033_v25, %v1045_v30  ;;  %v411_v59 = vmax.f32 %v379_v42, 0.0 }
  0x3d   : > { %568 = vst.msk [vmem:[%s1070_s28 + $0x50] sm:$0xf] %vm547_vm0, %v750_v23  ;;  %569 = vst.msk [vmem:[%s1070_s28 + $0x54] sm:$0xf] %vm547_vm0, %v751_v39  ;;  %v384_v26 = vmul.f32 %v1033_v25, %v1048_v31  ;;  %v385_v27 = vmul.f32 %v1033_v25, %v1051_v4  ;;  %v386_v28 = vmul.f32 %v1033_v25, %v1054_v8  ;;  %v412_v60 = vmax.f32 %v380_v43, 0.0 }
  0x3e   : > { %570 = vst.msk [vmem:[%s1070_s28 + $0x58] sm:$0xf] %vm547_vm0, %v752_v40  ;;  %571 = vst.msk [vmem:[%s1070_s28 + $0x5c] sm:$0xf] %vm547_vm0, %v753_v41  ;;  %v413_v61 = vmax.f32 %v381_v44, 0.0  ;;  %v414_v62 = vmax.f32 %v382_v58, 0.0  ;;  %v754_v4 = vpack.c.bf16 %v411_v59, %v411_v59 }
  0x3f   : > { %v415_v63 = vmax.f32 %v383_v24, 0.0  ;;  %v416_v30 = vmax.f32 %v384_v26, 0.0  ;;  %v417_v0 = vmax.f32 %v385_v27, 0.0  ;;  %v418_v31 = vmax.f32 %v386_v28, 0.0 }
  0x40   : > { %v755_v1 = vpack.c.bf16 %v412_v60, %v412_v60  ;;  %v756_v45 = vpack.c.bf16 %v413_v61, %v413_v61  ;;  %v757_v25 = vpack.c.bf16 %v414_v62, %v414_v62  ;;  %572 = vst.msk [vmem:[%s1070_s28 + $0x60] sm:$0xf] %vm547_vm0, %v754_v4 }
  0x41   : > { %v758_v8 = vpack.c.bf16 %v415_v63, %v415_v63  ;;  %v759_v48 = vpack.c.bf16 %v416_v30, %v416_v30  ;;  %v760_v49 = vpack.c.bf16 %v417_v0, %v417_v0  ;;  %v761_v50 = vpack.c.bf16 %v418_v31, %v418_v31 }
  0x42   : > { %573 = vst.msk [vmem:[%s1070_s28 + $0x64] sm:$0xf] %vm547_vm0, %v755_v1  ;;  %574 = vst.msk [vmem:[%s1070_s28 + $0x68] sm:$0xf] %vm547_vm0, %v756_v45 }
  0x43   : > { %575 = vst.msk [vmem:[%s1070_s28 + $0x6c] sm:$0xf] %vm547_vm0, %v757_v25  ;;  %576 = vst.msk [vmem:[%s1070_s28 + $0x70] sm:$0xf] %vm547_vm0, %v758_v8 }
  0x44   : > { %577 = vst.msk [vmem:[%s1070_s28 + $0x74] sm:$0xf] %vm547_vm0, %v759_v48  ;;  %578 = vst.msk [vmem:[%s1070_s28 + $0x78] sm:$0xf] %vm547_vm0, %v760_v49 }
  0x45   : > { %579 = vst.msk [vmem:[%s1070_s28 + $0x7c] sm:$0xf] %vm547_vm0, %v761_v50 }
  0x46 PF: > { %s13_s14 = sadd.s32 1, %s889_s14   ;;  %s1197_s12 = smov %s885_s13 }
  0x47   : > { %p10_p5 = scmp.ge.s32.totalorder %s13_s14, 4   ;;  %s1198_s13 = smov %s1200_s15 }
  0x49   :  { %12 = sbr.rel (!%p10_p5) target bundleno = 2 (0x2), region = 68 }

// kernel: generator_forward.62
= control target key start
LH: loop header
LB: loop body
LE: loop exit
PB: predicated region body
PF: predicated region fallthrough
CT: control target
= control target key end

     0   :  { %s421_s9 = smov 0   ;;  %s423_s10 = smov 0   ;;  %s462_s0 = inlined_call_operand.vmem [shape: bf16[2,64,128], index: 0, kind: input, shape index: {}]   ;;  %s463_s1 = inlined_call_operand.vmem [shape: f32[2,1,128], index: 1, kind: output, shape index: {0}]   ;;  %s464_s2 = inlined_call_operand.vmem [shape: f32[2,1,128], index: 2, kind: output, shape index: {1}]  }
   0x1   :  { %s425_s11 = smov 0  }
   0x2 LB: > { %s25_s12 = sadd.s32 1, %s400_s10  ;;  %p333_p0 = scmp.ge.s32.totalorder %s404_s11, 1  ;;  %s404_s11 = sphi %s425_s11, %s13_s11   ;;  %s400_s10 = sphi %s423_s10, %s466_s10   ;;  %s396_s9 = sphi %s421_s9, %s465_s9  }
   0x3   : > { %p27_p1 = scmp.ge.s32.totalorder %s25_s12, 2  ;;  %p134_p2 = scmp.lt.s32.totalorder %s404_s11, 3 }
   0x5   : > { %s468_s12 = smov (%p27_p1, %s25_s12), 0  ;;  %p135_p3 = pnand %p333_p0, %p134_p2 }
   0x6   : > { %p162_p4 = scmp.lt.s32.totalorder (!%p135_p3), %s396_s9, 1 }
   0x7   : > { %138 = sbr.rel (%p135_p3) target bundleno = 47 (0x2f), region = 24 }
   0xc   : > { %s470_s9 = smov (!%p162_p4, %s396_s9), 1 }
   0xd   : > { %s338_s13 = sshll.u32 %s470_s9, 5  ;;  %s173_s19 = scalar_lea.vmem %s463_s1, %s470_s9 }
   0xe   : > { %s169_s16 = scalar_lea.vmem %s462_s0, %s338_s13  ;;  %s176_s22 = scalar_lea.vmem %s464_s2, %s470_s9 }
   0xf   : > { %v340_v0 = vld [vmem:[%s169_s16] sm:$0xff]   ;;  %v355_v1 = vld [vmem:[%s169_s16 + $0x8] sm:$0xff]   ;;  %v356_v2 = vld [vmem:[%s169_s16 + $0x10] sm:$0xff]  }
  0x10   : > { %v341_v3 = vunpack.c.l.bf16 %v340_v0  ;;  %v342_v4 = vunpack.c.h.bf16 %v340_v0  ;;  %v345_v5 = vunpack.c.l.bf16 %v355_v1  ;;  %v346_v6 = vunpack.c.h.bf16 %v355_v1  ;;  %v357_v12 = vld [vmem:[%s169_s16 + $0x18] sm:$0xff]  }
  0x11   : > { %v349_v7 = vunpack.c.l.bf16 %v356_v2  ;;  %v350_v13 = vunpack.c.h.bf16 %v356_v2  ;;  %v353_v17 = vunpack.c.l.bf16 %v357_v12  ;;  %v354_v21 = vunpack.c.h.bf16 %v357_v12 }
  0x12   : > { %v193_v8 = vadd.f32 %v342_v4, %v341_v3  ;;  %v206_v9 = vmul.f32 %v341_v3, %v341_v3  ;;  %v207_v10 = vmul.f32 %v342_v4, %v342_v4  ;;  %v208_v11 = vmul.f32 %v345_v5, %v345_v5 }
  0x13   : > { %v209_v15 = vmul.f32 %v346_v6, %v346_v6  ;;  %v210_v19 = vmul.f32 %v349_v7, %v349_v7  ;;  %v211_v23 = vmul.f32 %v350_v13, %v350_v13  ;;  %v212_v26 = vmul.f32 %v353_v17, %v353_v17 }
  0x14   : > { %v194_v14 = vadd.f32 %v345_v5, %v193_v8  ;;  %v214_v16 = vadd.f32 %v207_v10, %v206_v9  ;;  %v213_v29 = vmul.f32 %v354_v21, %v354_v21 }
  0x16   : > { %v195_v18 = vadd.f32 %v346_v6, %v194_v14  ;;  %v215_v20 = vadd.f32 %v214_v16, %v208_v11 }
  0x18   : > { %v196_v22 = vadd.f32 %v349_v7, %v195_v18  ;;  %v216_v24 = vadd.f32 %v215_v20, %v209_v15 }
  0x1a   : > { %v197_v25 = vadd.f32 %v350_v13, %v196_v22  ;;  %v217_v27 = vadd.f32 %v216_v24, %v210_v19 }
  0x1c   : > { %v198_v28 = vadd.f32 %v353_v17, %v197_v25  ;;  %v218_v30 = vadd.f32 %v217_v27, %v211_v23 }
  0x1e   : > { %v199_v31 = vadd.f32 %v354_v21, %v198_v28  ;;  %v219_v32 = vadd.f32 %v218_v30, %v212_v26 }
  0x20   : > { %v200_v33 = vrot.slane %v199_v31, 4  ;;  %v220_v34 = vadd.f32 %v219_v32, %v213_v29 }
  0x22   : > { %v201_v35 = vadd.f32 %v200_v33, %v199_v31  ;;  %v221_v36 = vrot.slane %v220_v34, 4 }
  0x24   : > { %v202_v37 = vrot.slane %v201_v35, 2  ;;  %v222_v38 = vadd.f32 %v221_v36, %v220_v34 }
  0x26   : > { %v203_v39 = vadd.f32 %v202_v37, %v201_v35  ;;  %v223_v40 = vrot.slane %v222_v38, 2 }
  0x28   : > { %v204_v41 = vrot.slane %v203_v39, 1  ;;  %v224_v42 = vadd.f32 %v223_v40, %v222_v38 }
  0x2a   : > { %v205_v43 = vadd.f32 %v204_v41, %v203_v39  ;;  %v225_v44 = vrot.slane %v224_v42, 1 }
  0x2c   : > { %231 = vst [vmem:[%s173_s19] sm:$0x1] %v205_v43  ;;  %v226_v45 = vadd.f32 %v225_v44, %v224_v42 }
  0x2e   : > { %232 = vst [vmem:[%s176_s22] sm:$0x1] %v226_v45 }
  0x2f PF: > { %s13_s11 = sadd.s32 1, %s404_s11   ;;  %s465_s9 = smov %s400_s10 }
  0x30   : > { %p10_p5 = scmp.ge.s32.totalorder %s13_s11, 4   ;;  %s466_s10 = smov %s468_s12 }
  0x32   :  { %12 = sbr.rel (!%p10_p5) target bundleno = 2 (0x2), region = 74 }

// kernel: generator_forward.61
= control target key start
LH: loop header
LB: loop body
LE: loop exit
PB: predicated region body
PF: predicated region fallthrough
CT: control target
= control target key end

     0   :  { %vm558_vm0 = vcmask 523264   ;;  %s1762_s1 = inlined_call_operand.vmem [shape: bf16[576,128], index: 1, kind: input, shape index: {}]   ;;  %s1763_s0 = inlined_call_operand.vmem [shape: bf16[128,576], index: 0, kind: input, shape index: {}]   ;;  %s1764_s2 = inlined_call_operand.vmem [shape: f32[1,128], index: 2, kind: input, shape index: {}]   ;;  %s1765_s3 = inlined_call_operand.vmem [shape: bf16[128,128], index: 3, kind: output, shape index: {}]  }
   0x1   :  { %v1294_v0 = vld [vmem:[%s1762_s1 + $0x78] sm:$0xff]   ;;  %v1298_v4 = vld [vmem:[%s1762_s1 + $0x70] sm:$0xff]   ;;  %v1302_v8 = vld [vmem:[%s1762_s1 + $0x68] sm:$0xff]  }
   0x2   :  { %v1295_v1 = vld [vmem:[%s1762_s1 + $0xf8] sm:$0xff]   ;;  %1122 = vmatprep.subr.bf16.mxu0 %v1294_v0  ;;  %v1299_v5 = vld [vmem:[%s1762_s1 + $0xf0] sm:$0xff]   ;;  %v1303_v9 = vld [vmem:[%s1762_s1 + $0xe8] sm:$0xff]  }
   0x3   :  { %v1296_v2 = vld [vmem:[%s1762_s1 + $0x38] sm:$0xff]   ;;  %1186 = vmatprep.subr.bf16.mxu1 %v1295_v1  ;;  %v1300_v6 = vld [vmem:[%s1762_s1 + $0x30] sm:$0xff]   ;;  %v1304_v10 = vld [vmem:[%s1762_s1 + $0x28] sm:$0xff]  }
   0x4   :  { %v1297_v3 = vld [vmem:[%s1762_s1 + $0xb8] sm:$0xff]   ;;  %1123 = vmatpush3.bf16.msra.mxu0 %v1296_v2  ;;  %v1301_v7 = vld [vmem:[%s1762_s1 + $0xb0] sm:$0xff]   ;;  %v1305_v11 = vld [vmem:[%s1762_s1 + $0xa8] sm:$0xff]  }
   0x5   :  { %1187 = vmatpush3.bf16.msra.mxu1 %v1297_v3  ;;  %1124 = vmatprep.subr.bf16.mxu0 %v1298_v4  ;;  %v1306_v12 = vld [vmem:[%s1762_s1 + $0x60] sm:$0xff]   ;;  %v1310_v16 = vld [vmem:[%s1762_s1 + $0x58] sm:$0xff]   ;;  %v1314_v20 = vld [vmem:[%s1762_s1 + $0x50] sm:$0xff]  }
   0x6   :  { %1188 = vmatprep.subr.bf16.mxu1 %v1299_v5  ;;  %v1307_v13 = vld [vmem:[%s1762_s1 + $0xe0] sm:$0xff]   ;;  %v1311_v17 = vld [vmem:[%s1762_s1 + $0xd8] sm:$0xff]   ;;  %v1315_v21 = vld [vmem:[%s1762_s1 + $0xd0] sm:$0xff]  }
   0x7   :  { %v1308_v14 = vld [vmem:[%s1762_s1 + $0x20] sm:$0xff]   ;;  %v1312_v18 = vld [vmem:[%s1762_s1 + $0x18] sm:$0xff]   ;;  %v1316_v22 = vld [vmem:[%s1762_s1 + $0x10] sm:$0xff]  }
   0x8   :  { %1125 = vmatpush3.bf16.msra.mxu0 %v1300_v6  ;;  %v1309_v15 = vld [vmem:[%s1762_s1 + $0xa0] sm:$0xff]   ;;  %v1313_v19 = vld [vmem:[%s1762_s1 + $0x98] sm:$0xff]   ;;  %v1317_v23 = vld [vmem:[%s1762_s1 + $0x90] sm:$0xff]  }
   0x9   :  { %1189 = vmatpush3.bf16.msra.mxu1 %v1301_v7  ;;  %1126 = vmatprep.subr.bf16.mxu0 %v1302_v8  ;;  %v1318_v24 = vld [vmem:[%s1762_s1 + $0x48] sm:$0xff]   ;;  %v1322_v28 = vld [vmem:[%s1762_s1 + $0x40] sm:$0xff]   ;;  %v1332_v36 = vld [vmem:[%s1762_s1 + $0x118] sm:$0xff]  }
   0xa   :  { %1190 = vmatprep.subr.bf16.mxu1 %v1303_v9  ;;  %v1319_v25 = vld [vmem:[%s1762_s1 + $0xc8] sm:$0xff]   ;;  %v1323_v29 = vld [vmem:[%s1762_s1 + $0xc0] sm:$0xff]   ;;  %v1345_v42 = vld [vmem:[%s1762_s1 + $0x110] sm:$0xff]  }
   0xb   :  { %v1320_v26 = vld [vmem:[%s1762_s1 + $0x8] sm:$0xff]   ;;  %v1324_v30 = vld [vmem:[%s1762_s1] sm:$0xff]   ;;  %v1341_v43 = vld [vmem:[%s1763_s0 + $0x5c] ss:$20 sps:$4 sm:$0xff]  }
   0xc   :  { %1127 = vmatpush3.bf16.msra.mxu0 %v1304_v10  ;;  %v1321_v27 = vld [vmem:[%s1762_s1 + $0x88] sm:$0xff]   ;;  %v1325_v31 = vld [vmem:[%s1762_s1 + $0x80] sm:$0xff]   ;;  %v1346_v47 = vld [vmem:[%s1763_s0 + $0x7c] ss:$20 sps:$4 sm:$0xff]  }
   0xd   :  { %1191 = vmatpush3.bf16.msra.mxu1 %v1305_v11  ;;  %1128 = vmatprep.subr.bf16.mxu0 %v1306_v12  ;;  %v1326_v32 = vld [vmem:[%s1763_s0] ss:$20 sps:$4 sm:$0xff]   ;;  %v1328_v33 = vld [vmem:[%s1763_s0 + $0x4] ss:$20 sps:$4 sm:$0xff]   ;;  %v1329_v34 = vld [vmem:[%s1763_s0 + $0x8] ss:$20 sps:$4 sm:$0xff]  }
   0xe   :  { %1192 = vmatprep.subr.bf16.mxu1 %v1307_v13  ;;  %v1331_v35 = vld [vmem:[%s1763_s0 + $0xc] ss:$20 sps:$4 sm:$0xff]   ;;  %615 = vmatprep.mubr.bf16.mxu0 %v1328_v33  ;;  %v1335_v38 = vld [vmem:[%s1763_s0 + $0x34] ss:$20 sps:$4 sm:$0xff]   ;;  %v1338_v40 = vld [vmem:[%s1763_s0 + $0x30] ss:$20 sps:$4 sm:$0xff]  }
   0xf   :  { %712 = vmatprep.mubr.bf16.mxu1 %v1331_v35  ;;  %v1333_v37 = vld [vmem:[%s1763_s0 + $0x2c] ss:$20 sps:$4 sm:$0xff]   ;;  %v1337_v39 = vld [vmem:[%s1763_s0 + $0x28] ss:$20 sps:$4 sm:$0xff]   ;;  %v1343_v44 = vld [vmem:[%s1763_s0 + $0x50] ss:$20 sps:$4 sm:$0xff]  }
  0x10   :  { %1129 = vmatpush3.bf16.msra.mxu0 %v1308_v14  ;;  %v1339_v41 = vld [vmem:[%s1763_s0 + $0x54] ss:$20 sps:$4 sm:$0xff]   ;;  %v1344_v45 = vld [vmem:[%s1763_s0 + $0x58] ss:$20 sps:$4 sm:$0xff]   ;;  %v1371_v49 = vld [vmem:[%s1762_s1 + $0x100] sm:$0xff]  }
  0x11   :  { %1193 = vmatpush3.bf16.msra.mxu1 %v1309_v15  ;;  %1130 = vmatprep.subr.bf16.mxu0 %v1310_v16  ;;  %v1358_v46 = vld [vmem:[%s1762_s1 + $0x108] sm:$0xff]   ;;  %v1348_v48 = vld [vmem:[%s1763_s0 + $0x84] ss:$20 sps:$4 sm:$0xff]   ;;  %v1351_v51 = vld [vmem:[%s1763_s0 + $0x80] ss:$20 sps:$4 sm:$0xff]  }
  0x12   :  { %1194 = vmatprep.subr.bf16.mxu1 %v1311_v17  ;;  %v1350_v50 = vld [vmem:[%s1763_s0 + $0x78] ss:$20 sps:$4 sm:$0xff]   ;;  %v1356_v54 = vld [vmem:[%s1763_s0 + $0xa0] ss:$20 sps:$4 sm:$0xff]   ;;  %v1357_v55 = vld [vmem:[%s1763_s0 + $0xa8] ss:$20 sps:$4 sm:$0xff]  }
  0x13   :  { %v1352_v52 = vld [vmem:[%s1763_s0 + $0xa4] ss:$20 sps:$4 sm:$0xff]   ;;  %v1354_v53 = vld [vmem:[%s1763_s0 + $0xac] ss:$20 sps:$4 sm:$0xff]   ;;  %v1361_v57 = vld [vmem:[%s1763_s0 + $0xd4] ss:$20 sps:$4 sm:$0xff]  }
  0x14   :  { %1131 = vmatpush3.bf16.msra.mxu0 %v1312_v18  ;;  %v1359_v56 = vld [vmem:[%s1763_s0 + $0xcc] ss:$20 sps:$4 sm:$0xff]   ;;  %v1363_v58 = vld [vmem:[%s1763_s0 + $0xc8] ss:$20 sps:$4 sm:$0xff]   ;;  %v1364_v59 = vld [vmem:[%s1763_s0 + $0xd0] ss:$20 sps:$4 sm:$0xff]  }
  0x15   :  { %1195 = vmatpush3.bf16.msra.mxu1 %v1313_v19  ;;  %1132 = vmatprep.subr.bf16.mxu0 %v1314_v20  ;;  %v1365_v60 = vld [vmem:[%s1763_s0 + $0xf4] ss:$20 sps:$4 sm:$0xff]   ;;  %v1367_v61 = vld [vmem:[%s1763_s0 + $0xfc] ss:$20 sps:$4 sm:$0xff]   ;;  %v1370_v63 = vld [vmem:[%s1763_s0 + $0xf8] ss:$20 sps:$4 sm:$0xff]  }
  0x16   :  { %1196 = vmatprep.subr.bf16.mxu1 %v1315_v21  ;;  %v1369_v62 = vld [vmem:[%s1763_s0 + $0xf0] ss:$20 sps:$4 sm:$0xff]   ;;  %v1376_v2 = vld [vmem:[%s1763_s0 + $0x118] ss:$20 sps:$4 sm:$0xff]   ;;  %v1377_v3 = vld [vmem:[%s1763_s0 + $0x120] ss:$20 sps:$4 sm:$0xff]  }
  0x17   :  { %v1372_v0 = vld [vmem:[%s1763_s0 + $0x11c] ss:$20 sps:$4 sm:$0xff]   ;;  %v1374_v1 = vld [vmem:[%s1763_s0 + $0x124] ss:$20 sps:$4 sm:$0xff]   ;;  %v1382_v8 = vld [vmem:[%s1763_s0 + $0x60] ss:$20 sps:$4 sm:$0xff]  }
  0x18   :  { %1133 = vmatpush3.bf16.msra.mxu0 %v1316_v22  ;;  %v1378_v4 = vld [vmem:[%s1763_s0 + $0x10] ss:$20 sps:$4 sm:$0xff]   ;;  %v1380_v6 = vld [vmem:[%s1763_s0 + $0x38] ss:$20 sps:$4 sm:$0xff]   ;;  %v1383_v9 = vld [vmem:[%s1763_s0 + $0x100] ss:$20 sps:$4 sm:$0xff]  }
  0x19   :  { %1197 = vmatpush3.bf16.msra.mxu1 %v1317_v23  ;;  %1134 = vmatprep.subr.bf16.mxu0 %v1318_v24  ;;  %v1379_v5 = vld [vmem:[%s1763_s0 + $0xb0] ss:$20 sps:$4 sm:$0xff]   ;;  %v1381_v7 = vld [vmem:[%s1763_s0 + $0xd8] ss:$20 sps:$4 sm:$0xff]   ;;  %v1384_v10 = vld [vmem:[%s1763_s0 + $0x88] ss:$20 sps:$4 sm:$0xff]  }
  0x1a   :  { %1198 = vmatprep.subr.bf16.mxu1 %v1319_v25  ;;  %v1385_v11 = vld [vmem:[%s1763_s0 + $0x128] ss:$20 sps:$4 sm:$0xff]   ;;  %v1645_v14 = vld [vmem:[%s1764_s2] ss:$0 sm:$0xff] }
  0x1c   :  { %1135 = vmatpush3.bf16.msra.mxu0 %v1320_v26 }
  0x1d   :  { %1199 = vmatpush3.bf16.msra.mxu1 %v1321_v27  ;;  %1136 = vmatprep.subr.bf16.mxu0 %v1322_v28 }
  0x1e   :  { %1200 = vmatprep.subr.bf16.mxu1 %v1323_v29 }
  0x20   :  { %1137 = vmatpush3.bf16.msra.mxu0 %v1324_v30 }
  0x21   :  { %1201 = vmatpush3.bf16.msra.mxu1 %v1325_v31  ;;  %1262 = vmatprep.subr.bf16.mxu0 %v1332_v36 }
  0x22   :  { %1286 = vmatprep.subr.bf16.mxu1 %v1332_v36 }
  0x23   :  { %616 = vmatmul.mubr.bf16.vlgmr.msra.gmra.mxu0 %v1326_v32 }
  0x24   :  { %713 = vmatmul.mubr.bf16.vlgmr.msra.gmra.mxu1 %v1329_v34  ;;  %1263 = vmatpush3.bf16.msra.mxu0 %v1332_v36 }
  0x25   :  { %1290 = vmatpush3.bf16.msra.mxu1 %v1332_v36  ;;  %623 = vmatprep.mubr.bf16.mxu0 %v1333_v37 }
  0x26   :  { %720 = vmatprep.mubr.bf16.mxu1 %v1335_v38  ;;  %1264 = vmatprep.subr.bf16.mxu0 %v1345_v42 }
  0x27   :  { %1287 = vmatprep.subr.bf16.mxu1 %v1345_v42 }
  0x28   :  { %1265 = vmatpush3.bf16.msra.mxu0 %v1345_v42 }
  0x29   :  { %1291 = vmatpush3.bf16.msra.mxu1 %v1345_v42  ;;  %1266 = vmatprep.subr.bf16.mxu0 %v1358_v46 }
  0x2a   :  { %1288 = vmatprep.subr.bf16.mxu1 %v1358_v46 }
  0x2b   :  { %624 = vmatmul.mubr.bf16.gmra.mxu0 %v1337_v39 }
  0x2c   :  { %721 = vmatmul.mubr.bf16.gmra.mxu1 %v1338_v40  ;;  %631 = vmatprep.mubr.bf16.mxu0 %v1339_v41 }
  0x2d   :  { %728 = vmatprep.mubr.bf16.mxu1 %v1341_v43  ;;  %1267 = vmatpush3.bf16.msra.mxu0 %v1358_v46 }
  0x2e   :  { %1292 = vmatpush3.bf16.msra.mxu1 %v1358_v46  ;;  %1268 = vmatprep.subr.bf16.mxu0 %v1371_v49 }
  0x2f   :  { %1289 = vmatprep.subr.bf16.mxu1 %v1371_v49 }
  0x31   :  { %1269 = vmatpush3.bf16.msra.mxu0 %v1371_v49 }
  0x32   :  { %1293 = vmatpush3.bf16.msra.mxu1 %v1371_v49 }
  0x33   :  { %632 = vmatmul.mubr.bf16.gmra.mxu0 %v1343_v44 }
  0x34   :  { %729 = vmatmul.mubr.bf16.gmra.mxu1 %v1344_v45  ;;  %639 = vmatprep.mubr.bf16.mxu0 %v1346_v47 }
  0x35   :  { %736 = vmatprep.mubr.bf16.mxu1 %v1348_v48 }
  0x3b   :  { %640 = vmatmul.mubr.bf16.gmra.mxu0 %v1350_v50 }
  0x3c   :  { %737 = vmatmul.mubr.bf16.gmra.mxu1 %v1351_v51  ;;  %647 = vmatprep.mubr.bf16.mxu0 %v1352_v52 }
  0x3d   :  { %744 = vmatprep.mubr.bf16.mxu1 %v1354_v53 }
  0x43   :  { %648 = vmatmul.mubr.bf16.gmra.mxu0 %v1356_v54 }
  0x44   :  { %745 = vmatmul.mubr.bf16.gmra.mxu1 %v1357_v55  ;;  %655 = vmatprep.mubr.bf16.mxu0 %v1359_v56 }
  0x45   :  { %752 = vmatprep.mubr.bf16.mxu1 %v1361_v57 }
  0x4b   :  { %656 = vmatmul.mubr.bf16.gmra.mxu0 %v1363_v58 }
  0x4c   :  { %753 = vmatmul.mubr.bf16.gmra.mxu1 %v1364_v59  ;;  %663 = vmatprep.mubr.bf16.mxu0 %v1365_v60 }
  0x4d   :  { %760 = vmatprep.mubr.bf16.mxu1 %v1367_v61 }
  0x53   :  { %664 = vmatmul.mubr.bf16.gmra.mxu0 %v1369_v62 }
  0x54   :  { %761 = vmatmul.mubr.bf16.gmra.mxu1 %v1370_v63  ;;  %671 = vmatprep.mubr.bf16.mxu0 %v1372_v0 }
  0x55   :  { %768 = vmatprep.mubr.bf16.mxu1 %v1374_v1 }
  0x5b   :  { %672 = vmatmul.mubr.bf16.gmra.mxu0 %v1376_v2 }
  0x5c   :  { %769 = vmatmul.mubr.bf16.gmra.mxu1 %v1377_v3  ;;  %1270 = vmatprep.mubr.msk.bf16.mxu0 %vm558_vm0, %v1378_v4 }
  0x5d   :  { %1278 = vmatprep.mubr.msk.bf16.mxu1 %vm558_vm0, %v1379_v5 }
  0x63   :  { %1271 = vmatmul.mubr.msk.bf16.vlgmr.msra.gmra.mxu0 %vm558_vm0, %v1380_v6 }
  0x64   :  { %1279 = vmatmul.mubr.msk.bf16.vlgmr.msra.gmra.mxu1 %vm558_vm0, %v1381_v7  ;;  %1274 = vmatprep.mubr.msk.bf16.mxu0 %vm558_vm0, %v1382_v8 }
  0x65   :  { %1282 = vmatprep.mubr.msk.bf16.mxu1 %vm558_vm0, %v1383_v9 }
  0x6b   :  { %1275 = vmatmul.mubr.msk.bf16.gmra.mxu0 %vm558_vm0, %v1384_v10 }
  0x6c   :  { %1283 = vmatmul.mubr.msk.bf16.gmra.mxu1 %vm558_vm0, %v1385_v11 }
  0xe3   :  { %v1138_v12 = vpop.f32.mrf.mxu0 }
  0xe4   :  { %v1202_v13 = vpop.f32.mrf.mxu1 }
  0xe5   :  { %v1139_v15 = vpop.f32.mrf.mxu0 }
  0xe6   :  { %v1140_v16 = vadd.f32 %v1139_v15, %v1138_v12  ;;  %v1203_v17 = vpop.f32.mrf.mxu1 }
  0xe7   :  { %v1141_v18 = vpop.f32.mrf.mxu0  ;;  %v1204_v20 = vadd.f32 %v1203_v17, %v1202_v13 }
  0xe8   :  { %v618_v19 = vadd.f32 %v1140_v16, %v1645_v14  ;;  %v1648_v21 = vpop.f32.mrf.mxu1 }
  0xe9   :  { %v1142_v22 = vpop.f32.mrf.mxu0 }
  0xea   :  { %v1650_v23 = vpop.f32.mrf.mxu1  ;;  %v1652_v24 = vadd.f32 %v1204_v20, %v618_v19  ;;  %v1143_v9 = vadd.f32 %v1142_v22, %v1141_v18 }
  0xeb   :  { %v1144_v25 = vpop.f32.mrf.mxu0  ;;  %v1207_v22 = vadd.f32 %v1650_v23, %v1648_v21 }
  0xec   :  { %v1654_v26 = vpop.f32.mrf.mxu1  ;;  %v621_v17 = vadd.f32 %v1143_v9, %v1645_v14 }
  0xed   :  { %v1145_v27 = vpop.f32.mrf.mxu0 }
  0xee   :  { %v1656_v28 = vpop.f32.mrf.mxu1  ;;  %v1146_v11 = vadd.f32 %v1145_v27, %v1144_v25 }
  0xef   :  { %v1147_v29 = vpop.f32.mrf.mxu0 }
  0xf0   :  { %v1658_v30 = vpop.f32.mrf.mxu1 }
  0xf1   :  { %v1148_v31 = vpop.f32.mrf.mxu0 }
  0xf2   :  { %v1212_v32 = vpop.f32.mrf.mxu1  ;;  %v1149_v12 = vadd.f32 %v1148_v31, %v1147_v29  ;;  %v1210_v31 = vadd.f32 %v1656_v28, %v1654_v26 }
  0xf3   :  { %v1150_v33 = vpop.f32.mrf.mxu0 }
  0xf4   :  { %v1660_v34 = vpop.f32.mrf.mxu1 }
  0xf5   :  { %v1151_v35 = vpop.f32.mrf.mxu0 }
  0xf6   :  { %v1662_v36 = vpop.f32.mrf.mxu1 }
  0xf7   :  { %v1153_v37 = vpop.f32.mrf.mxu0 }
  0xf8   :  { %v1664_v38 = vpop.f32.mrf.mxu1 }
  0xf9   :  { %v1154_v39 = vpop.f32.mrf.mxu0 }
  0xfa   :  { %v1666_v40 = vpop.f32.mrf.mxu1  ;;  %v1155_v25 = vadd.f32 %v1154_v39, %v1153_v37 }
  0xfb   :  { %1766 = vst [vmem:[#allocation2_spill] sm:$0xff] %v1666_v40  ;;  %v1156_v41 = vpop.f32.mrf.mxu0  ;;  %v1152_v40 = vadd.f32 %v1151_v35, %v1150_v33 }
  0xfc   :  { %v1668_v42 = vpop.f32.mrf.mxu1  ;;  %v1709_v26 = vadd.f32 %v1155_v25, %v1645_v14 }
  0xfd   :  { %v1157_v43 = vpop.f32.mrf.mxu0 }
  0xfe   :  { %v1670_v44 = vpop.f32.mrf.mxu1 }
  0xff   :  { %v1159_v45 = vpop.f32.mrf.mxu0 }
 0x100   :  { %v1672_v46 = vpop.f32.mrf.mxu1 }
 0x101   :  { %v1160_v47 = vpop.f32.mrf.mxu0 }
 0x102   :  { %v1674_v48 = vpop.f32.mrf.mxu1 }
 0x103   :  { %v1162_v49 = vpop.f32.mrf.mxu0 }
 0x104   :  { %v1676_v50 = vpop.f32.mrf.mxu1 }
 0x105   :  { %v1163_v51 = vpop.f32.mrf.mxu0 }
 0x106   :  { %v1227_v52 = vpop.f32.mrf.mxu1 }
 0x107   :  { %v1165_v53 = vpop.f32.mrf.mxu0 }
 0x108   :  { %v1678_v54 = vpop.f32.mrf.mxu1 }
 0x109   :  { %v1166_v55 = vpop.f32.mrf.mxu0 }
 0x10a   :  { %v1230_v56 = vpop.f32.mrf.mxu1  ;;  %v1167_v27 = vadd.f32 %v1166_v55, %v1165_v53 }
 0x10b   :  { %v1168_v57 = vpop.f32.mrf.mxu0  ;;  %v1231_v55 = vadd.f32 %v1230_v56, %v1678_v54 }
 0x10c   :  { %v1232_v58 = vpop.f32.mrf.mxu1  ;;  %v653_v28 = vadd.f32 %v1167_v27, %v1645_v14 }
 0x10d   :  { %v1169_v59 = vpop.f32.mrf.mxu0 }
 0x10e   :  { %v1233_v60 = vpop.f32.mrf.mxu1  ;;  %v1170_v19 = vadd.f32 %v1169_v59, %v1168_v57  ;;  %v1213_v57 = vadd.f32 %v1212_v32, %v1658_v30  ;;  %v1158_v59 = vadd.f32 %v1157_v43, %v1156_v41  ;;  %v750_v25 = vadd.f32 %v1231_v55, %v653_v28 }
 0x10f   :  { %v1171_v61 = vpop.f32.mrf.mxu0  ;;  %v1234_v30 = vadd.f32 %v1233_v60, %v1232_v58 }
 0x110   :  { %v1235_v62 = vpop.f32.mrf.mxu1  ;;  %v658_v9 = vadd.f32 %v1170_v19, %v1645_v14  ;;  %v642_v43 = vadd.f32 %v1158_v59, %v1645_v14 }
 0x111   :  { %v1172_v63 = vpop.f32.mrf.mxu0 }
 0x112   :  { %v1236_v0 = vpop.f32.mrf.mxu1  ;;  %v1173_v20 = vadd.f32 %v1172_v63, %v1171_v61  ;;  %v1161_v61 = vadd.f32 %v1160_v47, %v1159_v45 }
 0x113   :  { %v1174_v1 = vpop.f32.mrf.mxu0  ;;  %v1237_v32 = vadd.f32 %v1236_v0, %v1235_v62 }
 0x114   :  { %v1680_v2 = vpop.f32.mrf.mxu1  ;;  %v661_v33 = vadd.f32 %v1173_v20, %v1645_v14  ;;  %v645_v45 = vadd.f32 %v1161_v61, %v1645_v14 }
 0x115   :  { %1767 = vst [vmem:[#allocation3_spill] sm:$0xff] %v1680_v2  ;;  %v1175_v3 = vpop.f32.mrf.mxu0  ;;  %v626_v2 = vadd.f32 %v1146_v11, %v1645_v14 }
 0x116   :  { %v1682_v4 = vpop.f32.mrf.mxu1  ;;  %v758_v11 = vadd.f32 %v1237_v32, %v661_v33 }
 0x117   :  { %1768 = vst [vmem:[#allocation4_spill] sm:$0xff] %v1682_v4  ;;  %v1177_v5 = vpop.f32.mrf.mxu0  ;;  %v723_v23 = vadd.f32 %v1210_v31, %v626_v2 }
 0x118   :  { %v1684_v6 = vpop.f32.mrf.mxu1 }
 0x119   :  { %1769 = vst [vmem:[#allocation5_spill] sm:$0xff] %v1684_v6  ;;  %v1178_v7 = vpop.f32.mrf.mxu0  ;;  %v629_v6 = vadd.f32 %v1149_v12, %v1645_v14  ;;  %v1176_v12 = vadd.f32 %v1175_v3, %v1174_v1 }
 0x11a   :  { %v1686_v8 = vpop.f32.mrf.mxu1  ;;  %v1179_v62 = vadd.f32 %v1178_v7, %v1177_v5  ;;  %v1222_v5 = vadd.f32 %v1670_v44, %v1668_v42  ;;  %v1225_v7 = vadd.f32 %v1674_v48, %v1672_v46  ;;  %v1216_v46 = vadd.f32 %v1662_v36, %v1660_v34  ;;  %v1771_v48 = vld [vmem:[#allocation2_spill] sm:$0xff] }
 0x11b   :  { %1770 = vst [vmem:[#allocation6_spill] sm:$0xff] %v1686_v8  ;;  %v1180_v10 = vpop.f32.mrf.mxu0  ;;  %v1164_v8 = vadd.f32 %v1163_v51, %v1162_v49  ;;  %v718_v49 = vadd.f32 %v1207_v22, %v621_v17  ;;  %v1705_v51 = vadd.f32 %v1152_v40, %v1645_v14  ;;  %v726_v39 = vadd.f32 %v1213_v57, %v629_v6 }
 0x11c   :  { %v1688_v13 = vpop.f32.mrf.mxu1  ;;  %v1228_v40 = vadd.f32 %v1227_v52, %v1676_v50  ;;  %v755_v6 = vadd.f32 %v1234_v30, %v658_v9  ;;  %v669_v57 = vadd.f32 %v1179_v62, %v1645_v14  ;;  %v1219_v9 = vadd.f32 %v1771_v48, %v1664_v38 }
 0x11d   :  { %v1181_v15 = vpop.f32.mrf.mxu0  ;;  %v650_v21 = vadd.f32 %v1164_v8, %v1645_v14 }
 0x11e   :  { %v1690_v16 = vpop.f32.mrf.mxu1  ;;  %v1182_v47 = vadd.f32 %v1181_v15, %v1180_v10  ;;  %v734_v30 = vadd.f32 %v1219_v9, %v1709_v26 }
 0x11f   :  { %v1183_v4 = vpop.f32.mrf.mxu0  ;;  %v747_v19 = vadd.f32 %v1228_v40, %v650_v21  ;;  %v1246_v59 = vadd.f32 %v1690_v16, %v1688_v13  ;;  %v742_v16 = vadd.f32 %v1225_v7, %v645_v45 }
 0x120   :  { %v1695_v18 = vpop.f32.mrf.mxu1  ;;  %v674_v50 = vadd.f32 %v1182_v47, %v1645_v14 }
 0x121   :  { %v1184_v29 = vpop.f32.mrf.mxu0 }
 0x122   :  { %v1248_v63 = vpop.f32.mrf.mxu1  ;;  %v1185_v2 = vadd.f32 %v1184_v29, %v1183_v4  ;;  %v666_v29 = vadd.f32 %v1176_v12, %v1645_v14  ;;  %v771_v34 = vadd.f32 %v1246_v59, %v674_v50 }
 0x123   :  { %v1272_v35 = vpop.f32.mrf.mxu0  ;;  %v1249_v61 = vadd.f32 %v1248_v63, %v1695_v18  ;;  %v1772_v18 = vld [vmem:[#allocation3_spill] sm:$0xff]  ;;  %v1773_v63 = vld [vmem:[#allocation4_spill] sm:$0xff] }
 0x124   :  { %v1280_v37 = vpop.f32.mrf.mxu1  ;;  %v820_v17 = vadd.f32 %v1272_v35, %v723_v23  ;;  %v677_v4 = vadd.f32 %v1185_v2, %v1645_v14  ;;  %v739_v14 = vadd.f32 %v1222_v5, %v642_v43  ;;  %v1240_v33 = vadd.f32 %v1773_v63, %v1772_v18  ;;  %v1774_v35 = vld [vmem:[#allocation5_spill] sm:$0xff] }
 0x125   :  { %v811_v41 = vpop.f32.mrf.mxu0  ;;  %v852_v0 = vadd.f32 %v1280_v37, %v755_v6  ;;  %v731_v37 = vadd.f32 %v1216_v46, %v1705_v51 }
 0x126   :  { %v843_v53 = vpop.f32.mrf.mxu1  ;;  %v812_v52 = vadd.f32 %v811_v41, %v1652_v24  ;;  %v774_v38 = vadd.f32 %v1249_v61, %v677_v4  ;;  %v763_v41 = vadd.f32 %v1240_v33, %v666_v29 }
 0x127   :  { %v1273_v8 = vpop.f32.mrf.mxu0  ;;  %v844_v15 = vadd.f32 %v843_v53, %v747_v19 }
 0x128   :  { %v823_v58 = vadd.f32 %v1273_v8, %v726_v39  ;;  %v1281_v60 = vpop.f32.mrf.mxu1 }
 0x129   :  { %v855_v20 = vadd.f32 %v1281_v60, %v758_v11  ;;  %v814_v22 = vpop.f32.mrf.mxu0 }
 0x12a   :  { %v1083_v10 = vpack.c.bf16 %v823_v58, %v820_v17  ;;  %v815_v54 = vadd.f32 %v814_v22, %v718_v49  ;;  %v846_v56 = vpop.f32.mrf.mxu1  ;;  %v1775_v49 = vld [vmem:[#allocation6_spill] sm:$0xff] }
 0x12b   :  { %v1103_v1 = vpack.c.bf16 %v855_v20, %v852_v0  ;;  %v847_v3 = vadd.f32 %v846_v56, %v750_v25  ;;  %v1276_v27 = vpop.f32.mrf.mxu0  ;;  %v1243_v21 = vadd.f32 %v1775_v49, %v1774_v35 }
 0x12c   :  { %1115 = vst [vmem:[%s1765_s3 + $0x8] sm:$0xff] %v1083_v10   ;;  %v1078_v24 = vpack.c.bf16 %v815_v54, %v812_v52  ;;  %v1284_v31 = vpop.f32.mrf.mxu1  ;;  %v836_v23 = vadd.f32 %v1276_v27, %v739_v14 }
 0x12d   :  { %1119 = vst [vmem:[%s1765_s3 + $0x28] sm:$0xff] %v1103_v1   ;;  %v1098_v42 = vpack.c.bf16 %v847_v3, %v844_v15  ;;  %v827_v44 = vpop.f32.mrf.mxu0  ;;  %v868_v32 = vadd.f32 %v1284_v31, %v771_v34  ;;  %v766_v40 = vadd.f32 %v1243_v21, %v669_v57 }
 0x12e   :  { %1079 = vst [vmem:[%s1765_s3] sm:$0xff] %v1078_v24   ;;  %v859_v13 = vpop.f32.mrf.mxu1  ;;  %v828_v47 = vadd.f32 %v827_v44, %v731_v37 }
 0x12f   :  { %1118 = vst [vmem:[%s1765_s3 + $0x20] sm:$0xff] %v1098_v42   ;;  %v1277_v36 = vpop.f32.mrf.mxu0  ;;  %v860_v6 = vadd.f32 %v859_v13, %v763_v41 }
 0x130   :  { %v839_v39 = vadd.f32 %v1277_v36, %v742_v16  ;;  %v1285_v28 = vpop.f32.mrf.mxu1 }
 0x131   :  { %v871_v43 = vadd.f32 %v1285_v28, %v774_v38  ;;  %v830_v45 = vpop.f32.mrf.mxu0 }
 0x132   :  { %v1093_v53 = vpack.c.bf16 %v839_v39, %v836_v23  ;;  %v831_v55 = vadd.f32 %v830_v45, %v734_v30  ;;  %v862_v2 = vpop.f32.mrf.mxu1 }
 0x133   :  { %v1113_v8 = vpack.c.bf16 %v871_v43, %v868_v32  ;;  %v863_v11 = vadd.f32 %v862_v2, %v766_v40 }
 0x134   :  { %1117 = vst [vmem:[%s1765_s3 + $0x18] sm:$0xff] %v1093_v53   ;;  %v1088_v51 = vpack.c.bf16 %v831_v55, %v828_v47 }
 0x135   :  { %1121 = vst [vmem:[%s1765_s3 + $0x38] sm:$0xff] %v1113_v8   ;;  %v1108_v26 = vpack.c.bf16 %v863_v11, %v860_v6 }
 0x136   :  { %1116 = vst [vmem:[%s1765_s3 + $0x10] sm:$0xff] %v1088_v51  }
 0x137   :  { %1120 = vst [vmem:[%s1765_s3 + $0x30] sm:$0xff] %v1108_v26  }

// kernel: generator_forward.63
= control target key start
LH: loop header
LB: loop body
LE: loop exit
PB: predicated region body
PF: predicated region fallthrough
CT: control target
= control target key end

     0   :  { %s585_s12 = smov 0   ;;  %s587_s13 = smov 0   ;;  %s633_s0 = inlined_call_operand.vmem [shape: bf16[2,64,128], index: 0, kind: input, shape index: {}]   ;;  %s634_s1 = inlined_call_operand.vmem [shape: f32[2,1,128], index: 1, kind: input, shape index: {}]   ;;  %s635_s2 = inlined_call_operand.vmem [shape: f32[2,1,128], index: 2, kind: input, shape index: {}]   ;;  %s636_s3 = inlined_call_operand.vmem [shape: bf16[2,64,128], index: 3, kind: output, shape index: {}]  }
   0x1   :  { %s589_s14 = smov 0  }
   0x2 LB: > { %s25_s15 = sadd.s32 1, %s559_s13  ;;  %p448_p0 = scmp.ge.s32.totalorder %s563_s14, 1  ;;  %s563_s14 = sphi %s589_s14, %s13_s14   ;;  %s559_s13 = sphi %s587_s13, %s638_s13   ;;  %s555_s12 = sphi %s585_s12, %s637_s12  }
   0x3   : > { %p27_p1 = scmp.ge.s32.totalorder %s25_s15, 2  ;;  %p174_p2 = scmp.lt.s32.totalorder %s563_s14, 3 }
   0x5   : > { %s640_s15 = smov (%p27_p1, %s25_s15), 0  ;;  %p175_p3 = pnand %p448_p0, %p174_p2 }
   0x6   : > { %p213_p4 = scmp.lt.s32.totalorder (!%p175_p3), %s555_s12, 1 }
   0x7   : > { %178 = sbr.rel (%p175_p3) target bundleno = 49 (0x31), region = 32 }
   0xc   : > { %s642_s12 = smov (!%p213_p4, %s555_s12), 1  ;;  %v262_v7 = vlaneseq }
   0xd   : > { %s224_s18 = scalar_lea.vmem %s634_s1, %s642_s12  ;;  %s227_s21 = scalar_lea.vmem %s635_s2, %s642_s12 }
   0xe   : > { %v254_v0 = vld [vmem:[%s224_s18] sm:$0x1]  ;;  %s463_s22 = sshll.u32 %s642_s12, 5  ;;  %v263_v9 = vshrl.u32 %v262_v7, 7 }
   0xf   : > { %v255_v1 = vmul.f32 0.015625, %v254_v0  ;;  %v256_v2 = vld [vmem:[%s227_s21] sm:$0x1]  ;;  %s220_s25 = scalar_lea.vmem %s633_s0, %s463_s22  ;;  %s236_s28 = scalar_lea.vmem %s636_s3, %s463_s22 }
  0x10   : > { %v257_v3 = vmul.f32 0.015625, %v256_v2  ;;  %v474_v10 = vld [vmem:[%s220_s25] sm:$0xff]   ;;  %v264_v11 = vsub.s32 0, %v263_v9  ;;  %v509_v12 = vld [vmem:[%s220_s25 + $0x8] sm:$0xff]   ;;  %v510_v13 = vld [vmem:[%s220_s25 + $0x10] sm:$0xff]  }
  0x11   : > { %v258_v4 = vmul.f32 %v255_v1, %v255_v1  ;;  %v511_v14 = vld [vmem:[%s220_s25 + $0x18] sm:$0xff]   ;;  %v475_v15 = vunpack.c.l.bf16 %v474_v10  ;;  %v476_v16 = vunpack.c.h.bf16 %v474_v10  ;;  %v479_v18 = vunpack.c.l.bf16 %v509_v12 }
  0x12   : > { %v265_v17 = vrot.slane %v255_v1, %v264_v11  ;;  %v480_v19 = vunpack.c.h.bf16 %v509_v12  ;;  %v483_v20 = vunpack.c.l.bf16 %v510_v13  ;;  %v484_v21 = vunpack.c.h.bf16 %v510_v13 }
  0x13   : > { %v259_v5 = vsub.f32 %v257_v3, %v258_v4  ;;  %v487_v22 = vunpack.c.l.bf16 %v511_v14  ;;  %v488_v23 = vunpack.c.h.bf16 %v511_v14 }
  0x14   : > { %v267_v24 = vsub.f32 %v475_v15, %v265_v17  ;;  %v268_v25 = vsub.f32 %v476_v16, %v265_v17  ;;  %v269_v26 = vsub.f32 %v479_v18, %v265_v17  ;;  %v270_v27 = vsub.f32 %v480_v19, %v265_v17 }
  0x15   : > { %v260_v6 = vmax.f32 %v259_v5, 0.0  ;;  %v271_v29 = vsub.f32 %v483_v20, %v265_v17  ;;  %v272_v30 = vsub.f32 %v484_v21, %v265_v17  ;;  %v273_v31 = vsub.f32 %v487_v22, %v265_v17 }
  0x16   : > { %v274_v32 = vsub.f32 %v488_v23, %v265_v17 }
  0x17   : > { %v275_v8 = vadd.f32 1e-05, %v260_v6 }
  0x19   : > { %539 = vrsqrt.f32 %v275_v8 }
  0x26   : > { %v540_v28 = vpop.eup %539 }
  0x27   : > { %v281_v33 = vrot.slane %v540_v28, %v264_v11 }
  0x29   : > { %v283_v34 = vmul.f32 %v281_v33, %v267_v24  ;;  %v284_v35 = vmul.f32 %v281_v33, %v268_v25  ;;  %v285_v36 = vmul.f32 %v281_v33, %v269_v26  ;;  %v286_v37 = vmul.f32 %v281_v33, %v270_v27 }
  0x2a   : > { %v287_v38 = vmul.f32 %v281_v33, %v271_v29  ;;  %v288_v39 = vmul.f32 %v281_v33, %v272_v30  ;;  %v289_v40 = vmul.f32 %v281_v33, %v273_v31  ;;  %v290_v41 = vmul.f32 %v281_v33, %v274_v32 }
  0x2b   : > { %v291_v42 = vmax.f32 %v283_v34, 0.0  ;;  %v292_v43 = vmax.f32 %v284_v35, 0.0  ;;  %v293_v44 = vmax.f32 %v285_v36, 0.0  ;;  %v294_v45 = vmax.f32 %v286_v37, 0.0 }
  0x2c   : > { %v295_v46 = vmax.f32 %v287_v38, 0.0  ;;  %v296_v47 = vmax.f32 %v288_v39, 0.0  ;;  %v297_v48 = vmax.f32 %v289_v40, 0.0  ;;  %v298_v49 = vmax.f32 %v290_v41, 0.0 }
  0x2d   : > { %v492_v50 = vpack.c.bf16 %v292_v43, %v291_v42  ;;  %v497_v51 = vpack.c.bf16 %v294_v45, %v293_v44 }
  0x2e   : > { %v502_v52 = vpack.c.bf16 %v296_v47, %v295_v46  ;;  %v507_v53 = vpack.c.bf16 %v298_v49, %v297_v48 }
  0x2f   : > { %493 = vst [vmem:[%s236_s28] sm:$0xff] %v492_v50   ;;  %512 = vst [vmem:[%s236_s28 + $0x8] sm:$0xff] %v497_v51  }
  0x30   : > { %513 = vst [vmem:[%s236_s28 + $0x10] sm:$0xff] %v502_v52   ;;  %514 = vst [vmem:[%s236_s28 + $0x18] sm:$0xff] %v507_v53  }
  0x31 PF: > { %s13_s14 = sadd.s32 1, %s563_s14   ;;  %s637_s12 = smov %s559_s13 }
  0x32   : > { %p10_p5 = scmp.ge.s32.totalorder %s13_s14, 4   ;;  %s638_s13 = smov %s640_s15 }
  0x34   :  { %12 = sbr.rel (!%p10_p5) target bundleno = 2 (0x2), region = 68 }

// kernel: generator_forward.65
= control target key start
LH: loop header
LB: loop body
LE: loop exit
PB: predicated region body
PF: predicated region fallthrough
CT: control target
= control target key end

     0   :  { %s496_s9 = smov 0   ;;  %s498_s10 = smov 0   ;;  %s536_s0 = inlined_call_operand.vmem [shape: bf16[2,16,256], index: 0, kind: input, shape index: {}]   ;;  %s537_s1 = inlined_call_operand.vmem [shape: f32[2,1,256], index: 1, kind: output, shape index: {0}]   ;;  %s538_s2 = inlined_call_operand.vmem [shape: f32[2,1,256], index: 2, kind: output, shape index: {1}]  }
   0x1   :  { %s500_s11 = smov 0  }
   0x2 LB: > { %s25_s12 = sadd.s32 1, %s474_s10  ;;  %p423_p0 = scmp.ge.s32.totalorder %s478_s11, 1  ;;  %s478_s11 = sphi %s500_s11, %s13_s11   ;;  %s474_s10 = sphi %s498_s10, %s540_s10   ;;  %s470_s9 = sphi %s496_s9, %s539_s9  }
   0x3   : > { %p27_p1 = scmp.ge.s32.totalorder %s25_s12, 2  ;;  %p135_p2 = scmp.lt.s32.totalorder %s478_s11, 3 }
   0x5   : > { %s542_s12 = smov (%p27_p1, %s25_s12), 0  ;;  %p136_p3 = pnand %p423_p0, %p135_p2 }
   0x6   : > { %p166_p4 = scmp.lt.s32.totalorder (!%p136_p3), %s470_s9, 1 }
   0x7   : > { %139 = sbr.rel (%p136_p3) target bundleno = 42 (0x2a), region = 24 }
   0xc   : > { %s544_s9 = smov (!%p166_p4, %s470_s9), 1  ;;  %v480_v18 = vmov 1966171168   ;;  %v232_v20 = vlaneseq }
   0xd   : > { %s430_s13 = sshll.u32 %s544_s9, 4  ;;  %v230_v19 = vunpack.c.l.s4 %v480_v18  ;;  %s426_s17 = sshll.u32 %s544_s9, 1 }
   0xe   : > { %s174_s16 = scalar_lea.vmem %s536_s0, %s430_s13  ;;  %v233_v30 = vshrl.u32 %v232_v20, 7  ;;  %s179_s20 = scalar_lea.vmem %s537_s1, %s426_s17  ;;  %vm246_vm0 = vcmp.lt.s32.totalorder %v232_v20, 256 }
   0xf   : > { %v184_v0 = vld [vmem:[%s174_s16] sm:$0xff]  ;;  %v185_v1 = vld [vmem:[%s174_s16 + $0x8] sm:$0xff]  ;;  %v231_v29 = vunpack.c.0.s8 %v230_v19  ;;  %s183_s23 = scalar_lea.vmem %s538_s2, %s426_s17 }
  0x10   : > { %v186_v2 = vunpack.c.l.bf16 %v184_v0  ;;  %v187_v3 = vunpack.c.h.bf16 %v184_v0  ;;  %v188_v4 = vunpack.c.l.bf16 %v185_v1  ;;  %v189_v5 = vunpack.c.h.bf16 %v185_v1 }
  0x11   : > { %v234_v39 = vsub.s32 %v231_v29, %v233_v30 }
  0x12   : > { %v190_v6 = vadd.f32 %v188_v4, %v186_v2  ;;  %v197_v7 = vadd.f32 %v189_v5, %v187_v3  ;;  %v204_v8 = vmul.f32 %v186_v2, %v186_v2  ;;  %v205_v9 = vmul.f32 %v187_v3, %v187_v3 }
  0x13   : > { %v206_v10 = vmul.f32 %v188_v4, %v188_v4  ;;  %v207_v11 = vmul.f32 %v189_v5, %v189_v5 }
  0x14   : > { %v191_v12 = vrot.slane %v190_v6, 4  ;;  %v198_v13 = vrot.slane %v197_v7, 4 }
  0x15   : > { %v208_v14 = vadd.f32 %v206_v10, %v204_v8  ;;  %v215_v15 = vadd.f32 %v207_v11, %v205_v9 }
  0x16   : > { %v192_v16 = vadd.f32 %v191_v12, %v190_v6  ;;  %v199_v17 = vadd.f32 %v198_v13, %v197_v7 }
  0x17   : > { %v209_v21 = vrot.slane %v208_v14, 4  ;;  %v216_v22 = vrot.slane %v215_v15, 4 }
  0x18   : > { %v193_v23 = vrot.slane %v192_v16, 2  ;;  %v200_v24 = vrot.slane %v199_v17, 2 }
  0x19   : > { %v210_v25 = vadd.f32 %v209_v21, %v208_v14  ;;  %v217_v26 = vadd.f32 %v216_v22, %v215_v15 }
  0x1a   : > { %v194_v27 = vadd.f32 %v193_v23, %v192_v16  ;;  %v201_v28 = vadd.f32 %v200_v24, %v199_v17 }
  0x1b   : > { %v211_v31 = vrot.slane %v210_v25, 2  ;;  %v218_v32 = vrot.slane %v217_v26, 2 }
  0x1c   : > { %v195_v33 = vrot.slane %v194_v27, 1  ;;  %v202_v34 = vrot.slane %v201_v28, 1 }
  0x1d   : > { %v212_v35 = vadd.f32 %v211_v31, %v210_v25  ;;  %v219_v36 = vadd.f32 %v218_v32, %v217_v26 }
  0x1e   : > { %v196_v37 = vadd.f32 %v195_v33, %v194_v27  ;;  %v203_v38 = vadd.f32 %v202_v34, %v201_v28 }
  0x1f   : > { %v213_v40 = vrot.slane %v212_v35, 1  ;;  %v220_v41 = vrot.slane %v219_v36, 1 }
  0x20   : > { %v228_v42 = vcombine.low %v196_v37, %v203_v38 }
  0x21   : > { %v214_v43 = vadd.f32 %v213_v40, %v212_v35  ;;  %v221_v44 = vadd.f32 %v220_v41, %v219_v36 }
  0x22   : > { %v235_v45 = vrot.slane %v228_v42, %v234_v39 }
  0x23   : > { %v251_v46 = vcombine.low %v214_v43, %v221_v44 }
  0x24   : > { %v242_v47 = vrot.slane %v235_v45, %v234_v39 }
  0x25   : > { %v258_v48 = vrot.slane %v251_v46, %v234_v39 }
  0x26   : > { %248 = vst.msk [vmem:[%s179_s20] sm:$0x3] %vm246_vm0, %v242_v47 }
  0x27   : > { %v265_v49 = vrot.slane %v258_v48, %v234_v39 }
  0x29   : > { %267 = vst.msk [vmem:[%s183_s23] sm:$0x3] %vm246_vm0, %v265_v49 }
  0x2a PF: > { %s13_s11 = sadd.s32 1, %s478_s11   ;;  %s539_s9 = smov %s474_s10 }
  0x2b   : > { %p10_p5 = scmp.ge.s32.totalorder %s13_s11, 4   ;;  %s540_s10 = smov %s542_s12 }
  0x2d   :  { %12 = sbr.rel (!%p10_p5) target bundleno = 2 (0x2), region = 74 }

// kernel: generator_forward.64
= control target key start
LH: loop header
LB: loop body
LE: loop exit
PB: predicated region body
PF: predicated region fallthrough
CT: control target
= control target key end

     0   :  { %s2251_s1 = inlined_call_operand.vmem [shape: bf16[1152,256], index: 1, kind: input, shape index: {}]   ;;  %s2252_s0 = inlined_call_operand.vmem [shape: bf16[32,1152], index: 0, kind: input, shape index: {}]   ;;  %s2253_s2 = inlined_call_operand.vmem [shape: f32[1,256], index: 2, kind: input, shape index: {}]   ;;  %s2254_s3 = inlined_call_operand.vmem [shape: bf16[32,256], index: 3, kind: output, shape index: {}]  }
   0x1   :  { %v1487_v0 = vld [vmem:[%s2251_s1 + $0x74] ss:$8 sps:$4 sm:$0xff]   ;;  %v1491_v2 = vld [vmem:[%s2251_s1 + $0x70] ss:$8 sps:$4 sm:$0xff]   ;;  %v1493_v4 = vld [vmem:[%s2251_s1 + $0x64] ss:$8 sps:$4 sm:$0xff]  }
   0x2   :  { %v1489_v1 = vld [vmem:[%s2251_s1 + $0x174] ss:$8 sps:$4 sm:$0xff]   ;;  %1003 = vmatprep.subr.bf16.mxu0 %v1487_v0  ;;  %v1492_v3 = vld [vmem:[%s2251_s1 + $0x170] ss:$8 sps:$4 sm:$0xff]   ;;  %v1495_v5 = vld [vmem:[%s2251_s1 + $0x164] ss:$8 sps:$4 sm:$0xff]  }
   0x3   :  { %1056 = vmatprep.subr.bf16.mxu1 %v1489_v1  ;;  %1004 = vmatpush1.bf16.msra.mxu0 %v1491_v2  ;;  %v1497_v6 = vld [vmem:[%s2251_s1 + $0x60] ss:$8 sps:$4 sm:$0xff]   ;;  %v1499_v8 = vld [vmem:[%s2251_s1 + $0x54] ss:$8 sps:$4 sm:$0xff]   ;;  %v1503_v10 = vld [vmem:[%s2251_s1 + $0x50] ss:$8 sps:$4 sm:$0xff]  }
   0x4   :  { %1057 = vmatpush1.bf16.msra.mxu1 %v1492_v3  ;;  %1005 = vmatprep.subr.bf16.mxu0 %v1493_v4  ;;  %v1498_v7 = vld [vmem:[%s2251_s1 + $0x160] ss:$8 sps:$4 sm:$0xff]   ;;  %v1501_v9 = vld [vmem:[%s2251_s1 + $0x154] ss:$8 sps:$4 sm:$0xff]   ;;  %v1504_v11 = vld [vmem:[%s2251_s1 + $0x150] ss:$8 sps:$4 sm:$0xff]  }
   0x5   :  { %1058 = vmatprep.subr.bf16.mxu1 %v1495_v5  ;;  %v1505_v12 = vld [vmem:[%s2251_s1 + $0x44] ss:$8 sps:$4 sm:$0xff]   ;;  %v1509_v14 = vld [vmem:[%s2251_s1 + $0x40] ss:$8 sps:$4 sm:$0xff]   ;;  %v1511_v16 = vld [vmem:[%s2251_s1 + $0x34] ss:$8 sps:$4 sm:$0xff]  }
   0x6   :  { %v1507_v13 = vld [vmem:[%s2251_s1 + $0x144] ss:$8 sps:$4 sm:$0xff]   ;;  %v1510_v15 = vld [vmem:[%s2251_s1 + $0x140] ss:$8 sps:$4 sm:$0xff]   ;;  %v1513_v17 = vld [vmem:[%s2251_s1 + $0x134] ss:$8 sps:$4 sm:$0xff]  }
   0x7   :  { %1006 = vmatpush1.bf16.msra.mxu0 %v1497_v6  ;;  %v1515_v18 = vld [vmem:[%s2251_s1 + $0x30] ss:$8 sps:$4 sm:$0xff]   ;;  %v1517_v20 = vld [vmem:[%s2251_s1 + $0x24] ss:$8 sps:$4 sm:$0xff]   ;;  %v1521_v22 = vld [vmem:[%s2251_s1 + $0x20] ss:$8 sps:$4 sm:$0xff]  }
   0x8   :  { %1059 = vmatpush1.bf16.msra.mxu1 %v1498_v7  ;;  %1007 = vmatprep.subr.bf16.mxu0 %v1499_v8  ;;  %v1516_v19 = vld [vmem:[%s2251_s1 + $0x130] ss:$8 sps:$4 sm:$0xff]   ;;  %v1519_v21 = vld [vmem:[%s2251_s1 + $0x124] ss:$8 sps:$4 sm:$0xff]   ;;  %v1522_v23 = vld [vmem:[%s2251_s1 + $0x120] ss:$8 sps:$4 sm:$0xff]  }
   0x9   :  { %1060 = vmatprep.subr.bf16.mxu1 %v1501_v9  ;;  %v1523_v24 = vld [vmem:[%s2251_s1 + $0x14] ss:$8 sps:$4 sm:$0xff]   ;;  %v1527_v26 = vld [vmem:[%s2251_s1 + $0x10] ss:$8 sps:$4 sm:$0xff]   ;;  %v1529_v28 = vld [vmem:[%s2251_s1 + $0x4] ss:$8 sps:$4 sm:$0xff]  }
   0xa   :  { %v1525_v25 = vld [vmem:[%s2251_s1 + $0x114] ss:$8 sps:$4 sm:$0xff]   ;;  %v1528_v27 = vld [vmem:[%s2251_s1 + $0x110] ss:$8 sps:$4 sm:$0xff]   ;;  %v1531_v29 = vld [vmem:[%s2251_s1 + $0x104] ss:$8 sps:$4 sm:$0xff]  }
   0xb   :  { %1008 = vmatpush1.bf16.msra.mxu0 %v1503_v10  ;;  %v1533_v30 = vld [vmem:[%s2251_s1] ss:$8 sps:$4 sm:$0xff]   ;;  %v1535_v32 = vld [vmem:[%s2251_s1 + $0xf4] ss:$8 sps:$4 sm:$0xff]   ;;  %v1539_v34 = vld [vmem:[%s2251_s1 + $0xf0] ss:$8 sps:$4 sm:$0xff]  }
   0xc   :  { %1061 = vmatpush1.bf16.msra.mxu1 %v1504_v11  ;;  %1009 = vmatprep.subr.bf16.mxu0 %v1505_v12  ;;  %v1534_v31 = vld [vmem:[%s2251_s1 + $0x100] ss:$8 sps:$4 sm:$0xff]   ;;  %v1537_v33 = vld [vmem:[%s2251_s1 + $0x1f4] ss:$8 sps:$4 sm:$0xff]   ;;  %v1540_v35 = vld [vmem:[%s2251_s1 + $0x1f0] ss:$8 sps:$4 sm:$0xff]  }
   0xd   :  { %1062 = vmatprep.subr.bf16.mxu1 %v1507_v13  ;;  %v1541_v36 = vld [vmem:[%s2251_s1 + $0xe4] ss:$8 sps:$4 sm:$0xff]   ;;  %v1545_v38 = vld [vmem:[%s2251_s1 + $0xe0] ss:$8 sps:$4 sm:$0xff]   ;;  %v1547_v40 = vld [vmem:[%s2251_s1 + $0xd4] ss:$8 sps:$4 sm:$0xff]  }
   0xe   :  { %v1543_v37 = vld [vmem:[%s2251_s1 + $0x1e4] ss:$8 sps:$4 sm:$0xff]   ;;  %v1546_v39 = vld [vmem:[%s2251_s1 + $0x1e0] ss:$8 sps:$4 sm:$0xff]   ;;  %v1549_v41 = vld [vmem:[%s2251_s1 + $0x1d4] ss:$8 sps:$4 sm:$0xff]  }
   0xf   :  { %1010 = vmatpush1.bf16.msra.mxu0 %v1509_v14  ;;  %v1551_v42 = vld [vmem:[%s2251_s1 + $0xd0] ss:$8 sps:$4 sm:$0xff]   ;;  %v1553_v44 = vld [vmem:[%s2251_s1 + $0xc4] ss:$8 sps:$4 sm:$0xff]   ;;  %v1557_v46 = vld [vmem:[%s2251_s1 + $0xc0] ss:$8 sps:$4 sm:$0xff]  }
  0x10   :  { %1063 = vmatpush1.bf16.msra.mxu1 %v1510_v15  ;;  %1011 = vmatprep.subr.bf16.mxu0 %v1511_v16  ;;  %v1552_v43 = vld [vmem:[%s2251_s1 + $0x1d0] ss:$8 sps:$4 sm:$0xff]   ;;  %v1555_v45 = vld [vmem:[%s2251_s1 + $0x1c4] ss:$8 sps:$4 sm:$0xff]   ;;  %v1558_v47 = vld [vmem:[%s2251_s1 + $0x1c0] ss:$8 sps:$4 sm:$0xff]  }
  0x11   :  { %1064 = vmatprep.subr.bf16.mxu1 %v1513_v17  ;;  %v1559_v48 = vld [vmem:[%s2251_s1 + $0xb4] ss:$8 sps:$4 sm:$0xff]   ;;  %v1585_v49 = vld [vmem:[%s2252_s0 + $0x4] ss:$36 sps:$4 sm:$0xff]   ;;  %v1588_v51 = vld [vmem:[%s2252_s0 + $0xc] ss:$36 sps:$4 sm:$0xff]  }
  0x12   :  { %v1561_v50 = vld [vmem:[%s2251_s1 + $0x1b4] ss:$8 sps:$4 sm:$0xff]   ;;  %1035 = vmatprep.mubr.bf16.mxu0 %v1585_v49  ;;  %v1563_v52 = vld [vmem:[%s2251_s1 + $0xb0] ss:$8 sps:$4 sm:$0xff]   ;;  %1088 = vmatprep.mubr.bf16.mxu1 %v1588_v51  ;;  %v1565_v54 = vld [vmem:[%s2251_s1 + $0xa4] ss:$8 sps:$4 sm:$0xff]  }
  0x13   :  { %1012 = vmatpush1.bf16.msra.mxu0 %v1515_v18  ;;  %v1564_v53 = vld [vmem:[%s2251_s1 + $0x1b0] ss:$8 sps:$4 sm:$0xff]   ;;  %v1567_v55 = vld [vmem:[%s2251_s1 + $0x1a4] ss:$8 sps:$4 sm:$0xff]   ;;  %v1569_v56 = vld [vmem:[%s2251_s1 + $0xa0] ss:$8 sps:$4 sm:$0xff]  }
  0x14   :  { %1065 = vmatpush1.bf16.msra.mxu1 %v1516_v19  ;;  %1013 = vmatprep.subr.bf16.mxu0 %v1517_v20  ;;  %v1570_v57 = vld [vmem:[%s2251_s1 + $0x1a0] ss:$8 sps:$4 sm:$0xff]   ;;  %v1571_v58 = vld [vmem:[%s2251_s1 + $0x94] ss:$8 sps:$4 sm:$0xff]   ;;  %v1575_v60 = vld [vmem:[%s2251_s1 + $0x90] ss:$8 sps:$4 sm:$0xff]  }
  0x15   :  { %1066 = vmatprep.subr.bf16.mxu1 %v1519_v21  ;;  %v1573_v59 = vld [vmem:[%s2251_s1 + $0x194] ss:$8 sps:$4 sm:$0xff]   ;;  %v1576_v61 = vld [vmem:[%s2251_s1 + $0x190] ss:$8 sps:$4 sm:$0xff]   ;;  %v1577_v62 = vld [vmem:[%s2251_s1 + $0x84] ss:$8 sps:$4 sm:$0xff]  }
  0x16   :  { %v1579_v63 = vld [vmem:[%s2251_s1 + $0x184] ss:$8 sps:$4 sm:$0xff]   ;;  %v1581_v0 = vld [vmem:[%s2251_s1 + $0x80] ss:$8 sps:$4 sm:$0xff]   ;;  %v1591_v2 = vld [vmem:[%s2251_s1 + $0x274] ss:$8 sps:$4 sm:$0xff]  }
  0x17   :  { %1014 = vmatpush1.bf16.msra.mxu0 %v1521_v22  ;;  %v1582_v1 = vld [vmem:[%s2251_s1 + $0x180] ss:$8 sps:$4 sm:$0xff]   ;;  %v1594_v3 = vld [vmem:[%s2251_s1 + $0x374] ss:$8 sps:$4 sm:$0xff]   ;;  %v1589_v6 = vld [vmem:[%s2251_s1 + $0x270] ss:$8 sps:$4 sm:$0xff]  }
  0x18   :  { %1067 = vmatpush1.bf16.msra.mxu1 %v1522_v23  ;;  %1015 = vmatprep.subr.bf16.mxu0 %v1523_v24  ;;  %v1583_v4 = vld [vmem:[%s2252_s0] ss:$36 sps:$4 sm:$0xff]   ;;  %v1586_v5 = vld [vmem:[%s2252_s0 + $0x8] ss:$36 sps:$4 sm:$0xff]   ;;  %v1592_v7 = vld [vmem:[%s2251_s1 + $0x370] ss:$8 sps:$4 sm:$0xff]  }
  0x19   :  { %1068 = vmatprep.subr.bf16.mxu1 %v1525_v25  ;;  %v1597_v8 = vld [vmem:[%s2251_s1 + $0x264] ss:$8 sps:$4 sm:$0xff]   ;;  %v1595_v10 = vld [vmem:[%s2251_s1 + $0x260] ss:$8 sps:$4 sm:$0xff]   ;;  %v1603_v12 = vld [vmem:[%s2251_s1 + $0x254] ss:$8 sps:$4 sm:$0xff]  }
  0x1a   :  { %v1600_v9 = vld [vmem:[%s2251_s1 + $0x364] ss:$8 sps:$4 sm:$0xff]   ;;  %v1598_v11 = vld [vmem:[%s2251_s1 + $0x360] ss:$8 sps:$4 sm:$0xff]   ;;  %v1606_v13 = vld [vmem:[%s2251_s1 + $0x354] ss:$8 sps:$4 sm:$0xff]  }
  0x1b   :  { %1016 = vmatpush1.bf16.msra.mxu0 %v1527_v26  ;;  %v1601_v14 = vld [vmem:[%s2251_s1 + $0x250] ss:$8 sps:$4 sm:$0xff]   ;;  %v1609_v16 = vld [vmem:[%s2251_s1 + $0x244] ss:$8 sps:$4 sm:$0xff]   ;;  %v1607_v18 = vld [vmem:[%s2251_s1 + $0x240] ss:$8 sps:$4 sm:$0xff]  }
  0x1c   :  { %1069 = vmatpush1.bf16.msra.mxu1 %v1528_v27  ;;  %1017 = vmatprep.subr.bf16.mxu0 %v1529_v28  ;;  %v1604_v15 = vld [vmem:[%s2251_s1 + $0x350] ss:$8 sps:$4 sm:$0xff]   ;;  %v1612_v17 = vld [vmem:[%s2251_s1 + $0x344] ss:$8 sps:$4 sm:$0xff]   ;;  %v1610_v19 = vld [vmem:[%s2251_s1 + $0x340] ss:$8 sps:$4 sm:$0xff]  }
  0x1d   :  { %1070 = vmatprep.subr.bf16.mxu1 %v1531_v29  ;;  %v1615_v20 = vld [vmem:[%s2251_s1 + $0x234] ss:$8 sps:$4 sm:$0xff]   ;;  %v1661_v22 = vld [vmem:[%s2252_s0 + $0x4c] ss:$36 sps:$4 sm:$0xff]   ;;  %v1619_v28 = vld [vmem:[%s2251_s1 + $0x220] ss:$8 sps:$4 sm:$0xff]  }
  0x1e   :  { %v1618_v21 = vld [vmem:[%s2251_s1 + $0x334] ss:$8 sps:$4 sm:$0xff]   ;;  %v1613_v23 = vld [vmem:[%s2251_s1 + $0x230] ss:$8 sps:$4 sm:$0xff]   ;;  %v1621_v25 = vld [vmem:[%s2251_s1 + $0x224] ss:$8 sps:$4 sm:$0xff]  }
  0x1f   :  { %1018 = vmatpush1.bf16.msra.mxu0 %v1533_v30  ;;  %v1616_v24 = vld [vmem:[%s2251_s1 + $0x330] ss:$8 sps:$4 sm:$0xff]   ;;  %v1624_v26 = vld [vmem:[%s2251_s1 + $0x324] ss:$8 sps:$4 sm:$0xff]   ;;  %v1622_v30 = vld [vmem:[%s2251_s1 + $0x320] ss:$8 sps:$4 sm:$0xff]  }
  0x20   :  { %1071 = vmatpush1.bf16.msra.mxu1 %v1534_v31  ;;  %1019 = vmatprep.subr.bf16.mxu0 %v1535_v32  ;;  %v1669_v27 = vld [vmem:[%s2252_s0 + $0x48] ss:$36 sps:$4 sm:$0xff]   ;;  %v1670_v29 = vld [vmem:[%s2252_s0 + $0x54] ss:$36 sps:$4 sm:$0xff]  }
  0x21   :  { %1072 = vmatprep.subr.bf16.mxu1 %v1537_v33  ;;  %v1672_v31 = vld [vmem:[%s2252_s0 + $0x50] ss:$36 sps:$4 sm:$0xff]   ;;  %v1646_v49 = vld [vmem:[%s2251_s1 + $0x3e0] ss:$8 sps:$4 sm:$0xff]  }
  0x22   :  { %v1627_v32 = vld [vmem:[%s2251_s1 + $0x214] ss:$8 sps:$4 sm:$0xff]  }
  0x23   :  { %1020 = vmatpush2.bf16.msra.mxu0 %v1539_v34  ;;  %v1630_v33 = vld [vmem:[%s2251_s1 + $0x314] ss:$8 sps:$4 sm:$0xff]   ;;  %v1625_v34 = vld [vmem:[%s2251_s1 + $0x210] ss:$8 sps:$4 sm:$0xff]  }
  0x24   :  { %1073 = vmatpush2.bf16.msra.mxu1 %v1540_v35  ;;  %1021 = vmatprep.subr.bf16.mxu0 %v1541_v36  ;;  %v1628_v35 = vld [vmem:[%s2251_s1 + $0x310] ss:$8 sps:$4 sm:$0xff]   ;;  %v1633_v36 = vld [vmem:[%s2251_s1 + $0x204] ss:$8 sps:$4 sm:$0xff]   ;;  %v1654_v51 = vld [vmem:[%s2251_s1 + $0x3d4] ss:$8 sps:$4 sm:$0xff]  }
  0x25   :  { %1074 = vmatprep.subr.bf16.mxu1 %v1543_v37  ;;  %v1636_v37 = vld [vmem:[%s2251_s1 + $0x304] ss:$8 sps:$4 sm:$0xff]  }
  0x27   :  { %1022 = vmatpush2.bf16.msra.mxu0 %v1545_v38  ;;  %v1631_v38 = vld [vmem:[%s2251_s1 + $0x200] ss:$8 sps:$4 sm:$0xff]  }
  0x28   :  { %1075 = vmatpush2.bf16.msra.mxu1 %v1546_v39  ;;  %1023 = vmatprep.subr.bf16.mxu0 %v1547_v40  ;;  %v1634_v39 = vld [vmem:[%s2251_s1 + $0x300] ss:$8 sps:$4 sm:$0xff]   ;;  %v1639_v40 = vld [vmem:[%s2251_s1 + $0x2f4] ss:$8 sps:$4 sm:$0xff]  }
  0x29   :  { %1076 = vmatprep.subr.bf16.mxu1 %v1549_v41  ;;  %v1693_v41 = vld [vmem:[%s2252_s0 + $0x14] ss:$36 sps:$4 sm:$0xff]  }
  0x2b   :  { %1024 = vmatpush2.bf16.msra.mxu0 %v1551_v42  ;;  %v1642_v42 = vld [vmem:[%s2251_s1 + $0x3f4] ss:$8 sps:$4 sm:$0xff]  }
  0x2c   :  { %1077 = vmatpush2.bf16.msra.mxu1 %v1552_v43  ;;  %1025 = vmatprep.subr.bf16.mxu0 %v1553_v44  ;;  %v1696_v43 = vld [vmem:[%s2252_s0 + $0x1c] ss:$36 sps:$4 sm:$0xff]   ;;  %v1637_v44 = vld [vmem:[%s2251_s1 + $0x2f0] ss:$8 sps:$4 sm:$0xff]  }
  0x2d   :  { %1078 = vmatprep.subr.bf16.mxu1 %v1555_v45  ;;  %v1640_v45 = vld [vmem:[%s2251_s1 + $0x3f0] ss:$8 sps:$4 sm:$0xff]  }
  0x2f   :  { %1026 = vmatpush2.bf16.msra.mxu0 %v1557_v46  ;;  %v1645_v46 = vld [vmem:[%s2251_s1 + $0x2e4] ss:$8 sps:$4 sm:$0xff]  }
  0x30   :  { %1079 = vmatpush2.bf16.msra.mxu1 %v1558_v47  ;;  %1027 = vmatprep.subr.bf16.mxu0 %v1559_v48  ;;  %v1648_v47 = vld [vmem:[%s2251_s1 + $0x3e4] ss:$8 sps:$4 sm:$0xff]   ;;  %v1643_v48 = vld [vmem:[%s2251_s1 + $0x2e0] ss:$8 sps:$4 sm:$0xff]  }
  0x31   :  { %1080 = vmatprep.subr.bf16.mxu1 %v1561_v50  ;;  %v1651_v50 = vld [vmem:[%s2251_s1 + $0x2d4] ss:$8 sps:$4 sm:$0xff]  }
  0x33   :  { %1028 = vmatpush2.bf16.msra.mxu0 %v1563_v52  ;;  %v1649_v52 = vld [vmem:[%s2251_s1 + $0x2d0] ss:$8 sps:$4 sm:$0xff]  }
  0x34   :  { %1081 = vmatpush2.bf16.msra.mxu1 %v1564_v53  ;;  %1029 = vmatprep.subr.bf16.mxu0 %v1565_v54  ;;  %v1652_v53 = vld [vmem:[%s2251_s1 + $0x3d0] ss:$8 sps:$4 sm:$0xff]   ;;  %v1657_v54 = vld [vmem:[%s2251_s1 + $0x2c4] ss:$8 sps:$4 sm:$0xff]  }
  0x35   :  { %1082 = vmatprep.subr.bf16.mxu1 %v1567_v55  ;;  %v1660_v55 = vld [vmem:[%s2251_s1 + $0x3c4] ss:$8 sps:$4 sm:$0xff]  }
  0x37   :  { %1030 = vmatpush2.bf16.msra.mxu0 %v1569_v56  ;;  %v1655_v56 = vld [vmem:[%s2251_s1 + $0x2c0] ss:$8 sps:$4 sm:$0xff]  }
  0x38   :  { %1083 = vmatpush2.bf16.msra.mxu1 %v1570_v57  ;;  %1031 = vmatprep.subr.bf16.mxu0 %v1571_v58  ;;  %v1658_v57 = vld [vmem:[%s2251_s1 + $0x3c0] ss:$8 sps:$4 sm:$0xff]   ;;  %v1665_v58 = vld [vmem:[%s2251_s1 + $0x2b4] ss:$8 sps:$4 sm:$0xff]  }
  0x39   :  { %1084 = vmatprep.subr.bf16.mxu1 %v1573_v59  ;;  %v1668_v59 = vld [vmem:[%s2251_s1 + $0x3b4] ss:$8 sps:$4 sm:$0xff]  }
  0x3b   :  { %1032 = vmatpush2.bf16.msra.mxu0 %v1575_v60  ;;  %v1663_v60 = vld [vmem:[%s2251_s1 + $0x2b0] ss:$8 sps:$4 sm:$0xff]  }
  0x3c   :  { %1085 = vmatpush2.bf16.msra.mxu1 %v1576_v61  ;;  %1033 = vmatprep.subr.bf16.mxu0 %v1577_v62  ;;  %v1666_v61 = vld [vmem:[%s2251_s1 + $0x3b0] ss:$8 sps:$4 sm:$0xff]   ;;  %v1675_v62 = vld [vmem:[%s2251_s1 + $0x2a4] ss:$8 sps:$4 sm:$0xff]  }
  0x3d   :  { %1086 = vmatprep.subr.bf16.mxu1 %v1579_v63  ;;  %v1678_v63 = vld [vmem:[%s2251_s1 + $0x3a4] ss:$8 sps:$4 sm:$0xff]  }
  0x3f   :  { %1034 = vmatpush2.bf16.msra.mxu0 %v1581_v0  ;;  %v1673_v0 = vld [vmem:[%s2251_s1 + $0x2a0] ss:$8 sps:$4 sm:$0xff]  }
  0x40   :  { %1087 = vmatpush2.bf16.msra.mxu1 %v1582_v1  ;;  %1109 = vmatprep.subr.bf16.mxu0 %v1591_v2  ;;  %v1676_v1 = vld [vmem:[%s2251_s1 + $0x3a0] ss:$8 sps:$4 sm:$0xff]   ;;  %v1681_v2 = vld [vmem:[%s2251_s1 + $0x294] ss:$8 sps:$4 sm:$0xff]  }
  0x41   :  { %1162 = vmatprep.subr.bf16.mxu1 %v1594_v3  ;;  %v1684_v3 = vld [vmem:[%s2251_s1 + $0x394] ss:$8 sps:$4 sm:$0xff]  }
  0x42   :  { %1036 = vmatmul.mubr.bf16.vlgmr.msra.gmra.mxu0 %v1583_v4  ;;  %v1679_v4 = vld [vmem:[%s2251_s1 + $0x290] ss:$8 sps:$4 sm:$0xff]  }
  0x43   :  { %1089 = vmatmul.mubr.bf16.vlgmr.msra.gmra.mxu1 %v1586_v5  ;;  %1110 = vmatpush1.bf16.msra.mxu0 %v1589_v6  ;;  %v1682_v5 = vld [vmem:[%s2251_s1 + $0x390] ss:$8 sps:$4 sm:$0xff]   ;;  %v1687_v6 = vld [vmem:[%s2251_s1 + $0x284] ss:$8 sps:$4 sm:$0xff]  }
  0x44   :  { %1163 = vmatpush1.bf16.msra.mxu1 %v1592_v7  ;;  %1111 = vmatprep.subr.bf16.mxu0 %v1597_v8  ;;  %v1690_v7 = vld [vmem:[%s2251_s1 + $0x384] ss:$8 sps:$4 sm:$0xff]   ;;  %v1685_v8 = vld [vmem:[%s2251_s1 + $0x280] ss:$8 sps:$4 sm:$0xff]  }
  0x45   :  { %1164 = vmatprep.subr.bf16.mxu1 %v1600_v9  ;;  %1045 = vmatprep.mubr.bf16.mxu0 %v1661_v22  ;;  %v1688_v9 = vld [vmem:[%s2251_s1 + $0x380] ss:$8 sps:$4 sm:$0xff]   ;;  %v1714_v22 = vld [vmem:[%s2251_s1 + $0x444] ss:$8 sps:$4 sm:$0xff]  }
  0x46   :  { %1098 = vmatprep.mubr.bf16.mxu1 %v1670_v29  ;;  %v1723_v29 = vld [vmem:[%s2251_s1 + $0x414] ss:$8 sps:$4 sm:$0xff]  }
  0x47   :  { %1112 = vmatpush1.bf16.msra.mxu0 %v1595_v10  ;;  %v1699_v10 = vld [vmem:[%s2251_s1 + $0x474] ss:$8 sps:$4 sm:$0xff]  }
  0x48   :  { %1165 = vmatpush1.bf16.msra.mxu1 %v1598_v11  ;;  %1113 = vmatprep.subr.bf16.mxu0 %v1603_v12  ;;  %v1691_v11 = vld [vmem:[%s2252_s0 + $0x10] ss:$36 sps:$4 sm:$0xff]   ;;  %v1694_v12 = vld [vmem:[%s2252_s0 + $0x18] ss:$36 sps:$4 sm:$0xff]  }
  0x49   :  { %1166 = vmatprep.subr.bf16.mxu1 %v1606_v13  ;;  %v1697_v13 = vld [vmem:[%s2251_s1 + $0x470] ss:$8 sps:$4 sm:$0xff]  }
  0x4a   :  { %1046 = vmatmul.mubr.bf16.gmra.mxu0 %v1669_v27  ;;  %v1720_v27 = vld [vmem:[%s2251_s1 + $0x424] ss:$8 sps:$4 sm:$0xff]  }
  0x4b   :  { %1114 = vmatpush1.bf16.msra.mxu0 %v1601_v14  ;;  %1099 = vmatmul.mubr.bf16.gmra.mxu1 %v1672_v31  ;;  %v1702_v14 = vld [vmem:[%s2251_s1 + $0x464] ss:$8 sps:$4 sm:$0xff]  }
  0x4c   :  { %1167 = vmatpush1.bf16.msra.mxu1 %v1604_v15  ;;  %1115 = vmatprep.subr.bf16.mxu0 %v1609_v16  ;;  %v1703_v15 = vld [vmem:[%s2252_s0 + $0x5c] ss:$36 sps:$4 sm:$0xff]   ;;  %v1709_v16 = vld [vmem:[%s2252_s0 + $0x64] ss:$36 sps:$4 sm:$0xff]  }
  0x4d   :  { %1168 = vmatprep.subr.bf16.mxu1 %v1612_v17  ;;  %1141 = vmatprep.mubr.bf16.mxu0 %v1693_v41  ;;  %v1700_v17 = vld [vmem:[%s2251_s1 + $0x460] ss:$8 sps:$4 sm:$0xff]   ;;  %v1726_v31 = vld [vmem:[%s2251_s1 + $0x404] ss:$8 sps:$4 sm:$0xff]  }
  0x4e   :  { %1194 = vmatprep.mubr.bf16.mxu1 %v1696_v43 }
  0x4f   :  { %1116 = vmatpush1.bf16.msra.mxu0 %v1607_v18  ;;  %v1708_v18 = vld [vmem:[%s2251_s1 + $0x454] ss:$8 sps:$4 sm:$0xff]  }
  0x50   :  { %1169 = vmatpush1.bf16.msra.mxu1 %v1610_v19  ;;  %1117 = vmatprep.subr.bf16.mxu0 %v1615_v20  ;;  %v1705_v19 = vld [vmem:[%s2252_s0 + $0x58] ss:$36 sps:$4 sm:$0xff]   ;;  %v1711_v20 = vld [vmem:[%s2252_s0 + $0x60] ss:$36 sps:$4 sm:$0xff]  }
  0x51   :  { %1170 = vmatprep.subr.bf16.mxu1 %v1618_v21  ;;  %v1706_v21 = vld [vmem:[%s2251_s1 + $0x450] ss:$8 sps:$4 sm:$0xff]  }
  0x53   :  { %1118 = vmatpush1.bf16.msra.mxu0 %v1613_v23  ;;  %v1712_v23 = vld [vmem:[%s2251_s1 + $0x440] ss:$8 sps:$4 sm:$0xff]  }
  0x54   :  { %1171 = vmatpush1.bf16.msra.mxu1 %v1616_v24  ;;  %1119 = vmatprep.subr.bf16.mxu0 %v1621_v25  ;;  %v1717_v24 = vld [vmem:[%s2251_s1 + $0x434] ss:$8 sps:$4 sm:$0xff]   ;;  %v1729_v25 = vmov 0  }
  0x55   :  { %1172 = vmatprep.subr.bf16.mxu1 %v1624_v26  ;;  %v1715_v26 = vld [vmem:[%s2251_s1 + $0x430] ss:$8 sps:$4 sm:$0xff]  }
  0x57   :  { %1120 = vmatpush1.bf16.msra.mxu0 %v1619_v28  ;;  %v1718_v28 = vld [vmem:[%s2251_s1 + $0x420] ss:$8 sps:$4 sm:$0xff]  }
  0x58   :  { %1173 = vmatpush1.bf16.msra.mxu1 %v1622_v30  ;;  %1121 = vmatprep.subr.bf16.mxu0 %v1627_v32  ;;  %v1721_v30 = vld [vmem:[%s2251_s1 + $0x410] ss:$8 sps:$4 sm:$0xff]   ;;  %v1724_v32 = vld [vmem:[%s2251_s1 + $0x400] ss:$8 sps:$4 sm:$0xff]  }
  0x59   :  { %1174 = vmatprep.subr.bf16.mxu1 %v1630_v33  ;;  %v1727_v33 = vld [vmem:[%s2252_s0 + $0x20] ss:$36 sps:$4 sm:$0xff]  }
  0x5b   :  { %1122 = vmatpush1.bf16.msra.mxu0 %v1625_v34  ;;  %v1728_v34 = vld [vmem:[%s2252_s0 + $0x68] ss:$36 sps:$4 sm:$0xff]  }
  0x5c   :  { %1175 = vmatpush1.bf16.msra.mxu1 %v1628_v35  ;;  %1123 = vmatprep.subr.bf16.mxu0 %v1633_v36 }
  0x5d   :  { %1176 = vmatprep.subr.bf16.mxu1 %v1636_v37 }
  0x5f   :  { %1124 = vmatpush1.bf16.msra.mxu0 %v1631_v38 }
  0x60   :  { %1177 = vmatpush1.bf16.msra.mxu1 %v1634_v39  ;;  %1125 = vmatprep.subr.bf16.mxu0 %v1639_v40 }
  0x61   :  { %1178 = vmatprep.subr.bf16.mxu1 %v1642_v42 }
  0x63   :  { %1126 = vmatpush2.bf16.msra.mxu0 %v1637_v44 }
  0x64   :  { %1179 = vmatpush2.bf16.msra.mxu1 %v1640_v45  ;;  %1127 = vmatprep.subr.bf16.mxu0 %v1645_v46 }
  0x65   :  { %1180 = vmatprep.subr.bf16.mxu1 %v1648_v47 }
  0x67   :  { %1128 = vmatpush2.bf16.msra.mxu0 %v1643_v48 }
  0x68   :  { %1181 = vmatpush2.bf16.msra.mxu1 %v1646_v49  ;;  %1129 = vmatprep.subr.bf16.mxu0 %v1651_v50 }
  0x69   :  { %1182 = vmatprep.subr.bf16.mxu1 %v1654_v51 }
  0x6b   :  { %1130 = vmatpush2.bf16.msra.mxu0 %v1649_v52 }
  0x6c   :  { %1183 = vmatpush2.bf16.msra.mxu1 %v1652_v53  ;;  %1131 = vmatprep.subr.bf16.mxu0 %v1657_v54  ;;  %v181_v53 = vlaneseq }
  0x6d   :  { %1184 = vmatprep.subr.bf16.mxu1 %v1660_v55 }
  0x6f   :  { %1132 = vmatpush2.bf16.msra.mxu0 %v1655_v56  ;;  %v182_v56 = vshrl.u32 %v181_v53, 7 }
  0x70   :  { %1185 = vmatpush2.bf16.msra.mxu1 %v1658_v57  ;;  %1133 = vmatprep.subr.bf16.mxu0 %v1665_v58 }
  0x71   :  { %1186 = vmatprep.subr.bf16.mxu1 %v1668_v59  ;;  %v183_v59 = vsub.s32 0, %v182_v56 }
  0x73   :  { %1134 = vmatpush2.bf16.msra.mxu0 %v1663_v60  ;;  %v187_v60 = vsub.s32 1, %v182_v56 }
  0x74   :  { %1187 = vmatpush2.bf16.msra.mxu1 %v1666_v61  ;;  %1135 = vmatprep.subr.bf16.mxu0 %v1675_v62  ;;  %v179_v62 = vld [vmem:[%s2253_s2] sm:$0x3] }
  0x75   :  { %1188 = vmatprep.subr.bf16.mxu1 %v1678_v63 }
  0x77   :  { %1136 = vmatpush2.bf16.msra.mxu0 %v1673_v0  ;;  %v184_v0 = vrot.slane %v179_v62, %v183_v59 }
  0x78   :  { %1189 = vmatpush2.bf16.msra.mxu1 %v1676_v1  ;;  %1137 = vmatprep.subr.bf16.mxu0 %v1681_v2  ;;  %v188_v1 = vrot.slane %v179_v62, %v187_v60 }
  0x79   :  { %1190 = vmatprep.subr.bf16.mxu1 %v1684_v3 }
  0x7b   :  { %1138 = vmatpush2.bf16.msra.mxu0 %v1679_v4 }
  0x7c   :  { %1191 = vmatpush2.bf16.msra.mxu1 %v1682_v5  ;;  %1139 = vmatprep.subr.bf16.mxu0 %v1687_v6 }
  0x7d   :  { %1192 = vmatprep.subr.bf16.mxu1 %v1690_v7 }
  0x7f   :  { %1140 = vmatpush2.bf16.msra.mxu0 %v1685_v8 }
  0x80   :  { %1193 = vmatpush2.bf16.msra.mxu1 %v1688_v9  ;;  %1215 = vmatprep.subr.bf16.mxu0 %v1699_v10 }
  0x81   :  { %1470 = vmatprep.subr.bf16.mxu1 %v1699_v10 }
  0x82   :  { %1142 = vmatmul.mubr.bf16.vlgmr.msra.gmra.mxu0 %v1691_v11 }
  0x83   :  { %1195 = vmatmul.mubr.bf16.vlgmr.msra.gmra.mxu1 %v1694_v12  ;;  %1216 = vmatpush1.bf16.msra.mxu0 %v1697_v13 }
  0x84   :  { %1478 = vmatpush1.bf16.msra.mxu1 %v1697_v13  ;;  %1217 = vmatprep.subr.bf16.mxu0 %v1702_v14 }
  0x85   :  { %1471 = vmatprep.subr.bf16.mxu1 %v1702_v14  ;;  %1151 = vmatprep.mubr.bf16.mxu0 %v1703_v15 }
  0x86   :  { %1204 = vmatprep.mubr.bf16.mxu1 %v1709_v16 }
  0x87   :  { %1218 = vmatpush1.bf16.msra.mxu0 %v1700_v17 }
  0x88   :  { %1479 = vmatpush1.bf16.msra.mxu1 %v1700_v17  ;;  %1219 = vmatprep.subr.bf16.mxu0 %v1708_v18 }
  0x89   :  { %1472 = vmatprep.subr.bf16.mxu1 %v1708_v18 }
  0x8a   :  { %1152 = vmatmul.mubr.bf16.gmra.mxu0 %v1705_v19 }
  0x8b   :  { %1205 = vmatmul.mubr.bf16.gmra.mxu1 %v1711_v20  ;;  %1220 = vmatpush1.bf16.msra.mxu0 %v1706_v21 }
  0x8c   :  { %1480 = vmatpush1.bf16.msra.mxu1 %v1706_v21  ;;  %1221 = vmatprep.subr.bf16.mxu0 %v1714_v22 }
  0x8d   :  { %1473 = vmatprep.subr.bf16.mxu1 %v1714_v22  ;;  %1247 = vmatprep.mubr.bf16.mxu0 %v1729_v25 }
  0x8e   :  { %1257 = vmatprep.mubr.bf16.mxu1 %v1729_v25 }
  0x8f   :  { %1222 = vmatpush1.bf16.msra.mxu0 %v1712_v23 }
  0x90   :  { %1481 = vmatpush1.bf16.msra.mxu1 %v1712_v23  ;;  %1223 = vmatprep.subr.bf16.mxu0 %v1717_v24 }
  0x91   :  { %1474 = vmatprep.subr.bf16.mxu1 %v1717_v24 }
  0x93   :  { %1224 = vmatpush1.bf16.msra.mxu0 %v1715_v26 }
  0x94   :  { %1482 = vmatpush1.bf16.msra.mxu1 %v1715_v26  ;;  %1225 = vmatprep.subr.bf16.mxu0 %v1720_v27 }
  0x95   :  { %1475 = vmatprep.subr.bf16.mxu1 %v1720_v27 }
  0x97   :  { %1226 = vmatpush1.bf16.msra.mxu0 %v1718_v28 }
  0x98   :  { %1483 = vmatpush1.bf16.msra.mxu1 %v1718_v28  ;;  %1227 = vmatprep.subr.bf16.mxu0 %v1723_v29 }
  0x99   :  { %1476 = vmatprep.subr.bf16.mxu1 %v1723_v29 }
  0x9b   :  { %1228 = vmatpush1.bf16.msra.mxu0 %v1721_v30 }
  0x9c   :  { %1484 = vmatpush1.bf16.msra.mxu1 %v1721_v30  ;;  %1229 = vmatprep.subr.bf16.mxu0 %v1726_v31 }
  0x9d   :  { %1477 = vmatprep.subr.bf16.mxu1 %v1726_v31 }
  0x9f   :  { %1230 = vmatpush1.bf16.msra.mxu0 %v1724_v32 }
  0xa0   :  { %1485 = vmatpush1.bf16.msra.mxu1 %v1724_v32 }
  0xa2   :  { %1248 = vmatmul.mubr.bf16.vlgmr.msra.gmra.mxu0 %v1727_v33 }
  0xa3   :  { %1258 = vmatmul.mubr.bf16.vlgmr.msra.gmra.mxu1 %v1728_v34 }
 0x102   :  { %v1037_v35 = vpop.f32.mrf.mxu0 }
 0x103   :  { %v1090_v36 = vpop.f32.mrf.mxu1  ;;  %v1038_v4 = vadd.f32 %v1037_v35, %v184_v0 }
 0x104   :  { %v1039_v37 = vpop.f32.mrf.mxu0 }
 0x105   :  { %v1092_v38 = vpop.f32.mrf.mxu1  ;;  %v1040_v5 = vadd.f32 %v1039_v37, %v188_v1  ;;  %v1091_v10 = vadd.f32 %v1090_v36, %v1038_v4 }
 0x106   :  { %v1041_v39 = vpop.f32.mrf.mxu0 }
 0x107   :  { %v1094_v40 = vpop.f32.mrf.mxu1  ;;  %v1093_v11 = vadd.f32 %v1092_v38, %v1040_v5  ;;  %v1042_v12 = vadd.f32 %v1041_v39, %v184_v0 }
 0x108   :  { %v1043_v41 = vpop.f32.mrf.mxu0 }
 0x109   :  { %v1096_v42 = vpop.f32.mrf.mxu1  ;;  %v1044_v13 = vadd.f32 %v1043_v41, %v188_v1  ;;  %v1095_v24 = vadd.f32 %v1094_v40, %v1042_v12 }
 0x10a   :  { %v1047_v43 = vpop.f32.mrf.mxu0 }
 0x10b   :  { %v1100_v44 = vpop.f32.mrf.mxu1  ;;  %v1048_v8 = vadd.f32 %v1047_v43, %v184_v0  ;;  %v1097_v25 = vadd.f32 %v1096_v42, %v1044_v13 }
 0x10c   :  { %v1049_v45 = vpop.f32.mrf.mxu0 }
 0x10d   :  { %v1102_v46 = vpop.f32.mrf.mxu1  ;;  %v1050_v9 = vadd.f32 %v1049_v45, %v188_v1  ;;  %v1101_v16 = vadd.f32 %v1100_v44, %v1048_v8 }
 0x10e   :  { %v1051_v47 = vpop.f32.mrf.mxu0 }
 0x10f   :  { %v1104_v48 = vpop.f32.mrf.mxu1  ;;  %v1052_v17 = vadd.f32 %v1051_v47, %v184_v0  ;;  %v1103_v18 = vadd.f32 %v1102_v46, %v1050_v9 }
 0x110   :  { %v1053_v49 = vpop.f32.mrf.mxu0 }
 0x111   :  { %v1106_v50 = vpop.f32.mrf.mxu1  ;;  %v1054_v19 = vadd.f32 %v1053_v49, %v188_v1  ;;  %v1105_v28 = vadd.f32 %v1104_v48, %v1052_v17 }
 0x113   :  { %v1107_v29 = vadd.f32 %v1106_v50, %v1054_v19 }
 0x142   :  { %v1143_v51 = vpop.f32.mrf.mxu0 }
 0x143   :  { %v1196_v52 = vpop.f32.mrf.mxu1  ;;  %v1144_v20 = vadd.f32 %v1143_v51, %v1091_v10 }
 0x144   :  { %v1145_v54 = vpop.f32.mrf.mxu0 }
 0x145   :  { %v1198_v55 = vpop.f32.mrf.mxu1  ;;  %v1146_v21 = vadd.f32 %v1145_v54, %v1093_v11  ;;  %v1197_v30 = vadd.f32 %v1196_v52, %v1144_v20 }
 0x146   :  { %v1147_v57 = vpop.f32.mrf.mxu0 }
 0x147   :  { %v1200_v58 = vpop.f32.mrf.mxu1  ;;  %v1199_v31 = vadd.f32 %v1198_v55, %v1146_v21  ;;  %v1148_v32 = vadd.f32 %v1147_v57, %v1095_v24 }
 0x148   :  { %v1149_v61 = vpop.f32.mrf.mxu0 }
 0x149   :  { %v1202_v63 = vpop.f32.mrf.mxu1  ;;  %v1150_v33 = vadd.f32 %v1149_v61, %v1097_v25  ;;  %v1201_v46 = vadd.f32 %v1200_v58, %v1148_v32 }
 0x14a   :  { %v1153_v2 = vpop.f32.mrf.mxu0 }
 0x14b   :  { %v1206_v3 = vpop.f32.mrf.mxu1  ;;  %v1154_v22 = vadd.f32 %v1153_v2, %v1101_v16  ;;  %v1203_v47 = vadd.f32 %v1202_v63, %v1150_v33 }
 0x14c   :  { %v1155_v6 = vpop.f32.mrf.mxu0 }
 0x14d   :  { %v1208_v7 = vpop.f32.mrf.mxu1  ;;  %v1156_v23 = vadd.f32 %v1155_v6, %v1103_v18  ;;  %v1207_v36 = vadd.f32 %v1206_v3, %v1154_v22 }
 0x14e   :  { %v1157_v14 = vpop.f32.mrf.mxu0 }
 0x14f   :  { %v1210_v15 = vpop.f32.mrf.mxu1  ;;  %v1158_v37 = vadd.f32 %v1157_v14, %v1105_v28  ;;  %v1209_v38 = vadd.f32 %v1208_v7, %v1156_v23 }
 0x150   :  { %v1159_v26 = vpop.f32.mrf.mxu0 }
 0x151   :  { %v1212_v27 = vpop.f32.mrf.mxu1  ;;  %v1160_v39 = vadd.f32 %v1159_v26, %v1107_v29  ;;  %v1211_v50 = vadd.f32 %v1210_v15, %v1158_v37 }
 0x153   :  { %v1213_v51 = vadd.f32 %v1212_v27, %v1160_v39 }
 0x162   :  { %v1249_v34 = vpop.f32.mrf.mxu0 }
 0x163   :  { %v1259_v35 = vpop.f32.mrf.mxu1  ;;  %v1250_v44 = vadd.f32 %v1249_v34, %v1197_v30 }
 0x164   :  { %v1251_v41 = vpop.f32.mrf.mxu0  ;;  %v1260_v45 = vadd.f32 %v1259_v35, %v1207_v36 }
 0x165   :  { %v1261_v43 = vpop.f32.mrf.mxu1  ;;  %v1252_v40 = vadd.f32 %v1251_v41, %v1199_v31 }
 0x166   :  { %v1262_v42 = vadd.f32 %v1261_v43, %v1209_v38  ;;  %v1253_v48 = vpop.f32.mrf.mxu0 }
 0x167   :  { %v1263_v49 = vpop.f32.mrf.mxu1  ;;  %v1466_v52 = vpack.c.bf16 %v1252_v40, %v1250_v44  ;;  %v1254_v56 = vadd.f32 %v1253_v48, %v1201_v46 }
 0x168   :  { %v1468_v53 = vpack.c.bf16 %v1262_v42, %v1260_v45  ;;  %v1255_v54 = vpop.f32.mrf.mxu0  ;;  %v1264_v57 = vadd.f32 %v1263_v49, %v1211_v50 }
 0x169   :  { %v1265_v55 = vpop.f32.mrf.mxu1  ;;  %1292 = vst [vmem:[%s2254_s3] sm:$0xff] %v1466_v52  ;;  %v1256_v58 = vadd.f32 %v1255_v54, %v1203_v47 }
 0x16a   :  { %1294 = vst [vmem:[%s2254_s3 + $0x10] sm:$0xff] %v1468_v53  ;;  %v1266_v59 = vadd.f32 %v1265_v55, %v1213_v51 }
 0x16b   :  { %v1467_v60 = vpack.c.bf16 %v1256_v58, %v1254_v56 }
 0x16c   :  { %v1469_v61 = vpack.c.bf16 %v1266_v59, %v1264_v57 }
 0x16d   :  { %1293 = vst [vmem:[%s2254_s3 + $0x8] sm:$0xff] %v1467_v60 }
 0x16e   :  { %1295 = vst [vmem:[%s2254_s3 + $0x18] sm:$0xff] %v1469_v61 }

// kernel: generator_forward.66
= control target key start
LH: loop header
LB: loop body
LE: loop exit
PB: predicated region body
PF: predicated region fallthrough
CT: control target
= control target key end

     0   :  { %s521_s12 = smov 0   ;;  %s523_s13 = smov 0   ;;  %s568_s0 = inlined_call_operand.vmem [shape: bf16[2,16,256], index: 0, kind: input, shape index: {}]   ;;  %s569_s1 = inlined_call_operand.vmem [shape: f32[2,1,256], index: 1, kind: input, shape index: {}]   ;;  %s570_s2 = inlined_call_operand.vmem [shape: f32[2,1,256], index: 2, kind: input, shape index: {}]   ;;  %s571_s3 = inlined_call_operand.vmem [shape: bf16[2,16,256], index: 3, kind: output, shape index: {}]  }
   0x1   :  { %s525_s14 = smov 0  }
   0x2 LB: > { %s25_s15 = sadd.s32 1, %s495_s13  ;;  %p436_p0 = scmp.ge.s32.totalorder %s499_s14, 1  ;;  %s499_s14 = sphi %s525_s14, %s13_s14   ;;  %s495_s13 = sphi %s523_s13, %s573_s13   ;;  %s491_s12 = sphi %s521_s12, %s572_s12  }
   0x3   : > { %p27_p1 = scmp.ge.s32.totalorder %s25_s15, 2  ;;  %p177_p2 = scmp.lt.s32.totalorder %s499_s14, 3 }
   0x5   : > { %s575_s15 = smov (%p27_p1, %s25_s15), 0  ;;  %p178_p3 = pnand %p436_p0, %p177_p2 }
   0x6   : > { %p220_p4 = scmp.lt.s32.totalorder (!%p178_p3), %s491_s12, 1 }
   0x7   : > { %181 = sbr.rel (%p178_p3) target bundleno = 49 (0x31), region = 32 }
   0xc   : > { %s577_s12 = smov (!%p220_p4, %s491_s12), 1  ;;  %v263_v7 = vlaneseq }
   0xd   : > { %s439_s16 = sshll.u32 %s577_s12, 1  ;;  %s447_s23 = sshll.u32 %s577_s12, 4 }
   0xe   : > { %s233_s19 = scalar_lea.vmem %s569_s1, %s439_s16  ;;  %s237_s22 = scalar_lea.vmem %s570_s2, %s439_s16  ;;  %v264_v9 = vshrl.u32 %v263_v7, 7 }
   0xf   : > { %v255_v0 = vld [vmem:[%s233_s19] sm:$0x3]  ;;  %s228_s26 = scalar_lea.vmem %s568_s0, %s447_s23  ;;  %s247_s29 = scalar_lea.vmem %s571_s3, %s447_s23 }
  0x10   : > { %v257_v1 = vld [vmem:[%s237_s22] sm:$0x3]  ;;  %v256_v2 = vmul.f32 0.0625, %v255_v0  ;;  %v265_v11 = vsub.s32 0, %v264_v9  ;;  %v269_v12 = vsub.s32 1, %v264_v9  ;;  %v250_v13 = vld [vmem:[%s228_s26 + $0x8] sm:$0xff] }
  0x11   : > { %v258_v3 = vmul.f32 0.0625, %v257_v1  ;;  %v249_v10 = vld [vmem:[%s228_s26] sm:$0xff]  ;;  %v253_v16 = vunpack.c.l.bf16 %v250_v13  ;;  %v254_v17 = vunpack.c.h.bf16 %v250_v13 }
  0x12   : > { %v259_v4 = vmul.f32 %v256_v2, %v256_v2  ;;  %v251_v14 = vunpack.c.l.bf16 %v249_v10  ;;  %v252_v15 = vunpack.c.h.bf16 %v249_v10  ;;  %v266_v18 = vrot.slane %v256_v2, %v265_v11 }
  0x13   : > { %v270_v19 = vrot.slane %v256_v2, %v269_v12 }
  0x14   : > { %v260_v5 = vsub.f32 %v258_v3, %v259_v4  ;;  %v273_v20 = vsub.f32 %v251_v14, %v266_v18  ;;  %v275_v22 = vsub.f32 %v253_v16, %v266_v18 }
  0x15   : > { %v274_v21 = vsub.f32 %v252_v15, %v270_v19  ;;  %v276_v23 = vsub.f32 %v254_v17, %v270_v19 }
  0x16   : > { %v261_v6 = vmax.f32 %v260_v5, 0.0 }
  0x18   : > { %v277_v8 = vadd.f32 1e-05, %v261_v6 }
  0x1a   : > { %475 = vrsqrt.f32 %v277_v8 }
  0x27   : > { %v476_v24 = vpop.eup %475 }
  0x28   : > { %v283_v25 = vrot.slane %v476_v24, %v265_v11  ;;  %v287_v26 = vrot.slane %v476_v24, %v269_v12 }
  0x2a   : > { %v290_v27 = vmul.f32 %v283_v25, %v273_v20  ;;  %v291_v28 = vmul.f32 %v287_v26, %v274_v21  ;;  %v292_v29 = vmul.f32 %v283_v25, %v275_v22  ;;  %v293_v30 = vmul.f32 %v287_v26, %v276_v23 }
  0x2c   : > { %v294_v31 = vmax.f32 %v290_v27, 0.0  ;;  %v295_v32 = vmax.f32 %v291_v28, 0.0  ;;  %v296_v33 = vmax.f32 %v292_v29, 0.0  ;;  %v297_v34 = vmax.f32 %v293_v30, 0.0 }
  0x2e   : > { %v449_v35 = vpack.c.bf16 %v295_v32, %v294_v31  ;;  %v450_v36 = vpack.c.bf16 %v297_v34, %v296_v33 }
  0x30   : > { %310 = vst [vmem:[%s247_s29] sm:$0xff] %v449_v35  ;;  %311 = vst [vmem:[%s247_s29 + $0x8] sm:$0xff] %v450_v36 }
  0x31 PF: > { %s13_s14 = sadd.s32 1, %s499_s14   ;;  %s572_s12 = smov %s495_s13 }
  0x32   : > { %p10_p5 = scmp.ge.s32.totalorder %s13_s14, 4   ;;  %s573_s13 = smov %s575_s15 }
  0x34   :  { %12 = sbr.rel (!%p10_p5) target bundleno = 2 (0x2), region = 68 }

// kernel: generator_forward.72
= control target key start
LH: loop header
LB: loop body
LE: loop exit
PB: predicated region body
PF: predicated region fallthrough
CT: control target
= control target key end

     0   :  { %s622_s15 = smov 0   ;;  %s624_s16 = smov 0   ;;  %s669_s0 = inlined_call_operand.vmem [shape: bf16[2,16,256], index: 0, kind: input, shape index: {}]   ;;  %s670_s1 = inlined_call_operand.vmem [shape: f32[2,1,256], index: 1, kind: input, shape index: {}]   ;;  %s671_s2 = inlined_call_operand.vmem [shape: f32[2,1,256], index: 2, kind: input, shape index: {}]   ;;  %s672_s3 = inlined_call_operand.vmem [shape: bf16[2,16,256], index: 3, kind: input, shape index: {}]   ;;  %s673_s4 = inlined_call_operand.vmem [shape: bf16[2,16,256], index: 4, kind: output, shape index: {}]  }
   0x1   :  { %s626_s17 = smov 0  }
   0x2 LB: > { %s26_s18 = sadd.s32 1, %s591_s16  ;;  %p529_p0 = scmp.ge.s32.totalorder %s595_s17, 1  ;;  %s595_s17 = sphi %s626_s17, %s14_s17   ;;  %s591_s16 = sphi %s624_s16, %s675_s16   ;;  %s587_s15 = sphi %s622_s15, %s674_s15  }
   0x3   : > { %p28_p1 = scmp.ge.s32.totalorder %s26_s18, 2  ;;  %p220_p2 = scmp.lt.s32.totalorder %s595_s17, 3 }
   0x5   : > { %s677_s18 = smov (%p28_p1, %s26_s18), 0  ;;  %p221_p3 = pnand %p529_p0, %p220_p2 }
   0x6   : > { %p275_p4 = scmp.lt.s32.totalorder (!%p221_p3), %s587_s15, 1 }
   0x7   : > { %224 = sbr.rel (%p221_p3) target bundleno = 49 (0x31), region = 36 }
   0xc   : > { %s679_s15 = smov (!%p275_p4, %s587_s15), 1  ;;  %v329_v7 = vlaneseq }
   0xd   : > { %s532_s19 = sshll.u32 %s679_s15, 1  ;;  %s646_s26 = sshll.u32 %s679_s15, 4 }
   0xe   : > { %s288_s22 = scalar_lea.vmem %s670_s1, %s532_s19  ;;  %s292_s25 = scalar_lea.vmem %s671_s2, %s532_s19  ;;  %v330_v9 = vshrl.u32 %v329_v7, 7 }
   0xf   : > { %v321_v0 = vld [vmem:[%s288_s22] sm:$0x3]  ;;  %s283_s29 = scalar_lea.vmem %s669_s0, %s646_s26  ;;  %s302_s6 = scalar_lea.vmem %s672_s3, %s646_s26 }
  0x10   : > { %v323_v1 = vld [vmem:[%s292_s25] sm:$0x3]  ;;  %v322_v2 = vmul.f32 0.0625, %v321_v0  ;;  %v331_v11 = vsub.s32 0, %v330_v9  ;;  %v335_v12 = vsub.s32 1, %v330_v9  ;;  %v316_v13 = vld [vmem:[%s283_s29 + $0x8] sm:$0xff]  ;;  %s313_s9 = scalar_lea.vmem %s673_s4, %s646_s26 }
  0x11   : > { %v324_v3 = vmul.f32 0.0625, %v323_v1  ;;  %v315_v10 = vld [vmem:[%s283_s29] sm:$0xff]  ;;  %v319_v16 = vunpack.c.l.bf16 %v316_v13  ;;  %v320_v17 = vunpack.c.h.bf16 %v316_v13  ;;  %v361_v21 = vld [vmem:[%s302_s6 + $0x8] sm:$0xff] }
  0x12   : > { %v325_v4 = vmul.f32 %v322_v2, %v322_v2  ;;  %v317_v14 = vunpack.c.l.bf16 %v315_v10  ;;  %v318_v15 = vunpack.c.h.bf16 %v315_v10  ;;  %v332_v18 = vrot.slane %v322_v2, %v331_v11  ;;  %v360_v20 = vld [vmem:[%s302_s6] sm:$0xff] }
  0x13   : > { %v336_v19 = vrot.slane %v322_v2, %v335_v12  ;;  %v362_v27 = vunpack.c.l.bf16 %v360_v20  ;;  %v363_v28 = vunpack.c.h.bf16 %v360_v20  ;;  %v364_v31 = vunpack.c.l.bf16 %v361_v21 }
  0x14   : > { %v326_v5 = vsub.f32 %v324_v3, %v325_v4  ;;  %v339_v22 = vsub.f32 %v317_v14, %v332_v18  ;;  %v341_v24 = vsub.f32 %v319_v16, %v332_v18  ;;  %v365_v32 = vunpack.c.h.bf16 %v361_v21 }
  0x15   : > { %v340_v23 = vsub.f32 %v318_v15, %v336_v19  ;;  %v342_v25 = vsub.f32 %v320_v17, %v336_v19 }
  0x16   : > { %v327_v6 = vmax.f32 %v326_v5, 0.0 }
  0x18   : > { %v343_v8 = vadd.f32 1e-05, %v327_v6 }
  0x1a   : > { %571 = vrsqrt.f32 %v343_v8 }
  0x27   : > { %v572_v26 = vpop.eup %571 }
  0x28   : > { %v349_v29 = vrot.slane %v572_v26, %v331_v11  ;;  %v353_v30 = vrot.slane %v572_v26, %v335_v12 }
  0x2a   : > { %v356_v33 = vmul.f32 %v349_v29, %v339_v22  ;;  %v357_v34 = vmul.f32 %v353_v30, %v340_v23  ;;  %v358_v35 = vmul.f32 %v349_v29, %v341_v24  ;;  %v359_v36 = vmul.f32 %v353_v30, %v342_v25 }
  0x2c   : > { %v366_v37 = vadd.f32 %v362_v27, %v356_v33  ;;  %v367_v38 = vadd.f32 %v363_v28, %v357_v34  ;;  %v368_v39 = vadd.f32 %v364_v31, %v358_v35  ;;  %v369_v40 = vadd.f32 %v365_v32, %v359_v36 }
  0x2e   : > { %v545_v41 = vpack.c.bf16 %v367_v38, %v366_v37  ;;  %v546_v42 = vpack.c.bf16 %v369_v40, %v368_v39 }
  0x30   : > { %382 = vst [vmem:[%s313_s9] sm:$0xff] %v545_v41  ;;  %383 = vst [vmem:[%s313_s9 + $0x8] sm:$0xff] %v546_v42 }
  0x31 PF: > { %s14_s17 = sadd.s32 1, %s595_s17   ;;  %s674_s15 = smov %s591_s16 }
  0x32   : > { %p11_p5 = scmp.ge.s32.totalorder %s14_s17, 4   ;;  %s675_s16 = smov %s677_s18 }
  0x34   :  { %13 = sbr.rel (!%p11_p5) target bundleno = 2 (0x2), region = 75 }

// kernel: generator_forward.67
= control target key start
LH: loop header
LB: loop body
LE: loop exit
PB: predicated region body
PF: predicated region fallthrough
CT: control target
= control target key end

     0   :  { %s1608_s12 = smov 0   ;;  %s1610_s13 = smov 0   ;;  %s1818_s0 = inlined_call_operand.vmem [shape: bf16[2,6,6,256], index: 0, kind: input, shape index: {}]   ;;  %s1819_s1 = inlined_call_operand.vmem [shape: bf16[3,3,256,256], index: 1, kind: input, shape index: {}]   ;;  %s1820_s2 = inlined_call_operand.vmem [shape: f32[1,256], index: 2, kind: input, shape index: {}]   ;;  %s1821_s3 = inlined_call_operand.vmem [shape: bf16[2,4,4,256], index: 3, kind: output, shape index: {}]  }
   0x1   :  { %s1612_s14 = smov 0   ;;  %s1614_s15 = smov 0  }
   0x2   :  { %s1616_s16 = smov 0   ;;  %s1618_s17 = smov 0  }
   0x3   :  { %s1620_s18 = smov 0  }
   0x4 LB: > { %s25_s19 = sadd.s32 1, %s1573_s15  ;;  %s28_s20 = sadd.s32 1, %s1577_s16  ;;  %s1585_s18 = sphi %s1620_s18, %s13_s18   ;;  %s1581_s17 = sphi %s1618_s17, %s1827_s17   ;;  %s1577_s16 = sphi %s1616_s16, %s1826_s16   ;;  %s1573_s15 = sphi %s1614_s15, %s1825_s15   ;;  %s1569_s14 = sphi %s1612_s14, %s1824_s14   ;;  %s1565_s13 = sphi %s1610_s13, %s1823_s13   ;;  %s1561_s12 = sphi %s1608_s12, %s1822_s12  }
   0x5   : > { %p26_p0 = scmp.ge.s32.totalorder %s25_s19, 3  ;;  %p1141_p1 = scmp.ge.s32.totalorder %s1585_s18, 1 }
   0x6   : > { %p168_p2 = scmp.lt.s32.totalorder %s1585_s18, 25  ;;  %s32_s21 = sadd.s32 1, %s1581_s17 }
   0x7   : > { %s1829_s19 = smov (%p26_p0, %s25_s19), 0  ;;  %s1831_s20 = smov (!%p26_p0, %s28_s20), %s1577_s16 }
   0x8   : > { %p169_p3 = pnand %p1141_p1, %p168_p2  ;;  %p30_p4 = scmp.ge.s32.totalorder %s1831_s20, 4 }
   0x9   : > { %s201_s22 = sadd.s32 (!%p169_p3), %s1561_s12, %s1565_s13  ;;  %p202_p6 = scmp.lt.s32.totalorder (!%p169_p3), %s1569_s14, 1 }
   0xa   : > { %s1833_s20 = smov (%p30_p4, %s1831_s20), 0  ;;  %s1835_s21 = smov (!%p30_p4, %s32_s21), %s1581_s17 }
   0xb   : > { %p34_p5 = scmp.ge.s32.totalorder %s1835_s21, 2  ;;  %172 = sbr.rel (%p169_p3) target bundleno = 378 (0x17a), region = 32 }
   0xc   : > { %p204_p7 = scmp.lt.s32.totalorder (!%p169_p3), %s201_s22, 5  ;;  %p214_p8 = scmp.lt.s32.totalorder (!%p169_p3), %s1565_s13, 3 }
   0xd   : > { %s1837_s21 = smov (%p34_p5, %s1835_s21), 0  ;;  %p1147_p9 = scmp.ne.s32.totalorder (!%p169_p3), %s1561_s12, 0 }
  0x10   : > { %s1839_s14 = smov (!%p202_p6, %s1569_s14), 1  ;;  %s1841_s22 = smov (!%p204_p7, %s201_s22), 5 }
  0x11   : > { %s1323_s23 = smul.u32 12, %s1839_s14  ;;  %s1142_s24 = sshll.u32 %s1841_s22, 1 }
  0x12   : > { %s1145_s30 = sshll.u32 %s1839_s14, 3  ;;  %s1843_s13 = smov (!%p214_p8, %s1565_s13), 3 }
  0x13   : > { %s208_s25 = sadd.s32 %s1323_s23, %s1142_s24  ;;  %s1144_s4 = sshll.u32 %s1843_s13, 1 }
  0x14   : > { %s1143_s26 = sshll.u32 %s208_s25, 2  ;;  %s218_s5 = sadd.s32 %s1145_s30, %s1144_s4 }
  0x15   : > { %s1660_s29 = scalar_lea.vmem %s1818_s0, %s1143_s26  ;;  %s1146_s6 = sshll.u32 %s218_s5, 1 }
  0x16   : > { %s1666_s9 = scalar_lea.vmem %s1821_s3, %s1146_s6  ;;  %224 = sbr.rel (%p1147_p9) target bundleno = 29 (0x1d), region = 36 }
  0x1b   : > { %v1587_v0 = vmov 0.0  }
  0x1c   : > { %225 = vst [vmem:[#allocation2] sm:$0xff] %v1587_v0 }
  0x1d PF: > { %s1322_s10 = smul.u32 768, %s1561_s12  ;;  %v1671_v1 = vld [vmem:[%s1660_s29] sm:$0x33]  ;;  %p1317_p10 = scmp.ne.s32.totalorder %s1561_s12, 2 }
  0x1e   : > { %v1674_v2 = vld [vmem:[%s1660_s29] sm:$0x77]  ;;  %v1150_v3 = vcombine.high %v1671_v1, %v1671_v1 }
  0x1f   : > { %v1217_v4 = vcombine.high %v1674_v2, %v1674_v2  ;;  %s1683_s14 = scalar_lea.vmem %s1819_s1, %s1322_s10 }
  0x20   : > { %v1381_v5 = vld [vmem:[%s1683_s14 + $0x74] ss:$8 sps:$4 sm:$0xff]   ;;  %462 = vmatprep.mubr.bf16.mxu0 %v1150_v3  ;;  %v1383_v8 = vld [vmem:[%s1683_s14 + $0x70] ss:$8 sps:$4 sm:$0xff]   ;;  %v1387_v12 = vld [vmem:[%s1683_s14 + $0x64] ss:$8 sps:$4 sm:$0xff]   ;;  %v1216_v3 = vcombine.low %v1674_v2, %v1674_v2 }
  0x21   : > { %v525_v6 = vshrl.u32 %v1217_v4, 16  ;;  %v527_v7 = vshll.u32 %v1217_v4, 16  ;;  %430 = vmatprep.subr.bf16.mxu0 %v1381_v5  ;;  %v1384_v9 = vld [vmem:[%s1683_s14 + $0x174] ss:$8 sps:$4 sm:$0xff]   ;;  %v1386_v10 = vld [vmem:[%s1683_s14 + $0x170] ss:$8 sps:$4 sm:$0xff]  }
  0x22   : > { %431 = vmatpush1.bf16.msra.mxu0 %v1383_v8  ;;  %v1389_v13 = vld [vmem:[%s1683_s14 + $0x60] ss:$8 sps:$4 sm:$0xff]   ;;  %693 = vmatprep.subr.bf16.mxu1 %v1384_v9  ;;  %v1390_v14 = vld [vmem:[%s1683_s14 + $0x164] ss:$8 sps:$4 sm:$0xff]   ;;  %v1393_v17 = vld [vmem:[%s1683_s14 + $0x54] ss:$8 sps:$4 sm:$0xff]  }
  0x23   : > { %v529_v11 = vrot.slane %v527_v7, 1  ;;  %694 = vmatpush1.bf16.msra.mxu1 %v1386_v10  ;;  %432 = vmatprep.subr.bf16.mxu0 %v1387_v12  ;;  %v1392_v16 = vld [vmem:[%s1683_s14 + $0x160] ss:$8 sps:$4 sm:$0xff]   ;;  %v1395_v18 = vld [vmem:[%s1683_s14 + $0x50] ss:$8 sps:$4 sm:$0xff]   ;;  %v520_v9 = vshll.u32 %v1216_v3, 16 }
  0x24   : > { %695 = vmatprep.subr.bf16.mxu1 %v1390_v14  ;;  %v1396_v19 = vld [vmem:[%s1683_s14 + $0x154] ss:$8 sps:$4 sm:$0xff]   ;;  %v1399_v20 = vld [vmem:[%s1683_s14 + $0x44] ss:$8 sps:$4 sm:$0xff]   ;;  %v1398_v21 = vld [vmem:[%s1683_s14 + $0x150] ss:$8 sps:$4 sm:$0xff]  }
  0x25   : > { %v530_v15 = vor.u32 %v529_v11, %v525_v6  ;;  %v1402_v22 = vld [vmem:[%s1683_s14 + $0x144] ss:$8 sps:$4 sm:$0xff]   ;;  %v1401_v23 = vld [vmem:[%s1683_s14 + $0x40] ss:$8 sps:$4 sm:$0xff]   ;;  %v1405_v24 = vld [vmem:[%s1683_s14 + $0x34] ss:$8 sps:$4 sm:$0xff]  }
  0x26   : > { %433 = vmatpush1.bf16.msra.mxu0 %v1389_v13  ;;  %v1404_v25 = vld [vmem:[%s1683_s14 + $0x140] ss:$8 sps:$4 sm:$0xff]   ;;  %v1408_v26 = vld [vmem:[%s1683_s14 + $0x134] ss:$8 sps:$4 sm:$0xff]   ;;  %v1407_v27 = vld [vmem:[%s1683_s14 + $0x30] ss:$8 sps:$4 sm:$0xff]  }
  0x27   : > { %725 = vmatprep.mubr.bf16.mxu1 %v530_v15  ;;  %434 = vmatprep.subr.bf16.mxu0 %v1393_v17  ;;  %v1411_v28 = vld [vmem:[%s1683_s14 + $0x24] ss:$8 sps:$4 sm:$0xff]   ;;  %v1410_v29 = vld [vmem:[%s1683_s14 + $0x130] ss:$8 sps:$4 sm:$0xff]   ;;  %v1413_v31 = vld [vmem:[%s1683_s14 + $0x20] ss:$8 sps:$4 sm:$0xff]   ;;  %v1149_v17 = vcombine.low %v1671_v1, %v1671_v1 }
  0x28   : > { %696 = vmatpush1.bf16.msra.mxu1 %v1392_v16  ;;  %v1414_v30 = vld [vmem:[%s1683_s14 + $0x124] ss:$8 sps:$4 sm:$0xff]   ;;  %v1417_v32 = vld [vmem:[%s1683_s14 + $0x14] ss:$8 sps:$4 sm:$0xff]   ;;  %v1416_v33 = vld [vmem:[%s1683_s14 + $0x120] ss:$8 sps:$4 sm:$0xff]  }
  0x29   : > { %697 = vmatprep.subr.bf16.mxu1 %v1396_v19  ;;  %v1420_v34 = vld [vmem:[%s1683_s14 + $0x114] ss:$8 sps:$4 sm:$0xff]   ;;  %v1419_v35 = vld [vmem:[%s1683_s14 + $0x10] ss:$8 sps:$4 sm:$0xff]   ;;  %v1423_v36 = vld [vmem:[%s1683_s14 + $0x4] ss:$8 sps:$4 sm:$0xff]  }
  0x2a   : > { %435 = vmatpush1.bf16.msra.mxu0 %v1395_v18  ;;  %v1422_v37 = vld [vmem:[%s1683_s14 + $0x110] ss:$8 sps:$4 sm:$0xff]   ;;  %v1426_v38 = vld [vmem:[%s1683_s14 + $0x104] ss:$8 sps:$4 sm:$0xff]   ;;  %v1425_v39 = vld [vmem:[%s1683_s14] ss:$8 sps:$4 sm:$0xff]  }
  0x2b   : > { %436 = vmatprep.subr.bf16.mxu0 %v1399_v20  ;;  %v1429_v40 = vld [vmem:[%s1683_s14 + $0xf4] ss:$8 sps:$4 sm:$0xff]   ;;  %v1428_v41 = vld [vmem:[%s1683_s14 + $0x100] ss:$8 sps:$4 sm:$0xff]   ;;  %v1431_v43 = vld [vmem:[%s1683_s14 + $0xf0] ss:$8 sps:$4 sm:$0xff]  }
  0x2c   : > { %698 = vmatpush1.bf16.msra.mxu1 %v1398_v21  ;;  %v1432_v42 = vld [vmem:[%s1683_s14 + $0x1f4] ss:$8 sps:$4 sm:$0xff]   ;;  %v1435_v44 = vld [vmem:[%s1683_s14 + $0xe4] ss:$8 sps:$4 sm:$0xff]   ;;  %v1434_v45 = vld [vmem:[%s1683_s14 + $0x1f0] ss:$8 sps:$4 sm:$0xff]  }
  0x2d   : > { %699 = vmatprep.subr.bf16.mxu1 %v1402_v22  ;;  %v1438_v46 = vld [vmem:[%s1683_s14 + $0x1e4] ss:$8 sps:$4 sm:$0xff]   ;;  %v1437_v47 = vld [vmem:[%s1683_s14 + $0xe0] ss:$8 sps:$4 sm:$0xff]   ;;  %v1441_v48 = vld [vmem:[%s1683_s14 + $0xd4] ss:$8 sps:$4 sm:$0xff]  }
  0x2e   : > { %437 = vmatpush1.bf16.msra.mxu0 %v1401_v23  ;;  %v1440_v49 = vld [vmem:[%s1683_s14 + $0x1e0] ss:$8 sps:$4 sm:$0xff]   ;;  %v1444_v50 = vld [vmem:[%s1683_s14 + $0x1d4] ss:$8 sps:$4 sm:$0xff]   ;;  %v1443_v51 = vld [vmem:[%s1683_s14 + $0xd0] ss:$8 sps:$4 sm:$0xff]  }
  0x2f   : > { %438 = vmatprep.subr.bf16.mxu0 %v1405_v24  ;;  %v1447_v52 = vld [vmem:[%s1683_s14 + $0xc4] ss:$8 sps:$4 sm:$0xff]   ;;  %v1446_v53 = vld [vmem:[%s1683_s14 + $0x1d0] ss:$8 sps:$4 sm:$0xff]   ;;  %v1449_v55 = vld [vmem:[%s1683_s14 + $0xc0] ss:$8 sps:$4 sm:$0xff]  }
  0x30   : > { %700 = vmatpush1.bf16.msra.mxu1 %v1404_v25  ;;  %v1450_v54 = vld [vmem:[%s1683_s14 + $0x1c4] ss:$8 sps:$4 sm:$0xff]   ;;  %v1453_v56 = vld [vmem:[%s1683_s14 + $0xb4] ss:$8 sps:$4 sm:$0xff]   ;;  %v1452_v57 = vld [vmem:[%s1683_s14 + $0x1c0] ss:$8 sps:$4 sm:$0xff]  }
  0x31   : > { %701 = vmatprep.subr.bf16.mxu1 %v1408_v26  ;;  %v1456_v58 = vld [vmem:[%s1683_s14 + $0x1b4] ss:$8 sps:$4 sm:$0xff]   ;;  %v1455_v59 = vld [vmem:[%s1683_s14 + $0xb0] ss:$8 sps:$4 sm:$0xff]   ;;  %v1459_v60 = vld [vmem:[%s1683_s14 + $0xa4] ss:$8 sps:$4 sm:$0xff]  }
  0x32   : > { %439 = vmatpush1.bf16.msra.mxu0 %v1407_v27  ;;  %v1458_v61 = vld [vmem:[%s1683_s14 + $0x1b0] ss:$8 sps:$4 sm:$0xff]   ;;  %v1462_v62 = vld [vmem:[%s1683_s14 + $0x1a4] ss:$8 sps:$4 sm:$0xff]   ;;  %v1461_v63 = vld [vmem:[%s1683_s14 + $0xa0] ss:$8 sps:$4 sm:$0xff]  }
  0x33   : > { %440 = vmatprep.subr.bf16.mxu0 %v1411_v28  ;;  %v1465_v0 = vld [vmem:[%s1683_s14 + $0x94] ss:$8 sps:$4 sm:$0xff]   ;;  %v1464_v4 = vld [vmem:[%s1683_s14 + $0x1a0] ss:$8 sps:$4 sm:$0xff]   ;;  %v1467_v6 = vld [vmem:[%s1683_s14 + $0x90] ss:$8 sps:$4 sm:$0xff]  }
  0x34   : > { %702 = vmatpush1.bf16.msra.mxu1 %v1410_v29  ;;  %v1468_v5 = vld [vmem:[%s1683_s14 + $0x194] ss:$8 sps:$4 sm:$0xff]   ;;  %v1747_v7 = vld [vmem:[%s1660_s29] sm:$0x66]  ;;  %v1470_v10 = vld [vmem:[%s1683_s14 + $0x190] ss:$8 sps:$4 sm:$0xff]  }
  0x35   : > { %703 = vmatprep.subr.bf16.mxu1 %v1414_v30  ;;  %v1471_v8 = vld [vmem:[%s1683_s14 + $0x84] ss:$8 sps:$4 sm:$0xff]   ;;  %v1473_v2 = vld [vmem:[%s1683_s14 + $0x80] ss:$8 sps:$4 sm:$0xff]   ;;  %v1284_v12 = vcombine.high %v1747_v7, %v1747_v7  ;;  %v1481_v13 = vld [vmem:[%s1683_s14 + $0x274] ss:$8 sps:$4 sm:$0xff]  }
  0x36   : > { %441 = vmatpush1.bf16.msra.mxu0 %v1413_v31  ;;  %v1474_v11 = vld [vmem:[%s1683_s14 + $0x184] ss:$8 sps:$4 sm:$0xff]   ;;  %v518_v14 = vshrl.u32 %v1216_v3, 16  ;;  %v522_v15 = vrot.slane %v520_v9, 1  ;;  %v1478_v16 = vld [vmem:[%s1683_s14 + $0x180] ss:$8 sps:$4 sm:$0xff]  }
  0x37   : > { %442 = vmatprep.subr.bf16.mxu0 %v1417_v32  ;;  %v1479_v18 = vld [vmem:[%s1683_s14 + $0x270] ss:$8 sps:$4 sm:$0xff]   ;;  %v781_v19 = vrot.slane %v1284_v12, 1  ;;  %v1486_v21 = vld [vmem:[%s1683_s14 + $0x264] ss:$8 sps:$4 sm:$0xff]  }
  0x38   : > { %704 = vmatpush1.bf16.msra.mxu1 %v1416_v33  ;;  %v523_v20 = vor.u32 %v522_v15, %v518_v14  ;;  %v1484_v22 = vld [vmem:[%s1683_s14 + $0x260] ss:$8 sps:$4 sm:$0xff]   ;;  %v1489_v1 = vld [vmem:[%s1683_s14 + $0x254] ss:$8 sps:$4 sm:$0xff]   ;;  %v1487_v23 = vld [vmem:[%s1683_s14 + $0x250] ss:$8 sps:$4 sm:$0xff]  }
  0x39   : > { %705 = vmatprep.subr.bf16.mxu1 %v1420_v34  ;;  %v1492_v24 = vld [vmem:[%s1683_s14 + $0x244] ss:$8 sps:$4 sm:$0xff]   ;;  %v1490_v25 = vld [vmem:[%s1683_s14 + $0x240] ss:$8 sps:$4 sm:$0xff]   ;;  %v1495_v26 = vld [vmem:[%s1683_s14 + $0x234] ss:$8 sps:$4 sm:$0xff]  }
  0x3a   : > { %443 = vmatpush1.bf16.msra.mxu0 %v1419_v35  ;;  %v1493_v27 = vld [vmem:[%s1683_s14 + $0x230] ss:$8 sps:$4 sm:$0xff]   ;;  %v1498_v28 = vld [vmem:[%s1683_s14 + $0x224] ss:$8 sps:$4 sm:$0xff]   ;;  %v1496_v29 = vld [vmem:[%s1683_s14 + $0x220] ss:$8 sps:$4 sm:$0xff]  }
  0x3b   : > { %444 = vmatprep.subr.bf16.mxu0 %v1423_v36  ;;  %v1501_v30 = vld [vmem:[%s1683_s14 + $0x214] ss:$8 sps:$4 sm:$0xff]   ;;  %v1499_v31 = vld [vmem:[%s1683_s14 + $0x210] ss:$8 sps:$4 sm:$0xff]   ;;  %v1504_v32 = vld [vmem:[%s1683_s14 + $0x204] ss:$8 sps:$4 sm:$0xff]  }
  0x3c   : > { %706 = vmatpush1.bf16.msra.mxu1 %v1422_v37  ;;  %v1502_v33 = vld [vmem:[%s1683_s14 + $0x200] ss:$8 sps:$4 sm:$0xff]   ;;  %v1507_v34 = vld [vmem:[%s1683_s14 + $0x2f4] ss:$8 sps:$4 sm:$0xff]   ;;  %v1505_v35 = vld [vmem:[%s1683_s14 + $0x2f0] ss:$8 sps:$4 sm:$0xff]  }
  0x3d   : > { %707 = vmatprep.subr.bf16.mxu1 %v1426_v38  ;;  %v1510_v36 = vld [vmem:[%s1683_s14 + $0x2e4] ss:$8 sps:$4 sm:$0xff]   ;;  %v1508_v37 = vld [vmem:[%s1683_s14 + $0x2e0] ss:$8 sps:$4 sm:$0xff]   ;;  %v1513_v38 = vld [vmem:[%s1683_s14 + $0x2d4] ss:$8 sps:$4 sm:$0xff]  }
  0x3e   : > { %445 = vmatpush1.bf16.msra.mxu0 %v1425_v39  ;;  %v1511_v39 = vld [vmem:[%s1683_s14 + $0x2d0] ss:$8 sps:$4 sm:$0xff]  }
  0x3f   : > { %446 = vmatprep.subr.bf16.mxu0 %v1429_v40  ;;  %v1516_v40 = vld [vmem:[%s1683_s14 + $0x2c4] ss:$8 sps:$4 sm:$0xff]  }
  0x40   : > { %708 = vmatpush1.bf16.msra.mxu1 %v1428_v41  ;;  %v1514_v41 = vld [vmem:[%s1683_s14 + $0x2c0] ss:$8 sps:$4 sm:$0xff]  }
  0x41   : > { %709 = vmatprep.subr.bf16.mxu1 %v1432_v42  ;;  %v1519_v42 = vld [vmem:[%s1683_s14 + $0x2b4] ss:$8 sps:$4 sm:$0xff]  }
  0x42   : > { %447 = vmatpush2.bf16.msra.mxu0 %v1431_v43  ;;  %v1517_v43 = vld [vmem:[%s1683_s14 + $0x2b0] ss:$8 sps:$4 sm:$0xff]  }
  0x43   : > { %448 = vmatprep.subr.bf16.mxu0 %v1435_v44  ;;  %v1522_v44 = vld [vmem:[%s1683_s14 + $0x2a4] ss:$8 sps:$4 sm:$0xff]  }
  0x44   : > { %710 = vmatpush2.bf16.msra.mxu1 %v1434_v45  ;;  %v1520_v45 = vld [vmem:[%s1683_s14 + $0x2a0] ss:$8 sps:$4 sm:$0xff]  }
  0x45   : > { %711 = vmatprep.subr.bf16.mxu1 %v1438_v46  ;;  %v1525_v46 = vld [vmem:[%s1683_s14 + $0x294] ss:$8 sps:$4 sm:$0xff]  }
  0x46   : > { %449 = vmatpush2.bf16.msra.mxu0 %v1437_v47  ;;  %v1523_v47 = vld [vmem:[%s1683_s14 + $0x290] ss:$8 sps:$4 sm:$0xff]  }
  0x47   : > { %450 = vmatprep.subr.bf16.mxu0 %v1441_v48  ;;  %v1528_v48 = vld [vmem:[%s1683_s14 + $0x284] ss:$8 sps:$4 sm:$0xff]  }
  0x48   : > { %712 = vmatpush2.bf16.msra.mxu1 %v1440_v49  ;;  %v1283_v49 = vcombine.low %v1747_v7, %v1747_v7 }
  0x49   : > { %713 = vmatprep.subr.bf16.mxu1 %v1444_v50  ;;  %v1526_v50 = vld [vmem:[%s1683_s14 + $0x280] ss:$8 sps:$4 sm:$0xff]  }
  0x4a   : > { %451 = vmatpush2.bf16.msra.mxu0 %v1443_v51  ;;  %v780_v51 = vrot.slane %v1283_v49, 1 }
  0x4b   : > { %452 = vmatprep.subr.bf16.mxu0 %v1447_v52 }
  0x4c   : > { %714 = vmatpush2.bf16.msra.mxu1 %v1446_v53 }
  0x4d   : > { %715 = vmatprep.subr.bf16.mxu1 %v1450_v54 }
  0x4e   : > { %453 = vmatpush2.bf16.msra.mxu0 %v1449_v55 }
  0x4f   : > { %454 = vmatprep.subr.bf16.mxu0 %v1453_v56 }
  0x50   : > { %716 = vmatpush2.bf16.msra.mxu1 %v1452_v57 }
  0x51   : > { %717 = vmatprep.subr.bf16.mxu1 %v1456_v58 }
  0x52   : > { %455 = vmatpush2.bf16.msra.mxu0 %v1455_v59 }
  0x53   : > { %456 = vmatprep.subr.bf16.mxu0 %v1459_v60 }
  0x54   : > { %718 = vmatpush2.bf16.msra.mxu1 %v1458_v61  ;;  %v226_v61 = vld [vmem:[#allocation2] sm:$0xff] }
  0x55   : > { %719 = vmatprep.subr.bf16.mxu1 %v1462_v62 }
  0x56   : > { %457 = vmatpush2.bf16.msra.mxu0 %v1461_v63 }
  0x57   : > { %458 = vmatprep.subr.bf16.mxu0 %v1465_v0 }
  0x58   : > { %720 = vmatpush2.bf16.msra.mxu1 %v1464_v4 }
  0x59   : > { %721 = vmatprep.subr.bf16.mxu1 %v1468_v5 }
  0x5a   : > { %459 = vmatpush2.bf16.msra.mxu0 %v1467_v6 }
  0x5b   : > { %460 = vmatprep.subr.bf16.mxu0 %v1471_v8 }
  0x5c   : > { %722 = vmatpush2.bf16.msra.mxu1 %v1470_v10 }
  0x5d   : > { %723 = vmatprep.subr.bf16.mxu1 %v1474_v11 }
  0x5e   : > { %461 = vmatpush2.bf16.msra.mxu0 %v1473_v2 }
  0x5f   : > { %944 = vmatprep.subr.bf16.mxu0 %v1481_v13 }
  0x60   : > { %724 = vmatpush2.bf16.msra.mxu1 %v1478_v16 }
  0x61   : > { %463 = vmatmul.mubr.bf16.vlgmr.msra.gmra.mxu0 %v1149_v17 }
  0x62   : > { %945 = vmatpush1.bf16.msra.mxu0 %v1479_v18  ;;  %976 = vmatprep.mubr.bf16.mxu0 %v781_v19 }
  0x63   : > { %726 = vmatmul.mubr.bf16.vlgmr.msra.gmra.mxu1 %v523_v20  ;;  %946 = vmatprep.subr.bf16.mxu0 %v1486_v21 }
  0x66   : > { %947 = vmatpush1.bf16.msra.mxu0 %v1484_v22 }
  0x67   : > { %948 = vmatprep.subr.bf16.mxu0 %v1489_v1 }
  0x6a   : > { %949 = vmatpush1.bf16.msra.mxu0 %v1487_v23 }
  0x6b   : > { %950 = vmatprep.subr.bf16.mxu0 %v1492_v24 }
  0x6e   : > { %951 = vmatpush1.bf16.msra.mxu0 %v1490_v25 }
  0x6f   : > { %952 = vmatprep.subr.bf16.mxu0 %v1495_v26 }
  0x72   : > { %953 = vmatpush1.bf16.msra.mxu0 %v1493_v27 }
  0x73   : > { %954 = vmatprep.subr.bf16.mxu0 %v1498_v28 }
  0x76   : > { %955 = vmatpush1.bf16.msra.mxu0 %v1496_v29 }
  0x77   : > { %956 = vmatprep.subr.bf16.mxu0 %v1501_v30 }
  0x7a   : > { %957 = vmatpush1.bf16.msra.mxu0 %v1499_v31 }
  0x7b   : > { %958 = vmatprep.subr.bf16.mxu0 %v1504_v32 }
  0x7e   : > { %959 = vmatpush1.bf16.msra.mxu0 %v1502_v33 }
  0x7f   : > { %960 = vmatprep.subr.bf16.mxu0 %v1507_v34 }
  0x82   : > { %961 = vmatpush2.bf16.msra.mxu0 %v1505_v35 }
  0x83   : > { %962 = vmatprep.subr.bf16.mxu0 %v1510_v36 }
  0x86   : > { %963 = vmatpush2.bf16.msra.mxu0 %v1508_v37 }
  0x87   : > { %964 = vmatprep.subr.bf16.mxu0 %v1513_v38 }
  0x8a   : > { %965 = vmatpush2.bf16.msra.mxu0 %v1511_v39 }
  0x8b   : > { %966 = vmatprep.subr.bf16.mxu0 %v1516_v40 }
  0x8e   : > { %967 = vmatpush2.bf16.msra.mxu0 %v1514_v41 }
  0x8f   : > { %968 = vmatprep.subr.bf16.mxu0 %v1519_v42 }
  0x92   : > { %969 = vmatpush2.bf16.msra.mxu0 %v1517_v43 }
  0x93   : > { %970 = vmatprep.subr.bf16.mxu0 %v1522_v44 }
  0x96   : > { %971 = vmatpush2.bf16.msra.mxu0 %v1520_v45 }
  0x97   : > { %972 = vmatprep.subr.bf16.mxu0 %v1525_v46 }
  0x9a   : > { %973 = vmatpush2.bf16.msra.mxu0 %v1523_v47 }
  0x9b   : > { %974 = vmatprep.subr.bf16.mxu0 %v1528_v48 }
  0x9e   : > { %975 = vmatpush2.bf16.msra.mxu0 %v1526_v50 }
  0xa1   : > { %977 = vmatmul.mubr.bf16.vlgmr.msra.gmra.mxu0 %v780_v51 }
 0x121   : > { %v464_v52 = vpop.f32.mrf.mxu0 }
 0x123   : > { %v466_v53 = vpop.f32.mrf.mxu0  ;;  %v727_v54 = vpop.f32.mrf.mxu1 }
 0x124   : > { %v473_v60 = vcombine.low %v464_v52, %v466_v53 }
 0x125   : > { %v468_v55 = vpop.f32.mrf.mxu0  ;;  %v729_v56 = vpop.f32.mrf.mxu1 }
 0x126   : > { %v475_v62 = vadd.f32 %v473_v60, %v226_v61  ;;  %v736_v63 = vcombine.low %v727_v54, %v729_v56 }
 0x127   : > { %v469_v57 = vpop.f32.mrf.mxu0  ;;  %v731_v58 = vpop.f32.mrf.mxu1 }
 0x128   : > { %v738_v4 = vadd.f32 %v736_v63, %v475_v62 }
 0x129   : > { %v732_v59 = vpop.f32.mrf.mxu1 }
 0x161   : > { %v978_v0 = vpop.f32.mrf.mxu0 }
 0x163   : > { %v980_v3 = vpop.f32.mrf.mxu0 }
 0x164   : > { %v987_v5 = vcombine.low %v978_v0, %v980_v3  ;;  %994 = sbr.rel (%p1317_p10) target bundleno = 378 (0x17a), region = 40 }
 0x165   : > { %v982_v6 = vpop.f32.mrf.mxu0 }
 0x166   : > { %v989_v7 = vadd.f32 %v987_v5, %v738_v4 }
 0x167   : > { %v983_v8 = vpop.f32.mrf.mxu0 }
 0x168   : > { %990 = vst [vmem:[#allocation2] sm:$0xff] %v989_v7 }
 0x169   : > { %v998_v9 = vlaneseq  ;;  %v996_v11 = vld [vmem:[%s1820_s2] sm:$0x3] }
 0x16b   : > { %v999_v10 = vshrl.u32 %v998_v9, 7 }
 0x16d   : > { %v1000_v2 = vsub.s32 0, %v999_v10  ;;  %v1004_v12 = vsub.s32 1, %v999_v10 }
 0x16f   : > { %v1001_v13 = vrot.slane %v996_v11, %v1000_v2  ;;  %v1005_v14 = vrot.slane %v996_v11, %v1004_v12  ;;  %v995_v15 = vld [vmem:[#allocation2] sm:$0xff] }
 0x171   : > { %v1006_v16 = vcombine.low %v1001_v13, %v1005_v14 }
 0x173   : > { %v1008_v17 = vadd.f32 %v1006_v16, %v995_v15 }
 0x175   : > { %v1010_v18 = vcombine.high %v1008_v17, %v1008_v17 }
 0x177   : > { %v1318_v19 = vpack.c.bf16 %v1010_v18, %v1008_v17 }
 0x179   : > { %1319 = vst.sshfl [vmem:[%s1666_s9] sm:$0x33 pattern:$0x76325410] %v1318_v19 }
 0x17a PF: > { %s13_s18 = sadd.s32 1, %s1585_s18   ;;  %s1822_s12 = smov %s1573_s15 }
 0x17b   : > { %p10_p11 = scmp.ge.s32.totalorder %s13_s18, 26   ;;  %s1823_s13 = smov %s1577_s16 }
 0x17c   : > { %s1824_s14 = smov %s1581_s17  ;;  %s1825_s15 = smov %s1829_s19 }
 0x17d   : > { %s1826_s16 = smov %s1833_s20  ;;  %s1827_s17 = smov %s1837_s21 }
 0x17e   :  { %12 = sbr.rel (!%p10_p11) target bundleno = 4 (0x4), region = 73 }

// kernel: generator_forward.104
= control target key start
LH: loop header
LB: loop body
LE: loop exit
PB: predicated region body
PF: predicated region fallthrough
CT: control target
= control target key end

     0   :  { %s976_s12 = smov 0   ;;  %s978_s13 = smov 0   ;;  %s1137_s0 = inlined_call_operand.vmem [shape: bf16[2,4,5,256], index: 0, kind: input, shape index: {}]   ;;  %s1138_s1 = inlined_call_operand.vmem [shape: bf16[1,2,256,128], index: 1, kind: input, shape index: {}]   ;;  %s1139_s2 = inlined_call_operand.vmem [shape: f32[1,128], index: 2, kind: input, shape index: {}]   ;;  %s1140_s3 = inlined_call_operand.vmem [shape: bf16[2,4,4,128], index: 3, kind: output, shape index: {}]  }
   0x1   :  { %s980_s14 = smov 0   ;;  %s982_s15 = smov 0  }
   0x2   :  { %s984_s16 = smov 0  }
   0x3 LB: > { %s28_s17 = sadd.s32 1, %s945_s14  ;;  %s32_s18 = sadd.s32 1, %s949_s15  ;;  %s953_s16 = sphi %s984_s16, %s13_s16   ;;  %s949_s15 = sphi %s982_s15, %s1144_s15   ;;  %s945_s14 = sphi %s980_s14, %s1143_s14   ;;  %s941_s13 = sphi %s978_s13, %s1142_s13   ;;  %s937_s12 = sphi %s976_s12, %s1141_s12  }
   0x4   : > { %p30_p0 = scmp.ge.s32.totalorder %s28_s17, 4  ;;  %p717_p1 = scmp.ge.s32.totalorder %s953_s16, 1 }
   0x5   : > { %p168_p2 = scmp.lt.s32.totalorder %s953_s16, 9 }
   0x6   : > { %s1146_s17 = smov (%p30_p0, %s28_s17), 0  ;;  %s1148_s18 = smov (!%p30_p0, %s32_s18), %s949_s15 }
   0x7   : > { %p169_p3 = pnand %p717_p1, %p168_p2  ;;  %p34_p4 = scmp.ge.s32.totalorder %s1148_s18, 2 }
   0x8   : > { %p201_p5 = scmp.lt.s32.totalorder (!%p169_p3), %s941_s13, 1  ;;  %p203_p6 = scmp.lt.s32.totalorder (!%p169_p3), %s937_s12, 3 }
   0x9   : > { %s1150_s18 = smov (%p34_p4, %s1148_s18), 0  ;;  %172 = sbr.rel (%p169_p3) target bundleno = 262 (0x106), region = 32 }
   0xe   : > { %v879_v0 = vld [vmem:[%s1138_s1 + $0x78] sm:$0xff]   ;;  %v883_v4 = vld [vmem:[%s1138_s1 + $0x70] sm:$0xff]   ;;  %s1152_s13 = smov (!%p201_p5, %s941_s13), 1  ;;  %s1154_s12 = smov (!%p203_p6, %s937_s12), 3  ;;  %v887_v8 = vld [vmem:[%s1138_s1 + $0x68] sm:$0xff]   ;;  %v955_v46 = vmov 0.0  }
   0xf   : > { %v880_v1 = vld [vmem:[%s1138_s1 + $0xf8] sm:$0xff]   ;;  %794 = vmatprep.subr.bf16.mxu0 %v879_v0  ;;  %v884_v5 = vld [vmem:[%s1138_s1 + $0xf0] sm:$0xff]   ;;  %s721_s6 = sshll.u32 %s1152_s13, 2  ;;  %v888_v9 = vld [vmem:[%s1138_s1 + $0xe8] sm:$0xff]   ;;  %s719_s22 = sshll.u32 %s1152_s13, 3 }
  0x10   : > { %v881_v2 = vld [vmem:[%s1138_s1 + $0x38] sm:$0xff]   ;;  %816 = vmatprep.subr.bf16.mxu1 %v880_v1  ;;  %v885_v6 = vld [vmem:[%s1138_s1 + $0x30] sm:$0xff]   ;;  %s1036_s9 = sadd.s32 %s721_s6, %s1154_s12  ;;  %v889_v10 = vld [vmem:[%s1138_s1 + $0x28] sm:$0xff]   ;;  %s718_s25 = sshll.u32 %s1154_s12, 1  ;;  %224 = vst [vmem:[#allocation2] sm:$0xf] %v955_v46 }
  0x11   : > { %v882_v3 = vld [vmem:[%s1138_s1 + $0xb8] sm:$0xff]   ;;  %795 = vmatpush3.bf16.msra.mxu0 %v881_v2  ;;  %v886_v7 = vld [vmem:[%s1138_s1 + $0xb0] sm:$0xff]   ;;  %v890_v11 = vld [vmem:[%s1138_s1 + $0xa8] sm:$0xff]   ;;  %s207_s13 = sadd.s32 %s719_s22, %s718_s25  ;;  %s722_s6 = sshll.u32 %s1036_s9, 1 }
  0x12   : > { %817 = vmatpush3.bf16.msra.mxu1 %v882_v3  ;;  %796 = vmatprep.subr.bf16.mxu0 %v883_v4  ;;  %v891_v12 = vld [vmem:[%s1138_s1 + $0x60] sm:$0xff]   ;;  %v895_v16 = vld [vmem:[%s1138_s1 + $0x58] sm:$0xff]   ;;  %v899_v20 = vld [vmem:[%s1138_s1 + $0x50] sm:$0xff]   ;;  %s720_s11 = sshll.u32 %s207_s13, 2  ;;  %s218_s8 = scalar_lea.vmem %s1140_s3, %s722_s6 }
  0x13   : > { %818 = vmatprep.subr.bf16.mxu1 %v884_v5  ;;  %v892_v13 = vld [vmem:[%s1138_s1 + $0xe0] sm:$0xff]   ;;  %v896_v17 = vld [vmem:[%s1138_s1 + $0xd8] sm:$0xff]   ;;  %v900_v21 = vld [vmem:[%s1138_s1 + $0xd0] sm:$0xff]   ;;  %s209_s27 = scalar_lea.vmem %s1137_s0, %s720_s11 }
  0x14   : > { %v893_v14 = vld [vmem:[%s1138_s1 + $0x20] sm:$0xff]   ;;  %v897_v18 = vld [vmem:[%s1138_s1 + $0x18] sm:$0xff]   ;;  %v901_v22 = vld [vmem:[%s1138_s1 + $0x10] sm:$0xff]  }
  0x15   : > { %797 = vmatpush3.bf16.msra.mxu0 %v885_v6  ;;  %v894_v15 = vld [vmem:[%s1138_s1 + $0xa0] sm:$0xff]   ;;  %v898_v19 = vld [vmem:[%s1138_s1 + $0x98] sm:$0xff]   ;;  %v902_v23 = vld [vmem:[%s1138_s1 + $0x90] sm:$0xff]  }
  0x16   : > { %819 = vmatpush3.bf16.msra.mxu1 %v886_v7  ;;  %798 = vmatprep.subr.bf16.mxu0 %v887_v8  ;;  %v903_v24 = vld [vmem:[%s1138_s1 + $0x48] sm:$0xff]   ;;  %v907_v28 = vld [vmem:[%s1138_s1 + $0x40] sm:$0xff]  }
  0x17   : > { %820 = vmatprep.subr.bf16.mxu1 %v888_v9  ;;  %v904_v25 = vld [vmem:[%s1138_s1 + $0xc8] sm:$0xff]   ;;  %v908_v29 = vld [vmem:[%s1138_s1 + $0xc0] sm:$0xff]  }
  0x18   : > { %v905_v26 = vld [vmem:[%s1138_s1 + $0x8] sm:$0xff]   ;;  %v909_v30 = vld [vmem:[%s1138_s1] sm:$0xff]  }
  0x19   : > { %799 = vmatpush3.bf16.msra.mxu0 %v889_v10  ;;  %v906_v27 = vld [vmem:[%s1138_s1 + $0x88] sm:$0xff]   ;;  %v910_v31 = vld [vmem:[%s1138_s1 + $0x80] sm:$0xff]  }
  0x1a   : > { %821 = vmatpush3.bf16.msra.mxu1 %v890_v11  ;;  %800 = vmatprep.subr.bf16.mxu0 %v891_v12  ;;  %v226_v32 = vld [vmem:[%s209_s27] sm:$0x33] }
  0x1b   : > { %822 = vmatprep.subr.bf16.mxu1 %v892_v13  ;;  %v406_v33 = vld [vmem:[%s209_s27] sm:$0x77]  ;;  %v723_v34 = vcombine.low %v226_v32, %v226_v32  ;;  %v724_v35 = vcombine.high %v226_v32, %v226_v32 }
  0x1c   : > { %v773_v36 = vcombine.low %v406_v33, %v406_v33  ;;  %v774_v37 = vcombine.high %v406_v33, %v406_v33  ;;  %v225_v50 = vld [vmem:[#allocation2] sm:$0xf] }
  0x1d   : > { %801 = vmatpush3.bf16.msra.mxu0 %v893_v14  ;;  %397 = vmatprep.mubr.bf16.mxu0 %v724_v35  ;;  %v791_v60 = vld [vmem:[%s1139_s2] ss:$0 sm:$0xff] }
  0x1e   : > { %823 = vmatpush3.bf16.msra.mxu1 %v894_v15  ;;  %802 = vmatprep.subr.bf16.mxu0 %v895_v16  ;;  %v450_v38 = vshll.u32 %v773_v36, 16  ;;  %v455_v39 = vshrl.u32 %v774_v37, 16  ;;  %v457_v40 = vshll.u32 %v774_v37, 16  ;;  %v448_v41 = vshrl.u32 %v773_v36, 16 }
  0x1f   : > { %824 = vmatprep.subr.bf16.mxu1 %v896_v17 }
  0x20   : > { %v459_v42 = vrot.slane %v457_v40, 1  ;;  %v452_v43 = vrot.slane %v450_v38, 1 }
  0x21   : > { %803 = vmatpush3.bf16.msra.mxu0 %v897_v18 }
  0x22   : > { %825 = vmatpush3.bf16.msra.mxu1 %v898_v19  ;;  %804 = vmatprep.subr.bf16.mxu0 %v899_v20  ;;  %v460_v44 = vor.u32 %v459_v42, %v455_v39  ;;  %v453_v45 = vor.u32 %v452_v43, %v448_v41 }
  0x23   : > { %826 = vmatprep.subr.bf16.mxu1 %v900_v21 }
  0x24   : > { %591 = vmatprep.mubr.bf16.mxu1 %v460_v44 }
  0x25   : > { %805 = vmatpush3.bf16.msra.mxu0 %v901_v22 }
  0x26   : > { %827 = vmatpush3.bf16.msra.mxu1 %v902_v23  ;;  %806 = vmatprep.subr.bf16.mxu0 %v903_v24 }
  0x27   : > { %828 = vmatprep.subr.bf16.mxu1 %v904_v25 }
  0x29   : > { %807 = vmatpush3.bf16.msra.mxu0 %v905_v26 }
  0x2a   : > { %829 = vmatpush3.bf16.msra.mxu1 %v906_v27  ;;  %808 = vmatprep.subr.bf16.mxu0 %v907_v28 }
  0x2b   : > { %830 = vmatprep.subr.bf16.mxu1 %v908_v29 }
  0x2d   : > { %809 = vmatpush3.bf16.msra.mxu0 %v909_v30 }
  0x2e   : > { %831 = vmatpush3.bf16.msra.mxu1 %v910_v31 }
  0x30   : > { %398 = vmatmul.mubr.bf16.vlgmr.msra.gmra.mxu0 %v723_v34 }
  0x31   : > { %592 = vmatmul.mubr.bf16.vlgmr.msra.gmra.mxu1 %v453_v45 }
  0xf0   : > { %v810_v47 = vpop.f32.mrf.mxu0 }
  0xf1   : > { %v832_v52 = vpop.f32.mrf.mxu1 }
  0xf2   : > { %v811_v48 = vpop.f32.mrf.mxu0 }
  0xf3   : > { %v812_v49 = vadd.f32 %v811_v48, %v810_v47  ;;  %v833_v55 = vpop.f32.mrf.mxu1 }
  0xf4   : > { %v813_v51 = vpop.f32.mrf.mxu0  ;;  %v834_v56 = vadd.f32 %v833_v55, %v832_v52 }
  0xf5   : > { %v405_v54 = vadd.f32 %v812_v49, %v225_v50  ;;  %v835_v57 = vpop.f32.mrf.mxu1 }
  0xf6   : > { %v814_v53 = vpop.f32.mrf.mxu0 }
  0xf7   : > { %v599_v58 = vadd.f32 %v834_v56, %v405_v54  ;;  %v836_v59 = vpop.f32.mrf.mxu1 }
  0xf9   : > { %600 = vst [vmem:[#allocation2] sm:$0xf] %v599_v58 }
 0x100   : > { %v604_v61 = vld [vmem:[#allocation2] sm:$0xf] }
 0x101   : > { %v612_v62 = vadd.f32 %v791_v60, %v604_v61 }
 0x103   : > { %v613_v63 = vpack.c.bf16 %v612_v62, %v612_v62 }
 0x105   : > { %614 = vst [vmem:[%s218_s8] sm:$0x3] %v613_v63 }
 0x106 PF: > { %s13_s16 = sadd.s32 1, %s953_s16   ;;  %s1141_s12 = smov %s945_s14 }
 0x107   : > { %p10_p7 = scmp.ge.s32.totalorder %s13_s16, 10   ;;  %s1142_s13 = smov %s949_s15 }
 0x108   : > { %s1143_s14 = smov %s1146_s17  ;;  %s1144_s15 = smov %s1150_s18 }
 0x109   :  { %12 = sbr.rel (!%p10_p7) target bundleno = 3 (0x3), region = 72 }

// kernel: generator_forward.106
= control target key start
LH: loop header
LB: loop body
LE: loop exit
PB: predicated region body
PF: predicated region fallthrough
CT: control target
= control target key end

     0   :  { %s1020_s12 = smov 0   ;;  %s1022_s13 = smov 0   ;;  %s1149_s0 = inlined_call_operand.vmem [shape: bf16[2,5,5,256], index: 0, kind: input, shape index: {}]   ;;  %s1150_s1 = inlined_call_operand.vmem [shape: bf16[2,2,256,128], index: 1, kind: input, shape index: {}]   ;;  %s1151_s2 = inlined_call_operand.vmem [shape: f32[1,128], index: 2, kind: input, shape index: {}]   ;;  %s1152_s3 = inlined_call_operand.vmem [shape: bf16[2,4,4,128], index: 3, kind: output, shape index: {}]  }
   0x1   :  { %s1024_s14 = smov 0   ;;  %s1026_s15 = smov 0  }
   0x2   :  { %s1028_s16 = smov 0   ;;  %s1030_s17 = smov 0  }
   0x3   :  { %s1032_s18 = smov 0  }
   0x4 LB: > { %s25_s19 = sadd.s32 1, %s985_s15  ;;  %s28_s20 = sadd.s32 1, %s989_s16  ;;  %s997_s18 = sphi %s1032_s18, %s13_s18   ;;  %s993_s17 = sphi %s1030_s17, %s1158_s17   ;;  %s989_s16 = sphi %s1028_s16, %s1157_s16   ;;  %s985_s15 = sphi %s1026_s15, %s1156_s15   ;;  %s981_s14 = sphi %s1024_s14, %s1155_s14   ;;  %s977_s13 = sphi %s1022_s13, %s1154_s13   ;;  %s973_s12 = sphi %s1020_s12, %s1153_s12  }
   0x5   : > { %p26_p0 = scmp.ge.s32.totalorder %s25_s19, 2  ;;  %p721_p1 = scmp.ge.s32.totalorder %s997_s18, 1 }
   0x6   : > { %p168_p2 = scmp.lt.s32.totalorder %s997_s18, 17  ;;  %s32_s21 = sadd.s32 1, %s993_s17 }
   0x7   : > { %s1160_s19 = smov (%p26_p0, %s25_s19), 0  ;;  %s1162_s20 = smov (!%p26_p0, %s28_s20), %s989_s16 }
   0x8   : > { %p169_p3 = pnand %p721_p1, %p168_p2  ;;  %p30_p4 = scmp.ge.s32.totalorder %s1162_s20, 4 }
   0x9   : > { %s200_s22 = sadd.s32 (!%p169_p3), %s973_s12, %s977_s13  ;;  %p201_p6 = scmp.lt.s32.totalorder (!%p169_p3), %s981_s14, 1 }
   0xa   : > { %s1164_s20 = smov (%p30_p4, %s1162_s20), 0  ;;  %s1166_s21 = smov (!%p30_p4, %s32_s21), %s993_s17 }
   0xb   : > { %p34_p5 = scmp.ge.s32.totalorder %s1166_s21, 2  ;;  %172 = sbr.rel (%p169_p3) target bundleno = 279 (0x117), region = 32 }
   0xc   : > { %p203_p7 = scmp.lt.s32.totalorder (!%p169_p3), %s200_s22, 4  ;;  %p213_p8 = scmp.lt.s32.totalorder (!%p169_p3), %s977_s13, 3 }
   0xd   : > { %s1168_s21 = smov (%p34_p5, %s1166_s21), 0  ;;  %p726_p9 = scmp.ne.s32.totalorder (!%p169_p3), %s973_s12, 0 }
  0x10   : > { %s1170_s14 = smov (!%p201_p6, %s981_s14), 1  ;;  %s1172_s22 = smov (!%p203_p7, %s200_s22), 4 }
  0x11   : > { %s849_s23 = smul.u32 10, %s1170_s14  ;;  %s722_s24 = sshll.u32 %s1172_s22, 1 }
  0x12   : > { %s724_s30 = sshll.u32 %s1170_s14, 2  ;;  %s1174_s13 = smov (!%p213_p8, %s977_s13), 3 }
  0x13   : > { %s207_s25 = sadd.s32 %s849_s23, %s722_s24  ;;  %s216_s4 = sadd.s32 %s724_s30, %s1174_s13 }
  0x14   : > { %s723_s26 = sshll.u32 %s207_s25, 2  ;;  %s725_s5 = sshll.u32 %s216_s4, 1 }
  0x15   : > { %s209_s29 = scalar_lea.vmem %s1149_s0, %s723_s26  ;;  %s1076_s8 = scalar_lea.vmem %s1152_s3, %s725_s5 }
  0x16   : > { %223 = sbr.rel (%p726_p9) target bundleno = 29 (0x1d), region = 36 }
  0x1b   : > { %v999_v0 = vmov 0.0  }
  0x1c   : > { %224 = vst [vmem:[#allocation2] sm:$0xf] %v999_v0 }
  0x1d PF: > { %s803_s9 = sshll.u32 %s973_s12, 8  ;;  %v1080_v1 = vld [vmem:[%s209_s29] sm:$0x33]  ;;  %p799_p10 = scmp.ne.s32.totalorder %s973_s12, 1 }
  0x1e   : > { %v406_v2 = vld [vmem:[%s209_s29] sm:$0x77]  ;;  %s1085_s13 = scalar_lea.vmem %s1150_s1, %s803_s9  ;;  %v730_v3 = vcombine.high %v1080_v1, %v1080_v1  ;;  %v729_v45 = vcombine.low %v1080_v1, %v1080_v1 }
  0x1f   : > { %v782_v4 = vcombine.high %v406_v2, %v406_v2  ;;  %v907_v5 = vld [vmem:[%s1085_s13 + $0x78] sm:$0xff]   ;;  %v911_v11 = vld [vmem:[%s1085_s13 + $0x70] sm:$0xff]   ;;  %v915_v17 = vld [vmem:[%s1085_s13 + $0x68] sm:$0xff]   ;;  %v781_v30 = vcombine.low %v406_v2, %v406_v2 }
  0x20   : > { %v908_v6 = vld [vmem:[%s1085_s13 + $0xf8] sm:$0xff]   ;;  %397 = vmatprep.mubr.bf16.mxu0 %v730_v3  ;;  %805 = vmatprep.subr.bf16.mxu0 %v907_v5  ;;  %v912_v13 = vld [vmem:[%s1085_s13 + $0xf0] sm:$0xff]   ;;  %v916_v18 = vld [vmem:[%s1085_s13 + $0xe8] sm:$0xff]  }
  0x21   : > { %v455_v7 = vshrl.u32 %v782_v4, 16  ;;  %v909_v8 = vld [vmem:[%s1085_s13 + $0x38] sm:$0xff]   ;;  %v457_v9 = vshll.u32 %v782_v4, 16  ;;  %827 = vmatprep.subr.bf16.mxu1 %v908_v6  ;;  %v913_v14 = vld [vmem:[%s1085_s13 + $0x30] sm:$0xff]   ;;  %v917_v19 = vld [vmem:[%s1085_s13 + $0x28] sm:$0xff]   ;;  %v450_v35 = vshll.u32 %v781_v30, 16 }
  0x22   : > { %v910_v10 = vld [vmem:[%s1085_s13 + $0xb8] sm:$0xff]   ;;  %806 = vmatpush3.bf16.msra.mxu0 %v909_v8  ;;  %v914_v16 = vld [vmem:[%s1085_s13 + $0xb0] sm:$0xff]   ;;  %v918_v20 = vld [vmem:[%s1085_s13 + $0xa8] sm:$0xff]   ;;  %v448_v39 = vshrl.u32 %v781_v30, 16 }
  0x23   : > { %v459_v12 = vrot.slane %v457_v9, 1  ;;  %828 = vmatpush3.bf16.msra.mxu1 %v910_v10  ;;  %807 = vmatprep.subr.bf16.mxu0 %v911_v11  ;;  %v919_v21 = vld [vmem:[%s1085_s13 + $0x60] sm:$0xff]   ;;  %v923_v25 = vld [vmem:[%s1085_s13 + $0x58] sm:$0xff]   ;;  %v927_v29 = vld [vmem:[%s1085_s13 + $0x50] sm:$0xff]   ;;  %v452_v41 = vrot.slane %v450_v35, 1 }
  0x24   : > { %829 = vmatprep.subr.bf16.mxu1 %v912_v13  ;;  %v920_v22 = vld [vmem:[%s1085_s13 + $0xe0] sm:$0xff]   ;;  %v924_v26 = vld [vmem:[%s1085_s13 + $0xd8] sm:$0xff]   ;;  %v928_v31 = vld [vmem:[%s1085_s13 + $0xd0] sm:$0xff]  }
  0x25   : > { %v460_v15 = vor.u32 %v459_v12, %v455_v7  ;;  %v921_v23 = vld [vmem:[%s1085_s13 + $0x20] sm:$0xff]   ;;  %v925_v27 = vld [vmem:[%s1085_s13 + $0x18] sm:$0xff]   ;;  %v929_v32 = vld [vmem:[%s1085_s13 + $0x10] sm:$0xff]   ;;  %v453_v46 = vor.u32 %v452_v41, %v448_v39 }
  0x26   : > { %808 = vmatpush3.bf16.msra.mxu0 %v913_v14  ;;  %v922_v24 = vld [vmem:[%s1085_s13 + $0xa0] sm:$0xff]   ;;  %v926_v28 = vld [vmem:[%s1085_s13 + $0x98] sm:$0xff]   ;;  %v930_v33 = vld [vmem:[%s1085_s13 + $0x90] sm:$0xff]  }
  0x27   : > { %591 = vmatprep.mubr.bf16.mxu1 %v460_v15  ;;  %830 = vmatpush3.bf16.msra.mxu1 %v914_v16  ;;  %v931_v34 = vld [vmem:[%s1085_s13 + $0x48] sm:$0xff]   ;;  %v935_v40 = vld [vmem:[%s1085_s13 + $0x40] sm:$0xff]  }
  0x28   : > { %809 = vmatprep.subr.bf16.mxu0 %v915_v17  ;;  %831 = vmatprep.subr.bf16.mxu1 %v916_v18  ;;  %v932_v36 = vld [vmem:[%s1085_s13 + $0xc8] sm:$0xff]   ;;  %v936_v42 = vld [vmem:[%s1085_s13 + $0xc0] sm:$0xff]  }
  0x29   : > { %v933_v37 = vld [vmem:[%s1085_s13 + $0x8] sm:$0xff]   ;;  %v937_v43 = vld [vmem:[%s1085_s13] sm:$0xff]  }
  0x2a   : > { %810 = vmatpush3.bf16.msra.mxu0 %v917_v19  ;;  %v934_v38 = vld [vmem:[%s1085_s13 + $0x88] sm:$0xff]   ;;  %v938_v44 = vld [vmem:[%s1085_s13 + $0x80] sm:$0xff]  }
  0x2b   : > { %832 = vmatpush3.bf16.msra.mxu1 %v918_v20  ;;  %811 = vmatprep.subr.bf16.mxu0 %v919_v21  ;;  %v225_v49 = vld [vmem:[#allocation2] sm:$0xf] }
  0x2c   : > { %833 = vmatprep.subr.bf16.mxu1 %v920_v22 }
  0x2e   : > { %812 = vmatpush3.bf16.msra.mxu0 %v921_v23 }
  0x2f   : > { %834 = vmatpush3.bf16.msra.mxu1 %v922_v24  ;;  %813 = vmatprep.subr.bf16.mxu0 %v923_v25 }
  0x30   : > { %835 = vmatprep.subr.bf16.mxu1 %v924_v26 }
  0x32   : > { %814 = vmatpush3.bf16.msra.mxu0 %v925_v27 }
  0x33   : > { %836 = vmatpush3.bf16.msra.mxu1 %v926_v28  ;;  %815 = vmatprep.subr.bf16.mxu0 %v927_v29 }
  0x34   : > { %837 = vmatprep.subr.bf16.mxu1 %v928_v31 }
  0x36   : > { %816 = vmatpush3.bf16.msra.mxu0 %v929_v32 }
  0x37   : > { %838 = vmatpush3.bf16.msra.mxu1 %v930_v33  ;;  %817 = vmatprep.subr.bf16.mxu0 %v931_v34 }
  0x38   : > { %839 = vmatprep.subr.bf16.mxu1 %v932_v36 }
  0x3a   : > { %818 = vmatpush3.bf16.msra.mxu0 %v933_v37 }
  0x3b   : > { %840 = vmatpush3.bf16.msra.mxu1 %v934_v38  ;;  %819 = vmatprep.subr.bf16.mxu0 %v935_v40 }
  0x3c   : > { %841 = vmatprep.subr.bf16.mxu1 %v936_v42 }
  0x3e   : > { %820 = vmatpush3.bf16.msra.mxu0 %v937_v43 }
  0x3f   : > { %842 = vmatpush3.bf16.msra.mxu1 %v938_v44 }
  0x41   : > { %398 = vmatmul.mubr.bf16.vlgmr.msra.gmra.mxu0 %v729_v45 }
  0x42   : > { %592 = vmatmul.mubr.bf16.vlgmr.msra.gmra.mxu1 %v453_v46 }
 0x101   : > { %v821_v47 = vpop.f32.mrf.mxu0 }
 0x102   : > { %v843_v48 = vpop.f32.mrf.mxu1 }
 0x103   : > { %v822_v50 = vpop.f32.mrf.mxu0 }
 0x104   : > { %v823_v51 = vadd.f32 %v822_v50, %v821_v47  ;;  %v844_v52 = vpop.f32.mrf.mxu1 }
 0x105   : > { %v824_v53 = vpop.f32.mrf.mxu0  ;;  %v845_v55 = vadd.f32 %v844_v52, %v843_v48 }
 0x106   : > { %v405_v54 = vadd.f32 %v823_v51, %v225_v49  ;;  %v846_v56 = vpop.f32.mrf.mxu1  ;;  %604 = sbr.rel (%p799_p10) target bundleno = 279 (0x117), region = 40 }
 0x107   : > { %v825_v57 = vpop.f32.mrf.mxu0 }
 0x108   : > { %v599_v58 = vadd.f32 %v845_v55, %v405_v54  ;;  %v847_v59 = vpop.f32.mrf.mxu1 }
 0x10a   : > { %600 = vst [vmem:[#allocation2] sm:$0xf] %v599_v58 }
 0x10b   : > { %v800_v61 = vld [vmem:[%s1151_s2] ss:$0 sm:$0xff] }
 0x111   : > { %v605_v60 = vld [vmem:[#allocation2] sm:$0xf] }
 0x112   : > { %v613_v62 = vadd.f32 %v800_v61, %v605_v60 }
 0x114   : > { %v614_v63 = vpack.c.bf16 %v613_v62, %v613_v62 }
 0x116   : > { %615 = vst [vmem:[%s1076_s8] sm:$0x3] %v614_v63 }
 0x117 PF: > { %s13_s18 = sadd.s32 1, %s997_s18   ;;  %s1153_s12 = smov %s985_s15 }
 0x118   : > { %p10_p11 = scmp.ge.s32.totalorder %s13_s18, 18   ;;  %s1154_s13 = smov %s989_s16 }
 0x119   : > { %s1155_s14 = smov %s993_s17  ;;  %s1156_s15 = smov %s1160_s19 }
 0x11a   : > { %s1157_s16 = smov %s1164_s20  ;;  %s1158_s17 = smov %s1168_s21 }
 0x11b   :  { %12 = sbr.rel (!%p10_p11) target bundleno = 4 (0x4), region = 72 }

// kernel: generator_forward.105
= control target key start
LH: loop header
LB: loop body
LE: loop exit
PB: predicated region body
PF: predicated region fallthrough
CT: control target
= control target key end

     0   :  { %s730_s12 = smov 0   ;;  %s732_s13 = smov 0   ;;  %s837_s0 = inlined_call_operand.vmem [shape: bf16[2,5,4,256], index: 0, kind: input, shape index: {}]   ;;  %s838_s1 = inlined_call_operand.vmem [shape: bf16[2,1,256,128], index: 1, kind: input, shape index: {}]   ;;  %s839_s2 = inlined_call_operand.vmem [shape: f32[1,128], index: 2, kind: input, shape index: {}]   ;;  %s840_s3 = inlined_call_operand.vmem [shape: bf16[2,4,4,128], index: 3, kind: output, shape index: {}]  }
   0x1   :  { %s734_s14 = smov 0   ;;  %s736_s15 = smov 0  }
   0x2   :  { %s738_s16 = smov 0   ;;  %s740_s17 = smov 0  }
   0x3   :  { %s742_s18 = smov 0  }
   0x4 LB: > { %s25_s19 = sadd.s32 1, %s695_s15  ;;  %s28_s20 = sadd.s32 1, %s699_s16  ;;  %s707_s18 = sphi %s742_s18, %s13_s18   ;;  %s703_s17 = sphi %s740_s17, %s846_s17   ;;  %s699_s16 = sphi %s738_s16, %s845_s16   ;;  %s695_s15 = sphi %s736_s15, %s844_s15   ;;  %s691_s14 = sphi %s734_s14, %s843_s14   ;;  %s687_s13 = sphi %s732_s13, %s842_s13   ;;  %s683_s12 = sphi %s730_s12, %s841_s12  }
   0x5   : > { %p26_p0 = scmp.ge.s32.totalorder %s25_s19, 2  ;;  %p527_p1 = scmp.ge.s32.totalorder %s707_s18, 1 }
   0x6   : > { %p168_p2 = scmp.lt.s32.totalorder %s707_s18, 17  ;;  %s32_s21 = sadd.s32 1, %s703_s17 }
   0x7   : > { %s848_s19 = smov (%p26_p0, %s25_s19), 0  ;;  %s850_s20 = smov (!%p26_p0, %s28_s20), %s699_s16 }
   0x8   : > { %p169_p3 = pnand %p527_p1, %p168_p2  ;;  %p30_p4 = scmp.ge.s32.totalorder %s850_s20, 4 }
   0x9   : > { %s200_s22 = sadd.s32 (!%p169_p3), %s683_s12, %s687_s13  ;;  %p201_p6 = scmp.lt.s32.totalorder (!%p169_p3), %s691_s14, 1 }
   0xa   : > { %s852_s20 = smov (%p30_p4, %s850_s20), 0  ;;  %s854_s21 = smov (!%p30_p4, %s32_s21), %s703_s17 }
   0xb   : > { %p34_p5 = scmp.ge.s32.totalorder %s854_s21, 2  ;;  %172 = sbr.rel (%p169_p3) target bundleno = 276 (0x114), region = 32 }
   0xc   : > { %p203_p7 = scmp.lt.s32.totalorder (!%p169_p3), %s200_s22, 4  ;;  %p213_p8 = scmp.lt.s32.totalorder (!%p169_p3), %s687_s13, 3 }
   0xd   : > { %s856_s21 = smov (%p34_p5, %s854_s21), 0  ;;  %p532_p9 = scmp.ne.s32.totalorder (!%p169_p3), %s683_s12, 0 }
  0x10   : > { %s858_s14 = smov (!%p201_p6, %s691_s14), 1  ;;  %s860_s22 = smov (!%p203_p7, %s200_s22), 4 }
  0x11   : > { %s579_s23 = smul.u32 10, %s858_s14  ;;  %s528_s24 = sshll.u32 %s860_s22, 1 }
  0x12   : > { %s530_s30 = sshll.u32 %s858_s14, 2  ;;  %s862_s13 = smov (!%p213_p8, %s687_s13), 3 }
  0x13   : > { %s207_s25 = sadd.s32 %s579_s23, %s528_s24  ;;  %s216_s4 = sadd.s32 %s530_s30, %s862_s13 }
  0x14   : > { %s529_s26 = sshll.u32 %s207_s25, 1  ;;  %s531_s5 = sshll.u32 %s216_s4, 1 }
  0x15   : > { %s209_s29 = scalar_lea.vmem %s837_s0, %s529_s26  ;;  %s786_s8 = scalar_lea.vmem %s840_s3, %s531_s5 }
  0x16   : > { %223 = sbr.rel (%p532_p9) target bundleno = 29 (0x1d), region = 36 }
  0x1b   : > { %v709_v0 = vmov 0.0  }
  0x1c   : > { %224 = vst [vmem:[#allocation2] sm:$0xf] %v709_v0 }
  0x1d PF: > { %s556_s9 = sshll.u32 %s683_s12, 7  ;;  %v535_v1 = vld.sshfl [vmem:[%s209_s29] sm:$0x33 pattern:$0x76325410]  ;;  %p552_p10 = scmp.ne.s32.totalorder %s683_s12, 1 }
  0x1e   : > { %s793_s14 = scalar_lea.vmem %s838_s1, %s556_s9  ;;  %v270_v2 = vcombine.high %v535_v1, %v535_v1 }
  0x1f   : > { %v637_v3 = vld [vmem:[%s793_s14 + $0x78] sm:$0xff]   ;;  %v639_v5 = vld [vmem:[%s793_s14 + $0x70] sm:$0xff]   ;;  %v641_v7 = vld [vmem:[%s793_s14 + $0x68] sm:$0xff]  }
  0x20   : > { %v638_v4 = vld [vmem:[%s793_s14 + $0x38] sm:$0xff]   ;;  %401 = vmatprep.mubr.bf16.mxu0 %v270_v2  ;;  %557 = vmatprep.subr.bf16.mxu0 %v637_v3  ;;  %v640_v6 = vld [vmem:[%s793_s14 + $0x30] sm:$0xff]   ;;  %v642_v8 = vld [vmem:[%s793_s14 + $0x28] sm:$0xff]  }
  0x21   : > { %558 = vmatpush3.bf16.msra.mxu0 %v638_v4  ;;  %v643_v9 = vld [vmem:[%s793_s14 + $0x60] sm:$0xff]   ;;  %v645_v11 = vld [vmem:[%s793_s14 + $0x58] sm:$0xff]   ;;  %v647_v13 = vld [vmem:[%s793_s14 + $0x50] sm:$0xff]  }
  0x22   : > { %559 = vmatprep.subr.bf16.mxu0 %v639_v5  ;;  %v644_v10 = vld [vmem:[%s793_s14 + $0x20] sm:$0xff]   ;;  %v646_v12 = vld [vmem:[%s793_s14 + $0x18] sm:$0xff]   ;;  %v648_v14 = vld [vmem:[%s793_s14 + $0x10] sm:$0xff]  }
  0x23   : > { %v649_v15 = vld [vmem:[%s793_s14 + $0x48] sm:$0xff]   ;;  %v651_v17 = vld [vmem:[%s793_s14 + $0x40] sm:$0xff]  }
  0x24   : > { %v650_v16 = vld [vmem:[%s793_s14 + $0x8] sm:$0xff]   ;;  %v652_v18 = vld [vmem:[%s793_s14] sm:$0xff]  }
  0x25   : > { %560 = vmatpush3.bf16.msra.mxu0 %v640_v6  ;;  %v225_v20 = vld [vmem:[#allocation2] sm:$0xf] }
  0x26   : > { %561 = vmatprep.subr.bf16.mxu0 %v641_v7 }
  0x29   : > { %562 = vmatpush3.bf16.msra.mxu0 %v642_v8 }
  0x2a   : > { %563 = vmatprep.subr.bf16.mxu0 %v643_v9 }
  0x2d   : > { %564 = vmatpush3.bf16.msra.mxu0 %v644_v10 }
  0x2e   : > { %565 = vmatprep.subr.bf16.mxu0 %v645_v11 }
  0x31   : > { %566 = vmatpush3.bf16.msra.mxu0 %v646_v12 }
  0x32   : > { %567 = vmatprep.subr.bf16.mxu0 %v647_v13 }
  0x35   : > { %568 = vmatpush3.bf16.msra.mxu0 %v648_v14 }
  0x36   : > { %569 = vmatprep.subr.bf16.mxu0 %v649_v15 }
  0x39   : > { %570 = vmatpush3.bf16.msra.mxu0 %v650_v16 }
  0x3a   : > { %571 = vmatprep.subr.bf16.mxu0 %v651_v17 }
  0x3d   : > { %572 = vmatpush3.bf16.msra.mxu0 %v652_v18 }
  0x40   : > { %402 = vmatmul.mubr.bf16.vlgmr.msra.gmra.mxu0 %v535_v1 }
 0x100   : > { %v573_v19 = vpop.f32.mrf.mxu0 }
 0x102   : > { %v574_v21 = vpop.f32.mrf.mxu0 }
 0x103   : > { %v575_v22 = vadd.f32 %v574_v21, %v573_v19  ;;  %414 = sbr.rel (%p552_p10) target bundleno = 276 (0x114), region = 40 }
 0x104   : > { %v576_v23 = vpop.f32.mrf.mxu0 }
 0x105   : > { %v409_v24 = vadd.f32 %v575_v22, %v225_v20 }
 0x106   : > { %v577_v25 = vpop.f32.mrf.mxu0 }
 0x107   : > { %410 = vst [vmem:[#allocation2] sm:$0xf] %v409_v24 }
 0x108   : > { %v553_v27 = vld [vmem:[%s839_s2] ss:$0 sm:$0xff] }
 0x10e   : > { %v415_v26 = vld [vmem:[#allocation2] sm:$0xf] }
 0x10f   : > { %v423_v28 = vadd.f32 %v553_v27, %v415_v26 }
 0x111   : > { %v424_v29 = vpack.c.bf16 %v423_v28, %v423_v28 }
 0x113   : > { %425 = vst [vmem:[%s786_s8] sm:$0x3] %v424_v29 }
 0x114 PF: > { %s13_s18 = sadd.s32 1, %s707_s18   ;;  %s841_s12 = smov %s695_s15 }
 0x115   : > { %p10_p11 = scmp.ge.s32.totalorder %s13_s18, 18   ;;  %s842_s13 = smov %s699_s16 }
 0x116   : > { %s843_s14 = smov %s703_s17  ;;  %s844_s15 = smov %s848_s19 }
 0x117   : > { %s845_s16 = smov %s852_s20  ;;  %s846_s17 = smov %s856_s21 }
 0x118   :  { %12 = sbr.rel (!%p10_p11) target bundleno = 4 (0x4), region = 71 }

// kernel: generator_forward.103
= control target key start
LH: loop header
LB: loop body
LE: loop exit
PB: predicated region body
PF: predicated region fallthrough
CT: control target
= control target key end

     0   :  { %s689_s12 = smov 0   ;;  %s691_s13 = smov 0   ;;  %s794_s0 = inlined_call_operand.vmem [shape: bf16[2,4,4,256], index: 0, kind: input, shape index: {}]   ;;  %s795_s1 = inlined_call_operand.vmem [shape: bf16[1,1,256,128], index: 1, kind: input, shape index: {}]   ;;  %s796_s2 = inlined_call_operand.vmem [shape: f32[1,128], index: 2, kind: input, shape index: {}]   ;;  %s797_s3 = inlined_call_operand.vmem [shape: bf16[2,4,4,128], index: 3, kind: output, shape index: {}]  }
   0x1   :  { %s693_s14 = smov 0   ;;  %s695_s15 = smov 0  }
   0x2   :  { %s697_s16 = smov 0  }
   0x3 LB: > { %s28_s17 = sadd.s32 1, %s658_s14  ;;  %s32_s18 = sadd.s32 1, %s662_s15  ;;  %s666_s16 = sphi %s697_s16, %s13_s16   ;;  %s662_s15 = sphi %s695_s15, %s801_s15   ;;  %s658_s14 = sphi %s693_s14, %s800_s14   ;;  %s654_s13 = sphi %s691_s13, %s799_s13   ;;  %s650_s12 = sphi %s689_s12, %s798_s12  }
   0x4   : > { %p30_p0 = scmp.ge.s32.totalorder %s28_s17, 4  ;;  %p523_p1 = scmp.ge.s32.totalorder %s666_s16, 1 }
   0x5   : > { %p168_p2 = scmp.lt.s32.totalorder %s666_s16, 9 }
   0x6   : > { %s803_s17 = smov (%p30_p0, %s28_s17), 0  ;;  %s805_s18 = smov (!%p30_p0, %s32_s18), %s662_s15 }
   0x7   : > { %p169_p3 = pnand %p523_p1, %p168_p2  ;;  %p34_p4 = scmp.ge.s32.totalorder %s805_s18, 2 }
   0x8   : > { %p201_p5 = scmp.lt.s32.totalorder (!%p169_p3), %s654_s13, 1  ;;  %p203_p6 = scmp.lt.s32.totalorder (!%p169_p3), %s650_s12, 3 }
   0x9   : > { %s807_s18 = smov (%p34_p4, %s805_s18), 0  ;;  %172 = sbr.rel (%p169_p3) target bundleno = 259 (0x103), region = 32 }
   0xe   : > { %v612_v0 = vld [vmem:[%s795_s1 + $0x78] sm:$0xff]   ;;  %v614_v2 = vld [vmem:[%s795_s1 + $0x70] sm:$0xff]   ;;  %s809_s13 = smov (!%p201_p5, %s654_s13), 1  ;;  %s811_s12 = smov (!%p203_p6, %s650_s12), 3  ;;  %v616_v4 = vld [vmem:[%s795_s1 + $0x68] sm:$0xff]   ;;  %v668_v18 = vmov 0.0  }
   0xf   : > { %v613_v1 = vld [vmem:[%s795_s1 + $0x38] sm:$0xff]   ;;  %549 = vmatprep.subr.bf16.mxu0 %v612_v0  ;;  %v615_v3 = vld [vmem:[%s795_s1 + $0x30] sm:$0xff]   ;;  %s525_s29 = sshll.u32 %s809_s13, 3  ;;  %s524_s30 = sshll.u32 %s811_s12, 1  ;;  %v617_v5 = vld [vmem:[%s795_s1 + $0x28] sm:$0xff]  }
  0x10   : > { %550 = vmatpush3.bf16.msra.mxu0 %v613_v1  ;;  %s527_s4 = sshll.u32 %s809_s13, 2  ;;  %s207_s7 = sadd.s32 %s525_s29, %s524_s30  ;;  %v618_v6 = vld [vmem:[%s795_s1 + $0x60] sm:$0xff]   ;;  %v620_v8 = vld [vmem:[%s795_s1 + $0x58] sm:$0xff]   ;;  %v622_v10 = vld [vmem:[%s795_s1 + $0x50] sm:$0xff]   ;;  %224 = vst [vmem:[#allocation2] sm:$0xf] %v668_v18 }
  0x11   : > { %551 = vmatprep.subr.bf16.mxu0 %v614_v2  ;;  %s737_s8 = sadd.s32 %s527_s4, %s811_s12  ;;  %s526_s11 = sshll.u32 %s207_s7, 1  ;;  %v619_v7 = vld [vmem:[%s795_s1 + $0x20] sm:$0xff]   ;;  %v621_v9 = vld [vmem:[%s795_s1 + $0x18] sm:$0xff]   ;;  %v623_v13 = vld [vmem:[%s795_s1 + $0x10] sm:$0xff]  }
  0x12   : > { %s209_s12 = scalar_lea.vmem %s794_s0, %s526_s11  ;;  %v624_v14 = vld [vmem:[%s795_s1 + $0x48] sm:$0xff]   ;;  %v626_v16 = vld [vmem:[%s795_s1 + $0x40] sm:$0xff]   ;;  %s528_s13 = sshll.u32 %s737_s8, 1 }
  0x13   : > { %v529_v11 = vld.sshfl [vmem:[%s209_s12] sm:$0x33 pattern:$0x76325410]  ;;  %v625_v15 = vld [vmem:[%s795_s1 + $0x8] sm:$0xff]   ;;  %s218_s23 = scalar_lea.vmem %s797_s3, %s528_s13 }
  0x14   : > { %552 = vmatpush3.bf16.msra.mxu0 %v615_v3  ;;  %v270_v12 = vcombine.high %v529_v11, %v529_v11  ;;  %v627_v17 = vld [vmem:[%s795_s1] sm:$0xff]  }
  0x15   : > { %553 = vmatprep.subr.bf16.mxu0 %v616_v4  ;;  %v546_v26 = vld [vmem:[%s796_s2] ss:$0 sm:$0xff] }
  0x16   : > { %401 = vmatprep.mubr.bf16.mxu0 %v270_v12 }
  0x17   : > { %v225_v20 = vld [vmem:[#allocation2] sm:$0xf] }
  0x18   : > { %554 = vmatpush3.bf16.msra.mxu0 %v617_v5 }
  0x19   : > { %555 = vmatprep.subr.bf16.mxu0 %v618_v6 }
  0x1c   : > { %556 = vmatpush3.bf16.msra.mxu0 %v619_v7 }
  0x1d   : > { %557 = vmatprep.subr.bf16.mxu0 %v620_v8 }
  0x20   : > { %558 = vmatpush3.bf16.msra.mxu0 %v621_v9 }
  0x21   : > { %559 = vmatprep.subr.bf16.mxu0 %v622_v10 }
  0x24   : > { %560 = vmatpush3.bf16.msra.mxu0 %v623_v13 }
  0x25   : > { %561 = vmatprep.subr.bf16.mxu0 %v624_v14 }
  0x28   : > { %562 = vmatpush3.bf16.msra.mxu0 %v625_v15 }
  0x29   : > { %563 = vmatprep.subr.bf16.mxu0 %v626_v16 }
  0x2c   : > { %564 = vmatpush3.bf16.msra.mxu0 %v627_v17 }
  0x2f   : > { %402 = vmatmul.mubr.bf16.vlgmr.msra.gmra.mxu0 %v529_v11 }
  0xef   : > { %v565_v19 = vpop.f32.mrf.mxu0 }
  0xf1   : > { %v566_v21 = vpop.f32.mrf.mxu0 }
  0xf2   : > { %v567_v22 = vadd.f32 %v566_v21, %v565_v19 }
  0xf3   : > { %v568_v23 = vpop.f32.mrf.mxu0 }
  0xf4   : > { %v409_v24 = vadd.f32 %v567_v22, %v225_v20 }
  0xf5   : > { %v569_v25 = vpop.f32.mrf.mxu0 }
  0xf6   : > { %410 = vst [vmem:[#allocation2] sm:$0xf] %v409_v24 }
  0xfd   : > { %v414_v27 = vld [vmem:[#allocation2] sm:$0xf] }
  0xfe   : > { %v422_v28 = vadd.f32 %v546_v26, %v414_v27 }
 0x100   : > { %v423_v29 = vpack.c.bf16 %v422_v28, %v422_v28 }
 0x102   : > { %424 = vst [vmem:[%s218_s23] sm:$0x3] %v423_v29 }
 0x103 PF: > { %s13_s16 = sadd.s32 1, %s666_s16   ;;  %s798_s12 = smov %s658_s14 }
 0x104   : > { %p10_p7 = scmp.ge.s32.totalorder %s13_s16, 10   ;;  %s799_s13 = smov %s662_s15 }
 0x105   : > { %s800_s14 = smov %s803_s17  ;;  %s801_s15 = smov %s807_s18 }
 0x106   :  { %12 = sbr.rel (!%p10_p7) target bundleno = 3 (0x3), region = 71 }

// kernel: generator_forward.112
= control target key start
LH: loop header
LB: loop body
LE: loop exit
PB: predicated region body
PF: predicated region fallthrough
CT: control target
= control target key end

     0   :  { %s845_s12 = smov 0   ;;  %s847_s13 = smov 0   ;;  %s956_s0 = inlined_call_operand.vmem [shape: bf16[2,9,9,128], index: 0, kind: input, shape index: {}]   ;;  %s957_s1 = inlined_call_operand.vmem [shape: bf16[2,2,128,64], index: 1, kind: input, shape index: {}]   ;;  %s958_s2 = inlined_call_operand.vmem [shape: f32[1,64], index: 2, kind: input, shape index: {}]   ;;  %s959_s3 = inlined_call_operand.vmem [shape: bf16[2,8,8,64], index: 3, kind: output, shape index: {}]  }
   0x1   :  { %s849_s14 = smov 0   ;;  %s851_s15 = smov 0  }
   0x2   :  { %s853_s16 = smov 0   ;;  %s855_s17 = smov 0  }
   0x3   :  { %s857_s18 = smov 0  }
   0x4 LB: > { %s25_s19 = sadd.s32 1, %s808_s15  ;;  %s28_s20 = sadd.s32 1, %s812_s16  ;;  %s820_s18 = sphi %s857_s18, %s13_s18   ;;  %s816_s17 = sphi %s855_s17, %s965_s17   ;;  %s812_s16 = sphi %s853_s16, %s964_s16   ;;  %s808_s15 = sphi %s851_s15, %s963_s15   ;;  %s804_s14 = sphi %s849_s14, %s962_s14   ;;  %s800_s13 = sphi %s847_s13, %s961_s13   ;;  %s796_s12 = sphi %s845_s12, %s960_s12  }
   0x5   : > { %p26_p0 = scmp.ge.s32.totalorder %s25_s19, 2  ;;  %p582_p1 = scmp.ge.s32.totalorder %s820_s18, 1 }
   0x6   : > { %p168_p2 = scmp.lt.s32.totalorder %s820_s18, 33  ;;  %s32_s21 = sadd.s32 1, %s816_s17 }
   0x7   : > { %s967_s19 = smov (%p26_p0, %s25_s19), 0  ;;  %s969_s20 = smov (!%p26_p0, %s28_s20), %s812_s16 }
   0x8   : > { %p169_p3 = pnand %p582_p1, %p168_p2  ;;  %p30_p4 = scmp.ge.s32.totalorder %s969_s20, 8 }
   0x9   : > { %s200_s22 = sadd.s32 (!%p169_p3), %s796_s12, %s800_s13  ;;  %p201_p6 = scmp.lt.s32.totalorder (!%p169_p3), %s804_s14, 1 }
   0xa   : > { %s971_s20 = smov (%p30_p4, %s969_s20), 0  ;;  %s973_s21 = smov (!%p30_p4, %s32_s21), %s816_s17 }
   0xb   : > { %p34_p5 = scmp.ge.s32.totalorder %s973_s21, 2  ;;  %172 = sbr.rel (%p169_p3) target bundleno = 273 (0x111), region = 32 }
   0xc   : > { %p203_p7 = scmp.lt.s32.totalorder (!%p169_p3), %s200_s22, 8  ;;  %p213_p8 = scmp.lt.s32.totalorder (!%p169_p3), %s800_s13, 7 }
   0xd   : > { %s975_s21 = smov (%p34_p5, %s973_s21), 0  ;;  %p587_p9 = scmp.ne.s32.totalorder (!%p169_p3), %s796_s12, 0 }
  0x10   : > { %s977_s14 = smov (!%p201_p6, %s804_s14), 1  ;;  %s979_s22 = smov (!%p203_p7, %s200_s22), 8 }
  0x11   : > { %s689_s23 = smul.u32 18, %s977_s14  ;;  %s583_s24 = sshll.u32 %s979_s22, 1 }
  0x12   : > { %s585_s30 = sshll.u32 %s977_s14, 3  ;;  %s981_s13 = smov (!%p213_p8, %s800_s13), 7 }
  0x13   : > { %s207_s25 = sadd.s32 %s689_s23, %s583_s24  ;;  %s216_s4 = sadd.s32 %s585_s30, %s981_s13 }
  0x14   : > { %s584_s26 = sshll.u32 %s207_s25, 2  ;;  %s586_s5 = sshll.u32 %s216_s4, 2 }
  0x15   : > { %s897_s29 = scalar_lea.vmem %s956_s0, %s584_s26  ;;  %s903_s8 = scalar_lea.vmem %s959_s3, %s586_s5 }
  0x16   : > { %223 = sbr.rel (%p587_p9) target bundleno = 29 (0x1d), region = 36 }
  0x1b   : > { %vm224_vm0 = vcmask 523264   ;;  %v822_v0 = vmov 0.0  }
  0x1c   : > { %225 = vst.msk [vmem:[#allocation2] sm:$0xff] %vm224_vm0, %v822_v0 }
  0x1d PF: > { %s629_s9 = sshll.u32 %s796_s12, 7  ;;  %v823_v1 = vmov 0.0   ;;  %vm824_vm1 = vmmov 0   ;;  %v765_v13 = vld [vmem:[%s897_s29] sm:$0x1f]   ;;  %vm459_vm2 = vcmask 523264  }
  0x1e   : > { %649 = vmatprep.subr.bf16.mxu0 %v823_v1  ;;  %669 = vmatprep.subr.bf16.mxu1 %v823_v1  ;;  %s910_s13 = scalar_lea.vmem %s957_s1, %s629_s9  ;;  %v365_v16 = vshll.u32 %v765_v13, 16  ;;  %v363_v19 = vshrl.u32 %v765_v13, 16  ;;  %v227_v22 = vld [vmem:[%s897_s29] sm:$0xf]  ;;  %p625_p10 = scmp.ne.s32.totalorder %s796_s12, 1 }
  0x1f   : > { %v749_v2 = vld [vmem:[%s910_s13 + $0x38] sm:$0xff]   ;;  %665 = vmatprep.mubr.msk.bf16.mxu0 %vm824_vm1, %v823_v1  ;;  %685 = vmatprep.mubr.msk.bf16.mxu1 %vm824_vm1, %v823_v1  ;;  %v751_v4 = vld [vmem:[%s910_s13 + $0x30] sm:$0xff]   ;;  %v753_v6 = vld [vmem:[%s910_s13 + $0x28] sm:$0xff]  }
  0x20   : > { %v750_v3 = vld [vmem:[%s910_s13 + $0x78] sm:$0xff]   ;;  %650 = vmatpush3.bf16.msra.mxu0 %v749_v2  ;;  %v752_v5 = vld [vmem:[%s910_s13 + $0x70] sm:$0xff]   ;;  %v754_v7 = vld [vmem:[%s910_s13 + $0x68] sm:$0xff]   ;;  %v367_v20 = vrot.slane %v365_v16, 1 }
  0x21   : > { %670 = vmatpush3.bf16.msra.mxu1 %v750_v3  ;;  %651 = vmatprep.subr.bf16.mxu0 %v823_v1  ;;  %v755_v8 = vld [vmem:[%s910_s13 + $0x20] sm:$0xff]   ;;  %v757_v10 = vld [vmem:[%s910_s13 + $0x18] sm:$0xff]   ;;  %v759_v12 = vld [vmem:[%s910_s13 + $0x10] sm:$0xff]  }
  0x22   : > { %671 = vmatprep.subr.bf16.mxu1 %v823_v1  ;;  %v756_v9 = vld [vmem:[%s910_s13 + $0x60] sm:$0xff]   ;;  %v758_v11 = vld [vmem:[%s910_s13 + $0x58] sm:$0xff]   ;;  %v760_v14 = vld [vmem:[%s910_s13 + $0x50] sm:$0xff]   ;;  %v368_v23 = vor.u32 %v367_v20, %v363_v19 }
  0x23   : > { %v761_v15 = vld [vmem:[%s910_s13 + $0x8] sm:$0xff]   ;;  %v763_v18 = vld [vmem:[%s910_s13] sm:$0xff]  }
  0x24   : > { %652 = vmatpush3.bf16.msra.mxu0 %v751_v4  ;;  %v762_v17 = vld [vmem:[%s910_s13 + $0x48] sm:$0xff]   ;;  %v764_v21 = vld [vmem:[%s910_s13 + $0x40] sm:$0xff]  }
  0x25   : > { %672 = vmatpush3.bf16.msra.mxu1 %v752_v5  ;;  %653 = vmatprep.subr.bf16.mxu0 %v823_v1  ;;  %v226_v24 = vld [vmem:[#allocation2] sm:$0xff] }
  0x26   : > { %673 = vmatprep.subr.bf16.mxu1 %v823_v1 }
  0x28   : > { %654 = vmatpush3.bf16.msra.mxu0 %v753_v6 }
  0x29   : > { %674 = vmatpush3.bf16.msra.mxu1 %v754_v7  ;;  %655 = vmatprep.subr.bf16.mxu0 %v823_v1 }
  0x2a   : > { %675 = vmatprep.subr.bf16.mxu1 %v823_v1 }
  0x2c   : > { %656 = vmatpush3.bf16.msra.mxu0 %v755_v8 }
  0x2d   : > { %676 = vmatpush3.bf16.msra.mxu1 %v756_v9  ;;  %657 = vmatprep.subr.bf16.mxu0 %v823_v1 }
  0x2e   : > { %677 = vmatprep.subr.bf16.mxu1 %v823_v1 }
  0x30   : > { %658 = vmatpush3.bf16.msra.mxu0 %v757_v10 }
  0x31   : > { %678 = vmatpush3.bf16.msra.mxu1 %v758_v11  ;;  %659 = vmatprep.subr.bf16.mxu0 %v823_v1 }
  0x32   : > { %679 = vmatprep.subr.bf16.mxu1 %v823_v1 }
  0x34   : > { %660 = vmatpush3.bf16.msra.mxu0 %v759_v12 }
  0x35   : > { %680 = vmatpush3.bf16.msra.mxu1 %v760_v14  ;;  %661 = vmatprep.subr.bf16.mxu0 %v823_v1 }
  0x36   : > { %681 = vmatprep.subr.bf16.mxu1 %v823_v1 }
  0x38   : > { %662 = vmatpush3.bf16.msra.mxu0 %v761_v15 }
  0x39   : > { %682 = vmatpush3.bf16.msra.mxu1 %v762_v17  ;;  %663 = vmatprep.subr.bf16.mxu0 %v823_v1 }
  0x3a   : > { %683 = vmatprep.subr.bf16.mxu1 %v823_v1 }
  0x3c   : > { %664 = vmatpush3.bf16.msra.mxu0 %v763_v18 }
  0x3d   : > { %684 = vmatpush3.bf16.msra.mxu1 %v764_v21 }
  0x3f   : > { %666 = vmatmul.mubr.bf16.vlgmr.msra.gmra.mxu0 %v227_v22 }
  0x40   : > { %686 = vmatmul.mubr.bf16.vlgmr.msra.gmra.mxu1 %v368_v23 }
  0xff   : > { %v329_v25 = vpop.f32.mrf.mxu0 }
 0x100   : > { %v335_v26 = vadd.f32 %v329_v25, %v226_v24  ;;  %v452_v27 = vpop.f32.mrf.mxu1 }
 0x101   : > { %v667_v28 = vpop.f32.mrf.mxu0 }
 0x102   : > { %v458_v29 = vadd.f32 %v452_v27, %v335_v26  ;;  %v687_v30 = vpop.f32.mrf.mxu1  ;;  %464 = sbr.rel (%p625_p10) target bundleno = 273 (0x111), region = 40 }
 0x103   : > { %v332_v31 = vpop.f32.mrf.mxu0 }
 0x104   : > { %460 = vst.msk [vmem:[#allocation2] sm:$0xff] %vm459_vm2, %v458_v29  ;;  %v455_v32 = vpop.f32.mrf.mxu1 }
 0x105   : > { %v668_v33 = vpop.f32.mrf.mxu0 }
 0x106   : > { %v688_v34 = vpop.f32.mrf.mxu1 }
 0x107   : > { %v626_v36 = vld [vmem:[%s958_s2] ss:$0 sm:$0xff]  ;;  %vm475_vm3 = vcmask 519168  }
 0x10b   : > { %v465_v35 = vld [vmem:[#allocation2] sm:$0xff] }
 0x10c   : > { %v473_v37 = vadd.f32 %v626_v36, %v465_v35 }
 0x10e   : > { %v474_v38 = vpack.c.bf16 %v473_v37, %v473_v37 }
 0x110   : > { %476 = vst.msk [vmem:[%s903_s8] sm:$0xf] %vm475_vm3, %v474_v38 }
 0x111 PF: > { %s13_s18 = sadd.s32 1, %s820_s18   ;;  %s960_s12 = smov %s808_s15 }
 0x112   : > { %p10_p11 = scmp.ge.s32.totalorder %s13_s18, 34   ;;  %s961_s13 = smov %s812_s16 }
 0x113   : > { %s962_s14 = smov %s816_s17  ;;  %s963_s15 = smov %s967_s19 }
 0x114   : > { %s964_s16 = smov %s971_s20  ;;  %s965_s17 = smov %s975_s21 }
 0x115   :  { %12 = sbr.rel (!%p10_p11) target bundleno = 4 (0x4), region = 72 }

// kernel: generator_forward.110
= control target key start
LH: loop header
LB: loop body
LE: loop exit
PB: predicated region body
PF: predicated region fallthrough
CT: control target
= control target key end

     0   :  { %s799_s12 = smov 0   ;;  %s801_s13 = smov 0   ;;  %s933_s0 = inlined_call_operand.vmem [shape: bf16[2,8,9,128], index: 0, kind: input, shape index: {}]   ;;  %s934_s1 = inlined_call_operand.vmem [shape: bf16[1,2,128,64], index: 1, kind: input, shape index: {}]   ;;  %s935_s2 = inlined_call_operand.vmem [shape: f32[1,64], index: 2, kind: input, shape index: {}]   ;;  %s936_s3 = inlined_call_operand.vmem [shape: bf16[2,8,8,64], index: 3, kind: output, shape index: {}]  }
   0x1   :  { %s803_s14 = smov 0   ;;  %s805_s15 = smov 0  }
   0x2   :  { %s807_s16 = smov 0  }
   0x3 LB: > { %s28_s17 = sadd.s32 1, %s767_s14  ;;  %s32_s18 = sadd.s32 1, %s771_s15  ;;  %s775_s16 = sphi %s807_s16, %s13_s16   ;;  %s771_s15 = sphi %s805_s15, %s940_s15   ;;  %s767_s14 = sphi %s803_s14, %s939_s14   ;;  %s763_s13 = sphi %s801_s13, %s938_s13   ;;  %s759_s12 = sphi %s799_s12, %s937_s12  }
   0x4   : > { %p30_p0 = scmp.ge.s32.totalorder %s28_s17, 8  ;;  %p578_p1 = scmp.ge.s32.totalorder %s775_s16, 1 }
   0x5   : > { %p168_p2 = scmp.lt.s32.totalorder %s775_s16, 17 }
   0x6   : > { %s942_s17 = smov (%p30_p0, %s28_s17), 0  ;;  %s944_s18 = smov (!%p30_p0, %s32_s18), %s771_s15 }
   0x7   : > { %p169_p3 = pnand %p578_p1, %p168_p2  ;;  %p34_p4 = scmp.ge.s32.totalorder %s944_s18, 2 }
   0x8   : > { %p201_p5 = scmp.lt.s32.totalorder (!%p169_p3), %s763_s13, 1  ;;  %p203_p6 = scmp.lt.s32.totalorder (!%p169_p3), %s759_s12, 7 }
   0x9   : > { %s946_s18 = smov (%p34_p4, %s944_s18), 0  ;;  %172 = sbr.rel (%p169_p3) target bundleno = 257 (0x101), region = 32 }
   0xe   : > { %v720_v0 = vld [vmem:[%s934_s1 + $0x38] sm:$0xff]   ;;  %v777_v1 = vmov 0.0   ;;  %v722_v3 = vld [vmem:[%s934_s1 + $0x30] sm:$0xff]   ;;  %vm778_vm0 = vmmov 0   ;;  %s948_s13 = smov (!%p201_p5, %s763_s13), 1  ;;  %s950_s12 = smov (!%p203_p6, %s759_s12), 7 }
   0xf   : > { %638 = vmatprep.subr.bf16.mxu0 %v777_v1  ;;  %658 = vmatprep.subr.bf16.mxu1 %v777_v1  ;;  %v721_v2 = vld [vmem:[%s934_s1 + $0x78] sm:$0xff]   ;;  %v723_v4 = vld [vmem:[%s934_s1 + $0x70] sm:$0xff]   ;;  %v724_v5 = vld [vmem:[%s934_s1 + $0x28] sm:$0xff]   ;;  %s580_s29 = sshll.u32 %s948_s13, 4  ;;  %s579_s5 = sshll.u32 %s950_s12, 1  ;;  %vm224_vm1 = vcmask 523264  }
  0x10   : > { %639 = vmatpush3.bf16.msra.mxu0 %v720_v0  ;;  %654 = vmatprep.mubr.msk.bf16.mxu0 %vm778_vm0, %v777_v1  ;;  %v725_v6 = vld [vmem:[%s934_s1 + $0x68] sm:$0xff]   ;;  %s582_s6 = sshll.u32 %s948_s13, 3  ;;  %s207_s7 = sadd.s32 %s580_s29, %s579_s5  ;;  %v726_v7 = vld [vmem:[%s934_s1 + $0x20] sm:$0xff]   ;;  %225 = vst.msk [vmem:[#allocation2] sm:$0xff] %vm224_vm1, %v777_v1  ;;  %v728_v9 = vld [vmem:[%s934_s1 + $0x18] sm:$0xff]   ;;  %vm474_vm2 = vcmask 519168  }
  0x11   : > { %659 = vmatpush3.bf16.msra.mxu1 %v721_v2  ;;  %640 = vmatprep.subr.bf16.mxu0 %v777_v1  ;;  %s863_s8 = sadd.s32 %s582_s6, %s950_s12  ;;  %v727_v8 = vld [vmem:[%s934_s1 + $0x60] sm:$0xff]   ;;  %s581_s20 = sshll.u32 %s207_s7, 2  ;;  %v729_v10 = vld [vmem:[%s934_s1 + $0x58] sm:$0xff]   ;;  %v730_v11 = vld [vmem:[%s934_s1 + $0x10] sm:$0xff]  }
  0x12   : > { %660 = vmatprep.subr.bf16.mxu1 %v777_v1  ;;  %674 = vmatprep.mubr.msk.bf16.mxu1 %vm778_vm0, %v777_v1  ;;  %s209_s25 = scalar_lea.vmem %s933_s0, %s581_s20  ;;  %v731_v13 = vld [vmem:[%s934_s1 + $0x50] sm:$0xff]   ;;  %v732_v14 = vld [vmem:[%s934_s1 + $0x8] sm:$0xff]   ;;  %v734_v17 = vld [vmem:[%s934_s1] sm:$0xff]   ;;  %s583_s12 = sshll.u32 %s863_s8, 2 }
  0x13   : > { %v736_v12 = vld [vmem:[%s209_s25] sm:$0x1f]   ;;  %v733_v16 = vld [vmem:[%s934_s1 + $0x48] sm:$0xff]   ;;  %s218_s22 = scalar_lea.vmem %s936_s3, %s583_s12 }
  0x14   : > { %641 = vmatpush3.bf16.msra.mxu0 %v722_v3  ;;  %v365_v15 = vshll.u32 %v736_v12, 16  ;;  %v363_v18 = vshrl.u32 %v736_v12, 16  ;;  %v735_v20 = vld [vmem:[%s934_s1 + $0x40] sm:$0xff]  }
  0x15   : > { %661 = vmatpush3.bf16.msra.mxu1 %v723_v4  ;;  %642 = vmatprep.subr.bf16.mxu0 %v777_v1  ;;  %v227_v21 = vld [vmem:[%s209_s25] sm:$0xf] }
  0x16   : > { %662 = vmatprep.subr.bf16.mxu1 %v777_v1  ;;  %v367_v19 = vrot.slane %v365_v15, 1  ;;  %v617_v34 = vld [vmem:[%s935_s2] ss:$0 sm:$0xff] }
  0x17   : > { %v226_v23 = vld [vmem:[#allocation2] sm:$0xff] }
  0x18   : > { %643 = vmatpush3.bf16.msra.mxu0 %v724_v5  ;;  %v368_v22 = vor.u32 %v367_v19, %v363_v18 }
  0x19   : > { %663 = vmatpush3.bf16.msra.mxu1 %v725_v6  ;;  %644 = vmatprep.subr.bf16.mxu0 %v777_v1 }
  0x1a   : > { %664 = vmatprep.subr.bf16.mxu1 %v777_v1 }
  0x1c   : > { %645 = vmatpush3.bf16.msra.mxu0 %v726_v7 }
  0x1d   : > { %665 = vmatpush3.bf16.msra.mxu1 %v727_v8  ;;  %646 = vmatprep.subr.bf16.mxu0 %v777_v1 }
  0x1e   : > { %666 = vmatprep.subr.bf16.mxu1 %v777_v1 }
  0x20   : > { %647 = vmatpush3.bf16.msra.mxu0 %v728_v9 }
  0x21   : > { %667 = vmatpush3.bf16.msra.mxu1 %v729_v10  ;;  %648 = vmatprep.subr.bf16.mxu0 %v777_v1 }
  0x22   : > { %668 = vmatprep.subr.bf16.mxu1 %v777_v1 }
  0x24   : > { %649 = vmatpush3.bf16.msra.mxu0 %v730_v11 }
  0x25   : > { %669 = vmatpush3.bf16.msra.mxu1 %v731_v13  ;;  %650 = vmatprep.subr.bf16.mxu0 %v777_v1 }
  0x26   : > { %670 = vmatprep.subr.bf16.mxu1 %v777_v1 }
  0x28   : > { %651 = vmatpush3.bf16.msra.mxu0 %v732_v14 }
  0x29   : > { %671 = vmatpush3.bf16.msra.mxu1 %v733_v16  ;;  %652 = vmatprep.subr.bf16.mxu0 %v777_v1 }
  0x2a   : > { %672 = vmatprep.subr.bf16.mxu1 %v777_v1 }
  0x2c   : > { %653 = vmatpush3.bf16.msra.mxu0 %v734_v17 }
  0x2d   : > { %673 = vmatpush3.bf16.msra.mxu1 %v735_v20 }
  0x2f   : > { %655 = vmatmul.mubr.bf16.vlgmr.msra.gmra.mxu0 %v227_v21 }
  0x30   : > { %675 = vmatmul.mubr.bf16.vlgmr.msra.gmra.mxu1 %v368_v22 }
  0xef   : > { %v329_v24 = vpop.f32.mrf.mxu0 }
  0xf0   : > { %v335_v25 = vadd.f32 %v329_v24, %v226_v23  ;;  %v452_v26 = vpop.f32.mrf.mxu1 }
  0xf1   : > { %v656_v27 = vpop.f32.mrf.mxu0 }
  0xf2   : > { %v458_v28 = vadd.f32 %v452_v26, %v335_v25  ;;  %v676_v29 = vpop.f32.mrf.mxu1 }
  0xf3   : > { %v332_v30 = vpop.f32.mrf.mxu0 }
  0xf4   : > { %460 = vst.msk [vmem:[#allocation2] sm:$0xff] %vm224_vm1, %v458_v28  ;;  %v455_v31 = vpop.f32.mrf.mxu1 }
  0xf5   : > { %v657_v32 = vpop.f32.mrf.mxu0 }
  0xf6   : > { %v677_v33 = vpop.f32.mrf.mxu1 }
  0xfb   : > { %v464_v35 = vld [vmem:[#allocation2] sm:$0xff] }
  0xfc   : > { %v472_v36 = vadd.f32 %v617_v34, %v464_v35 }
  0xfe   : > { %v473_v37 = vpack.c.bf16 %v472_v36, %v472_v36 }
 0x100   : > { %475 = vst.msk [vmem:[%s218_s22] sm:$0xf] %vm474_vm2, %v473_v37 }
 0x101 PF: > { %s13_s16 = sadd.s32 1, %s775_s16   ;;  %s937_s12 = smov %s767_s14 }
 0x102   : > { %p10_p7 = scmp.ge.s32.totalorder %s13_s16, 18   ;;  %s938_s13 = smov %s771_s15 }
 0x103   : > { %s939_s14 = smov %s942_s17  ;;  %s940_s15 = smov %s946_s18 }
 0x104   :  { %12 = sbr.rel (!%p10_p7) target bundleno = 3 (0x3), region = 72 }

// kernel: generator_forward.109
= control target key start
LH: loop header
LB: loop body
LE: loop exit
PB: predicated region body
PF: predicated region fallthrough
CT: control target
= control target key end

     0   :  { %s602_s12 = smov 0   ;;  %s604_s13 = smov 0   ;;  %s690_s0 = inlined_call_operand.vmem [shape: bf16[2,8,8,128], index: 0, kind: input, shape index: {}]   ;;  %s691_s1 = inlined_call_operand.vmem [shape: bf16[1,1,128,64], index: 1, kind: input, shape index: {}]   ;;  %s692_s2 = inlined_call_operand.vmem [shape: f32[1,64], index: 2, kind: input, shape index: {}]   ;;  %s693_s3 = inlined_call_operand.vmem [shape: bf16[2,8,8,64], index: 3, kind: output, shape index: {}]  }
   0x1   :  { %s606_s14 = smov 0   ;;  %s608_s15 = smov 0  }
   0x2   :  { %s610_s16 = smov 0  }
   0x3 LB: > { %s28_s17 = sadd.s32 1, %s570_s14  ;;  %s32_s18 = sadd.s32 1, %s574_s15  ;;  %s578_s16 = sphi %s610_s16, %s13_s16   ;;  %s574_s15 = sphi %s608_s15, %s697_s15   ;;  %s570_s14 = sphi %s606_s14, %s696_s14   ;;  %s566_s13 = sphi %s604_s13, %s695_s13   ;;  %s562_s12 = sphi %s602_s12, %s694_s12  }
   0x4   : > { %p30_p0 = scmp.ge.s32.totalorder %s28_s17, 8  ;;  %p445_p1 = scmp.ge.s32.totalorder %s578_s16, 1 }
   0x5   : > { %p167_p2 = scmp.lt.s32.totalorder %s578_s16, 17 }
   0x6   : > { %s699_s17 = smov (%p30_p0, %s28_s17), 0  ;;  %s701_s18 = smov (!%p30_p0, %s32_s18), %s574_s15 }
   0x7   : > { %p168_p3 = pnand %p445_p1, %p167_p2  ;;  %p34_p4 = scmp.ge.s32.totalorder %s701_s18, 2 }
   0x8   : > { %p199_p5 = scmp.lt.s32.totalorder (!%p168_p3), %s566_s13, 1  ;;  %p201_p6 = scmp.lt.s32.totalorder (!%p168_p3), %s562_s12, 7 }
   0x9   : > { %s703_s18 = smov (%p34_p4, %s701_s18), 0  ;;  %171 = sbr.rel (%p168_p3) target bundleno = 255 (0xff), region = 32 }
   0xe   : > { %v532_v0 = vld [vmem:[%s691_s1 + $0x38] sm:$0xff]   ;;  %v580_v1 = vmov 0.0   ;;  %v533_v2 = vld [vmem:[%s691_s1 + $0x30] sm:$0xff]   ;;  %vm581_vm0 = vmmov 0   ;;  %v534_v3 = vld [vmem:[%s691_s1 + $0x28] sm:$0xff]   ;;  %vm221_vm1 = vcmask 523264  }
   0xf   : > { %470 = vmatprep.subr.bf16.mxu0 %v580_v1  ;;  %486 = vmatprep.mubr.msk.bf16.mxu0 %vm581_vm0, %v580_v1  ;;  %222 = vst.msk [vmem:[#allocation2] sm:$0xff] %vm221_vm1, %v580_v1  ;;  %v535_v4 = vld [vmem:[%s691_s1 + $0x20] sm:$0xff]   ;;  %v536_v5 = vld [vmem:[%s691_s1 + $0x18] sm:$0xff]   ;;  %s705_s13 = smov (!%p199_p5, %s566_s13), 1  ;;  %s707_s12 = smov (!%p201_p6, %s562_s12), 7  ;;  %v537_v6 = vld [vmem:[%s691_s1 + $0x10] sm:$0xff]  }
  0x10   : > { %471 = vmatpush3.bf16.msra.mxu0 %v532_v0  ;;  %s446_s4 = sshll.u32 %s705_s13, 3  ;;  %v538_v7 = vld [vmem:[%s691_s1 + $0x8] sm:$0xff]   ;;  %v539_v8 = vld [vmem:[%s691_s1] sm:$0xff]   ;;  %vm348_vm2 = vcmask 519168  }
  0x11   : > { %472 = vmatprep.subr.bf16.mxu0 %v580_v1  ;;  %s204_s5 = sadd.s32 %s446_s4, %s707_s12  ;;  %v458_v16 = vld [vmem:[%s692_s2] ss:$0 sm:$0xff] }
  0x12   : > { %s447_s8 = sshll.u32 %s204_s5, 2 }
  0x13   : > { %s206_s20 = scalar_lea.vmem %s690_s0, %s447_s8  ;;  %s215_s23 = scalar_lea.vmem %s693_s3, %s447_s8 }
  0x14   : > { %473 = vmatpush3.bf16.msra.mxu0 %v533_v2  ;;  %v224_v9 = vld [vmem:[%s206_s20] sm:$0xf] }
  0x15   : > { %474 = vmatprep.subr.bf16.mxu0 %v580_v1 }
  0x16   : > { %v223_v10 = vld [vmem:[#allocation2] sm:$0xff] }
  0x18   : > { %475 = vmatpush3.bf16.msra.mxu0 %v534_v3 }
  0x19   : > { %476 = vmatprep.subr.bf16.mxu0 %v580_v1 }
  0x1c   : > { %477 = vmatpush3.bf16.msra.mxu0 %v535_v4 }
  0x1d   : > { %478 = vmatprep.subr.bf16.mxu0 %v580_v1 }
  0x20   : > { %479 = vmatpush3.bf16.msra.mxu0 %v536_v5 }
  0x21   : > { %480 = vmatprep.subr.bf16.mxu0 %v580_v1 }
  0x24   : > { %481 = vmatpush3.bf16.msra.mxu0 %v537_v6 }
  0x25   : > { %482 = vmatprep.subr.bf16.mxu0 %v580_v1 }
  0x28   : > { %483 = vmatpush3.bf16.msra.mxu0 %v538_v7 }
  0x29   : > { %484 = vmatprep.subr.bf16.mxu0 %v580_v1 }
  0x2c   : > { %485 = vmatpush3.bf16.msra.mxu0 %v539_v8 }
  0x2f   : > { %487 = vmatmul.mubr.bf16.vlgmr.msra.gmra.mxu0 %v224_v9 }
  0xef   : > { %v326_v11 = vpop.f32.mrf.mxu0 }
  0xf0   : > { %v332_v12 = vadd.f32 %v326_v11, %v223_v10 }
  0xf1   : > { %v488_v13 = vpop.f32.mrf.mxu0 }
  0xf2   : > { %334 = vst.msk [vmem:[#allocation2] sm:$0xff] %vm221_vm1, %v332_v12 }
  0xf3   : > { %v329_v14 = vpop.f32.mrf.mxu0 }
  0xf5   : > { %v489_v15 = vpop.f32.mrf.mxu0 }
  0xf9   : > { %v338_v17 = vld [vmem:[#allocation2] sm:$0xff] }
  0xfa   : > { %v346_v18 = vadd.f32 %v458_v16, %v338_v17 }
  0xfc   : > { %v347_v19 = vpack.c.bf16 %v346_v18, %v346_v18 }
  0xfe   : > { %349 = vst.msk [vmem:[%s215_s23] sm:$0xf] %vm348_vm2, %v347_v19 }
  0xff PF: > { %s13_s16 = sadd.s32 1, %s578_s16   ;;  %s694_s12 = smov %s570_s14 }
 0x100   : > { %p10_p7 = scmp.ge.s32.totalorder %s13_s16, 18   ;;  %s695_s13 = smov %s574_s15 }
 0x101   : > { %s696_s14 = smov %s699_s17  ;;  %s697_s15 = smov %s703_s18 }
 0x102   :  { %12 = sbr.rel (!%p10_p7) target bundleno = 3 (0x3), region = 71 }

// kernel: generator_forward.111
= control target key start
LH: loop header
LB: loop body
LE: loop exit
PB: predicated region body
PF: predicated region fallthrough
CT: control target
= control target key end

     0   :  { %s645_s12 = smov 0   ;;  %s647_s13 = smov 0   ;;  %s732_s0 = inlined_call_operand.vmem [shape: bf16[2,9,8,128], index: 0, kind: input, shape index: {}]   ;;  %s733_s1 = inlined_call_operand.vmem [shape: bf16[2,1,128,64], index: 1, kind: input, shape index: {}]   ;;  %s734_s2 = inlined_call_operand.vmem [shape: f32[1,64], index: 2, kind: input, shape index: {}]   ;;  %s735_s3 = inlined_call_operand.vmem [shape: bf16[2,8,8,64], index: 3, kind: output, shape index: {}]  }
   0x1   :  { %s649_s14 = smov 0   ;;  %s651_s15 = smov 0  }
   0x2   :  { %s653_s16 = smov 0   ;;  %s655_s17 = smov 0  }
   0x3   :  { %s657_s18 = smov 0  }
   0x4 LB: > { %s25_s19 = sadd.s32 1, %s608_s15  ;;  %s28_s20 = sadd.s32 1, %s612_s16  ;;  %s620_s18 = sphi %s657_s18, %s13_s18   ;;  %s616_s17 = sphi %s655_s17, %s741_s17   ;;  %s612_s16 = sphi %s653_s16, %s740_s16   ;;  %s608_s15 = sphi %s651_s15, %s739_s15   ;;  %s604_s14 = sphi %s649_s14, %s738_s14   ;;  %s600_s13 = sphi %s647_s13, %s737_s13   ;;  %s596_s12 = sphi %s645_s12, %s736_s12  }
   0x5   : > { %p26_p0 = scmp.ge.s32.totalorder %s25_s19, 2  ;;  %p449_p1 = scmp.ge.s32.totalorder %s620_s18, 1 }
   0x6   : > { %p167_p2 = scmp.lt.s32.totalorder %s620_s18, 33  ;;  %s32_s21 = sadd.s32 1, %s616_s17 }
   0x7   : > { %s743_s19 = smov (%p26_p0, %s25_s19), 0  ;;  %s745_s20 = smov (!%p26_p0, %s28_s20), %s612_s16 }
   0x8   : > { %p168_p3 = pnand %p449_p1, %p167_p2  ;;  %p30_p4 = scmp.ge.s32.totalorder %s745_s20, 8 }
   0x9   : > { %s198_s22 = sadd.s32 (!%p168_p3), %s596_s12, %s600_s13  ;;  %p199_p6 = scmp.lt.s32.totalorder (!%p168_p3), %s604_s14, 1 }
   0xa   : > { %s747_s20 = smov (%p30_p4, %s745_s20), 0  ;;  %s749_s21 = smov (!%p30_p4, %s32_s21), %s616_s17 }
   0xb   : > { %p34_p5 = scmp.ge.s32.totalorder %s749_s21, 2  ;;  %171 = sbr.rel (%p168_p3) target bundleno = 267 (0x10b), region = 32 }
   0xc   : > { %p201_p7 = scmp.lt.s32.totalorder (!%p168_p3), %s198_s22, 8  ;;  %p210_p8 = scmp.lt.s32.totalorder (!%p168_p3), %s600_s13, 7 }
   0xd   : > { %s751_s21 = smov (%p34_p5, %s749_s21), 0  ;;  %p453_p9 = scmp.ne.s32.totalorder (!%p168_p3), %s596_s12, 0 }
  0x10   : > { %s753_s14 = smov (!%p199_p6, %s604_s14), 1  ;;  %s755_s22 = smov (!%p201_p7, %s198_s22), 8 }
  0x11   : > { %s498_s23 = smul.u32 9, %s753_s14  ;;  %s451_s24 = sshll.u32 %s753_s14, 3 }
  0x12   : > { %s757_s13 = smov (!%p210_p8, %s600_s13), 7  ;;  %220 = sbr.rel (%p453_p9) target bundleno = 25 (0x19), region = 36 }
  0x13   : > { %s204_s25 = sadd.s32 %s498_s23, %s755_s22  ;;  %s213_s27 = sadd.s32 %s451_s24, %s757_s13 }
  0x14   : > { %s450_s26 = sshll.u32 %s204_s25, 2  ;;  %s452_s4 = sshll.u32 %s213_s27, 2 }
  0x15   : > { %s693_s30 = scalar_lea.vmem %s732_s0, %s450_s26  ;;  %s698_s7 = scalar_lea.vmem %s735_s3, %s452_s4 }
  0x17   : > { %vm221_vm0 = vcmask 523264   ;;  %v622_v0 = vmov 0.0  }
  0x18   : > { %222 = vst.msk [vmem:[#allocation2] sm:$0xff] %vm221_vm0, %v622_v0 }
  0x19 PF: > { %s468_s8 = sshll.u32 %s596_s12, 6  ;;  %v623_v1 = vmov 0.0   ;;  %vm624_vm1 = vmmov 0   ;;  %v224_v10 = vld [vmem:[%s693_s30] sm:$0xf]  ;;  %vm333_vm2 = vcmask 523264  }
  0x1a   : > { %478 = vmatprep.subr.bf16.mxu0 %v623_v1  ;;  %s227_s11 = scalar_lea.vmem %s733_s1, %s468_s8  ;;  %494 = vmatprep.mubr.msk.bf16.mxu0 %vm624_vm1, %v623_v1  ;;  %p464_p10 = scmp.ne.s32.totalorder %s596_s12, 1 }
  0x1b   : > { %v558_v2 = vld [vmem:[%s227_s11 + $0x38] sm:$0xff]   ;;  %v559_v3 = vld [vmem:[%s227_s11 + $0x30] sm:$0xff]   ;;  %v560_v4 = vld [vmem:[%s227_s11 + $0x28] sm:$0xff]  }
  0x1c   : > { %479 = vmatpush3.bf16.msra.mxu0 %v558_v2  ;;  %v561_v5 = vld [vmem:[%s227_s11 + $0x20] sm:$0xff]   ;;  %v562_v6 = vld [vmem:[%s227_s11 + $0x18] sm:$0xff]   ;;  %v563_v7 = vld [vmem:[%s227_s11 + $0x10] sm:$0xff]  }
  0x1d   : > { %480 = vmatprep.subr.bf16.mxu0 %v623_v1  ;;  %v564_v8 = vld [vmem:[%s227_s11 + $0x8] sm:$0xff]   ;;  %v565_v9 = vld [vmem:[%s227_s11] sm:$0xff]  }
  0x1f   : > { %v223_v11 = vld [vmem:[#allocation2] sm:$0xff] }
  0x20   : > { %481 = vmatpush3.bf16.msra.mxu0 %v559_v3 }
  0x21   : > { %482 = vmatprep.subr.bf16.mxu0 %v623_v1 }
  0x24   : > { %483 = vmatpush3.bf16.msra.mxu0 %v560_v4 }
  0x25   : > { %484 = vmatprep.subr.bf16.mxu0 %v623_v1 }
  0x28   : > { %485 = vmatpush3.bf16.msra.mxu0 %v561_v5 }
  0x29   : > { %486 = vmatprep.subr.bf16.mxu0 %v623_v1 }
  0x2c   : > { %487 = vmatpush3.bf16.msra.mxu0 %v562_v6 }
  0x2d   : > { %488 = vmatprep.subr.bf16.mxu0 %v623_v1 }
  0x30   : > { %489 = vmatpush3.bf16.msra.mxu0 %v563_v7 }
  0x31   : > { %490 = vmatprep.subr.bf16.mxu0 %v623_v1 }
  0x34   : > { %491 = vmatpush3.bf16.msra.mxu0 %v564_v8 }
  0x35   : > { %492 = vmatprep.subr.bf16.mxu0 %v623_v1 }
  0x38   : > { %493 = vmatpush3.bf16.msra.mxu0 %v565_v9 }
  0x3b   : > { %495 = vmatmul.mubr.bf16.vlgmr.msra.gmra.mxu0 %v224_v10 }
  0xfb   : > { %v326_v12 = vpop.f32.mrf.mxu0 }
  0xfc   : > { %v332_v13 = vadd.f32 %v326_v12, %v223_v11 }
  0xfd   : > { %v496_v14 = vpop.f32.mrf.mxu0  ;;  %338 = sbr.rel (%p464_p10) target bundleno = 267 (0x10b), region = 40 }
  0xfe   : > { %334 = vst.msk [vmem:[#allocation2] sm:$0xff] %vm333_vm2, %v332_v13 }
  0xff   : > { %v329_v15 = vpop.f32.mrf.mxu0 }
 0x101   : > { %v497_v16 = vpop.f32.mrf.mxu0 }
 0x102   : > { %v465_v18 = vld [vmem:[%s734_s2] ss:$0 sm:$0xff]  ;;  %vm349_vm3 = vcmask 519168  }
 0x105   : > { %v339_v17 = vld [vmem:[#allocation2] sm:$0xff] }
 0x106   : > { %v347_v19 = vadd.f32 %v465_v18, %v339_v17 }
 0x108   : > { %v348_v20 = vpack.c.bf16 %v347_v19, %v347_v19 }
 0x10a   : > { %350 = vst.msk [vmem:[%s698_s7] sm:$0xf] %vm349_vm3, %v348_v20 }
 0x10b PF: > { %s13_s18 = sadd.s32 1, %s620_s18   ;;  %s736_s12 = smov %s608_s15 }
 0x10c   : > { %p10_p11 = scmp.ge.s32.totalorder %s13_s18, 34   ;;  %s737_s13 = smov %s612_s16 }
 0x10d   : > { %s738_s14 = smov %s616_s17  ;;  %s739_s15 = smov %s743_s19 }
 0x10e   : > { %s740_s16 = smov %s747_s20  ;;  %s741_s17 = smov %s751_s21 }
 0x10f   :  { %12 = sbr.rel (!%p10_p11) target bundleno = 4 (0x4), region = 71 }

// kernel: generator_forward.115
= control target key start
LH: loop header
LB: loop body
LE: loop exit
PB: predicated region body
PF: predicated region fallthrough
CT: control target
= control target key end

     0   :  { %s1474_s12 = smov 0   ;;  %s1476_s13 = smov 0   ;;  %s1673_s0 = inlined_call_operand.vmem [shape: bf16[2,22,22,64], index: 0, kind: input, shape index: {}]   ;;  %s1674_s1 = inlined_call_operand.vmem [shape: bf16[7,7,64,128], index: 1, kind: input, shape index: {}]   ;;  %s1675_s2 = inlined_call_operand.vmem [shape: f32[1,128], index: 2, kind: input, shape index: {}]   ;;  %s1676_s3 = inlined_call_operand.vmem [shape: bf16[2,16,16,128], index: 3, kind: output, shape index: {}]  }
   0x1   :  { %s1478_s14 = smov 0   ;;  %s1480_s15 = smov 0  }
   0x2   :  { %s1482_s16 = smov 0   ;;  %s1484_s17 = smov 0  }
   0x3   :  { %s1486_s18 = smov 0  }
   0x4 LB: > { %s25_s19 = sadd.s32 1, %s1437_s15  ;;  %s28_s20 = sadd.s32 1, %s1441_s16  ;;  %s1449_s18 = sphi %s1486_s18, %s13_s18   ;;  %s1445_s17 = sphi %s1484_s17, %s1682_s17   ;;  %s1441_s16 = sphi %s1482_s16, %s1681_s16   ;;  %s1437_s15 = sphi %s1480_s15, %s1680_s15   ;;  %s1433_s14 = sphi %s1478_s14, %s1679_s14   ;;  %s1429_s13 = sphi %s1476_s13, %s1678_s13   ;;  %s1425_s12 = sphi %s1474_s12, %s1677_s12  }
   0x5   : > { %p26_p0 = scmp.ge.s32.totalorder %s25_s19, 7  ;;  %p1057_p1 = scmp.ge.s32.totalorder %s1449_s18, 1 }
   0x6   : > { %p168_p2 = scmp.lt.s32.totalorder %s1449_s18, 225  ;;  %s32_s21 = sadd.s32 1, %s1445_s17 }
   0x7   : > { %s1684_s19 = smov (%p26_p0, %s25_s19), 0  ;;  %s1686_s20 = smov (!%p26_p0, %s28_s20), %s1441_s16 }
   0x8   : > { %p169_p3 = pnand %p1057_p1, %p168_p2  ;;  %p30_p4 = scmp.ge.s32.totalorder %s1686_s20, 16 }
   0x9   : > { %s201_s22 = sadd.s32 (!%p169_p3), %s1425_s12, %s1429_s13  ;;  %p202_p6 = scmp.lt.s32.totalorder (!%p169_p3), %s1433_s14, 1 }
   0xa   : > { %s1688_s20 = smov (%p30_p4, %s1686_s20), 0  ;;  %s1690_s21 = smov (!%p30_p4, %s32_s21), %s1445_s17 }
   0xb   : > { %p34_p5 = scmp.ge.s32.totalorder %s1690_s21, 2  ;;  %172 = sbr.rel (%p169_p3) target bundleno = 319 (0x13f), region = 32 }
   0xc   : > { %p204_p7 = scmp.lt.s32.totalorder (!%p169_p3), %s201_s22, 21  ;;  %p214_p8 = scmp.lt.s32.totalorder (!%p169_p3), %s1429_s13, 15 }
   0xd   : > { %s1692_s21 = smov (%p34_p5, %s1690_s21), 0  ;;  %p1062_p9 = scmp.ne.s32.totalorder (!%p169_p3), %s1425_s12, 0 }
  0x10   : > { %s1694_s14 = smov (!%p202_p6, %s1433_s14), 1  ;;  %s1696_s22 = smov (!%p204_p7, %s201_s22), 21 }
  0x11   : > { %s1295_s23 = smul.u32 66, %s1694_s14  ;;  %s1060_s25 = sshll.u32 %s1694_s14, 5 }
  0x12   : > { %s1294_s24 = smul.u32 3, %s1696_s22  ;;  %s1698_s13 = smov (!%p214_p8, %s1429_s13), 15 }
  0x13   : > { %s1059_s28 = sshll.u32 %s1698_s13, 1  ;;  %225 = sbr.rel (%p1062_p9) target bundleno = 26 (0x1a), region = 36 }
  0x14   : > { %s208_s26 = sadd.s32 %s1295_s23, %s1294_s24  ;;  %s218_s5 = sadd.s32 %s1060_s25, %s1059_s28 }
  0x15   : > { %s1058_s27 = sshll.u32 %s208_s26, 2  ;;  %s1061_s6 = sshll.u32 %s218_s5, 2 }
  0x16   : > { %s1527_s4 = scalar_lea.vmem %s1673_s0, %s1058_s27  ;;  %s1532_s9 = scalar_lea.vmem %s1676_s3, %s1061_s6 }
  0x18   : > { %v1451_v0 = vmov 0.0  }
  0x19   : > { %226 = vst [vmem:[#allocation2] sm:$0xff] %v1451_v0  ;;  %227 = vst [vmem:[#allocation2 + $0x8] sm:$0xff] %v1451_v0 }
  0x1a PF: > { %s1167_s10 = smul.u32 224, %s1425_s12  ;;  %v1452_v1 = vmov 0.0   ;;  %v319_v2 = vld [vmem:[%s1527_s4] sm:$0xf]  ;;  %vm1453_vm0 = vmmov 0   ;;  %vm272_vm2 = vcmask 523264  }
  0x1b   : > { %1210 = vmatprep.subr.bf16.mxu0 %v1452_v1  ;;  %1222 = vmatprep.subr.bf16.mxu1 %v1452_v1  ;;  %v1549_v3 = vld [vmem:[%s1527_s4 + $0x4] sm:$0xf]  ;;  %v1564_v15 = vld [vmem:[%s1527_s4 + $0x8] ss:$0 sps:$4 sm:$0x11]   ;;  %vm439_vm3 = vcmask 1046528  }
  0x1c   : > { %s1542_s14 = scalar_lea.vmem %s1674_s1, %s1167_s10  ;;  %1218 = vmatprep.mubr.msk.bf16.mxu0 %vm1453_vm0, %v1452_v1  ;;  %1230 = vmatprep.mubr.msk.bf16.mxu1 %vm1453_vm0, %v1452_v1  ;;  %v1079_v5 = vcombine.low %v319_v2, %v1549_v3  ;;  %v350_v18 = vshll.u32 %v1564_v15, 16  ;;  %vm341_vm1 = vsmask.f32 7424  ;;  %v1363_v19 = vld [vmem:[%s1527_s4] sm:$0xff]   ;;  %v441_v41 = vrot.slane %v1564_v15, 1  ;;  %p1161_p10 = scmp.ne.s32.totalorder %s1425_s12, 6 }
  0x1d   : > { %v1355_v4 = vld [vmem:[%s1542_s14 + $0x18] sm:$0xff]   ;;  %v1357_v7 = vld [vmem:[%s1542_s14 + $0x10] sm:$0xff]   ;;  %v1359_v10 = vld [vmem:[%s1542_s14 + $0x8] sm:$0xff]   ;;  %vm528_vm4 = vsmask.f32 6400  ;;  %vm631_vm5 = vcmask 1045504  }
  0x1e   : > { %v1356_v6 = vld [vmem:[%s1542_s14 + $0x38] sm:$0xff]   ;;  %1211 = vmatpush3.bf16.msra.mxu0 %v1355_v4  ;;  %v1358_v8 = vld [vmem:[%s1542_s14 + $0x30] sm:$0xff]   ;;  %v345_v9 = vshll.u32 %v1079_v5, 16  ;;  %v343_v11 = vshrl.u32 %v1079_v5, 16  ;;  %v1360_v12 = vld [vmem:[%s1542_s14 + $0x28] sm:$0xff]   ;;  %v352_v20 = vrot.slane %v350_v18, 1 }
  0x1f   : > { %1223 = vmatpush3.bf16.msra.mxu1 %v1356_v6  ;;  %1212 = vmatprep.subr.bf16.mxu0 %v1452_v1  ;;  %v1361_v14 = vld [vmem:[%s1542_s14] sm:$0xff]   ;;  %v1364_v21 = vld [vmem:[%s1542_s14 + $0x58] sm:$0xff]   ;;  %v1368_v26 = vld [vmem:[%s1542_s14 + $0x50] sm:$0xff]   ;;  %vm720_vm6 = vsmask.f32 5376  ;;  %vm823_vm7 = vcmask 1044480  }
  0x20   : > { %1224 = vmatprep.subr.bf16.mxu1 %v1452_v1  ;;  %v347_v13 = vrot.slane %v345_v9, 1  ;;  %v1362_v16 = vld [vmem:[%s1542_s14 + $0x20] sm:$0xff]   ;;  %v1367_v23 = vld [vmem:[%s1542_s14 + $0x78] sm:$0xff]   ;;  %v1581_v27 = vld [vmem:[%s1527_s4 + $0x8] ss:$0 sps:$4 sm:$0x33]  }
  0x21   : > { %v424_v24 = vld [vmem:[%s1527_s4] sm:$0xe]  ;;  %v1369_v28 = vld [vmem:[%s1542_s14 + $0x70] sm:$0xff]   ;;  %v1370_v31 = vld [vmem:[%s1542_s14 + $0x48] sm:$0xff]   ;;  %v538_v32 = vshrl.u32 %v1581_v27, 16  ;;  %v541_v33 = vshll.u32 %v1581_v27, 16 }
  0x22   : > { %1213 = vmatpush3.bf16.msra.mxu0 %v1357_v7  ;;  %v348_v17 = vor.u32 %v347_v13, %v343_v11  ;;  %v1095_v25 = vcombine.low %v424_v24, %v1549_v3  ;;  %v1371_v34 = vld [vmem:[%s1542_s14 + $0x68] sm:$0xff]   ;;  %v1372_v39 = vld [vmem:[%s1542_s14 + $0x40] sm:$0xff]   ;;  %v1375_v48 = vld [vmem:[%s1542_s14 + $0x98] sm:$0xff]   ;;  %v633_v4 = vrot.slane %v1581_v27, 2 }
  0x23   : > { %1225 = vmatpush3.bf16.msra.mxu1 %v1358_v8  ;;  %1214 = vmatprep.subr.bf16.mxu0 %v1452_v1  ;;  %v540_v37 = vrot.slane %v538_v32, 1  ;;  %v543_v38 = vrot.slane %v541_v33, 2  ;;  %v1373_v42 = vld [vmem:[%s1542_s14 + $0x60] sm:$0xff]   ;;  %v1603_v46 = vld [vmem:[%s1527_s4 + $0x8] ss:$0 sps:$4 sm:$0x77]  }
  0x24   : > { %1226 = vmatprep.subr.bf16.mxu1 %v1452_v1  ;;  %v353_v22 = vsel %vm341_vm1, %v348_v17, %v352_v20  ;;  %v530_v29 = vshrl.u32 %v1095_v25, 16  ;;  %v533_v30 = vshll.u32 %v1095_v25, 16  ;;  %v440_v40 = vrot.slane %v1095_v25, 1  ;;  %v616_v45 = vld [vmem:[%s1527_s4] sm:$0xc]  ;;  %v1377_v50 = vld [vmem:[%s1542_s14 + $0xb8] sm:$0xff]  }
  0x25   : > { %v544_v44 = vor.u32 %v543_v38, %v540_v37  ;;  %v1125_v51 = vcombine.low %v616_v45, %v1549_v3  ;;  %v1378_v52 = vld [vmem:[%s1542_s14 + $0x90] sm:$0xff]   ;;  %v730_v56 = vshrl.u32 %v1603_v46, 16  ;;  %v733_v57 = vshll.u32 %v1603_v46, 16  ;;  %v1380_v58 = vld [vmem:[%s1542_s14 + $0x88] sm:$0xff]   ;;  %v1382_v0 = vld [vmem:[%s1542_s14 + $0x80] sm:$0xff]  }
  0x26   : > { %1215 = vmatpush3.bf16.msra.mxu0 %v1359_v10  ;;  %v532_v35 = vrot.slane %v530_v29, 1  ;;  %v535_v36 = vrot.slane %v533_v30, 2  ;;  %v442_v47 = vsel %vm439_vm3, %v440_v40, %v441_v41  ;;  %v1379_v53 = vld [vmem:[%s1542_s14 + $0xb0] sm:$0xff]   ;;  %v1381_v59 = vld [vmem:[%s1542_s14 + $0xa8] sm:$0xff]   ;;  %v1383_v5 = vld [vmem:[%s1542_s14 + $0xa0] sm:$0xff]   ;;  %v825_v17 = vrot.slane %v1603_v46, 3 }
  0x27   : > { %1227 = vmatpush3.bf16.msra.mxu1 %v1360_v12  ;;  %1216 = vmatprep.subr.bf16.mxu0 %v1452_v1  ;;  %v722_v54 = vshrl.u32 %v1125_v51, 16  ;;  %v725_v55 = vshll.u32 %v1125_v51, 16  ;;  %v732_v62 = vrot.slane %v730_v56, 2  ;;  %v735_v63 = vrot.slane %v733_v57, 3  ;;  %v1385_v9 = vld [vmem:[%s1542_s14 + $0xd8] sm:$0xff]   ;;  %v1387_v11 = vld [vmem:[%s1542_s14 + $0xd0] sm:$0xff]  }
  0x28   : > { %1228 = vmatprep.subr.bf16.mxu1 %v1452_v1  ;;  %v536_v43 = vor.u32 %v535_v36, %v532_v35  ;;  %v632_v2 = vrot.slane %v1125_v51, 2  ;;  %v808_v12 = vld [vmem:[%s1527_s4] sm:$0x8]  ;;  %v1388_v13 = vld [vmem:[%s1542_s14 + $0xc8] sm:$0xff]  }
  0x29   : > { %v724_v60 = vrot.slane %v722_v54, 2  ;;  %v727_v61 = vrot.slane %v725_v55, 3  ;;  %v736_v7 = vor.u32 %v735_v63, %v732_v62  ;;  %v1389_v15 = vld [vmem:[%s1542_s14 + $0xc0] sm:$0xff]   ;;  %v229_v35 = vld [vmem:[#allocation2 + $0x8] sm:$0xff] }
  0x2a   : > { %1217 = vmatpush3.bf16.msra.mxu0 %v1361_v14  ;;  %v545_v49 = vsel %vm528_vm4, %v536_v43, %v544_v44  ;;  %v634_v8 = vsel %vm631_vm5, %v632_v2, %v633_v4  ;;  %v1155_v14 = vcombine.low %v808_v12, %v1549_v3  ;;  %v228_v33 = vld [vmem:[#allocation2] sm:$0xff] }
  0x2b   : > { %1229 = vmatpush3.bf16.msra.mxu1 %v1362_v16  ;;  %1234 = vmatprep.subr.bf16.mxu0 %v1452_v1  ;;  %v728_v6 = vor.u32 %v727_v61, %v724_v60 }
  0x2c   : > { %1246 = vmatprep.subr.bf16.mxu1 %v1452_v1  ;;  %v824_v16 = vrot.slane %v1155_v14, 3 }
  0x2d   : > { %1219 = vmatmul.mubr.msk.bf16.vlgmr.msra.gmra.mxu0 %vm272_vm2, %v1363_v19  ;;  %v737_v10 = vsel %vm720_vm6, %v728_v6, %v736_v7 }
  0x2e   : > { %1235 = vmatpush3.bf16.msra.mxu0 %v1364_v21  ;;  %1231 = vmatmul.mubr.msk.bf16.vlgmr.msra.gmra.mxu1 %vm272_vm2, %v353_v22  ;;  %v826_v18 = vsel %vm823_vm7, %v824_v16, %v825_v17 }
  0x2f   : > { %1247 = vmatpush3.bf16.msra.mxu1 %v1367_v23  ;;  %1236 = vmatprep.subr.bf16.mxu0 %v1452_v1 }
  0x30   : > { %1248 = vmatprep.subr.bf16.mxu1 %v1452_v1  ;;  %1242 = vmatprep.mubr.msk.bf16.mxu0 %vm1453_vm0, %v1452_v1 }
  0x31   : > { %1254 = vmatprep.mubr.msk.bf16.mxu1 %vm1453_vm0, %v1452_v1 }
  0x32   : > { %1237 = vmatpush3.bf16.msra.mxu0 %v1368_v26 }
  0x33   : > { %1249 = vmatpush3.bf16.msra.mxu1 %v1369_v28  ;;  %1238 = vmatprep.subr.bf16.mxu0 %v1452_v1 }
  0x34   : > { %1250 = vmatprep.subr.bf16.mxu1 %v1452_v1 }
  0x36   : > { %1239 = vmatpush3.bf16.msra.mxu0 %v1370_v31 }
  0x37   : > { %1251 = vmatpush3.bf16.msra.mxu1 %v1371_v34  ;;  %1240 = vmatprep.subr.bf16.mxu0 %v1452_v1 }
  0x38   : > { %1252 = vmatprep.subr.bf16.mxu1 %v1452_v1 }
  0x3a   : > { %1241 = vmatpush3.bf16.msra.mxu0 %v1372_v39 }
  0x3b   : > { %1253 = vmatpush3.bf16.msra.mxu1 %v1373_v42  ;;  %1258 = vmatprep.subr.bf16.mxu0 %v1452_v1 }
  0x3c   : > { %1270 = vmatprep.subr.bf16.mxu1 %v1452_v1 }
  0x3d   : > { %1243 = vmatmul.mubr.msk.bf16.vlgmr.msra.gmra.mxu0 %vm272_vm2, %v442_v47 }
  0x3e   : > { %1259 = vmatpush3.bf16.msra.mxu0 %v1375_v48  ;;  %1255 = vmatmul.mubr.msk.bf16.vlgmr.msra.gmra.mxu1 %vm272_vm2, %v545_v49 }
  0x3f   : > { %1271 = vmatpush3.bf16.msra.mxu1 %v1377_v50  ;;  %1260 = vmatprep.subr.bf16.mxu0 %v1452_v1 }
  0x40   : > { %1272 = vmatprep.subr.bf16.mxu1 %v1452_v1  ;;  %1266 = vmatprep.mubr.msk.bf16.mxu0 %vm1453_vm0, %v1452_v1 }
  0x41   : > { %1278 = vmatprep.mubr.msk.bf16.mxu1 %vm1453_vm0, %v1452_v1 }
  0x42   : > { %1261 = vmatpush3.bf16.msra.mxu0 %v1378_v52 }
  0x43   : > { %1273 = vmatpush3.bf16.msra.mxu1 %v1379_v53  ;;  %1262 = vmatprep.subr.bf16.mxu0 %v1452_v1 }
  0x44   : > { %1274 = vmatprep.subr.bf16.mxu1 %v1452_v1 }
  0x46   : > { %1263 = vmatpush3.bf16.msra.mxu0 %v1380_v58 }
  0x47   : > { %1275 = vmatpush3.bf16.msra.mxu1 %v1381_v59  ;;  %1264 = vmatprep.subr.bf16.mxu0 %v1452_v1 }
  0x48   : > { %1276 = vmatprep.subr.bf16.mxu1 %v1452_v1 }
  0x4a   : > { %1265 = vmatpush3.bf16.msra.mxu0 %v1382_v0 }
  0x4b   : > { %1277 = vmatpush3.bf16.msra.mxu1 %v1383_v5  ;;  %1282 = vmatprep.subr.bf16.mxu0 %v1452_v1 }
  0x4d   : > { %1267 = vmatmul.mubr.msk.bf16.vlgmr.msra.gmra.mxu0 %vm272_vm2, %v634_v8 }
  0x4e   : > { %1283 = vmatpush3.bf16.msra.mxu0 %v1385_v9  ;;  %1279 = vmatmul.mubr.msk.bf16.vlgmr.msra.gmra.mxu1 %vm272_vm2, %v737_v10 }
  0x4f   : > { %1284 = vmatprep.subr.bf16.mxu0 %v1452_v1  ;;  %1290 = vmatprep.mubr.msk.bf16.mxu0 %vm1453_vm0, %v1452_v1 }
  0x52   : > { %1285 = vmatpush3.bf16.msra.mxu0 %v1387_v11 }
  0x53   : > { %1286 = vmatprep.subr.bf16.mxu0 %v1452_v1 }
  0x56   : > { %1287 = vmatpush3.bf16.msra.mxu0 %v1388_v13 }
  0x57   : > { %1288 = vmatprep.subr.bf16.mxu0 %v1452_v1 }
  0x5a   : > { %1289 = vmatpush3.bf16.msra.mxu0 %v1389_v15 }
  0x5d   : > { %1291 = vmatmul.mubr.msk.bf16.vlgmr.msra.gmra.mxu0 %vm272_vm2, %v826_v18 }
  0xed   : > { %v310_v19 = vpop.f32.mrf.mxu0 }
  0xee   : > { %v415_v20 = vpop.f32.mrf.mxu1  ;;  %v317_v34 = vadd.f32 %v310_v19, %v228_v33 }
  0xef   : > { %v1220_v21 = vpop.f32.mrf.mxu0 }
  0xf0   : > { %v1232_v22 = vpop.f32.mrf.mxu1  ;;  %v422_v39 = vadd.f32 %v415_v20, %v317_v34 }
  0xf1   : > { %v313_v23 = vpop.f32.mrf.mxu0 }
  0xf2   : > { %v418_v3 = vpop.f32.mrf.mxu1  ;;  %v318_v40 = vadd.f32 %v313_v23, %v229_v35 }
  0xf3   : > { %v1221_v24 = vpop.f32.mrf.mxu0 }
  0xf4   : > { %v1233_v25 = vpop.f32.mrf.mxu1  ;;  %v423_v46 = vadd.f32 %v418_v3, %v318_v40 }
  0xfd   : > { %v504_v26 = vpop.f32.mrf.mxu0 }
  0xfe   : > { %v607_v27 = vpop.f32.mrf.mxu1  ;;  %v511_v43 = vadd.f32 %v504_v26, %v422_v39 }
  0xff   : > { %v1244_v28 = vpop.f32.mrf.mxu0 }
 0x100   : > { %v1256_v29 = vpop.f32.mrf.mxu1  ;;  %v614_v48 = vadd.f32 %v607_v27, %v511_v43 }
 0x101   : > { %v507_v30 = vpop.f32.mrf.mxu0 }
 0x102   : > { %v610_v31 = vpop.f32.mrf.mxu1  ;;  %v512_v49 = vadd.f32 %v507_v30, %v423_v46 }
 0x103   : > { %v1245_v1 = vpop.f32.mrf.mxu0 }
 0x104   : > { %v1257_v32 = vpop.f32.mrf.mxu1  ;;  %v615_v51 = vadd.f32 %v610_v31, %v512_v49 }
 0x10d   : > { %v696_v36 = vpop.f32.mrf.mxu0 }
 0x10e   : > { %v799_v37 = vpop.f32.mrf.mxu1  ;;  %v703_v50 = vadd.f32 %v696_v36, %v614_v48 }
 0x10f   : > { %v1268_v38 = vpop.f32.mrf.mxu0 }
 0x110   : > { %v1280_v41 = vpop.f32.mrf.mxu1  ;;  %v806_v52 = vadd.f32 %v799_v37, %v703_v50 }
 0x111   : > { %v699_v42 = vpop.f32.mrf.mxu0 }
 0x112   : > { %v802_v44 = vpop.f32.mrf.mxu1  ;;  %v704_v53 = vadd.f32 %v699_v42, %v615_v51 }
 0x113   : > { %v1269_v45 = vpop.f32.mrf.mxu0 }
 0x114   : > { %v1281_v47 = vpop.f32.mrf.mxu1  ;;  %v807_v57 = vadd.f32 %v802_v44, %v704_v53 }
 0x11d   : > { %v888_v54 = vpop.f32.mrf.mxu0 }
 0x11e   : > { %v895_v55 = vadd.f32 %v888_v54, %v806_v52 }
 0x11f   : > { %v1292_v56 = vpop.f32.mrf.mxu0 }
 0x120   : > { %897 = vst [vmem:[#allocation2] sm:$0xff] %v895_v55  ;;  %902 = sbr.rel (%p1161_p10) target bundleno = 319 (0x13f), region = 40 }
 0x121   : > { %v891_v58 = vpop.f32.mrf.mxu0 }
 0x122   : > { %v896_v59 = vadd.f32 %v891_v58, %v807_v57 }
 0x123   : > { %v1293_v60 = vpop.f32.mrf.mxu0 }
 0x124   : > { %898 = vst [vmem:[#allocation2 + $0x8] sm:$0xff] %v896_v59 }
 0x125   : > { %v1162_v63 = vld [vmem:[%s1675_s2] ss:$0 sm:$0xff] }
 0x127   : > { %v903_v61 = vld [vmem:[#allocation2] sm:$0xff] }
 0x128   : > { %v912_v0 = vadd.f32 %v1162_v63, %v903_v61 }
 0x12a   : > { %1391 = vtanh.f32 %v912_v0 }
 0x12b   : > { %v904_v62 = vld [vmem:[#allocation2 + $0x8] sm:$0xff] }
 0x12c   : > { %v913_v2 = vadd.f32 %v1162_v63, %v904_v62 }
 0x12e   : > { %1393 = vtanh.f32 %v913_v2 }
 0x137   : > { %v1392_v4 = vpop.eup %1391 }
 0x13b   : > { %v1394_v5 = vpop.eup %1393 }
 0x13c   : > { %v1173_v6 = vpack.c.bf16 %v1394_v5, %v1392_v4 }
 0x13e   : > { %1174 = vst [vmem:[%s1532_s9] sm:$0xff] %v1173_v6  }
 0x13f PF: > { %s13_s18 = sadd.s32 1, %s1449_s18   ;;  %s1677_s12 = smov %s1437_s15 }
 0x140   : > { %p10_p11 = scmp.ge.s32.totalorder %s13_s18, 226   ;;  %s1678_s13 = smov %s1441_s16 }
 0x141   : > { %s1679_s14 = smov %s1445_s17  ;;  %s1680_s15 = smov %s1684_s19 }
 0x142   : > { %s1681_s16 = smov %s1688_s20  ;;  %s1682_s17 = smov %s1692_s21 }
 0x143   :  { %12 = sbr.rel (!%p10_p11) target bundleno = 4 (0x4), region = 77 }

</bundles_post_ra>
